<compile_context>
chip_gen: v7x
topology: tpu7x:2x2x1
jax: 0.10.0
libtpu: 0.0.40
codegen_flags: <defaults>
</compile_context>

<pallas_src>
import functools

import jax
import jax.numpy as jnp
from jax.experimental import pallas as pl
from jax.experimental.pallas import tpu as pltpu

MAT_TM = 512                          # matmul row tile
EW_TMS = (4096, 2048, 1024, 512, 256)  # elementwise row-tile candidates
LANE = 128
VMEM_LIMIT = 48 * 1024 * 1024         # safe ceiling on v5e/v6e (128M) and v7x (64M)

_MOSAIC_PAR = pltpu.CompilerParams(dimension_semantics=("parallel",),
                                   vmem_limit_bytes=VMEM_LIMIT)


def _rup(x, m):
    return (x + m - 1) // m * m


def _pad2(a, rows, cols):
    return jnp.pad(a, ((0, rows - a.shape[0]), (0, cols - a.shape[1])))


def _pad_rows(m):
    return _rup(m, MAT_TM) if m >= MAT_TM else _rup(m, 8)


def _mat_tile(mp):
    return MAT_TM if mp % MAT_TM == 0 else mp


def _ew_tile(mp):
    for t in EW_TMS:
        if mp % t == 0:
            return t
    return mp


# ----------------------------------------------------------------------------
# Pallas kernels
# ----------------------------------------------------------------------------
def _matmul_stats_kernel(x_ref, w_ref, o_ref, st_ref):
    # bf16 @ bf16 with f32 accumulation; BN statistics computed from the f32
    # accumulator, packed into one aligned 8-row store (rows 0/1 = sum / sumsq).
    y = jnp.dot(x_ref[...], w_ref[...], preferred_element_type=jnp.float32)
    o_ref[...] = y.astype(o_ref.dtype)
    s = jnp.sum(y, axis=0, keepdims=True)
    sq = jnp.sum(y * y, axis=0, keepdims=True)
    st_ref[...] = jnp.concatenate(
        [s, sq, jnp.zeros((6, y.shape[1]), jnp.float32)], axis=0)


def _matmul_bias_kernel(x_ref, w_ref, b_ref, o_ref):
    y = jnp.dot(x_ref[...], w_ref[...],
                preferred_element_type=jnp.float32) + b_ref[...]
    o_ref[...] = y.astype(o_ref.dtype)


def _affine_kernel(x_ref, scale_ref, shift_ref, o_ref, *, relu):
    y = x_ref[...].astype(jnp.float32) * scale_ref[...] + shift_ref[...]
    if relu:
        y = jnp.maximum(y, 0.0)
    o_ref[...] = y.astype(o_ref.dtype)


def _affine_add_kernel(x_ref, res_ref, scale_ref, shift_ref, o_ref):
    y = (x_ref[...].astype(jnp.float32) * scale_ref[...] + shift_ref[...]
         + res_ref[...].astype(jnp.float32))
    o_ref[...] = y.astype(o_ref.dtype)


# ----------------------------------------------------------------------------
# Pallas wrappers
# ----------------------------------------------------------------------------
def matmul_stats(x_bf16, w):
    """(M,K)@(K,N) in bf16 (f32 acc). Returns padded (Mp,Np) bf16 output plus
    fused per-channel sum and sum-of-squares (length N, f32)."""
    M, K = x_bf16.shape
    N = w.shape[1]
    Mp, Kp, Np = _pad_rows(M), _rup(K, LANE), _rup(N, LANE)
    tm = _mat_tile(Mp)
    G = Mp // tm
    xp = _pad2(x_bf16.astype(jnp.bfloat16), Mp, Kp)
    wp = _pad2(w.astype(jnp.bfloat16), Kp, Np)
    y, st = pl.pallas_call(
        _matmul_stats_kernel,
        out_shape=(jax.ShapeDtypeStruct((Mp, Np), jnp.bfloat16),
                   jax.ShapeDtypeStruct((G * 8, Np), jnp.float32)),
        grid_spec=pltpu.PrefetchScalarGridSpec(
            num_scalar_prefetch=0,
            grid=(G,),
            in_specs=[pl.BlockSpec((tm, Kp), lambda i: (i, 0)),
                      pl.BlockSpec((Kp, Np), lambda i: (0, 0))],
            out_specs=[pl.BlockSpec((tm, Np), lambda i: (i, 0)),
                       pl.BlockSpec((8, Np), lambda i: (i, 0))]),
        compiler_params=_MOSAIC_PAR,
    )(xp, wp)
    st = st.reshape(G, 8, Np)
    # padded rows/channels are exactly zero (no bias), so they contribute 0.
    return y, st[:, 0, :N].sum(axis=0), st[:, 1, :N].sum(axis=0)


def matmul_bias(x_bf16, w, b):
    """(M,K)@(K,N)+b in bf16 (f32 acc). Returns padded (Mp,Np) f32 output."""
    M, K = x_bf16.shape
    N = w.shape[1]
    Mp, Kp, Np = _pad_rows(M), _rup(K, LANE), _rup(N, LANE)
    tm = _mat_tile(Mp)
    xp = _pad2(x_bf16.astype(jnp.bfloat16), Mp, Kp)
    wp = _pad2(w.astype(jnp.bfloat16), Kp, Np)
    bp = jnp.pad(b.astype(jnp.float32), (0, Np - N)).reshape(1, Np)
    return pl.pallas_call(
        _matmul_bias_kernel,
        out_shape=jax.ShapeDtypeStruct((Mp, Np), jnp.float32),
        grid_spec=pltpu.PrefetchScalarGridSpec(
            num_scalar_prefetch=0,
            grid=(Mp // tm,),
            in_specs=[pl.BlockSpec((tm, Kp), lambda i: (i, 0)),
                      pl.BlockSpec((Kp, Np), lambda i: (0, 0)),
                      pl.BlockSpec((1, Np), lambda i: (0, 0))],
            out_specs=pl.BlockSpec((tm, Np), lambda i: (i, 0))),
        compiler_params=_MOSAIC_PAR,
    )(xp, wp, bp)


def bn_scale_shift(s, ss, count, gamma, beta, eps=1e-5):
    mean = s / count
    var = jnp.maximum(ss / count - mean * mean, 0.0)   # clamp vs. cancellation
    inv_std = jax.lax.rsqrt(var + eps)
    scale = gamma * inv_std
    shift = beta - mean * scale
    return scale, shift


def affine(y_pad, scale, shift, *, relu=False, residual_pad=None):
    """y*scale + shift (+residual)(+ReLU) over an already-padded (Mp,Np)
    matrix; output bf16."""
    Mp, Np = y_pad.shape
    tm = _ew_tile(Mp)
    n = scale.shape[0]
    scale_p = jnp.pad(scale.astype(jnp.float32), (0, Np - n)).reshape(1, Np)
    shift_p = jnp.pad(shift.astype(jnp.float32), (0, Np - n)).reshape(1, Np)
    if residual_pad is None:
        kern = functools.partial(_affine_kernel, relu=relu)
        args = (y_pad, scale_p, shift_p)
        in_specs = [pl.BlockSpec((tm, Np), lambda i: (i, 0)),
                    pl.BlockSpec((1, Np), lambda i: (0, 0)),
                    pl.BlockSpec((1, Np), lambda i: (0, 0))]
    else:
        assert residual_pad.shape == y_pad.shape, (residual_pad.shape, y_pad.shape)
        kern = _affine_add_kernel
        args = (y_pad, residual_pad, scale_p, shift_p)
        in_specs = [pl.BlockSpec((tm, Np), lambda i: (i, 0)),
                    pl.BlockSpec((tm, Np), lambda i: (i, 0)),
                    pl.BlockSpec((1, Np), lambda i: (0, 0)),
                    pl.BlockSpec((1, Np), lambda i: (0, 0))]
    return pl.pallas_call(
        kern,
        out_shape=jax.ShapeDtypeStruct((Mp, Np), jnp.bfloat16),
        grid_spec=pltpu.PrefetchScalarGridSpec(
            num_scalar_prefetch=0,
            grid=(Mp // tm,),
            in_specs=in_specs,
            out_specs=pl.BlockSpec((tm, Np), lambda i: (i, 0))),
        compiler_params=_MOSAIC_PAR,
    )(*args)


# ----------------------------------------------------------------------------
# Convolution lowering (glue: patch extraction; compute: Pallas matmuls)
# ----------------------------------------------------------------------------
def im2col(x_nhwc, kh, kw, stride, pad):
    # Patches are materialized directly in bf16 (halves the dominant HBM patch
    # traffic). TODO(synk): implicit GEMM with halo DMA to avoid inflation.
    x = x_nhwc.astype(jnp.bfloat16)
    N, H, W, C = x.shape
    xp = jnp.pad(x, ((0, 0), (pad, pad), (pad, pad), (0, 0))) if pad else x
    Hout = (H + 2 * pad - kh) // stride + 1
    Wout = (W + 2 * pad - kw) // stride + 1
    cols = []
    for dy in range(kh):
        for dx in range(kw):
            cols.append(xp[:, dy:dy + Hout * stride:stride,
                           dx:dx + Wout * stride:stride, :])
    patches = jnp.concatenate(cols, axis=-1)          # (N, Hout, Wout, kh*kw*C)
    return patches.reshape(N * Hout * Wout, kh * kw * C), (N, Hout, Wout)


def conv_bn(x_nhwc, w, gamma, beta, *, stride, pad, relu=True, residual_pad=None):
    """Conv2d (pre-BN bias dropped: exact no-op in train-mode BN) + BatchNorm
    (+ReLU / +residual). BN statistics are fused into the matmul kernel.
    Returns (NHWC activation, padded (Mp,Np) matrix for residual reuse)."""
    Cout, Cin, kh, kw = w.shape                        # PyTorch Conv2d layout
    patches, (N, Ho, Wo) = im2col(x_nhwc, kh, kw, stride, pad)
    w_mat = jnp.transpose(w, (2, 3, 1, 0)).reshape(kh * kw * Cin, Cout)
    y_pad, s, ss = matmul_stats(patches, w_mat)
    M = N * Ho * Wo
    scale, shift = bn_scale_shift(s, ss, M, gamma, beta)
    out_pad = affine(y_pad, scale, shift, relu=relu, residual_pad=residual_pad)
    out_nhwc = out_pad[:M, :Cout].reshape(N, Ho, Wo, Cout)
    return out_nhwc, out_pad


def conv_transpose_bn_relu_s2(x_nhwc, w, gamma, beta):
    """ConvTranspose2d(k=4, stride=2, pad=1) + BN + ReLU via parity-fused
    sub-pixel decomposition: ONE matmul of a 3x3-halo patch (K = 9*Cin)
    against a block-structured weight (9*Cin, 4*Cout); all four output
    parities come out of a single MXU pass and one affine pass."""
    Cin, Cout, _, _ = w.shape                          # PyTorch layout (Cin,Cout,4,4)
    N, H, W, _ = x_nhwc.shape
    # 3x3 stride-1 halo patch centered at each input pixel (zero-padded border).
    patches, _ = im2col(x_nhwc, 3, 3, 1, 1)            # (M, 9*Cin)
    # Parity p = 2*r + c occupies output columns [p*Cout, (p+1)*Cout).
    # Window offset (dy,dx) in {r,r+1} x {c,c+1} contributes kernel tap
    # (3 + r - 2*dy, 3 + c - 2*dx); every other offset contributes zero.
    blocks = []
    for dy in range(3):
        for dx in range(3):
            row = []
            for r in range(2):
                for c in range(2):
                    if dy in (r, r + 1) and dx in (c, c + 1):
                        row.append(w[:, :, 3 + r - 2 * dy, 3 + c - 2 * dx])
                    else:
                        row.append(jnp.zeros((Cin, Cout), w.dtype))
            blocks.append(jnp.concatenate(row, axis=1))        # (Cin, 4*Cout)
    w_mat = jnp.concatenate(blocks, axis=0)                    # (9*Cin, 4*Cout)
    y_pad, s, ss = matmul_stats(patches, w_mat)
    M = N * H * W
    scale, shift = bn_scale_shift(s.reshape(4, Cout).sum(axis=0),
                                  ss.reshape(4, Cout).sum(axis=0),
                                  4 * M, gamma, beta)
    out_pad = affine(y_pad, jnp.tile(scale, 4), jnp.tile(shift, 4), relu=True)
    out = out_pad[:M, :4 * Cout].reshape(N, H, W, 2, 2, Cout)
    # (N, H, r, W, c, C) -> (N, 2H, 2W, C)
    out = jnp.transpose(out, (0, 1, 3, 2, 4, 5)).reshape(N, 2 * H, 2 * W, Cout)
    return out


def conv_transpose_s1(x_nhwc, w, b, pad):
    """ConvTranspose2d with stride 1 == conv with spatially flipped kernel."""
    Cin, Cout, kh, kw = w.shape
    w_conv = jnp.transpose(jnp.flip(w, axis=(2, 3)), (1, 0, 2, 3))  # (Cout,Cin,kh,kw)
    patches, (N, Ho, Wo) = im2col(x_nhwc, kh, kw, 1, kh - 1 - pad)
    w_mat = jnp.transpose(w_conv, (2, 3, 1, 0)).reshape(kh * kw * Cin, Cout)
    y_pad = matmul_bias(patches, w_mat, b)
    M = N * Ho * Wo
    return y_pad[:M, :Cout].reshape(N, Ho, Wo, Cout)


# ----------------------------------------------------------------------------
# Network definition
# ----------------------------------------------------------------------------
def init_params(key):
    keys = iter(jax.random.split(key, 64))

    def w(shape, scale=0.1):
        return scale * jax.random.normal(next(keys), shape, jnp.float32)

    def conv_p(cout, cin, k):
        return {'w': w((cout, cin, k, k)), 'b': w((cout,), 0.01)}

    def convT_p(cin, cout, k):
        return {'w': w((cin, cout, k, k)), 'b': w((cout,), 0.01)}

    def bn_p(c):
        return {'g': jnp.ones((c,), jnp.float32),
                'be': jnp.zeros((c,), jnp.float32)}

    def res_p(c):
        return {'conv1': conv_p(c, c, 3), 'bn1': bn_p(c),
                'conv2': conv_p(c, c, 3), 'bn2': bn_p(c)}

    return {
        'conv1': conv_p(32, 3, 9),   'bn1': bn_p(32),
        'conv2': conv_p(64, 32, 4),  'bn2': bn_p(64),
        'conv3': conv_p(128, 64, 4), 'bn3': bn_p(128),
        'res1': res_p(128), 'res2': res_p(128), 'res3': res_p(128),
        'res4': res_p(128), 'res5': res_p(128),
        'conv4': convT_p(128, 64, 4), 'bn4': bn_p(64),
        'conv5': convT_p(64, 32, 4),  'bn5': bn_p(32),
        'conv6': convT_p(32, 3, 9),
    }


def residual_block(x_nhwc, x_pad, p):
    y_nhwc, _ = conv_bn(x_nhwc, p['conv1']['w'], p['bn1']['g'], p['bn1']['be'],
                        stride=1, pad=1, relu=True)
    out_nhwc, out_pad = conv_bn(y_nhwc, p['conv2']['w'], p['bn2']['g'],
                                p['bn2']['be'], stride=1, pad=1, relu=False,
                                residual_pad=x_pad)                # bn2(..)+x_in
    return out_nhwc, out_pad


def image_transform_net(x_nchw, params):
    # Pre-BN conv biases are omitted from compute (train-mode BN subtracts the
    # batch mean, so they are an exact no-op); conv6 keeps its bias.
    # TODO(synk): BatchNorm running-mean/var buffers (momentum tracking) are
    # not materialized; the train-mode forward only depends on batch stats.
    x = jnp.transpose(x_nchw, (0, 2, 3, 1)).astype(jnp.float32)   # NCHW -> NHWC

    x, _ = conv_bn(x, params['conv1']['w'], params['bn1']['g'],
                   params['bn1']['be'], stride=1, pad=4)
    x, _ = conv_bn(x, params['conv2']['w'], params['bn2']['g'],
                   params['bn2']['be'], stride=2, pad=1)
    x, x_pad = conv_bn(x, params['conv3']['w'], params['bn3']['g'],
                       params['bn3']['be'], stride=2, pad=1)

    for name in ('res1', 'res2', 'res3', 'res4', 'res5'):
        x, x_pad = residual_block(x, x_pad, params[name])

    x = conv_transpose_bn_relu_s2(x, params['conv4']['w'],
                                  params['bn4']['g'], params['bn4']['be'])
    x = conv_transpose_bn_relu_s2(x, params['conv5']['w'],
                                  params['bn5']['g'], params['bn5']['be'])
    x = conv_transpose_s1(x, params['conv6']['w'], params['conv6']['b'], pad=4)

    return jnp.transpose(x, (0, 3, 1, 2)).astype(jnp.float32)      # back to NCHW


if __name__ == "__main__":
    key = jax.random.PRNGKey(0)
    x = jax.random.normal(key, (2, 3, 16, 16), jnp.float32)   # NCHW input
    params = init_params(jax.random.PRNGKey(42))

    fwd = jax.jit(image_transform_net)
    out = jax.block_until_ready(fwd(x, params))

    assert out.shape == (2, 3, 16, 16), out.shape
    assert out.dtype == jnp.float32
    assert bool(jnp.all(jnp.isfinite(out)))
    print("KERNEL_OK")
</pallas_src>

<mosaic_0001>
module attributes {stable_mosaic.version = 11 : i64} {
  func.func @_affine_kernel(%arg0: i32, %arg1: memref<512x128xbf16, #tpu.memory_space<vmem>>, %arg2: memref<1x128xf32, #tpu.memory_space<vmem>>, %arg3: memref<1x128xf32, #tpu.memory_space<vmem>>, %arg4: memref<512x128xbf16, #tpu.memory_space<vmem>>) attributes {dimension_semantics = [#tpu.dimension_semantics<parallel>], iteration_bounds = array<i64: 1>, scalar_prefetch = 0 : i64, scratch_operands = 0 : i64, tpu.core_type = #tpu.core_type<tc>, window_params = [{transform_indices = @transform_0, window_bounds = array<i64: 512, 128>}, {pipeline_mode = #tpu.pipeline_mode<synchronous>, transform_indices = @transform_1, window_bounds = array<i64: 1, 128>}, {pipeline_mode = #tpu.pipeline_mode<synchronous>, transform_indices = @transform_2, window_bounds = array<i64: 1, 128>}, {transform_indices = @transform_3, window_bounds = array<i64: 512, 128>}]} {
    %c0 = arith.constant 0 : index
    %c0_0 = arith.constant 0 : index
    %0 = vector.load %arg1[%c0, %c0_0] : memref<512x128xbf16, #tpu.memory_space<vmem>>, vector<512x128xbf16>
    %1 = arith.extf %0 : vector<512x128xbf16> to vector<512x128xf32>
    %c0_1 = arith.constant 0 : index
    %c0_2 = arith.constant 0 : index
    %2 = vector.load %arg2[%c0_1, %c0_2] : memref<1x128xf32, #tpu.memory_space<vmem>>, vector<1x128xf32>
    %3 = vector.broadcast %2 : vector<1x128xf32> to vector<512x128xf32>
    %4 = arith.mulf %1, %3 : vector<512x128xf32>
    %c0_3 = arith.constant 0 : index
    %c0_4 = arith.constant 0 : index
    %5 = vector.load %arg3[%c0_3, %c0_4] : memref<1x128xf32, #tpu.memory_space<vmem>>, vector<1x128xf32>
    %6 = vector.broadcast %5 : vector<1x128xf32> to vector<512x128xf32>
    %7 = arith.addf %4, %6 : vector<512x128xf32>
    %cst = arith.constant 0.000000e+00 : f32
    %8 = vector.broadcast %cst : f32 to vector<512x128xf32>
    %9 = arith.maximumf %7, %8 : vector<512x128xf32>
    %10 = arith.truncf %9 : vector<512x128xf32> to vector<512x128xbf16>
    %c0_5 = arith.constant 0 : index
    %c0_6 = arith.constant 0 : index
    %11 = vector.load %arg4[%c0_5, %c0_6] : memref<512x128xbf16, #tpu.memory_space<vmem>>, vector<512x128xbf16>
    tpu.vector_store %arg4[%c0_5, %c0_6], %10 {strides = array<i32>} : memref<512x128xbf16, #tpu.memory_space<vmem>>, vector<512x128xbf16>,
    return
  }
  func.func @transform_0(%arg0: i32) -> (i32, i32) {
    %c0_i32 = arith.constant 0 : i32
    %c0_i32_0 = arith.constant 0 : i32
    return %arg0, %c0_i32 : i32, i32
  }
  func.func @transform_1(%arg0: i32) -> (i32, i32) {
    %c0_i32 = arith.constant 0 : i32
    %c0_i32_0 = arith.constant 0 : i32
    %c0_i32_1 = arith.constant 0 : i32
    return %c0_i32, %c0_i32_0 : i32, i32
  }
  func.func @transform_2(%arg0: i32) -> (i32, i32) {
    %c0_i32 = arith.constant 0 : i32
    %c0_i32_0 = arith.constant 0 : i32
    %c0_i32_1 = arith.constant 0 : i32
    return %c0_i32, %c0_i32_0 : i32, i32
  }
  func.func @transform_3(%arg0: i32) -> (i32, i32) {
    %c0_i32 = arith.constant 0 : i32
    %c0_i32_0 = arith.constant 0 : i32
    return %arg0, %c0_i32 : i32, i32
  }
}

module attributes {stable_mosaic.version = 11 : i64} {
  func.func @_matmul_stats_kernel(%arg0: i32, %arg1: memref<512x256xbf16, #tpu.memory_space<vmem>>, %arg2: memref<256x128xbf16, #tpu.memory_space<vmem>>, %arg3: memref<512x128xbf16, #tpu.memory_space<vmem>>, %arg4: memref<8x128xf32, #tpu.memory_space<vmem>>) attributes {dimension_semantics = [#tpu.dimension_semantics<parallel>], iteration_bounds = array<i64: 1>, scalar_prefetch = 0 : i64, scratch_operands = 0 : i64, tpu.core_type = #tpu.core_type<tc>, window_params = [{transform_indices = @transform_0, window_bounds = array<i64: 512, 256>}, {pipeline_mode = #tpu.pipeline_mode<synchronous>, transform_indices = @transform_1, window_bounds = array<i64: 256, 128>}, {transform_indices = @transform_2, window_bounds = array<i64: 512, 128>}, {transform_indices = @transform_3, window_bounds = array<i64: 8, 128>}]} {
    %c0 = arith.constant 0 : index
    %c0_0 = arith.constant 0 : index
    %0 = vector.load %arg1[%c0, %c0_0] : memref<512x256xbf16, #tpu.memory_space<vmem>>, vector<512x256xbf16>
    %c0_1 = arith.constant 0 : index
    %c0_2 = arith.constant 0 : index
    %1 = vector.load %arg2[%c0_1, %c0_2] : memref<256x128xbf16, #tpu.memory_space<vmem>>, vector<256x128xbf16>
    %cst = arith.constant dense<0.000000e+00> : vector<512x128xf32>
    %2 = tpu.matmul %0, %1, %cst {dimension_numbers = #tpu.dot_dimension_numbers<[1], [0], [0], [1], [0, 0, 1, 1], [], []>} : vector<512x256xbf16>, vector<256x128xbf16>, vector<512x128xf32> -> vector<512x128xf32>
    %3 = arith.truncf %2 : vector<512x128xf32> to vector<512x128xbf16>
    %c0_3 = arith.constant 0 : index
    %c0_4 = arith.constant 0 : index
    %4 = vector.load %arg3[%c0_3, %c0_4] : memref<512x128xbf16, #tpu.memory_space<vmem>>, vector<512x128xbf16>
    tpu.vector_store %arg3[%c0_3, %c0_4], %3 {strides = array<i32>} : memref<512x128xbf16, #tpu.memory_space<vmem>>, vector<512x128xbf16>,
    %cst_5 = arith.constant dense<0.000000e+00> : vector<128xf32>
    %5 = vector.multi_reduction <add>, %2, %cst_5 [0] : vector<512x128xf32> to vector<128xf32>
    %6 = vector.shape_cast %5 : vector<128xf32> to vector<1x128xf32>
    %7 = arith.mulf %2, %2 : vector<512x128xf32>
    %cst_6 = arith.constant dense<0.000000e+00> : vector<128xf32>
    %8 = vector.multi_reduction <add>, %7, %cst_6 [0] : vector<512x128xf32> to vector<128xf32>
    %9 = vector.shape_cast %8 : vector<128xf32> to vector<1x128xf32>
    %cst_7 = arith.constant 0.000000e+00 : f32
    %10 = vector.broadcast %cst_7 : f32 to vector<6x128xf32>
    %11 = tpu.concatenate %6, %9, %10 in 0 : vector<1x128xf32>, vector<1x128xf32>, vector<6x128xf32> -> vector<8x128xf32>
    %c0_8 = arith.constant 0 : index
    %c0_9 = arith.constant 0 : index
    %12 = vector.load %arg4[%c0_8, %c0_9] : memref<8x128xf32, #tpu.memory_space<vmem>>, vector<8x128xf32>
    tpu.vector_store %arg4[%c0_8, %c0_9], %11 {strides = array<i32>} : memref<8x128xf32, #tpu.memory_space<vmem>>, vector<8x128xf32>,
    return
  }
  func.func @transform_0(%arg0: i32) -> (i32, i32) {
    %c0_i32 = arith.constant 0 : i32
    %c0_i32_0 = arith.constant 0 : i32
    return %arg0, %c0_i32 : i32, i32
  }
  func.func @transform_1(%arg0: i32) -> (i32, i32) {
    %c0_i32 = arith.constant 0 : i32
    %c0_i32_0 = arith.constant 0 : i32
    %c0_i32_1 = arith.constant 0 : i32
    return %c0_i32, %c0_i32_0 : i32, i32
  }
  func.func @transform_2(%arg0: i32) -> (i32, i32) {
    %c0_i32 = arith.constant 0 : i32
    %c0_i32_0 = arith.constant 0 : i32
    return %arg0, %c0_i32 : i32, i32
  }
  func.func @transform_3(%arg0: i32) -> (i32, i32) {
    %c0_i32 = arith.constant 0 : i32
    %c0_i32_0 = arith.constant 0 : i32
    return %arg0, %c0_i32 : i32, i32
  }
}

module attributes {stable_mosaic.version = 11 : i64} {
  func.func @_matmul_stats_kernel(%arg0: i32, %arg1: memref<128x512xbf16, #tpu.memory_space<vmem>>, %arg2: memref<512x128xbf16, #tpu.memory_space<vmem>>, %arg3: memref<128x128xbf16, #tpu.memory_space<vmem>>, %arg4: memref<8x128xf32, #tpu.memory_space<vmem>>) attributes {dimension_semantics = [#tpu.dimension_semantics<parallel>], iteration_bounds = array<i64: 1>, scalar_prefetch = 0 : i64, scratch_operands = 0 : i64, tpu.core_type = #tpu.core_type<tc>, window_params = [{transform_indices = @transform_0, window_bounds = array<i64: 128, 512>}, {pipeline_mode = #tpu.pipeline_mode<synchronous>, transform_indices = @transform_1, window_bounds = array<i64: 512, 128>}, {transform_indices = @transform_2, window_bounds = array<i64: 128, 128>}, {transform_indices = @transform_3, window_bounds = array<i64: 8, 128>}]} {
    %c0 = arith.constant 0 : index
    %c0_0 = arith.constant 0 : index
    %0 = vector.load %arg1[%c0, %c0_0] : memref<128x512xbf16, #tpu.memory_space<vmem>>, vector<128x512xbf16>
    %c0_1 = arith.constant 0 : index
    %c0_2 = arith.constant 0 : index
    %1 = vector.load %arg2[%c0_1, %c0_2] : memref<512x128xbf16, #tpu.memory_space<vmem>>, vector<512x128xbf16>
    %cst = arith.constant dense<0.000000e+00> : vector<128x128xf32>
    %2 = tpu.matmul %0, %1, %cst {dimension_numbers = #tpu.dot_dimension_numbers<[1], [0], [0], [1], [0, 0, 1, 1], [], []>} : vector<128x512xbf16>, vector<512x128xbf16>, vector<128x128xf32> -> vector<128x128xf32>
    %3 = arith.truncf %2 : vector<128x128xf32> to vector<128x128xbf16>
    %c0_3 = arith.constant 0 : index
    %c0_4 = arith.constant 0 : index
    %4 = vector.load %arg3[%c0_3, %c0_4] : memref<128x128xbf16, #tpu.memory_space<vmem>>, vector<128x128xbf16>
    tpu.vector_store %arg3[%c0_3, %c0_4], %3 {strides = array<i32>} : memref<128x128xbf16, #tpu.memory_space<vmem>>, vector<128x128xbf16>,
    %cst_5 = arith.constant dense<0.000000e+00> : vector<128xf32>
    %5 = vector.multi_reduction <add>, %2, %cst_5 [0] : vector<128x128xf32> to vector<128xf32>
    %6 = vector.shape_cast %5 : vector<128xf32> to vector<1x128xf32>
    %7 = arith.mulf %2, %2 : vector<128x128xf32>
    %cst_6 = arith.constant dense<0.000000e+00> : vector<128xf32>
    %8 = vector.multi_reduction <add>, %7, %cst_6 [0] : vector<128x128xf32> to vector<128xf32>
    %9 = vector.shape_cast %8 : vector<128xf32> to vector<1x128xf32>
    %cst_7 = arith.constant 0.000000e+00 : f32
    %10 = vector.broadcast %cst_7 : f32 to vector<6x128xf32>
    %11 = tpu.concatenate %6, %9, %10 in 0 : vector<1x128xf32>, vector<1x128xf32>, vector<6x128xf32> -> vector<8x128xf32>
    %c0_8 = arith.constant 0 : index
    %c0_9 = arith.constant 0 : index
    %12 = vector.load %arg4[%c0_8, %c0_9] : memref<8x128xf32, #tpu.memory_space<vmem>>, vector<8x128xf32>
    tpu.vector_store %arg4[%c0_8, %c0_9], %11 {strides = array<i32>} : memref<8x128xf32, #tpu.memory_space<vmem>>, vector<8x128xf32>,
    return
  }
  func.func @transform_0(%arg0: i32) -> (i32, i32) {
    %c0_i32 = arith.constant 0 : i32
    %c0_i32_0 = arith.constant 0 : i32
    return %arg0, %c0_i32 : i32, i32
  }
  func.func @transform_1(%arg0: i32) -> (i32, i32) {
    %c0_i32 = arith.constant 0 : i32
    %c0_i32_0 = arith.constant 0 : i32
    %c0_i32_1 = arith.constant 0 : i32
    return %c0_i32, %c0_i32_0 : i32, i32
  }
  func.func @transform_2(%arg0: i32) -> (i32, i32) {
    %c0_i32 = arith.constant 0 : i32
    %c0_i32_0 = arith.constant 0 : i32
    return %arg0, %c0_i32 : i32, i32
  }
  func.func @transform_3(%arg0: i32) -> (i32, i32) {
    %c0_i32 = arith.constant 0 : i32
    %c0_i32_0 = arith.constant 0 : i32
    return %arg0, %c0_i32 : i32, i32
  }
}

module attributes {stable_mosaic.version = 11 : i64} {
  func.func @_affine_kernel(%arg0: i32, %arg1: memref<128x128xbf16, #tpu.memory_space<vmem>>, %arg2: memref<1x128xf32, #tpu.memory_space<vmem>>, %arg3: memref<1x128xf32, #tpu.memory_space<vmem>>, %arg4: memref<128x128xbf16, #tpu.memory_space<vmem>>) attributes {dimension_semantics = [#tpu.dimension_semantics<parallel>], iteration_bounds = array<i64: 1>, scalar_prefetch = 0 : i64, scratch_operands = 0 : i64, tpu.core_type = #tpu.core_type<tc>, window_params = [{transform_indices = @transform_0, window_bounds = array<i64: 128, 128>}, {pipeline_mode = #tpu.pipeline_mode<synchronous>, transform_indices = @transform_1, window_bounds = array<i64: 1, 128>}, {pipeline_mode = #tpu.pipeline_mode<synchronous>, transform_indices = @transform_2, window_bounds = array<i64: 1, 128>}, {transform_indices = @transform_3, window_bounds = array<i64: 128, 128>}]} {
    %c0 = arith.constant 0 : index
    %c0_0 = arith.constant 0 : index
    %0 = vector.load %arg1[%c0, %c0_0] : memref<128x128xbf16, #tpu.memory_space<vmem>>, vector<128x128xbf16>
    %1 = arith.extf %0 : vector<128x128xbf16> to vector<128x128xf32>
    %c0_1 = arith.constant 0 : index
    %c0_2 = arith.constant 0 : index
    %2 = vector.load %arg2[%c0_1, %c0_2] : memref<1x128xf32, #tpu.memory_space<vmem>>, vector<1x128xf32>
    %3 = vector.broadcast %2 : vector<1x128xf32> to vector<128x128xf32>
    %4 = arith.mulf %1, %3 : vector<128x128xf32>
    %c0_3 = arith.constant 0 : index
    %c0_4 = arith.constant 0 : index
    %5 = vector.load %arg3[%c0_3, %c0_4] : memref<1x128xf32, #tpu.memory_space<vmem>>, vector<1x128xf32>
    %6 = vector.broadcast %5 : vector<1x128xf32> to vector<128x128xf32>
    %7 = arith.addf %4, %6 : vector<128x128xf32>
    %cst = arith.constant 0.000000e+00 : f32
    %8 = vector.broadcast %cst : f32 to vector<128x128xf32>
    %9 = arith.maximumf %7, %8 : vector<128x128xf32>
    %10 = arith.truncf %9 : vector<128x128xf32> to vector<128x128xbf16>
    %c0_5 = arith.constant 0 : index
    %c0_6 = arith.constant 0 : index
    %11 = vector.load %arg4[%c0_5, %c0_6] : memref<128x128xbf16, #tpu.memory_space<vmem>>, vector<128x128xbf16>
    tpu.vector_store %arg4[%c0_5, %c0_6], %10 {strides = array<i32>} : memref<128x128xbf16, #tpu.memory_space<vmem>>, vector<128x128xbf16>,
    return
  }
  func.func @transform_0(%arg0: i32) -> (i32, i32) {
    %c0_i32 = arith.constant 0 : i32
    %c0_i32_0 = arith.constant 0 : i32
    return %arg0, %c0_i32 : i32, i32
  }
  func.func @transform_1(%arg0: i32) -> (i32, i32) {
    %c0_i32 = arith.constant 0 : i32
    %c0_i32_0 = arith.constant 0 : i32
    %c0_i32_1 = arith.constant 0 : i32
    return %c0_i32, %c0_i32_0 : i32, i32
  }
  func.func @transform_2(%arg0: i32) -> (i32, i32) {
    %c0_i32 = arith.constant 0 : i32
    %c0_i32_0 = arith.constant 0 : i32
    %c0_i32_1 = arith.constant 0 : i32
    return %c0_i32, %c0_i32_0 : i32, i32
  }
  func.func @transform_3(%arg0: i32) -> (i32, i32) {
    %c0_i32 = arith.constant 0 : i32
    %c0_i32_0 = arith.constant 0 : i32
    return %arg0, %c0_i32 : i32, i32
  }
}

module attributes {stable_mosaic.version = 11 : i64} {
  func.func @_matmul_stats_kernel(%arg0: i32, %arg1: memref<32x1024xbf16, #tpu.memory_space<vmem>>, %arg2: memref<1024x128xbf16, #tpu.memory_space<vmem>>, %arg3: memref<32x128xbf16, #tpu.memory_space<vmem>>, %arg4: memref<8x128xf32, #tpu.memory_space<vmem>>) attributes {dimension_semantics = [#tpu.dimension_semantics<parallel>], iteration_bounds = array<i64: 1>, scalar_prefetch = 0 : i64, scratch_operands = 0 : i64, tpu.core_type = #tpu.core_type<tc>, window_params = [{transform_indices = @transform_0, window_bounds = array<i64: 32, 1024>}, {pipeline_mode = #tpu.pipeline_mode<synchronous>, transform_indices = @transform_1, window_bounds = array<i64: 1024, 128>}, {transform_indices = @transform_2, window_bounds = array<i64: 32, 128>}, {transform_indices = @transform_3, window_bounds = array<i64: 8, 128>}]} {
    %c0 = arith.constant 0 : index
    %c0_0 = arith.constant 0 : index
    %0 = vector.load %arg1[%c0, %c0_0] : memref<32x1024xbf16, #tpu.memory_space<vmem>>, vector<32x1024xbf16>
    %c0_1 = arith.constant 0 : index
    %c0_2 = arith.constant 0 : index
    %1 = vector.load %arg2[%c0_1, %c0_2] : memref<1024x128xbf16, #tpu.memory_space<vmem>>, vector<1024x128xbf16>
    %cst = arith.constant dense<0.000000e+00> : vector<32x128xf32>
    %2 = tpu.matmul %0, %1, %cst {dimension_numbers = #tpu.dot_dimension_numbers<[1], [0], [0], [1], [0, 0, 1, 1], [], []>} : vector<32x1024xbf16>, vector<1024x128xbf16>, vector<32x128xf32> -> vector<32x128xf32>
    %3 = arith.truncf %2 : vector<32x128xf32> to vector<32x128xbf16>
    %c0_3 = arith.constant 0 : index
    %c0_4 = arith.constant 0 : index
    %4 = vector.load %arg3[%c0_3, %c0_4] : memref<32x128xbf16, #tpu.memory_space<vmem>>, vector<32x128xbf16>
    tpu.vector_store %arg3[%c0_3, %c0_4], %3 {strides = array<i32>} : memref<32x128xbf16, #tpu.memory_space<vmem>>, vector<32x128xbf16>,
    %cst_5 = arith.constant dense<0.000000e+00> : vector<128xf32>
    %5 = vector.multi_reduction <add>, %2, %cst_5 [0] : vector<32x128xf32> to vector<128xf32>
    %6 = vector.shape_cast %5 : vector<128xf32> to vector<1x128xf32>
    %7 = arith.mulf %2, %2 : vector<32x128xf32>
    %cst_6 = arith.constant dense<0.000000e+00> : vector<128xf32>
    %8 = vector.multi_reduction <add>, %7, %cst_6 [0] : vector<32x128xf32> to vector<128xf32>
    %9 = vector.shape_cast %8 : vector<128xf32> to vector<1x128xf32>
    %cst_7 = arith.constant 0.000000e+00 : f32
    %10 = vector.broadcast %cst_7 : f32 to vector<6x128xf32>
    %11 = tpu.concatenate %6, %9, %10 in 0 : vector<1x128xf32>, vector<1x128xf32>, vector<6x128xf32> -> vector<8x128xf32>
    %c0_8 = arith.constant 0 : index
    %c0_9 = arith.constant 0 : index
    %12 = vector.load %arg4[%c0_8, %c0_9] : memref<8x128xf32, #tpu.memory_space<vmem>>, vector<8x128xf32>
    tpu.vector_store %arg4[%c0_8, %c0_9], %11 {strides = array<i32>} : memref<8x128xf32, #tpu.memory_space<vmem>>, vector<8x128xf32>,
    return
  }
  func.func @transform_0(%arg0: i32) -> (i32, i32) {
    %c0_i32 = arith.constant 0 : i32
    %c0_i32_0 = arith.constant 0 : i32
    return %arg0, %c0_i32 : i32, i32
  }
  func.func @transform_1(%arg0: i32) -> (i32, i32) {
    %c0_i32 = arith.constant 0 : i32
    %c0_i32_0 = arith.constant 0 : i32
    %c0_i32_1 = arith.constant 0 : i32
    return %c0_i32, %c0_i32_0 : i32, i32
  }
  func.func @transform_2(%arg0: i32) -> (i32, i32) {
    %c0_i32 = arith.constant 0 : i32
    %c0_i32_0 = arith.constant 0 : i32
    return %arg0, %c0_i32 : i32, i32
  }
  func.func @transform_3(%arg0: i32) -> (i32, i32) {
    %c0_i32 = arith.constant 0 : i32
    %c0_i32_0 = arith.constant 0 : i32
    return %arg0, %c0_i32 : i32, i32
  }
}

module attributes {stable_mosaic.version = 11 : i64} {
  func.func @_affine_kernel(%arg0: i32, %arg1: memref<32x128xbf16, #tpu.memory_space<vmem>>, %arg2: memref<1x128xf32, #tpu.memory_space<vmem>>, %arg3: memref<1x128xf32, #tpu.memory_space<vmem>>, %arg4: memref<32x128xbf16, #tpu.memory_space<vmem>>) attributes {dimension_semantics = [#tpu.dimension_semantics<parallel>], iteration_bounds = array<i64: 1>, scalar_prefetch = 0 : i64, scratch_operands = 0 : i64, tpu.core_type = #tpu.core_type<tc>, window_params = [{transform_indices = @transform_0, window_bounds = array<i64: 32, 128>}, {pipeline_mode = #tpu.pipeline_mode<synchronous>, transform_indices = @transform_1, window_bounds = array<i64: 1, 128>}, {pipeline_mode = #tpu.pipeline_mode<synchronous>, transform_indices = @transform_2, window_bounds = array<i64: 1, 128>}, {transform_indices = @transform_3, window_bounds = array<i64: 32, 128>}]} {
    %c0 = arith.constant 0 : index
    %c0_0 = arith.constant 0 : index
    %0 = vector.load %arg1[%c0, %c0_0] : memref<32x128xbf16, #tpu.memory_space<vmem>>, vector<32x128xbf16>
    %1 = arith.extf %0 : vector<32x128xbf16> to vector<32x128xf32>
    %c0_1 = arith.constant 0 : index
    %c0_2 = arith.constant 0 : index
    %2 = vector.load %arg2[%c0_1, %c0_2] : memref<1x128xf32, #tpu.memory_space<vmem>>, vector<1x128xf32>
    %3 = vector.broadcast %2 : vector<1x128xf32> to vector<32x128xf32>
    %4 = arith.mulf %1, %3 : vector<32x128xf32>
    %c0_3 = arith.constant 0 : index
    %c0_4 = arith.constant 0 : index
    %5 = vector.load %arg3[%c0_3, %c0_4] : memref<1x128xf32, #tpu.memory_space<vmem>>, vector<1x128xf32>
    %6 = vector.broadcast %5 : vector<1x128xf32> to vector<32x128xf32>
    %7 = arith.addf %4, %6 : vector<32x128xf32>
    %cst = arith.constant 0.000000e+00 : f32
    %8 = vector.broadcast %cst : f32 to vector<32x128xf32>
    %9 = arith.maximumf %7, %8 : vector<32x128xf32>
    %10 = arith.truncf %9 : vector<32x128xf32> to vector<32x128xbf16>
    %c0_5 = arith.constant 0 : index
    %c0_6 = arith.constant 0 : index
    %11 = vector.load %arg4[%c0_5, %c0_6] : memref<32x128xbf16, #tpu.memory_space<vmem>>, vector<32x128xbf16>
    tpu.vector_store %arg4[%c0_5, %c0_6], %10 {strides = array<i32>} : memref<32x128xbf16, #tpu.memory_space<vmem>>, vector<32x128xbf16>,
    return
  }
  func.func @transform_0(%arg0: i32) -> (i32, i32) {
    %c0_i32 = arith.constant 0 : i32
    %c0_i32_0 = arith.constant 0 : i32
    return %arg0, %c0_i32 : i32, i32
  }
  func.func @transform_1(%arg0: i32) -> (i32, i32) {
    %c0_i32 = arith.constant 0 : i32
    %c0_i32_0 = arith.constant 0 : i32
    %c0_i32_1 = arith.constant 0 : i32
    return %c0_i32, %c0_i32_0 : i32, i32
  }
  func.func @transform_2(%arg0: i32) -> (i32, i32) {
    %c0_i32 = arith.constant 0 : i32
    %c0_i32_0 = arith.constant 0 : i32
    %c0_i32_1 = arith.constant 0 : i32
    return %c0_i32, %c0_i32_0 : i32, i32
  }
  func.func @transform_3(%arg0: i32) -> (i32, i32) {
    %c0_i32 = arith.constant 0 : i32
    %c0_i32_0 = arith.constant 0 : i32
    return %arg0, %c0_i32 : i32, i32
  }
}

module attributes {stable_mosaic.version = 11 : i64} {
  func.func @_matmul_stats_kernel(%arg0: i32, %arg1: memref<32x1152xbf16, #tpu.memory_space<vmem>>, %arg2: memref<1152x128xbf16, #tpu.memory_space<vmem>>, %arg3: memref<32x128xbf16, #tpu.memory_space<vmem>>, %arg4: memref<8x128xf32, #tpu.memory_space<vmem>>) attributes {dimension_semantics = [#tpu.dimension_semantics<parallel>], iteration_bounds = array<i64: 1>, scalar_prefetch = 0 : i64, scratch_operands = 0 : i64, tpu.core_type = #tpu.core_type<tc>, window_params = [{transform_indices = @transform_0, window_bounds = array<i64: 32, 1152>}, {pipeline_mode = #tpu.pipeline_mode<synchronous>, transform_indices = @transform_1, window_bounds = array<i64: 1152, 128>}, {transform_indices = @transform_2, window_bounds = array<i64: 32, 128>}, {transform_indices = @transform_3, window_bounds = array<i64: 8, 128>}]} {
    %c0 = arith.constant 0 : index
    %c0_0 = arith.constant 0 : index
    %0 = vector.load %arg1[%c0, %c0_0] : memref<32x1152xbf16, #tpu.memory_space<vmem>>, vector<32x1152xbf16>
    %c0_1 = arith.constant 0 : index
    %c0_2 = arith.constant 0 : index
    %1 = vector.load %arg2[%c0_1, %c0_2] : memref<1152x128xbf16, #tpu.memory_space<vmem>>, vector<1152x128xbf16>
    %cst = arith.constant dense<0.000000e+00> : vector<32x128xf32>
    %2 = tpu.matmul %0, %1, %cst {dimension_numbers = #tpu.dot_dimension_numbers<[1], [0], [0], [1], [0, 0, 1, 1], [], []>} : vector<32x1152xbf16>, vector<1152x128xbf16>, vector<32x128xf32> -> vector<32x128xf32>
    %3 = arith.truncf %2 : vector<32x128xf32> to vector<32x128xbf16>
    %c0_3 = arith.constant 0 : index
    %c0_4 = arith.constant 0 : index
    %4 = vector.load %arg3[%c0_3, %c0_4] : memref<32x128xbf16, #tpu.memory_space<vmem>>, vector<32x128xbf16>
    tpu.vector_store %arg3[%c0_3, %c0_4], %3 {strides = array<i32>} : memref<32x128xbf16, #tpu.memory_space<vmem>>, vector<32x128xbf16>,
    %cst_5 = arith.constant dense<0.000000e+00> : vector<128xf32>
    %5 = vector.multi_reduction <add>, %2, %cst_5 [0] : vector<32x128xf32> to vector<128xf32>
    %6 = vector.shape_cast %5 : vector<128xf32> to vector<1x128xf32>
    %7 = arith.mulf %2, %2 : vector<32x128xf32>
    %cst_6 = arith.constant dense<0.000000e+00> : vector<128xf32>
    %8 = vector.multi_reduction <add>, %7, %cst_6 [0] : vector<32x128xf32> to vector<128xf32>
    %9 = vector.shape_cast %8 : vector<128xf32> to vector<1x128xf32>
    %cst_7 = arith.constant 0.000000e+00 : f32
    %10 = vector.broadcast %cst_7 : f32 to vector<6x128xf32>
    %11 = tpu.concatenate %6, %9, %10 in 0 : vector<1x128xf32>, vector<1x128xf32>, vector<6x128xf32> -> vector<8x128xf32>
    %c0_8 = arith.constant 0 : index
    %c0_9 = arith.constant 0 : index
    %12 = vector.load %arg4[%c0_8, %c0_9] : memref<8x128xf32, #tpu.memory_space<vmem>>, vector<8x128xf32>
    tpu.vector_store %arg4[%c0_8, %c0_9], %11 {strides = array<i32>} : memref<8x128xf32, #tpu.memory_space<vmem>>, vector<8x128xf32>,
    return
  }
  func.func @transform_0(%arg0: i32) -> (i32, i32) {
    %c0_i32 = arith.constant 0 : i32
    %c0_i32_0 = arith.constant 0 : i32
    return %arg0, %c0_i32 : i32, i32
  }
  func.func @transform_1(%arg0: i32) -> (i32, i32) {
    %c0_i32 = arith.constant 0 : i32
    %c0_i32_0 = arith.constant 0 : i32
    %c0_i32_1 = arith.constant 0 : i32
    return %c0_i32, %c0_i32_0 : i32, i32
  }
  func.func @transform_2(%arg0: i32) -> (i32, i32) {
    %c0_i32 = arith.constant 0 : i32
    %c0_i32_0 = arith.constant 0 : i32
    return %arg0, %c0_i32 : i32, i32
  }
  func.func @transform_3(%arg0: i32) -> (i32, i32) {
    %c0_i32 = arith.constant 0 : i32
    %c0_i32_0 = arith.constant 0 : i32
    return %arg0, %c0_i32 : i32, i32
  }
}

module attributes {stable_mosaic.version = 11 : i64} {
  func.func @_affine_add_kernel(%arg0: i32, %arg1: memref<32x128xbf16, #tpu.memory_space<vmem>>, %arg2: memref<32x128xbf16, #tpu.memory_space<vmem>>, %arg3: memref<1x128xf32, #tpu.memory_space<vmem>>, %arg4: memref<1x128xf32, #tpu.memory_space<vmem>>, %arg5: memref<32x128xbf16, #tpu.memory_space<vmem>>) attributes {dimension_semantics = [#tpu.dimension_semantics<parallel>], iteration_bounds = array<i64: 1>, scalar_prefetch = 0 : i64, scratch_operands = 0 : i64, tpu.core_type = #tpu.core_type<tc>, window_params = [{transform_indices = @transform_0, window_bounds = array<i64: 32, 128>}, {transform_indices = @transform_1, window_bounds = array<i64: 32, 128>}, {pipeline_mode = #tpu.pipeline_mode<synchronous>, transform_indices = @transform_2, window_bounds = array<i64: 1, 128>}, {pipeline_mode = #tpu.pipeline_mode<synchronous>, transform_indices = @transform_3, window_bounds = array<i64: 1, 128>}, {transform_indices = @transform_4, window_bounds = array<i64: 32, 128>}]} {
    %c0 = arith.constant 0 : index
    %c0_0 = arith.constant 0 : index
    %0 = vector.load %arg1[%c0, %c0_0] : memref<32x128xbf16, #tpu.memory_space<vmem>>, vector<32x128xbf16>
    %1 = arith.extf %0 : vector<32x128xbf16> to vector<32x128xf32>
    %c0_1 = arith.constant 0 : index
    %c0_2 = arith.constant 0 : index
    %2 = vector.load %arg3[%c0_1, %c0_2] : memref<1x128xf32, #tpu.memory_space<vmem>>, vector<1x128xf32>
    %3 = vector.broadcast %2 : vector<1x128xf32> to vector<32x128xf32>
    %4 = arith.mulf %1, %3 : vector<32x128xf32>
    %c0_3 = arith.constant 0 : index
    %c0_4 = arith.constant 0 : index
    %5 = vector.load %arg4[%c0_3, %c0_4] : memref<1x128xf32, #tpu.memory_space<vmem>>, vector<1x128xf32>
    %6 = vector.broadcast %5 : vector<1x128xf32> to vector<32x128xf32>
    %7 = arith.addf %4, %6 : vector<32x128xf32>
    %c0_5 = arith.constant 0 : index
    %c0_6 = arith.constant 0 : index
    %8 = vector.load %arg2[%c0_5, %c0_6] : memref<32x128xbf16, #tpu.memory_space<vmem>>, vector<32x128xbf16>
    %9 = arith.extf %8 : vector<32x128xbf16> to vector<32x128xf32>
    %10 = arith.addf %7, %9 : vector<32x128xf32>
    %11 = arith.truncf %10 : vector<32x128xf32> to vector<32x128xbf16>
    %c0_7 = arith.constant 0 : index
    %c0_8 = arith.constant 0 : index
    %12 = vector.load %arg5[%c0_7, %c0_8] : memref<32x128xbf16, #tpu.memory_space<vmem>>, vector<32x128xbf16>
    tpu.vector_store %arg5[%c0_7, %c0_8], %11 {strides = array<i32>} : memref<32x128xbf16, #tpu.memory_space<vmem>>, vector<32x128xbf16>,
    return
  }
  func.func @transform_0(%arg0: i32) -> (i32, i32) {
    %c0_i32 = arith.constant 0 : i32
    %c0_i32_0 = arith.constant 0 : i32
    return %arg0, %c0_i32 : i32, i32
  }
  func.func @transform_1(%arg0: i32) -> (i32, i32) {
    %c0_i32 = arith.constant 0 : i32
    %c0_i32_0 = arith.constant 0 : i32
    return %arg0, %c0_i32 : i32, i32
  }
  func.func @transform_2(%arg0: i32) -> (i32, i32) {
    %c0_i32 = arith.constant 0 : i32
    %c0_i32_0 = arith.constant 0 : i32
    %c0_i32_1 = arith.constant 0 : i32
    return %c0_i32, %c0_i32_0 : i32, i32
  }
  func.func @transform_3(%arg0: i32) -> (i32, i32) {
    %c0_i32 = arith.constant 0 : i32
    %c0_i32_0 = arith.constant 0 : i32
    %c0_i32_1 = arith.constant 0 : i32
    return %c0_i32, %c0_i32_0 : i32, i32
  }
  func.func @transform_4(%arg0: i32) -> (i32, i32) {
    %c0_i32 = arith.constant 0 : i32
    %c0_i32_0 = arith.constant 0 : i32
    return %arg0, %c0_i32 : i32, i32
  }
}

module attributes {stable_mosaic.version = 11 : i64} {
  func.func @_affine_kernel(%arg0: i32, %arg1: memref<32x256xbf16, #tpu.memory_space<vmem>>, %arg2: memref<1x256xf32, #tpu.memory_space<vmem>>, %arg3: memref<1x256xf32, #tpu.memory_space<vmem>>, %arg4: memref<32x256xbf16, #tpu.memory_space<vmem>>) attributes {dimension_semantics = [#tpu.dimension_semantics<parallel>], iteration_bounds = array<i64: 1>, scalar_prefetch = 0 : i64, scratch_operands = 0 : i64, tpu.core_type = #tpu.core_type<tc>, window_params = [{transform_indices = @transform_0, window_bounds = array<i64: 32, 256>}, {pipeline_mode = #tpu.pipeline_mode<synchronous>, transform_indices = @transform_1, window_bounds = array<i64: 1, 256>}, {pipeline_mode = #tpu.pipeline_mode<synchronous>, transform_indices = @transform_2, window_bounds = array<i64: 1, 256>}, {transform_indices = @transform_3, window_bounds = array<i64: 32, 256>}]} {
    %c0 = arith.constant 0 : index
    %c0_0 = arith.constant 0 : index
    %0 = vector.load %arg1[%c0, %c0_0] : memref<32x256xbf16, #tpu.memory_space<vmem>>, vector<32x256xbf16>
    %1 = arith.extf %0 : vector<32x256xbf16> to vector<32x256xf32>
    %c0_1 = arith.constant 0 : index
    %c0_2 = arith.constant 0 : index
    %2 = vector.load %arg2[%c0_1, %c0_2] : memref<1x256xf32, #tpu.memory_space<vmem>>, vector<1x256xf32>
    %3 = vector.broadcast %2 : vector<1x256xf32> to vector<32x256xf32>
    %4 = arith.mulf %1, %3 : vector<32x256xf32>
    %c0_3 = arith.constant 0 : index
    %c0_4 = arith.constant 0 : index
    %5 = vector.load %arg3[%c0_3, %c0_4] : memref<1x256xf32, #tpu.memory_space<vmem>>, vector<1x256xf32>
    %6 = vector.broadcast %5 : vector<1x256xf32> to vector<32x256xf32>
    %7 = arith.addf %4, %6 : vector<32x256xf32>
    %cst = arith.constant 0.000000e+00 : f32
    %8 = vector.broadcast %cst : f32 to vector<32x256xf32>
    %9 = arith.maximumf %7, %8 : vector<32x256xf32>
    %10 = arith.truncf %9 : vector<32x256xf32> to vector<32x256xbf16>
    %c0_5 = arith.constant 0 : index
    %c0_6 = arith.constant 0 : index
    %11 = vector.load %arg4[%c0_5, %c0_6] : memref<32x256xbf16, #tpu.memory_space<vmem>>, vector<32x256xbf16>
    tpu.vector_store %arg4[%c0_5, %c0_6], %10 {strides = array<i32>} : memref<32x256xbf16, #tpu.memory_space<vmem>>, vector<32x256xbf16>,
    return
  }
  func.func @transform_0(%arg0: i32) -> (i32, i32) {
    %c0_i32 = arith.constant 0 : i32
    %c0_i32_0 = arith.constant 0 : i32
    return %arg0, %c0_i32 : i32, i32
  }
  func.func @transform_1(%arg0: i32) -> (i32, i32) {
    %c0_i32 = arith.constant 0 : i32
    %c0_i32_0 = arith.constant 0 : i32
    %c0_i32_1 = arith.constant 0 : i32
    return %c0_i32, %c0_i32_0 : i32, i32
  }
  func.func @transform_2(%arg0: i32) -> (i32, i32) {
    %c0_i32 = arith.constant 0 : i32
    %c0_i32_0 = arith.constant 0 : i32
    %c0_i32_1 = arith.constant 0 : i32
    return %c0_i32, %c0_i32_0 : i32, i32
  }
  func.func @transform_3(%arg0: i32) -> (i32, i32) {
    %c0_i32 = arith.constant 0 : i32
    %c0_i32_0 = arith.constant 0 : i32
    return %arg0, %c0_i32 : i32, i32
  }
}

module attributes {stable_mosaic.version = 11 : i64} {
  func.func @_matmul_stats_kernel(%arg0: i32, %arg1: memref<32x1152xbf16, #tpu.memory_space<vmem>>, %arg2: memref<1152x256xbf16, #tpu.memory_space<vmem>>, %arg3: memref<32x256xbf16, #tpu.memory_space<vmem>>, %arg4: memref<8x256xf32, #tpu.memory_space<vmem>>) attributes {dimension_semantics = [#tpu.dimension_semantics<parallel>], iteration_bounds = array<i64: 1>, scalar_prefetch = 0 : i64, scratch_operands = 0 : i64, tpu.core_type = #tpu.core_type<tc>, window_params = [{transform_indices = @transform_0, window_bounds = array<i64: 32, 1152>}, {pipeline_mode = #tpu.pipeline_mode<synchronous>, transform_indices = @transform_1, window_bounds = array<i64: 1152, 256>}, {transform_indices = @transform_2, window_bounds = array<i64: 32, 256>}, {transform_indices = @transform_3, window_bounds = array<i64: 8, 256>}]} {
    %c0 = arith.constant 0 : index
    %c0_0 = arith.constant 0 : index
    %0 = vector.load %arg1[%c0, %c0_0] : memref<32x1152xbf16, #tpu.memory_space<vmem>>, vector<32x1152xbf16>
    %c0_1 = arith.constant 0 : index
    %c0_2 = arith.constant 0 : index
    %1 = vector.load %arg2[%c0_1, %c0_2] : memref<1152x256xbf16, #tpu.memory_space<vmem>>, vector<1152x256xbf16>
    %cst = arith.constant dense<0.000000e+00> : vector<32x256xf32>
    %2 = tpu.matmul %0, %1, %cst {dimension_numbers = #tpu.dot_dimension_numbers<[1], [0], [0], [1], [0, 0, 1, 1], [], []>} : vector<32x1152xbf16>, vector<1152x256xbf16>, vector<32x256xf32> -> vector<32x256xf32>
    %3 = arith.truncf %2 : vector<32x256xf32> to vector<32x256xbf16>
    %c0_3 = arith.constant 0 : index
    %c0_4 = arith.constant 0 : index
    %4 = vector.load %arg3[%c0_3, %c0_4] : memref<32x256xbf16, #tpu.memory_space<vmem>>, vector<32x256xbf16>
    tpu.vector_store %arg3[%c0_3, %c0_4], %3 {strides = array<i32>} : memref<32x256xbf16, #tpu.memory_space<vmem>>, vector<32x256xbf16>,
    %cst_5 = arith.constant dense<0.000000e+00> : vector<256xf32>
    %5 = vector.multi_reduction <add>, %2, %cst_5 [0] : vector<32x256xf32> to vector<256xf32>
    %6 = vector.shape_cast %5 : vector<256xf32> to vector<1x256xf32>
    %7 = arith.mulf %2, %2 : vector<32x256xf32>
    %cst_6 = arith.constant dense<0.000000e+00> : vector<256xf32>
    %8 = vector.multi_reduction <add>, %7, %cst_6 [0] : vector<32x256xf32> to vector<256xf32>
    %9 = vector.shape_cast %8 : vector<256xf32> to vector<1x256xf32>
    %cst_7 = arith.constant 0.000000e+00 : f32
    %10 = vector.broadcast %cst_7 : f32 to vector<6x256xf32>
    %11 = tpu.concatenate %6, %9, %10 in 0 : vector<1x256xf32>, vector<1x256xf32>, vector<6x256xf32> -> vector<8x256xf32>
    %c0_8 = arith.constant 0 : index
    %c0_9 = arith.constant 0 : index
    %12 = vector.load %arg4[%c0_8, %c0_9] : memref<8x256xf32, #tpu.memory_space<vmem>>, vector<8x256xf32>
    tpu.vector_store %arg4[%c0_8, %c0_9], %11 {strides = array<i32>} : memref<8x256xf32, #tpu.memory_space<vmem>>, vector<8x256xf32>,
    return
  }
  func.func @transform_0(%arg0: i32) -> (i32, i32) {
    %c0_i32 = arith.constant 0 : i32
    %c0_i32_0 = arith.constant 0 : i32
    return %arg0, %c0_i32 : i32, i32
  }
  func.func @transform_1(%arg0: i32) -> (i32, i32) {
    %c0_i32 = arith.constant 0 : i32
    %c0_i32_0 = arith.constant 0 : i32
    %c0_i32_1 = arith.constant 0 : i32
    return %c0_i32, %c0_i32_0 : i32, i32
  }
  func.func @transform_2(%arg0: i32) -> (i32, i32) {
    %c0_i32 = arith.constant 0 : i32
    %c0_i32_0 = arith.constant 0 : i32
    return %arg0, %c0_i32 : i32, i32
  }
  func.func @transform_3(%arg0: i32) -> (i32, i32) {
    %c0_i32 = arith.constant 0 : i32
    %c0_i32_0 = arith.constant 0 : i32
    return %arg0, %c0_i32 : i32, i32
  }
}

module attributes {stable_mosaic.version = 11 : i64} {
  func.func @_matmul_stats_kernel(%arg0: i32, %arg1: memref<128x640xbf16, #tpu.memory_space<vmem>>, %arg2: memref<640x128xbf16, #tpu.memory_space<vmem>>, %arg3: memref<128x128xbf16, #tpu.memory_space<vmem>>, %arg4: memref<8x128xf32, #tpu.memory_space<vmem>>) attributes {dimension_semantics = [#tpu.dimension_semantics<parallel>], iteration_bounds = array<i64: 1>, scalar_prefetch = 0 : i64, scratch_operands = 0 : i64, tpu.core_type = #tpu.core_type<tc>, window_params = [{transform_indices = @transform_0, window_bounds = array<i64: 128, 640>}, {pipeline_mode = #tpu.pipeline_mode<synchronous>, transform_indices = @transform_1, window_bounds = array<i64: 640, 128>}, {transform_indices = @transform_2, window_bounds = array<i64: 128, 128>}, {transform_indices = @transform_3, window_bounds = array<i64: 8, 128>}]} {
    %c0 = arith.constant 0 : index
    %c0_0 = arith.constant 0 : index
    %0 = vector.load %arg1[%c0, %c0_0] : memref<128x640xbf16, #tpu.memory_space<vmem>>, vector<128x640xbf16>
    %c0_1 = arith.constant 0 : index
    %c0_2 = arith.constant 0 : index
    %1 = vector.load %arg2[%c0_1, %c0_2] : memref<640x128xbf16, #tpu.memory_space<vmem>>, vector<640x128xbf16>
    %cst = arith.constant dense<0.000000e+00> : vector<128x128xf32>
    %2 = tpu.matmul %0, %1, %cst {dimension_numbers = #tpu.dot_dimension_numbers<[1], [0], [0], [1], [0, 0, 1, 1], [], []>} : vector<128x640xbf16>, vector<640x128xbf16>, vector<128x128xf32> -> vector<128x128xf32>
    %3 = arith.truncf %2 : vector<128x128xf32> to vector<128x128xbf16>
    %c0_3 = arith.constant 0 : index
    %c0_4 = arith.constant 0 : index
    %4 = vector.load %arg3[%c0_3, %c0_4] : memref<128x128xbf16, #tpu.memory_space<vmem>>, vector<128x128xbf16>
    tpu.vector_store %arg3[%c0_3, %c0_4], %3 {strides = array<i32>} : memref<128x128xbf16, #tpu.memory_space<vmem>>, vector<128x128xbf16>,
    %cst_5 = arith.constant dense<0.000000e+00> : vector<128xf32>
    %5 = vector.multi_reduction <add>, %2, %cst_5 [0] : vector<128x128xf32> to vector<128xf32>
    %6 = vector.shape_cast %5 : vector<128xf32> to vector<1x128xf32>
    %7 = arith.mulf %2, %2 : vector<128x128xf32>
    %cst_6 = arith.constant dense<0.000000e+00> : vector<128xf32>
    %8 = vector.multi_reduction <add>, %7, %cst_6 [0] : vector<128x128xf32> to vector<128xf32>
    %9 = vector.shape_cast %8 : vector<128xf32> to vector<1x128xf32>
    %cst_7 = arith.constant 0.000000e+00 : f32
    %10 = vector.broadcast %cst_7 : f32 to vector<6x128xf32>
    %11 = tpu.concatenate %6, %9, %10 in 0 : vector<1x128xf32>, vector<1x128xf32>, vector<6x128xf32> -> vector<8x128xf32>
    %c0_8 = arith.constant 0 : index
    %c0_9 = arith.constant 0 : index
    %12 = vector.load %arg4[%c0_8, %c0_9] : memref<8x128xf32, #tpu.memory_space<vmem>>, vector<8x128xf32>
    tpu.vector_store %arg4[%c0_8, %c0_9], %11 {strides = array<i32>} : memref<8x128xf32, #tpu.memory_space<vmem>>, vector<8x128xf32>,
    return
  }
  func.func @transform_0(%arg0: i32) -> (i32, i32) {
    %c0_i32 = arith.constant 0 : i32
    %c0_i32_0 = arith.constant 0 : i32
    return %arg0, %c0_i32 : i32, i32
  }
  func.func @transform_1(%arg0: i32) -> (i32, i32) {
    %c0_i32 = arith.constant 0 : i32
    %c0_i32_0 = arith.constant 0 : i32
    %c0_i32_1 = arith.constant 0 : i32
    return %c0_i32, %c0_i32_0 : i32, i32
  }
  func.func @transform_2(%arg0: i32) -> (i32, i32) {
    %c0_i32 = arith.constant 0 : i32
    %c0_i32_0 = arith.constant 0 : i32
    return %arg0, %c0_i32 : i32, i32
  }
  func.func @transform_3(%arg0: i32) -> (i32, i32) {
    %c0_i32 = arith.constant 0 : i32
    %c0_i32_0 = arith.constant 0 : i32
    return %arg0, %c0_i32 : i32, i32
  }
}

module attributes {stable_mosaic.version = 11 : i64} {
  func.func @_matmul_bias_kernel(%arg0: i32, %arg1: memref<512x2688xbf16, #tpu.memory_space<vmem>>, %arg2: memref<2688x128xbf16, #tpu.memory_space<vmem>>, %arg3: memref<1x128xf32, #tpu.memory_space<vmem>>, %arg4: memref<512x128xf32, #tpu.memory_space<vmem>>) attributes {dimension_semantics = [#tpu.dimension_semantics<parallel>], iteration_bounds = array<i64: 1>, scalar_prefetch = 0 : i64, scratch_operands = 0 : i64, tpu.core_type = #tpu.core_type<tc>, window_params = [{transform_indices = @transform_0, window_bounds = array<i64: 512, 2688>}, {pipeline_mode = #tpu.pipeline_mode<synchronous>, transform_indices = @transform_1, window_bounds = array<i64: 2688, 128>}, {pipeline_mode = #tpu.pipeline_mode<synchronous>, transform_indices = @transform_2, window_bounds = array<i64: 1, 128>}, {transform_indices = @transform_3, window_bounds = array<i64: 512, 128>}]} {
    %c0 = arith.constant 0 : index
    %c0_0 = arith.constant 0 : index
    %0 = vector.load %arg1[%c0, %c0_0] : memref<512x2688xbf16, #tpu.memory_space<vmem>>, vector<512x2688xbf16>
    %c0_1 = arith.constant 0 : index
    %c0_2 = arith.constant 0 : index
    %1 = vector.load %arg2[%c0_1, %c0_2] : memref<2688x128xbf16, #tpu.memory_space<vmem>>, vector<2688x128xbf16>
    %cst = arith.constant dense<0.000000e+00> : vector<512x128xf32>
    %2 = tpu.matmul %0, %1, %cst {dimension_numbers = #tpu.dot_dimension_numbers<[1], [0], [0], [1], [0, 0, 1, 1], [], []>} : vector<512x2688xbf16>, vector<2688x128xbf16>, vector<512x128xf32> -> vector<512x128xf32>
    %c0_3 = arith.constant 0 : index
    %c0_4 = arith.constant 0 : index
    %3 = vector.load %arg3[%c0_3, %c0_4] : memref<1x128xf32, #tpu.memory_space<vmem>>, vector<1x128xf32>
    %4 = vector.broadcast %3 : vector<1x128xf32> to vector<512x128xf32>
    %5 = arith.addf %2, %4 : vector<512x128xf32>
    %c0_5 = arith.constant 0 : index
    %c0_6 = arith.constant 0 : index
    %6 = vector.load %arg4[%c0_5, %c0_6] : memref<512x128xf32, #tpu.memory_space<vmem>>, vector<512x128xf32>
    tpu.vector_store %arg4[%c0_5, %c0_6], %5 {strides = array<i32>} : memref<512x128xf32, #tpu.memory_space<vmem>>, vector<512x128xf32>,
    return
  }
  func.func @transform_0(%arg0: i32) -> (i32, i32) {
    %c0_i32 = arith.constant 0 : i32
    %c0_i32_0 = arith.constant 0 : i32
    return %arg0, %c0_i32 : i32, i32
  }
  func.func @transform_1(%arg0: i32) -> (i32, i32) {
    %c0_i32 = arith.constant 0 : i32
    %c0_i32_0 = arith.constant 0 : i32
    %c0_i32_1 = arith.constant 0 : i32
    return %c0_i32, %c0_i32_0 : i32, i32
  }
  func.func @transform_2(%arg0: i32) -> (i32, i32) {
    %c0_i32 = arith.constant 0 : i32
    %c0_i32_0 = arith.constant 0 : i32
    %c0_i32_1 = arith.constant 0 : i32
    return %c0_i32, %c0_i32_0 : i32, i32
  }
  func.func @transform_3(%arg0: i32) -> (i32, i32) {
    %c0_i32 = arith.constant 0 : i32
    %c0_i32_0 = arith.constant 0 : i32
    return %arg0, %c0_i32 : i32, i32
  }
}

</mosaic_0001>

<bundles_post_ra>
// kernel: image_transform_net.32
= control target key start
LH: loop header
LB: loop body
LE: loop exit
PB: predicated region body
PF: predicated region fallthrough
CT: control target
= control target key end

     0   :  { %s1502_s0 = inlined_call_operand.vmem [shape: bf16[512,128], index: 0, kind: input, shape index: {}]   ;;  %s1503_s1 = inlined_call_operand.vmem [shape: f32[1,128], index: 1, kind: input, shape index: {}]   ;;  %s1504_s2 = inlined_call_operand.vmem [shape: f32[1,128], index: 2, kind: input, shape index: {}]   ;;  %s1505_s3 = inlined_call_operand.vmem [shape: bf16[512,128], index: 3, kind: output, shape index: {}]  }
   0x1   :  { %v803_v0 = vld [vmem:[%s1502_s0] sm:$0xff]   ;;  %v1090_v4 = vld [vmem:[%s1502_s0 + $0x8] sm:$0xff]   ;;  %v1091_v5 = vld [vmem:[%s1502_s0 + $0x10] sm:$0xff]  }
   0x2   :  { %v1178_v1 = vld [vmem:[%s1503_s1] ss:$0 sm:$0xff]  ;;  %v804_v2 = vunpack.c.l.bf16 %v803_v0  ;;  %v805_v3 = vunpack.c.h.bf16 %v803_v0  ;;  %v1092_v6 = vld [vmem:[%s1502_s0 + $0x18] sm:$0xff]   ;;  %v808_v8 = vunpack.c.l.bf16 %v1090_v4  ;;  %v809_v9 = vunpack.c.h.bf16 %v1090_v4  ;;  %v1094_v33 = vld [vmem:[%s1502_s0 + $0x28] sm:$0xff]  }
   0x3   :  { %v1192_v7 = vld [vmem:[%s1504_s2] ss:$0 sm:$0xff]  ;;  %v812_v10 = vunpack.c.l.bf16 %v1091_v5  ;;  %v813_v11 = vunpack.c.h.bf16 %v1091_v5  ;;  %v816_v14 = vunpack.c.l.bf16 %v1092_v6  ;;  %v817_v15 = vunpack.c.h.bf16 %v1092_v6  ;;  %v1095_v38 = vld [vmem:[%s1502_s0 + $0x30] sm:$0xff]   ;;  %v1096_v43 = vld [vmem:[%s1502_s0 + $0x38] sm:$0xff]  }
   0x4   :  { %v149_v12 = vmul.f32 %v804_v2, %v1178_v1  ;;  %v150_v13 = vmul.f32 %v805_v3, %v1178_v1  ;;  %v151_v16 = vmul.f32 %v808_v8, %v1178_v1  ;;  %v152_v17 = vmul.f32 %v809_v9, %v1178_v1  ;;  %v1093_v28 = vld [vmem:[%s1502_s0 + $0x20] sm:$0xff]  }
   0x5   :  { %v153_v18 = vmul.f32 %v812_v10, %v1178_v1  ;;  %v154_v19 = vmul.f32 %v813_v11, %v1178_v1  ;;  %v155_v22 = vmul.f32 %v816_v14, %v1178_v1  ;;  %v156_v23 = vmul.f32 %v817_v15, %v1178_v1  ;;  %v1097_v0 = vld [vmem:[%s1502_s0 + $0x40] sm:$0xff]   ;;  %v1098_v11 = vld [vmem:[%s1502_s0 + $0x48] sm:$0xff]  }
   0x6   :  { %v220_v20 = vadd.f32 %v1192_v7, %v149_v12  ;;  %v221_v21 = vadd.f32 %v1192_v7, %v150_v13  ;;  %v222_v24 = vadd.f32 %v1192_v7, %v151_v16  ;;  %v223_v25 = vadd.f32 %v1192_v7, %v152_v17  ;;  %v1099_v16 = vld [vmem:[%s1502_s0 + $0x50] sm:$0xff]  }
   0x7   :  { %v224_v26 = vadd.f32 %v1192_v7, %v153_v18  ;;  %v225_v27 = vadd.f32 %v1192_v7, %v154_v19  ;;  %v226_v31 = vadd.f32 %v1192_v7, %v155_v22  ;;  %v227_v32 = vadd.f32 %v1192_v7, %v156_v23 }
   0x8   :  { %v284_v29 = vmax.f32 %v220_v20, 0.0  ;;  %v285_v30 = vmax.f32 %v221_v21, 0.0  ;;  %v286_v34 = vmax.f32 %v222_v24, 0.0  ;;  %v287_v35 = vmax.f32 %v223_v25, 0.0  ;;  %v1100_v25 = vld [vmem:[%s1502_s0 + $0x58] sm:$0xff]  }
   0x9   :  { %v288_v36 = vmax.f32 %v224_v26, 0.0  ;;  %v289_v37 = vmax.f32 %v225_v27, 0.0  ;;  %v290_v40 = vmax.f32 %v226_v31, 0.0  ;;  %v291_v41 = vmax.f32 %v227_v32, 0.0 }
   0xa   :  { %v933_v39 = vpack.c.bf16 %v285_v30, %v284_v29  ;;  %v820_v42 = vunpack.c.l.bf16 %v1093_v28  ;;  %v938_v44 = vpack.c.bf16 %v287_v35, %v286_v34  ;;  %v821_v46 = vunpack.c.h.bf16 %v1093_v28 }
   0xb   :  { %v943_v45 = vpack.c.bf16 %v289_v37, %v288_v36  ;;  %v824_v47 = vunpack.c.l.bf16 %v1094_v33  ;;  %v948_v48 = vpack.c.bf16 %v291_v41, %v290_v40  ;;  %v825_v50 = vunpack.c.h.bf16 %v1094_v33 }
   0xc   :  { %934 = vst [vmem:[%s1505_s3] sm:$0xff] %v933_v39   ;;  %v157_v49 = vmul.f32 %v820_v42, %v1178_v1  ;;  %v828_v51 = vunpack.c.l.bf16 %v1095_v38  ;;  %1121 = vst [vmem:[%s1505_s3 + $0x8] sm:$0xff] %v938_v44   ;;  %v158_v52 = vmul.f32 %v821_v46, %v1178_v1  ;;  %v829_v54 = vunpack.c.h.bf16 %v1095_v38  ;;  %v1101_v38 = vld [vmem:[%s1502_s0 + $0x60] sm:$0xff]  }
   0xd   :  { %1122 = vst [vmem:[%s1505_s3 + $0x10] sm:$0xff] %v943_v45   ;;  %v159_v53 = vmul.f32 %v824_v47, %v1178_v1  ;;  %v832_v55 = vunpack.c.l.bf16 %v1096_v43  ;;  %1123 = vst [vmem:[%s1505_s3 + $0x18] sm:$0xff] %v948_v48   ;;  %v160_v57 = vmul.f32 %v825_v50, %v1178_v1  ;;  %v833_v59 = vunpack.c.h.bf16 %v1096_v43 }
   0xe   :  { %v228_v56 = vadd.f32 %v1192_v7, %v157_v49  ;;  %v161_v58 = vmul.f32 %v828_v51, %v1178_v1  ;;  %v229_v60 = vadd.f32 %v1192_v7, %v158_v52  ;;  %v162_v62 = vmul.f32 %v829_v54, %v1178_v1  ;;  %v1102_v51 = vld [vmem:[%s1502_s0 + $0x68] sm:$0xff]  }
   0xf   :  { %v230_v61 = vadd.f32 %v1192_v7, %v159_v53  ;;  %v163_v63 = vmul.f32 %v832_v55, %v1178_v1  ;;  %v231_v3 = vadd.f32 %v1192_v7, %v160_v57  ;;  %v164_v5 = vmul.f32 %v833_v59, %v1178_v1 }
  0x10   :  { %v292_v2 = vmax.f32 %v228_v56, 0.0  ;;  %v232_v4 = vadd.f32 %v1192_v7, %v161_v58  ;;  %v293_v6 = vmax.f32 %v229_v60, 0.0  ;;  %v233_v9 = vadd.f32 %v1192_v7, %v162_v62  ;;  %v1103_v60 = vld [vmem:[%s1502_s0 + $0x70] sm:$0xff]  }
  0x11   :  { %v294_v8 = vmax.f32 %v230_v61, 0.0  ;;  %v234_v10 = vadd.f32 %v1192_v7, %v163_v63  ;;  %v295_v12 = vmax.f32 %v231_v3, 0.0  ;;  %v235_v14 = vadd.f32 %v1192_v7, %v164_v5 }
  0x12   :  { %v296_v13 = vmax.f32 %v232_v4, 0.0  ;;  %v836_v15 = vunpack.c.l.bf16 %v1097_v0  ;;  %v953_v17 = vpack.c.bf16 %v293_v6, %v292_v2  ;;  %v297_v18 = vmax.f32 %v233_v9, 0.0  ;;  %v1104_v2 = vld [vmem:[%s1502_s0 + $0x78] sm:$0xff]  }
  0x13   :  { %v298_v19 = vmax.f32 %v234_v10, 0.0  ;;  %v837_v20 = vunpack.c.h.bf16 %v1097_v0  ;;  %v958_v21 = vpack.c.bf16 %v295_v12, %v294_v8  ;;  %v299_v22 = vmax.f32 %v235_v14, 0.0  ;;  %v1105_v12 = vld [vmem:[%s1502_s0 + $0x80] sm:$0xff]  }
  0x14   :  { %v165_v23 = vmul.f32 %v836_v15, %v1178_v1  ;;  %v840_v24 = vunpack.c.l.bf16 %v1098_v11  ;;  %1124 = vst [vmem:[%s1505_s3 + $0x20] sm:$0xff] %v953_v17   ;;  %v963_v26 = vpack.c.bf16 %v297_v18, %v296_v13  ;;  %v841_v28 = vunpack.c.h.bf16 %v1098_v11 }
  0x15   :  { %v166_v27 = vmul.f32 %v837_v20, %v1178_v1  ;;  %v844_v29 = vunpack.c.l.bf16 %v1099_v16  ;;  %1125 = vst [vmem:[%s1505_s3 + $0x28] sm:$0xff] %v958_v21   ;;  %v968_v30 = vpack.c.bf16 %v299_v22, %v298_v19  ;;  %v845_v33 = vunpack.c.h.bf16 %v1099_v16 }
  0x16   :  { %v236_v31 = vadd.f32 %v1192_v7, %v165_v23  ;;  %v167_v32 = vmul.f32 %v840_v24, %v1178_v1  ;;  %1126 = vst [vmem:[%s1505_s3 + $0x30] sm:$0xff] %v963_v26   ;;  %v168_v35 = vmul.f32 %v841_v28, %v1178_v1  ;;  %v848_v37 = vunpack.c.l.bf16 %v1100_v25 }
  0x17   :  { %v237_v34 = vadd.f32 %v1192_v7, %v166_v27  ;;  %v169_v36 = vmul.f32 %v844_v29, %v1178_v1  ;;  %1127 = vst [vmem:[%s1505_s3 + $0x38] sm:$0xff] %v968_v30   ;;  %v170_v41 = vmul.f32 %v845_v33, %v1178_v1  ;;  %v849_v42 = vunpack.c.h.bf16 %v1100_v25  ;;  %v1106_v29 = vld [vmem:[%s1502_s0 + $0x88] sm:$0xff]  }
  0x18   :  { %v300_v39 = vmax.f32 %v236_v31, 0.0  ;;  %v238_v40 = vadd.f32 %v1192_v7, %v167_v32  ;;  %v239_v44 = vadd.f32 %v1192_v7, %v168_v35  ;;  %v171_v46 = vmul.f32 %v848_v37, %v1178_v1 }
  0x19   :  { %v301_v43 = vmax.f32 %v237_v34, 0.0  ;;  %v240_v45 = vadd.f32 %v1192_v7, %v169_v36  ;;  %v241_v48 = vadd.f32 %v1192_v7, %v170_v41  ;;  %v172_v49 = vmul.f32 %v849_v42, %v1178_v1  ;;  %v1107_v34 = vld [vmem:[%s1502_s0 + $0x90] sm:$0xff]  }
  0x1a   :  { %v302_v47 = vmax.f32 %v238_v40, 0.0  ;;  %v852_v50 = vunpack.c.l.bf16 %v1101_v38  ;;  %v303_v53 = vmax.f32 %v239_v44, 0.0  ;;  %v242_v55 = vadd.f32 %v1192_v7, %v171_v46 }
  0x1b   :  { %v973_v52 = vpack.c.bf16 %v301_v43, %v300_v39  ;;  %v304_v54 = vmax.f32 %v240_v45, 0.0  ;;  %v305_v56 = vmax.f32 %v241_v48, 0.0  ;;  %v243_v57 = vadd.f32 %v1192_v7, %v172_v49  ;;  %v1108_v43 = vld [vmem:[%s1502_s0 + $0x98] sm:$0xff]  }
  0x1c   :  { %v853_v58 = vunpack.c.h.bf16 %v1101_v38  ;;  %v173_v59 = vmul.f32 %v852_v50, %v1178_v1  ;;  %v978_v61 = vpack.c.bf16 %v303_v53, %v302_v47  ;;  %v306_v62 = vmax.f32 %v242_v55, 0.0 }
  0x1d   :  { %1128 = vst [vmem:[%s1505_s3 + $0x40] sm:$0xff] %v973_v52   ;;  %v856_v63 = vunpack.c.l.bf16 %v1102_v51  ;;  %v857_v0 = vunpack.c.h.bf16 %v1102_v51  ;;  %v983_v3 = vpack.c.bf16 %v305_v56, %v304_v54  ;;  %v307_v4 = vmax.f32 %v243_v57, 0.0  ;;  %v1109_v56 = vld [vmem:[%s1502_s0 + $0xa0] sm:$0xff]  }
  0x1e   :  { %v174_v5 = vmul.f32 %v853_v58, %v1178_v1  ;;  %v244_v6 = vadd.f32 %v1192_v7, %v173_v59  ;;  %1129 = vst [vmem:[%s1505_s3 + $0x48] sm:$0xff] %v978_v61   ;;  %v860_v10 = vunpack.c.l.bf16 %v1103_v60  ;;  %v861_v11 = vunpack.c.h.bf16 %v1103_v60 }
  0x1f   :  { %v175_v8 = vmul.f32 %v856_v63, %v1178_v1  ;;  %v176_v9 = vmul.f32 %v857_v0, %v1178_v1  ;;  %1130 = vst [vmem:[%s1505_s3 + $0x50] sm:$0xff] %v983_v3   ;;  %v988_v13 = vpack.c.bf16 %v307_v4, %v306_v62  ;;  %v864_v16 = vunpack.c.l.bf16 %v1104_v2 }
  0x20   :  { %v245_v14 = vadd.f32 %v1192_v7, %v174_v5  ;;  %v308_v15 = vmax.f32 %v244_v6, 0.0  ;;  %v177_v19 = vmul.f32 %v860_v10, %v1178_v1  ;;  %v178_v20 = vmul.f32 %v861_v11, %v1178_v1 }
  0x21   :  { %v246_v17 = vadd.f32 %v1192_v7, %v175_v8  ;;  %v247_v18 = vadd.f32 %v1192_v7, %v176_v9  ;;  %1131 = vst [vmem:[%s1505_s3 + $0x58] sm:$0xff] %v988_v13   ;;  %v865_v22 = vunpack.c.h.bf16 %v1104_v2  ;;  %v179_v23 = vmul.f32 %v864_v16, %v1178_v1  ;;  %v1110_v2 = vld [vmem:[%s1502_s0 + $0xa8] sm:$0xff]   ;;  %v1111_v16 = vld [vmem:[%s1502_s0 + $0xb0] sm:$0xff]  }
  0x22   :  { %v309_v21 = vmax.f32 %v245_v14, 0.0  ;;  %v868_v24 = vunpack.c.l.bf16 %v1105_v12  ;;  %v248_v27 = vadd.f32 %v1192_v7, %v177_v19  ;;  %v249_v28 = vadd.f32 %v1192_v7, %v178_v20 }
  0x23   :  { %v310_v25 = vmax.f32 %v246_v17, 0.0  ;;  %v311_v26 = vmax.f32 %v247_v18, 0.0  ;;  %v180_v31 = vmul.f32 %v865_v22, %v1178_v1  ;;  %v250_v32 = vadd.f32 %v1192_v7, %v179_v23 }
  0x24   :  { %v993_v30 = vpack.c.bf16 %v309_v21, %v308_v15  ;;  %v869_v33 = vunpack.c.h.bf16 %v1105_v12  ;;  %v312_v36 = vmax.f32 %v248_v27, 0.0  ;;  %v313_v37 = vmax.f32 %v249_v28, 0.0  ;;  %v1112_v21 = vld [vmem:[%s1502_s0 + $0xb8] sm:$0xff]  }
  0x25   :  { %v998_v35 = vpack.c.bf16 %v311_v26, %v310_v25  ;;  %v181_v38 = vmul.f32 %v868_v24, %v1178_v1  ;;  %v251_v39 = vadd.f32 %v1192_v7, %v180_v31  ;;  %v314_v40 = vmax.f32 %v250_v32, 0.0 }
  0x26   :  { %1132 = vst [vmem:[%s1505_s3 + $0x60] sm:$0xff] %v993_v30   ;;  %v182_v41 = vmul.f32 %v869_v33, %v1178_v1  ;;  %v872_v42 = vunpack.c.l.bf16 %v1106_v29  ;;  %v1003_v44 = vpack.c.bf16 %v313_v37, %v312_v36  ;;  %v873_v46 = vunpack.c.h.bf16 %v1106_v29 }
  0x27   :  { %1133 = vst [vmem:[%s1505_s3 + $0x68] sm:$0xff] %v998_v35   ;;  %v252_v45 = vadd.f32 %v1192_v7, %v181_v38  ;;  %v876_v47 = vunpack.c.l.bf16 %v1107_v34  ;;  %v315_v48 = vmax.f32 %v251_v39, 0.0  ;;  %v877_v51 = vunpack.c.h.bf16 %v1107_v34  ;;  %v1113_v34 = vld [vmem:[%s1502_s0 + $0xc0] sm:$0xff]  }
  0x28   :  { %v253_v49 = vadd.f32 %v1192_v7, %v182_v41  ;;  %v183_v50 = vmul.f32 %v872_v42, %v1178_v1  ;;  %1134 = vst [vmem:[%s1505_s3 + $0x70] sm:$0xff] %v1003_v44   ;;  %v184_v53 = vmul.f32 %v873_v46, %v1178_v1  ;;  %v880_v55 = vunpack.c.l.bf16 %v1108_v43 }
  0x29   :  { %v316_v52 = vmax.f32 %v252_v45, 0.0  ;;  %v185_v54 = vmul.f32 %v876_v47, %v1178_v1  ;;  %v1008_v57 = vpack.c.bf16 %v315_v48, %v314_v40  ;;  %v186_v60 = vmul.f32 %v877_v51, %v1178_v1  ;;  %v1114_v47 = vld [vmem:[%s1502_s0 + $0xc8] sm:$0xff]  }
  0x2a   :  { %v317_v58 = vmax.f32 %v253_v49, 0.0  ;;  %v254_v59 = vadd.f32 %v1192_v7, %v183_v50  ;;  %v255_v61 = vadd.f32 %v1192_v7, %v184_v53  ;;  %v881_v63 = vunpack.c.h.bf16 %v1108_v43 }
  0x2b   :  { %v256_v62 = vadd.f32 %v1192_v7, %v185_v54  ;;  %v187_v0 = vmul.f32 %v880_v55, %v1178_v1  ;;  %1135 = vst [vmem:[%s1505_s3 + $0x78] sm:$0xff] %v1008_v57   ;;  %v257_v5 = vadd.f32 %v1192_v7, %v186_v60  ;;  %v884_v6 = vunpack.c.l.bf16 %v1109_v56 }
  0x2c   :  { %v1013_v3 = vpack.c.bf16 %v317_v58, %v316_v52  ;;  %v318_v4 = vmax.f32 %v254_v59, 0.0  ;;  %v319_v8 = vmax.f32 %v255_v61, 0.0  ;;  %v188_v10 = vmul.f32 %v881_v63, %v1178_v1  ;;  %v1115_v52 = vld [vmem:[%s1502_s0 + $0xd0] sm:$0xff]   ;;  %v1116_v61 = vld [vmem:[%s1502_s0 + $0xd8] sm:$0xff]  }
  0x2d   :  { %v320_v9 = vmax.f32 %v256_v62, 0.0  ;;  %v258_v11 = vadd.f32 %v1192_v7, %v187_v0  ;;  %v321_v12 = vmax.f32 %v257_v5, 0.0  ;;  %v885_v13 = vunpack.c.h.bf16 %v1109_v56 }
  0x2e   :  { %1136 = vst [vmem:[%s1505_s3 + $0x80] sm:$0xff] %v1013_v3   ;;  %v189_v14 = vmul.f32 %v884_v6, %v1178_v1  ;;  %v888_v15 = vunpack.c.l.bf16 %v1110_v2  ;;  %v1018_v17 = vpack.c.bf16 %v319_v8, %v318_v4  ;;  %v259_v18 = vadd.f32 %v1192_v7, %v188_v10 }
  0x2f   :  { %v322_v19 = vmax.f32 %v258_v11, 0.0  ;;  %v889_v20 = vunpack.c.h.bf16 %v1110_v2  ;;  %v1023_v22 = vpack.c.bf16 %v321_v12, %v320_v9  ;;  %v190_v23 = vmul.f32 %v885_v13, %v1178_v1  ;;  %v1117_v12 = vld [vmem:[%s1502_s0 + $0xe0] sm:$0xff]  }
  0x30   :  { %v260_v24 = vadd.f32 %v1192_v7, %v189_v14  ;;  %v191_v25 = vmul.f32 %v888_v15, %v1178_v1  ;;  %1137 = vst [vmem:[%s1505_s3 + $0x88] sm:$0xff] %v1018_v17   ;;  %v323_v26 = vmax.f32 %v259_v18, 0.0  ;;  %v892_v28 = vunpack.c.l.bf16 %v1111_v16 }
  0x31   :  { %v192_v27 = vmul.f32 %v889_v20, %v1178_v1  ;;  %v893_v29 = vunpack.c.h.bf16 %v1111_v16  ;;  %1138 = vst [vmem:[%s1505_s3 + $0x90] sm:$0xff] %v1023_v22   ;;  %v261_v30 = vadd.f32 %v1192_v7, %v190_v23  ;;  %v896_v33 = vunpack.c.l.bf16 %v1112_v21 }
  0x32   :  { %v324_v31 = vmax.f32 %v260_v24, 0.0  ;;  %v262_v32 = vadd.f32 %v1192_v7, %v191_v25  ;;  %v1028_v35 = vpack.c.bf16 %v323_v26, %v322_v19  ;;  %v193_v37 = vmul.f32 %v892_v28, %v1178_v1 }
  0x33   :  { %v263_v36 = vadd.f32 %v1192_v7, %v192_v27  ;;  %v194_v38 = vmul.f32 %v893_v29, %v1178_v1  ;;  %v325_v39 = vmax.f32 %v261_v30, 0.0  ;;  %v897_v41 = vunpack.c.h.bf16 %v1112_v21  ;;  %v1118_v21 = vld [vmem:[%s1502_s0 + $0xe8] sm:$0xff]  }
  0x34   :  { %v326_v40 = vmax.f32 %v262_v32, 0.0  ;;  %v195_v42 = vmul.f32 %v896_v33, %v1178_v1  ;;  %1139 = vst [vmem:[%s1505_s3 + $0x98] sm:$0xff] %v1028_v35   ;;  %v264_v44 = vadd.f32 %v1192_v7, %v193_v37  ;;  %v900_v46 = vunpack.c.l.bf16 %v1113_v34 }
  0x35   :  { %v327_v43 = vmax.f32 %v263_v36, 0.0  ;;  %v265_v45 = vadd.f32 %v1192_v7, %v194_v38  ;;  %v1033_v48 = vpack.c.bf16 %v325_v39, %v324_v31  ;;  %v196_v49 = vmul.f32 %v897_v41, %v1178_v1  ;;  %v1120_v39 = vld [vmem:[%s1502_s0 + $0xf8] sm:$0xff]  }
  0x36   :  { %v266_v50 = vadd.f32 %v1192_v7, %v195_v42  ;;  %v901_v51 = vunpack.c.h.bf16 %v1113_v34  ;;  %v328_v54 = vmax.f32 %v264_v44, 0.0  ;;  %v197_v56 = vmul.f32 %v900_v46, %v1178_v1  ;;  %v1119_v34 = vld [vmem:[%s1502_s0 + $0xf0] sm:$0xff]  }
  0x37   :  { %v1038_v53 = vpack.c.bf16 %v327_v43, %v326_v40  ;;  %v329_v55 = vmax.f32 %v265_v45, 0.0  ;;  %1140 = vst [vmem:[%s1505_s3 + $0xa0] sm:$0xff] %v1033_v48   ;;  %v267_v57 = vadd.f32 %v1192_v7, %v196_v49  ;;  %v904_v60 = vunpack.c.l.bf16 %v1114_v47 }
  0x38   :  { %v330_v58 = vmax.f32 %v266_v50, 0.0  ;;  %v198_v59 = vmul.f32 %v901_v51, %v1178_v1  ;;  %v268_v63 = vadd.f32 %v1192_v7, %v197_v56  ;;  %v905_v0 = vunpack.c.h.bf16 %v1114_v47 }
  0x39   :  { %1141 = vst [vmem:[%s1505_s3 + $0xa8] sm:$0xff] %v1038_v53   ;;  %v1043_v62 = vpack.c.bf16 %v329_v55, %v328_v54  ;;  %v908_v2 = vunpack.c.l.bf16 %v1115_v52  ;;  %v331_v3 = vmax.f32 %v267_v57, 0.0  ;;  %v199_v5 = vmul.f32 %v904_v60, %v1178_v1 }
  0x3a   :  { %v269_v4 = vadd.f32 %v1192_v7, %v198_v59  ;;  %v909_v6 = vunpack.c.h.bf16 %v1115_v52  ;;  %v332_v8 = vmax.f32 %v268_v63, 0.0  ;;  %v200_v9 = vmul.f32 %v905_v0, %v1178_v1 }
  0x3b   :  { %1142 = vst [vmem:[%s1505_s3 + $0xb0] sm:$0xff] %v1043_v62   ;;  %v201_v10 = vmul.f32 %v908_v2, %v1178_v1  ;;  %v912_v11 = vunpack.c.l.bf16 %v1116_v61  ;;  %v1048_v13 = vpack.c.bf16 %v331_v3, %v330_v58  ;;  %v270_v15 = vadd.f32 %v1192_v7, %v199_v5 }
  0x3c   :  { %v333_v14 = vmax.f32 %v269_v4, 0.0  ;;  %v202_v16 = vmul.f32 %v909_v6, %v1178_v1  ;;  %v271_v17 = vadd.f32 %v1192_v7, %v200_v9  ;;  %v913_v19 = vunpack.c.h.bf16 %v1116_v61 }
  0x3d   :  { %v272_v18 = vadd.f32 %v1192_v7, %v201_v10  ;;  %v203_v20 = vmul.f32 %v912_v11, %v1178_v1  ;;  %1143 = vst [vmem:[%s1505_s3 + $0xb8] sm:$0xff] %v1048_v13   ;;  %v334_v23 = vmax.f32 %v270_v15, 0.0  ;;  %v916_v25 = vunpack.c.l.bf16 %v1117_v12 }
  0x3e   :  { %v1053_v22 = vpack.c.bf16 %v333_v14, %v332_v8  ;;  %v273_v24 = vadd.f32 %v1192_v7, %v202_v16  ;;  %v335_v26 = vmax.f32 %v271_v17, 0.0  ;;  %v204_v28 = vmul.f32 %v913_v19, %v1178_v1 }
  0x3f   :  { %v336_v27 = vmax.f32 %v272_v18, 0.0  ;;  %v274_v29 = vadd.f32 %v1192_v7, %v203_v20  ;;  %v917_v31 = vunpack.c.h.bf16 %v1117_v12  ;;  %v205_v32 = vmul.f32 %v916_v25, %v1178_v1 }
  0x40   :  { %1144 = vst [vmem:[%s1505_s3 + $0xc0] sm:$0xff] %v1053_v22   ;;  %v337_v30 = vmax.f32 %v273_v24, 0.0  ;;  %v920_v33 = vunpack.c.l.bf16 %v1118_v21  ;;  %v1058_v35 = vpack.c.bf16 %v335_v26, %v334_v23  ;;  %v275_v36 = vadd.f32 %v1192_v7, %v204_v28 }
  0x41   :  { %v338_v37 = vmax.f32 %v274_v29, 0.0  ;;  %v921_v38 = vunpack.c.h.bf16 %v1118_v21  ;;  %v206_v41 = vmul.f32 %v917_v31, %v1178_v1  ;;  %v276_v42 = vadd.f32 %v1192_v7, %v205_v32 }
  0x42   :  { %v1063_v40 = vpack.c.bf16 %v337_v30, %v336_v27  ;;  %v207_v43 = vmul.f32 %v920_v33, %v1178_v1  ;;  %1145 = vst [vmem:[%s1505_s3 + $0xc8] sm:$0xff] %v1058_v35   ;;  %v339_v44 = vmax.f32 %v275_v36, 0.0  ;;  %v924_v46 = vunpack.c.l.bf16 %v1119_v34 }
  0x43   :  { %v208_v45 = vmul.f32 %v921_v38, %v1178_v1  ;;  %v925_v47 = vunpack.c.h.bf16 %v1119_v34  ;;  %v277_v48 = vadd.f32 %v1192_v7, %v206_v41  ;;  %v340_v49 = vmax.f32 %v276_v42, 0.0 }
  0x44   :  { %1146 = vst [vmem:[%s1505_s3 + $0xd0] sm:$0xff] %v1063_v40   ;;  %v278_v50 = vadd.f32 %v1192_v7, %v207_v43  ;;  %v928_v51 = vunpack.c.l.bf16 %v1120_v39  ;;  %v1068_v52 = vpack.c.bf16 %v339_v44, %v338_v37  ;;  %v209_v54 = vmul.f32 %v924_v46, %v1178_v1 }
  0x45   :  { %v279_v53 = vadd.f32 %v1192_v7, %v208_v45  ;;  %v210_v55 = vmul.f32 %v925_v47, %v1178_v1  ;;  %v341_v56 = vmax.f32 %v277_v48, 0.0  ;;  %v929_v58 = vunpack.c.h.bf16 %v1120_v39 }
  0x46   :  { %v342_v57 = vmax.f32 %v278_v50, 0.0  ;;  %v211_v59 = vmul.f32 %v928_v51, %v1178_v1  ;;  %1147 = vst [vmem:[%s1505_s3 + $0xd8] sm:$0xff] %v1068_v52   ;;  %v280_v61 = vadd.f32 %v1192_v7, %v209_v54 }
  0x47   :  { %v343_v60 = vmax.f32 %v279_v53, 0.0  ;;  %v281_v62 = vadd.f32 %v1192_v7, %v210_v55  ;;  %v1073_v63 = vpack.c.bf16 %v341_v56, %v340_v49  ;;  %v212_v0 = vmul.f32 %v929_v58, %v1178_v1 }
  0x48   :  { %v282_v2 = vadd.f32 %v1192_v7, %v211_v59  ;;  %v344_v4 = vmax.f32 %v280_v61, 0.0 }
  0x49   :  { %v1078_v3 = vpack.c.bf16 %v343_v60, %v342_v57  ;;  %v345_v5 = vmax.f32 %v281_v62, 0.0  ;;  %1148 = vst [vmem:[%s1505_s3 + $0xe0] sm:$0xff] %v1073_v63   ;;  %v283_v6 = vadd.f32 %v1192_v7, %v212_v0 }
  0x4a   :  { %v346_v8 = vmax.f32 %v282_v2, 0.0 }
  0x4b   :  { %1149 = vst [vmem:[%s1505_s3 + $0xe8] sm:$0xff] %v1078_v3   ;;  %v1083_v9 = vpack.c.bf16 %v345_v5, %v344_v4  ;;  %v347_v10 = vmax.f32 %v283_v6, 0.0 }
  0x4d   :  { %1150 = vst [vmem:[%s1505_s3 + $0xf0] sm:$0xff] %v1083_v9   ;;  %v1088_v1 = vpack.c.bf16 %v347_v10, %v346_v8 }
  0x4f   :  { %1151 = vst [vmem:[%s1505_s3 + $0xf8] sm:$0xff] %v1088_v1  }

// kernel: image_transform_net.31
= control target key start
LH: loop header
LB: loop body
LE: loop exit
PB: predicated region body
PF: predicated region fallthrough
CT: control target
= control target key end

     0   :  { %v1894_v0 = vmov 0   ;;  %vm1337_vm0 = vcmask 1040384   ;;  %vm1339_vm1 = vcmask 1041408   ;;  %s2478_s1 = inlined_call_operand.vmem [shape: bf16[256,128], index: 1, kind: input, shape index: {}]   ;;  %s2479_s0 = inlined_call_operand.vmem [shape: bf16[512,256], index: 0, kind: input, shape index: {}]   ;;  %s2480_s2 = inlined_call_operand.vmem [shape: bf16[512,128], index: 2, kind: output, shape index: {0}]   ;;  %s2481_s3 = inlined_call_operand.vmem [shape: f32[8,128], index: 3, kind: output, shape index: {1}]  }
   0x1   :  { %526 = vmatprep.subr.bf16.mxu0 %v1894_v0  ;;  %v1782_v1 = vld [vmem:[%s2478_s1] sm:$0xff]   ;;  %1749 = vmatprep.subr.bf16.mxu1 %v1894_v0  ;;  %v1783_v2 = vld [vmem:[%s2478_s1 + $0x8] sm:$0xff]   ;;  %v1784_v3 = vld [vmem:[%s2478_s1 + $0x10] sm:$0xff]  }
   0x2   :  { %527 = vmatpush1.bf16.msra.mxu0 %v1782_v1  ;;  %1765 = vmatpush1.bf16.msra.mxu1 %v1782_v1  ;;  %v1785_v4 = vld [vmem:[%s2478_s1 + $0x18] sm:$0xff]   ;;  %v1786_v5 = vld [vmem:[%s2478_s1 + $0x20] sm:$0xff]   ;;  %v1787_v7 = vld [vmem:[%s2478_s1 + $0x28] sm:$0xff]  }
   0x3   :  { %528 = vmatprep.subr.bf16.mxu0 %v1894_v0  ;;  %1750 = vmatprep.subr.bf16.mxu1 %v1894_v0  ;;  %v1800_v6 = vld [vmem:[%s2479_s0 + $0x4] ss:$8 sps:$4 sm:$0xff]   ;;  %v1788_v8 = vld [vmem:[%s2478_s1 + $0x30] sm:$0xff]   ;;  %v1789_v9 = vld [vmem:[%s2478_s1 + $0x38] sm:$0xff]  }
   0x4   :  { %558 = vmatprep.mubr.bf16.mxu0 %v1800_v6  ;;  %v1824_v10 = vld [vmem:[%s2479_s0 + $0x104] ss:$8 sps:$4 sm:$0xff]   ;;  %v1792_v13 = vld [vmem:[%s2478_s1 + $0x50] sm:$0xff]   ;;  %v1793_v14 = vld [vmem:[%s2478_s1 + $0x58] sm:$0xff]  }
   0x5   :  { %686 = vmatprep.mubr.bf16.mxu1 %v1824_v10  ;;  %v1790_v11 = vld [vmem:[%s2478_s1 + $0x40] sm:$0xff]   ;;  %v1791_v12 = vld [vmem:[%s2478_s1 + $0x48] sm:$0xff]   ;;  %v1796_v17 = vld [vmem:[%s2478_s1 + $0x70] sm:$0xff]  }
   0x6   :  { %529 = vmatpush1.bf16.msra.mxu0 %v1783_v2  ;;  %1766 = vmatpush1.bf16.msra.mxu1 %v1783_v2  ;;  %v1794_v15 = vld [vmem:[%s2478_s1 + $0x60] sm:$0xff]   ;;  %v1795_v16 = vld [vmem:[%s2478_s1 + $0x68] sm:$0xff]   ;;  %v1797_v18 = vld [vmem:[%s2478_s1 + $0x78] sm:$0xff]  }
   0x7   :  { %530 = vmatprep.subr.bf16.mxu0 %v1894_v0  ;;  %1751 = vmatprep.subr.bf16.mxu1 %v1894_v0  ;;  %v1798_v19 = vld [vmem:[%s2479_s0] ss:$8 sps:$4 sm:$0xff]   ;;  %v1801_v21 = vld [vmem:[%s2479_s0 + $0x14] ss:$8 sps:$4 sm:$0xff]   ;;  %v1803_v23 = vld [vmem:[%s2479_s0 + $0x10] ss:$8 sps:$4 sm:$0xff]  }
   0x8   :  { %v1822_v20 = vld [vmem:[%s2479_s0 + $0x100] ss:$8 sps:$4 sm:$0xff]   ;;  %v1828_v22 = vld [vmem:[%s2479_s0 + $0x114] ss:$8 sps:$4 sm:$0xff]   ;;  %v1830_v24 = vld [vmem:[%s2479_s0 + $0x110] ss:$8 sps:$4 sm:$0xff]  }
   0x9   :  { %v1804_v25 = vld [vmem:[%s2479_s0 + $0x24] ss:$8 sps:$4 sm:$0xff]   ;;  %v1806_v27 = vld [vmem:[%s2479_s0 + $0x20] ss:$8 sps:$4 sm:$0xff]   ;;  %v1807_v29 = vld [vmem:[%s2479_s0 + $0x34] ss:$8 sps:$4 sm:$0xff]  }
   0xa   :  { %531 = vmatpush1.bf16.msra.mxu0 %v1784_v3  ;;  %1767 = vmatpush1.bf16.msra.mxu1 %v1784_v3  ;;  %v1834_v26 = vld [vmem:[%s2479_s0 + $0x124] ss:$8 sps:$4 sm:$0xff]   ;;  %v1836_v28 = vld [vmem:[%s2479_s0 + $0x120] ss:$8 sps:$4 sm:$0xff]   ;;  %v1840_v30 = vld [vmem:[%s2479_s0 + $0x134] ss:$8 sps:$4 sm:$0xff]  }
   0xb   :  { %532 = vmatprep.subr.bf16.mxu0 %v1894_v0  ;;  %1752 = vmatprep.subr.bf16.mxu1 %v1894_v0  ;;  %v1809_v31 = vld [vmem:[%s2479_s0 + $0x30] ss:$8 sps:$4 sm:$0xff]   ;;  %v1810_v33 = vld [vmem:[%s2479_s0 + $0x44] ss:$8 sps:$4 sm:$0xff]   ;;  %v1812_v35 = vld [vmem:[%s2479_s0 + $0x40] ss:$8 sps:$4 sm:$0xff]  }
   0xc   :  { %v1842_v32 = vld [vmem:[%s2479_s0 + $0x130] ss:$8 sps:$4 sm:$0xff]   ;;  %v1846_v34 = vld [vmem:[%s2479_s0 + $0x144] ss:$8 sps:$4 sm:$0xff]   ;;  %v1848_v36 = vld [vmem:[%s2479_s0 + $0x140] ss:$8 sps:$4 sm:$0xff]  }
   0xd   :  { %v1813_v37 = vld [vmem:[%s2479_s0 + $0x54] ss:$8 sps:$4 sm:$0xff]   ;;  %v1815_v39 = vld [vmem:[%s2479_s0 + $0x50] ss:$8 sps:$4 sm:$0xff]   ;;  %v1816_v41 = vld [vmem:[%s2479_s0 + $0x64] ss:$8 sps:$4 sm:$0xff]  }
   0xe   :  { %533 = vmatpush1.bf16.msra.mxu0 %v1785_v4  ;;  %1768 = vmatpush1.bf16.msra.mxu1 %v1785_v4  ;;  %v1852_v38 = vld [vmem:[%s2479_s0 + $0x154] ss:$8 sps:$4 sm:$0xff]   ;;  %v1854_v40 = vld [vmem:[%s2479_s0 + $0x150] ss:$8 sps:$4 sm:$0xff]   ;;  %v1858_v42 = vld [vmem:[%s2479_s0 + $0x164] ss:$8 sps:$4 sm:$0xff]  }
   0xf   :  { %534 = vmatprep.subr.bf16.mxu0 %v1894_v0  ;;  %1753 = vmatprep.subr.bf16.mxu1 %v1894_v0  ;;  %v1818_v43 = vld [vmem:[%s2479_s0 + $0x60] ss:$8 sps:$4 sm:$0xff]   ;;  %v1819_v45 = vld [vmem:[%s2479_s0 + $0x74] ss:$8 sps:$4 sm:$0xff]   ;;  %v1821_v47 = vld [vmem:[%s2479_s0 + $0x70] ss:$8 sps:$4 sm:$0xff]  }
  0x10   :  { %v1860_v44 = vld [vmem:[%s2479_s0 + $0x160] ss:$8 sps:$4 sm:$0xff]   ;;  %v1864_v46 = vld [vmem:[%s2479_s0 + $0x174] ss:$8 sps:$4 sm:$0xff]   ;;  %v1866_v48 = vld [vmem:[%s2479_s0 + $0x170] ss:$8 sps:$4 sm:$0xff]  }
  0x11   :  { %v1825_v49 = vld [vmem:[%s2479_s0 + $0x84] ss:$8 sps:$4 sm:$0xff]   ;;  %v1827_v51 = vld [vmem:[%s2479_s0 + $0x80] ss:$8 sps:$4 sm:$0xff]   ;;  %v1831_v53 = vld [vmem:[%s2479_s0 + $0x94] ss:$8 sps:$4 sm:$0xff]  }
  0x12   :  { %535 = vmatpush1.bf16.msra.mxu0 %v1786_v5  ;;  %1769 = vmatpush1.bf16.msra.mxu1 %v1786_v5  ;;  %v1870_v50 = vld [vmem:[%s2479_s0 + $0x184] ss:$8 sps:$4 sm:$0xff]   ;;  %v1872_v52 = vld [vmem:[%s2479_s0 + $0x180] ss:$8 sps:$4 sm:$0xff]   ;;  %v1873_v54 = vld [vmem:[%s2479_s0 + $0x194] ss:$8 sps:$4 sm:$0xff]  }
  0x13   :  { %536 = vmatprep.subr.bf16.mxu0 %v1894_v0  ;;  %1754 = vmatprep.subr.bf16.mxu1 %v1894_v0  ;;  %v1833_v55 = vld [vmem:[%s2479_s0 + $0x90] ss:$8 sps:$4 sm:$0xff]   ;;  %v1837_v57 = vld [vmem:[%s2479_s0 + $0xa4] ss:$8 sps:$4 sm:$0xff]   ;;  %v1839_v59 = vld [vmem:[%s2479_s0 + $0xa0] ss:$8 sps:$4 sm:$0xff]  }
  0x14   :  { %v1875_v56 = vld [vmem:[%s2479_s0 + $0x190] ss:$8 sps:$4 sm:$0xff]   ;;  %v1876_v58 = vld [vmem:[%s2479_s0 + $0x1a4] ss:$8 sps:$4 sm:$0xff]   ;;  %v1878_v60 = vld [vmem:[%s2479_s0 + $0x1a0] ss:$8 sps:$4 sm:$0xff]  }
  0x15   :  { %v1843_v61 = vld [vmem:[%s2479_s0 + $0xb4] ss:$8 sps:$4 sm:$0xff]   ;;  %v1845_v63 = vld [vmem:[%s2479_s0 + $0xb0] ss:$8 sps:$4 sm:$0xff]   ;;  %v1849_v1 = vld [vmem:[%s2479_s0 + $0xc4] ss:$8 sps:$4 sm:$0xff]  }
  0x16   :  { %537 = vmatpush1.bf16.msra.mxu0 %v1787_v7  ;;  %1770 = vmatpush1.bf16.msra.mxu1 %v1787_v7  ;;  %v1879_v62 = vld [vmem:[%s2479_s0 + $0x1b4] ss:$8 sps:$4 sm:$0xff]   ;;  %v1882_v2 = vld [vmem:[%s2479_s0 + $0x1c4] ss:$8 sps:$4 sm:$0xff]   ;;  %v1851_v3 = vld [vmem:[%s2479_s0 + $0xc0] ss:$8 sps:$4 sm:$0xff]  }
  0x17   :  { %538 = vmatprep.subr.bf16.mxu0 %v1894_v0  ;;  %1755 = vmatprep.subr.bf16.mxu1 %v1894_v0  ;;  %v1884_v4 = vld [vmem:[%s2479_s0 + $0x1c0] ss:$8 sps:$4 sm:$0xff]   ;;  %v1855_v5 = vld [vmem:[%s2479_s0 + $0xd4] ss:$8 sps:$4 sm:$0xff]   ;;  %v1857_v7 = vld [vmem:[%s2479_s0 + $0xd0] ss:$8 sps:$4 sm:$0xff]  }
  0x18   :  { %v1885_v6 = vld [vmem:[%s2479_s0 + $0x1d4] ss:$8 sps:$4 sm:$0xff]   ;;  %v1888_v10 = vld [vmem:[%s2479_s0 + $0x1e4] ss:$8 sps:$4 sm:$0xff]  }
  0x1a   :  { %539 = vmatpush1.bf16.msra.mxu0 %v1788_v8  ;;  %1771 = vmatpush1.bf16.msra.mxu1 %v1788_v8  ;;  %v1887_v8 = vld [vmem:[%s2479_s0 + $0x1d0] ss:$8 sps:$4 sm:$0xff]  }
  0x1b   :  { %540 = vmatprep.subr.bf16.mxu0 %v1894_v0  ;;  %1756 = vmatprep.subr.bf16.mxu1 %v1894_v0 }
  0x1e   :  { %541 = vmatpush1.bf16.msra.mxu0 %v1789_v9  ;;  %1772 = vmatpush1.bf16.msra.mxu1 %v1789_v9  ;;  %v1861_v9 = vld [vmem:[%s2479_s0 + $0xe4] ss:$8 sps:$4 sm:$0xff]  }
  0x1f   :  { %542 = vmatprep.subr.bf16.mxu0 %v1894_v0  ;;  %1757 = vmatprep.subr.bf16.mxu1 %v1894_v0 }
  0x22   :  { %543 = vmatpush1.bf16.msra.mxu0 %v1790_v11  ;;  %1773 = vmatpush1.bf16.msra.mxu1 %v1790_v11  ;;  %v1863_v11 = vld [vmem:[%s2479_s0 + $0xe0] ss:$8 sps:$4 sm:$0xff]  }
  0x23   :  { %544 = vmatprep.subr.bf16.mxu0 %v1894_v0  ;;  %1758 = vmatprep.subr.bf16.mxu1 %v1894_v0 }
  0x26   :  { %545 = vmatpush1.bf16.msra.mxu0 %v1791_v12  ;;  %1774 = vmatpush1.bf16.msra.mxu1 %v1791_v12  ;;  %v1890_v12 = vld [vmem:[%s2479_s0 + $0x1e0] ss:$8 sps:$4 sm:$0xff]  }
  0x27   :  { %546 = vmatprep.subr.bf16.mxu0 %v1894_v0  ;;  %1759 = vmatprep.subr.bf16.mxu1 %v1894_v0 }
  0x2a   :  { %547 = vmatpush1.bf16.msra.mxu0 %v1792_v13  ;;  %1775 = vmatpush1.bf16.msra.mxu1 %v1792_v13  ;;  %v1867_v13 = vld [vmem:[%s2479_s0 + $0xf4] ss:$8 sps:$4 sm:$0xff]  }
  0x2b   :  { %548 = vmatprep.subr.bf16.mxu0 %v1894_v0  ;;  %1760 = vmatprep.subr.bf16.mxu1 %v1894_v0 }
  0x2e   :  { %549 = vmatpush1.bf16.msra.mxu0 %v1793_v14  ;;  %1776 = vmatpush1.bf16.msra.mxu1 %v1793_v14  ;;  %v1891_v14 = vld [vmem:[%s2479_s0 + $0x1f4] ss:$8 sps:$4 sm:$0xff]  }
  0x2f   :  { %550 = vmatprep.subr.bf16.mxu0 %v1894_v0  ;;  %1761 = vmatprep.subr.bf16.mxu1 %v1894_v0 }
  0x32   :  { %551 = vmatpush1.bf16.msra.mxu0 %v1794_v15  ;;  %1777 = vmatpush1.bf16.msra.mxu1 %v1794_v15  ;;  %v1869_v15 = vld [vmem:[%s2479_s0 + $0xf0] ss:$8 sps:$4 sm:$0xff]  }
  0x33   :  { %552 = vmatprep.subr.bf16.mxu0 %v1894_v0  ;;  %1762 = vmatprep.subr.bf16.mxu1 %v1894_v0 }
  0x36   :  { %553 = vmatpush1.bf16.msra.mxu0 %v1795_v16  ;;  %1778 = vmatpush1.bf16.msra.mxu1 %v1795_v16  ;;  %v1893_v16 = vld [vmem:[%s2479_s0 + $0x1f0] ss:$8 sps:$4 sm:$0xff]  }
  0x37   :  { %554 = vmatprep.subr.bf16.mxu0 %v1894_v0  ;;  %1763 = vmatprep.subr.bf16.mxu1 %v1894_v0 }
  0x3a   :  { %555 = vmatpush1.bf16.msra.mxu0 %v1796_v17  ;;  %1779 = vmatpush1.bf16.msra.mxu1 %v1796_v17 }
  0x3b   :  { %556 = vmatprep.subr.bf16.mxu0 %v1894_v0  ;;  %1764 = vmatprep.subr.bf16.mxu1 %v1894_v0  ;;  %v1881_v0 = vld [vmem:[%s2479_s0 + $0x1b0] ss:$8 sps:$4 sm:$0xff]  }
  0x3e   :  { %557 = vmatpush1.bf16.msra.mxu0 %v1797_v18  ;;  %1780 = vmatpush1.bf16.msra.mxu1 %v1797_v18 }
  0x41   :  { %559 = vmatmul.mubr.bf16.vlgmr.msra.gmra.mrb[0].mxu0 %v1798_v19  ;;  %687 = vmatmul.mubr.bf16.vlgmr.msra.gmra.mrb[0].mxu1 %v1822_v20 }
  0x42   :  { %566 = vmatprep.mubr.bf16.mxu0 %v1801_v21  ;;  %694 = vmatprep.mubr.bf16.mxu1 %v1828_v22 }
  0x49   :  { %567 = vmatmul.mubr.bf16.gmra.mrb[4].mxu0 %v1803_v23  ;;  %695 = vmatmul.mubr.bf16.gmra.mrb[4].mxu1 %v1830_v24 }
  0x4a   :  { %574 = vmatprep.mubr.bf16.mxu0 %v1804_v25  ;;  %702 = vmatprep.mubr.bf16.mxu1 %v1834_v26 }
  0x51   :  { %575 = vmatmul.mubr.bf16.gmra.mrb[8].mxu0 %v1806_v27  ;;  %703 = vmatmul.mubr.bf16.gmra.mrb[8].mxu1 %v1836_v28 }
  0x52   :  { %582 = vmatprep.mubr.bf16.mxu0 %v1807_v29  ;;  %710 = vmatprep.mubr.bf16.mxu1 %v1840_v30 }
  0x59   :  { %583 = vmatmul.mubr.bf16.gmra.mrb[12].mxu0 %v1809_v31  ;;  %711 = vmatmul.mubr.bf16.gmra.mrb[12].mxu1 %v1842_v32 }
  0x5a   :  { %590 = vmatprep.mubr.bf16.mxu0 %v1810_v33  ;;  %718 = vmatprep.mubr.bf16.mxu1 %v1846_v34 }
  0x61   :  { %591 = vmatmul.mubr.bf16.gmra.mrb[16].mxu0 %v1812_v35  ;;  %719 = vmatmul.mubr.bf16.gmra.mrb[16].mxu1 %v1848_v36 }
  0x62   :  { %598 = vmatprep.mubr.bf16.mxu0 %v1813_v37  ;;  %726 = vmatprep.mubr.bf16.mxu1 %v1852_v38 }
  0x69   :  { %599 = vmatmul.mubr.bf16.gmra.mrb[20].mxu0 %v1815_v39  ;;  %727 = vmatmul.mubr.bf16.gmra.mrb[20].mxu1 %v1854_v40 }
  0x6a   :  { %606 = vmatprep.mubr.bf16.mxu0 %v1816_v41  ;;  %734 = vmatprep.mubr.bf16.mxu1 %v1858_v42 }
  0x71   :  { %607 = vmatmul.mubr.bf16.gmra.mrb[24].mxu0 %v1818_v43  ;;  %735 = vmatmul.mubr.bf16.gmra.mrb[24].mxu1 %v1860_v44 }
  0x72   :  { %614 = vmatprep.mubr.bf16.mxu0 %v1819_v45  ;;  %742 = vmatprep.mubr.bf16.mxu1 %v1864_v46 }
  0x79   :  { %615 = vmatmul.mubr.bf16.gmra.mrb[28].mxu0 %v1821_v47  ;;  %743 = vmatmul.mubr.bf16.gmra.mrb[28].mxu1 %v1866_v48 }
  0x7a   :  { %622 = vmatprep.mubr.bf16.mxu0 %v1825_v49  ;;  %750 = vmatprep.mubr.bf16.mxu1 %v1870_v50 }
  0x81   :  { %623 = vmatmul.mubr.bf16.gmra.mrb[32].mxu0 %v1827_v51  ;;  %751 = vmatmul.mubr.bf16.gmra.mrb[32].mxu1 %v1872_v52 }
  0x82   :  { %630 = vmatprep.mubr.bf16.mxu0 %v1831_v53  ;;  %758 = vmatprep.mubr.bf16.mxu1 %v1873_v54 }
  0x89   :  { %631 = vmatmul.mubr.bf16.gmra.mrb[36].mxu0 %v1833_v55  ;;  %759 = vmatmul.mubr.bf16.gmra.mrb[36].mxu1 %v1875_v56 }
  0x8a   :  { %638 = vmatprep.mubr.bf16.mxu0 %v1837_v57  ;;  %766 = vmatprep.mubr.bf16.mxu1 %v1876_v58 }
  0x91   :  { %639 = vmatmul.mubr.bf16.gmra.mrb[40].mxu0 %v1839_v59  ;;  %767 = vmatmul.mubr.bf16.gmra.mrb[40].mxu1 %v1878_v60 }
  0x92   :  { %646 = vmatprep.mubr.bf16.mxu0 %v1843_v61  ;;  %774 = vmatprep.mubr.bf16.mxu1 %v1879_v62 }
  0x99   :  { %647 = vmatmul.mubr.bf16.gmra.mrb[44].mxu0 %v1845_v63  ;;  %775 = vmatmul.mubr.bf16.gmra.mrb[44].mxu1 %v1881_v0 }
  0x9a   :  { %654 = vmatprep.mubr.bf16.mxu0 %v1849_v1  ;;  %782 = vmatprep.mubr.bf16.mxu1 %v1882_v2 }
  0xa1   :  { %655 = vmatmul.mubr.bf16.gmra.mrb[48].mxu0 %v1851_v3  ;;  %783 = vmatmul.mubr.bf16.gmra.mrb[48].mxu1 %v1884_v4 }
  0xa2   :  { %662 = vmatprep.mubr.bf16.mxu0 %v1855_v5  ;;  %790 = vmatprep.mubr.bf16.mxu1 %v1885_v6 }
  0xa9   :  { %663 = vmatmul.mubr.bf16.gmra.mrb[52].mxu0 %v1857_v7  ;;  %791 = vmatmul.mubr.bf16.gmra.mrb[52].mxu1 %v1887_v8 }
  0xaa   :  { %670 = vmatprep.mubr.bf16.mxu0 %v1861_v9  ;;  %798 = vmatprep.mubr.bf16.mxu1 %v1888_v10 }
  0xb1   :  { %671 = vmatmul.mubr.bf16.gmra.mrb[56].mxu0 %v1863_v11  ;;  %799 = vmatmul.mubr.bf16.gmra.mrb[56].mxu1 %v1890_v12 }
  0xb2   :  { %678 = vmatprep.mubr.bf16.mxu0 %v1867_v13  ;;  %806 = vmatprep.mubr.bf16.mxu1 %v1891_v14 }
  0xb9   :  { %679 = vmatmul.mubr.bf16.gmra.mrb[60].mxu0 %v1869_v15  ;;  %807 = vmatmul.mubr.bf16.gmra.mrb[60].mxu1 %v1893_v16 }
 0x114   :  { %v560_v17 = vpop.f32.mrb[0].mxu0  ;;  %v2187_v18 = vpop.f32.mrb[0].mxu1 }
 0x115   :  { %v562_v19 = vpop.f32.mrb[1].mxu0  ;;  %v690_v20 = vpop.f32.mrb[1].mxu1  ;;  %v1204_v21 = vmul.f32 %v560_v17, %v560_v17 }
 0x116   :  { %v563_v22 = vpop.f32.mrb[2].mxu0  ;;  %v2189_v23 = vpop.f32.mrb[2].mxu1 }
 0x117   :  { %v1561_v24 = vpack.c.bf16 %v563_v22, %v560_v17  ;;  %v1135_v25 = vadd.f32 %v563_v22, %v560_v17  ;;  %v1205_v26 = vmul.f32 %v563_v22, %v563_v22  ;;  %v565_v27 = vpop.f32.mrb[3].mxu0  ;;  %v1641_v28 = vpack.c.bf16 %v2189_v23, %v2187_v18  ;;  %v693_v29 = vpop.f32.mrb[3].mxu1 }
 0x119   :  { %1562 = vst [vmem:[%s2480_s2] sm:$0xff] %v1561_v24   ;;  %v1268_v30 = vadd.f32 %v1205_v26, %v1204_v21  ;;  %1733 = vst [vmem:[%s2480_s2 + $0x80] sm:$0xff] %v1641_v28  }
 0x11c   :  { %v568_v31 = vpop.f32.mrb[4].mxu0  ;;  %v2199_v32 = vpop.f32.mrb[4].mxu1 }
 0x11d   :  { %v1136_v33 = vadd.f32 %v1135_v25, %v568_v31  ;;  %v1206_v34 = vmul.f32 %v568_v31, %v568_v31  ;;  %v570_v35 = vpop.f32.mrb[5].mxu0  ;;  %v698_v36 = vpop.f32.mrb[5].mxu1 }
 0x11e   :  { %v571_v37 = vpop.f32.mrb[6].mxu0  ;;  %v2201_v38 = vpop.f32.mrb[6].mxu1 }
 0x11f   :  { %v1269_v39 = vadd.f32 %v1268_v30, %v1206_v34  ;;  %v1566_v40 = vpack.c.bf16 %v571_v37, %v568_v31  ;;  %v1137_v41 = vadd.f32 %v1136_v33, %v571_v37  ;;  %v1207_v42 = vmul.f32 %v571_v37, %v571_v37  ;;  %v573_v43 = vpop.f32.mrb[7].mxu0  ;;  %v701_v44 = vpop.f32.mrb[7].mxu1 }
 0x120   :  { %v1646_v45 = vpack.c.bf16 %v2201_v38, %v2199_v32 }
 0x121   :  { %1718 = vst [vmem:[%s2480_s2 + $0x8] sm:$0xff] %v1566_v40   ;;  %v1270_v46 = vadd.f32 %v1269_v39, %v1207_v42 }
 0x122   :  { %1734 = vst [vmem:[%s2480_s2 + $0x88] sm:$0xff] %v1646_v45  }
 0x124   :  { %v576_v47 = vpop.f32.mrb[8].mxu0  ;;  %v2211_v48 = vpop.f32.mrb[8].mxu1 }
 0x125   :  { %v1138_v49 = vadd.f32 %v1137_v41, %v576_v47  ;;  %v1208_v50 = vmul.f32 %v576_v47, %v576_v47  ;;  %v578_v51 = vpop.f32.mrb[9].mxu0  ;;  %v706_v52 = vpop.f32.mrb[9].mxu1 }
 0x126   :  { %v579_v53 = vpop.f32.mrb[10].mxu0  ;;  %v2213_v54 = vpop.f32.mrb[10].mxu1 }
 0x127   :  { %v1271_v55 = vadd.f32 %v1270_v46, %v1208_v50  ;;  %v1571_v56 = vpack.c.bf16 %v579_v53, %v576_v47  ;;  %v1139_v57 = vadd.f32 %v1138_v49, %v579_v53  ;;  %v1209_v58 = vmul.f32 %v579_v53, %v579_v53  ;;  %v581_v59 = vpop.f32.mrb[11].mxu0  ;;  %v709_v60 = vpop.f32.mrb[11].mxu1 }
 0x128   :  { %v1651_v61 = vpack.c.bf16 %v2213_v54, %v2211_v48 }
 0x129   :  { %1719 = vst [vmem:[%s2480_s2 + $0x10] sm:$0xff] %v1571_v56   ;;  %v1272_v62 = vadd.f32 %v1271_v55, %v1209_v58 }
 0x12a   :  { %1735 = vst [vmem:[%s2480_s2 + $0x90] sm:$0xff] %v1651_v61  }
 0x12c   :  { %v584_v63 = vpop.f32.mrb[12].mxu0  ;;  %v2223_v0 = vpop.f32.mrb[12].mxu1 }
 0x12d   :  { %v1140_v1 = vadd.f32 %v1139_v57, %v584_v63  ;;  %v1210_v2 = vmul.f32 %v584_v63, %v584_v63  ;;  %v586_v3 = vpop.f32.mrb[13].mxu0  ;;  %v714_v4 = vpop.f32.mrb[13].mxu1 }
 0x12e   :  { %v587_v5 = vpop.f32.mrb[14].mxu0  ;;  %v2225_v6 = vpop.f32.mrb[14].mxu1 }
 0x12f   :  { %v1273_v7 = vadd.f32 %v1272_v62, %v1210_v2  ;;  %v1576_v8 = vpack.c.bf16 %v587_v5, %v584_v63  ;;  %v1141_v9 = vadd.f32 %v1140_v1, %v587_v5  ;;  %v1211_v10 = vmul.f32 %v587_v5, %v587_v5  ;;  %v589_v11 = vpop.f32.mrb[15].mxu0  ;;  %v717_v12 = vpop.f32.mrb[15].mxu1 }
 0x130   :  { %v1656_v13 = vpack.c.bf16 %v2225_v6, %v2223_v0 }
 0x131   :  { %1720 = vst [vmem:[%s2480_s2 + $0x18] sm:$0xff] %v1576_v8   ;;  %v1274_v14 = vadd.f32 %v1273_v7, %v1211_v10 }
 0x132   :  { %1736 = vst [vmem:[%s2480_s2 + $0x98] sm:$0xff] %v1656_v13  }
 0x134   :  { %v592_v15 = vpop.f32.mrb[16].mxu0  ;;  %v2235_v16 = vpop.f32.mrb[16].mxu1 }
 0x135   :  { %v1142_v17 = vadd.f32 %v1141_v9, %v592_v15  ;;  %v1212_v19 = vmul.f32 %v592_v15, %v592_v15  ;;  %v594_v20 = vpop.f32.mrb[17].mxu0  ;;  %v722_v21 = vpop.f32.mrb[17].mxu1 }
 0x136   :  { %v595_v22 = vpop.f32.mrb[18].mxu0  ;;  %v2237_v24 = vpop.f32.mrb[18].mxu1 }
 0x137   :  { %v1275_v25 = vadd.f32 %v1274_v14, %v1212_v19  ;;  %v1581_v26 = vpack.c.bf16 %v595_v22, %v592_v15  ;;  %v1143_v27 = vadd.f32 %v1142_v17, %v595_v22  ;;  %v1213_v28 = vmul.f32 %v595_v22, %v595_v22  ;;  %v597_v29 = vpop.f32.mrb[19].mxu0  ;;  %v725_v30 = vpop.f32.mrb[19].mxu1 }
 0x138   :  { %v1661_v31 = vpack.c.bf16 %v2237_v24, %v2235_v16 }
 0x139   :  { %1721 = vst [vmem:[%s2480_s2 + $0x20] sm:$0xff] %v1581_v26   ;;  %v1276_v33 = vadd.f32 %v1275_v25, %v1213_v28 }
 0x13a   :  { %1737 = vst [vmem:[%s2480_s2 + $0xa0] sm:$0xff] %v1661_v31  }
 0x13c   :  { %v600_v34 = vpop.f32.mrb[20].mxu0  ;;  %v2247_v35 = vpop.f32.mrb[20].mxu1 }
 0x13d   :  { %v1144_v36 = vadd.f32 %v1143_v27, %v600_v34  ;;  %v1214_v37 = vmul.f32 %v600_v34, %v600_v34  ;;  %v602_v39 = vpop.f32.mrb[21].mxu0  ;;  %v730_v40 = vpop.f32.mrb[21].mxu1 }
 0x13e   :  { %v603_v41 = vpop.f32.mrb[22].mxu0  ;;  %v2249_v42 = vpop.f32.mrb[22].mxu1 }
 0x13f   :  { %v1277_v43 = vadd.f32 %v1276_v33, %v1214_v37  ;;  %v1586_v44 = vpack.c.bf16 %v603_v41, %v600_v34  ;;  %v1145_v45 = vadd.f32 %v1144_v36, %v603_v41  ;;  %v1215_v46 = vmul.f32 %v603_v41, %v603_v41  ;;  %v605_v47 = vpop.f32.mrb[23].mxu0  ;;  %v733_v49 = vpop.f32.mrb[23].mxu1 }
 0x140   :  { %v1666_v50 = vpack.c.bf16 %v2249_v42, %v2247_v35 }
 0x141   :  { %1722 = vst [vmem:[%s2480_s2 + $0x28] sm:$0xff] %v1586_v44   ;;  %v1278_v51 = vadd.f32 %v1277_v43, %v1215_v46 }
 0x142   :  { %1738 = vst [vmem:[%s2480_s2 + $0xa8] sm:$0xff] %v1666_v50  }
 0x144   :  { %v608_v52 = vpop.f32.mrb[24].mxu0  ;;  %v2259_v53 = vpop.f32.mrb[24].mxu1 }
 0x145   :  { %v1146_v55 = vadd.f32 %v1145_v45, %v608_v52  ;;  %v1216_v56 = vmul.f32 %v608_v52, %v608_v52  ;;  %v610_v57 = vpop.f32.mrb[25].mxu0  ;;  %v738_v58 = vpop.f32.mrb[25].mxu1 }
 0x146   :  { %v611_v59 = vpop.f32.mrb[26].mxu0  ;;  %v2261_v60 = vpop.f32.mrb[26].mxu1 }
 0x147   :  { %v1279_v61 = vadd.f32 %v1278_v51, %v1216_v56  ;;  %v1591_v62 = vpack.c.bf16 %v611_v59, %v608_v52  ;;  %v1147_v63 = vadd.f32 %v1146_v55, %v611_v59  ;;  %v1217_v1 = vmul.f32 %v611_v59, %v611_v59  ;;  %v613_v2 = vpop.f32.mrb[27].mxu0  ;;  %v741_v3 = vpop.f32.mrb[27].mxu1 }
 0x148   :  { %v1671_v4 = vpack.c.bf16 %v2261_v60, %v2259_v53 }
 0x149   :  { %1723 = vst [vmem:[%s2480_s2 + $0x30] sm:$0xff] %v1591_v62   ;;  %v1280_v5 = vadd.f32 %v1279_v61, %v1217_v1 }
 0x14a   :  { %1739 = vst [vmem:[%s2480_s2 + $0xb0] sm:$0xff] %v1671_v4  }
 0x14c   :  { %v616_v7 = vpop.f32.mrb[28].mxu0  ;;  %v2271_v8 = vpop.f32.mrb[28].mxu1 }
 0x14d   :  { %v1148_v9 = vadd.f32 %v1147_v63, %v616_v7  ;;  %v1218_v10 = vmul.f32 %v616_v7, %v616_v7  ;;  %v618_v11 = vpop.f32.mrb[29].mxu0  ;;  %v746_v12 = vpop.f32.mrb[29].mxu1 }
 0x14e   :  { %v619_v13 = vpop.f32.mrb[30].mxu0  ;;  %v2273_v14 = vpop.f32.mrb[30].mxu1 }
 0x14f   :  { %v1281_v15 = vadd.f32 %v1280_v5, %v1218_v10  ;;  %v1596_v17 = vpack.c.bf16 %v619_v13, %v616_v7  ;;  %v1149_v19 = vadd.f32 %v1148_v9, %v619_v13  ;;  %v1219_v20 = vmul.f32 %v619_v13, %v619_v13  ;;  %v621_v21 = vpop.f32.mrb[31].mxu0  ;;  %v749_v22 = vpop.f32.mrb[31].mxu1 }
 0x150   :  { %v1676_v25 = vpack.c.bf16 %v2273_v14, %v2271_v8 }
 0x151   :  { %1724 = vst [vmem:[%s2480_s2 + $0x38] sm:$0xff] %v1596_v17   ;;  %v1282_v26 = vadd.f32 %v1281_v15, %v1219_v20 }
 0x152   :  { %1740 = vst [vmem:[%s2480_s2 + $0xb8] sm:$0xff] %v1676_v25  }
 0x154   :  { %v624_v27 = vpop.f32.mrb[32].mxu0  ;;  %v2283_v28 = vpop.f32.mrb[32].mxu1 }
 0x155   :  { %v1150_v29 = vadd.f32 %v1149_v19, %v624_v27  ;;  %v1220_v30 = vmul.f32 %v624_v27, %v624_v27  ;;  %v626_v31 = vpop.f32.mrb[33].mxu0  ;;  %v754_v33 = vpop.f32.mrb[33].mxu1 }
 0x156   :  { %v627_v34 = vpop.f32.mrb[34].mxu0  ;;  %v2285_v36 = vpop.f32.mrb[34].mxu1 }
 0x157   :  { %v1283_v37 = vadd.f32 %v1282_v26, %v1220_v30  ;;  %v1601_v39 = vpack.c.bf16 %v627_v34, %v624_v27  ;;  %v1151_v40 = vadd.f32 %v1150_v29, %v627_v34  ;;  %v1221_v41 = vmul.f32 %v627_v34, %v627_v34  ;;  %v629_v43 = vpop.f32.mrb[35].mxu0  ;;  %v757_v44 = vpop.f32.mrb[35].mxu1 }
 0x158   :  { %v1681_v45 = vpack.c.bf16 %v2285_v36, %v2283_v28 }
 0x159   :  { %1725 = vst [vmem:[%s2480_s2 + $0x40] sm:$0xff] %v1601_v39   ;;  %v1284_v46 = vadd.f32 %v1283_v37, %v1221_v41 }
 0x15a   :  { %1741 = vst [vmem:[%s2480_s2 + $0xc0] sm:$0xff] %v1681_v45  }
 0x15c   :  { %v632_v47 = vpop.f32.mrb[36].mxu0  ;;  %v2295_v49 = vpop.f32.mrb[36].mxu1 }
 0x15d   :  { %v1152_v50 = vadd.f32 %v1151_v40, %v632_v47  ;;  %v1222_v51 = vmul.f32 %v632_v47, %v632_v47  ;;  %v634_v52 = vpop.f32.mrb[37].mxu0  ;;  %v762_v55 = vpop.f32.mrb[37].mxu1 }
 0x15e   :  { %v635_v56 = vpop.f32.mrb[38].mxu0  ;;  %v2297_v57 = vpop.f32.mrb[38].mxu1 }
 0x15f   :  { %v1285_v58 = vadd.f32 %v1284_v46, %v1222_v51  ;;  %v1606_v59 = vpack.c.bf16 %v635_v56, %v632_v47  ;;  %v1153_v61 = vadd.f32 %v1152_v50, %v635_v56  ;;  %v1223_v62 = vmul.f32 %v635_v56, %v635_v56  ;;  %v637_v63 = vpop.f32.mrb[39].mxu0  ;;  %v765_v1 = vpop.f32.mrb[39].mxu1 }
 0x160   :  { %v1686_v2 = vpack.c.bf16 %v2297_v57, %v2295_v49 }
 0x161   :  { %1726 = vst [vmem:[%s2480_s2 + $0x48] sm:$0xff] %v1606_v59   ;;  %v1286_v3 = vadd.f32 %v1285_v58, %v1223_v62 }
 0x162   :  { %1742 = vst [vmem:[%s2480_s2 + $0xc8] sm:$0xff] %v1686_v2  }
 0x164   :  { %v640_v4 = vpop.f32.mrb[40].mxu0  ;;  %v2307_v5 = vpop.f32.mrb[40].mxu1 }
 0x165   :  { %v1154_v7 = vadd.f32 %v1153_v61, %v640_v4  ;;  %v1224_v9 = vmul.f32 %v640_v4, %v640_v4  ;;  %v642_v10 = vpop.f32.mrb[41].mxu0  ;;  %v770_v11 = vpop.f32.mrb[41].mxu1 }
 0x166   :  { %v643_v12 = vpop.f32.mrb[42].mxu0  ;;  %v2309_v13 = vpop.f32.mrb[42].mxu1 }
 0x167   :  { %v1287_v15 = vadd.f32 %v1286_v3, %v1224_v9  ;;  %v1611_v17 = vpack.c.bf16 %v643_v12, %v640_v4  ;;  %v1155_v19 = vadd.f32 %v1154_v7, %v643_v12  ;;  %v1225_v20 = vmul.f32 %v643_v12, %v643_v12  ;;  %v645_v21 = vpop.f32.mrb[43].mxu0  ;;  %v773_v22 = vpop.f32.mrb[43].mxu1 }
 0x168   :  { %v1691_v25 = vpack.c.bf16 %v2309_v13, %v2307_v5 }
 0x169   :  { %1727 = vst [vmem:[%s2480_s2 + $0x50] sm:$0xff] %v1611_v17   ;;  %v1288_v26 = vadd.f32 %v1287_v15, %v1225_v20 }
 0x16a   :  { %1743 = vst [vmem:[%s2480_s2 + $0xd0] sm:$0xff] %v1691_v25  }
 0x16c   :  { %v648_v27 = vpop.f32.mrb[44].mxu0  ;;  %v2319_v29 = vpop.f32.mrb[44].mxu1 }
 0x16d   :  { %v1156_v30 = vadd.f32 %v1155_v19, %v648_v27  ;;  %v1226_v31 = vmul.f32 %v648_v27, %v648_v27  ;;  %v650_v33 = vpop.f32.mrb[45].mxu0  ;;  %v778_v34 = vpop.f32.mrb[45].mxu1 }
 0x16e   :  { %v651_v37 = vpop.f32.mrb[46].mxu0  ;;  %v2321_v39 = vpop.f32.mrb[46].mxu1 }
 0x16f   :  { %v1289_v40 = vadd.f32 %v1288_v26, %v1226_v31  ;;  %v1616_v41 = vpack.c.bf16 %v651_v37, %v648_v27  ;;  %v1157_v43 = vadd.f32 %v1156_v30, %v651_v37  ;;  %v1227_v44 = vmul.f32 %v651_v37, %v651_v37  ;;  %v653_v45 = vpop.f32.mrb[47].mxu0  ;;  %v781_v46 = vpop.f32.mrb[47].mxu1 }
 0x170   :  { %v1696_v47 = vpack.c.bf16 %v2321_v39, %v2319_v29 }
 0x171   :  { %1728 = vst [vmem:[%s2480_s2 + $0x58] sm:$0xff] %v1616_v41   ;;  %v1290_v50 = vadd.f32 %v1289_v40, %v1227_v44 }
 0x172   :  { %1744 = vst [vmem:[%s2480_s2 + $0xd8] sm:$0xff] %v1696_v47  }
 0x174   :  { %v656_v51 = vpop.f32.mrb[48].mxu0  ;;  %v2331_v52 = vpop.f32.mrb[48].mxu1 }
 0x175   :  { %v1158_v55 = vadd.f32 %v1157_v43, %v656_v51  ;;  %v1228_v56 = vmul.f32 %v656_v51, %v656_v51  ;;  %v658_v58 = vpop.f32.mrb[49].mxu0  ;;  %v786_v59 = vpop.f32.mrb[49].mxu1 }
 0x176   :  { %v659_v61 = vpop.f32.mrb[50].mxu0  ;;  %v2333_v62 = vpop.f32.mrb[50].mxu1 }
 0x177   :  { %v1291_v63 = vadd.f32 %v1290_v50, %v1228_v56  ;;  %v1621_v1 = vpack.c.bf16 %v659_v61, %v656_v51  ;;  %v1159_v2 = vadd.f32 %v1158_v55, %v659_v61  ;;  %v1229_v3 = vmul.f32 %v659_v61, %v659_v61  ;;  %v661_v4 = vpop.f32.mrb[51].mxu0  ;;  %v789_v7 = vpop.f32.mrb[51].mxu1 }
 0x178   :  { %v1701_v9 = vpack.c.bf16 %v2333_v62, %v2331_v52 }
 0x179   :  { %1729 = vst [vmem:[%s2480_s2 + $0x60] sm:$0xff] %v1621_v1   ;;  %v1292_v10 = vadd.f32 %v1291_v63, %v1229_v3 }
 0x17a   :  { %1745 = vst [vmem:[%s2480_s2 + $0xe0] sm:$0xff] %v1701_v9  }
 0x17c   :  { %v664_v11 = vpop.f32.mrb[52].mxu0  ;;  %v2343_v12 = vpop.f32.mrb[52].mxu1 }
 0x17d   :  { %v1160_v15 = vadd.f32 %v1159_v2, %v664_v11  ;;  %v1230_v17 = vmul.f32 %v664_v11, %v664_v11  ;;  %v666_v19 = vpop.f32.mrb[53].mxu0  ;;  %v794_v20 = vpop.f32.mrb[53].mxu1 }
 0x17e   :  { %v667_v21 = vpop.f32.mrb[54].mxu0  ;;  %v2345_v22 = vpop.f32.mrb[54].mxu1 }
 0x17f   :  { %v1293_v25 = vadd.f32 %v1292_v10, %v1230_v17  ;;  %v1626_v26 = vpack.c.bf16 %v667_v21, %v664_v11  ;;  %v1161_v27 = vadd.f32 %v1160_v15, %v667_v21  ;;  %v1231_v30 = vmul.f32 %v667_v21, %v667_v21  ;;  %v669_v31 = vpop.f32.mrb[55].mxu0  ;;  %v797_v33 = vpop.f32.mrb[55].mxu1 }
 0x180   :  { %v1706_v34 = vpack.c.bf16 %v2345_v22, %v2343_v12 }
 0x181   :  { %1730 = vst [vmem:[%s2480_s2 + $0x68] sm:$0xff] %v1626_v26   ;;  %v1294_v37 = vadd.f32 %v1293_v25, %v1231_v30  ;;  %v1236_v30 = vmul.f32 %v2187_v18, %v2187_v18 }
 0x182   :  { %1746 = vst [vmem:[%s2480_s2 + $0xe8] sm:$0xff] %v1706_v34   ;;  %v1237_v34 = vmul.f32 %v2189_v23, %v2189_v23 }
 0x184   :  { %v672_v40 = vpop.f32.mrb[56].mxu0  ;;  %v2355_v41 = vpop.f32.mrb[56].mxu1 }
 0x185   :  { %v1162_v43 = vadd.f32 %v1161_v27, %v672_v40  ;;  %v1232_v44 = vmul.f32 %v672_v40, %v672_v40  ;;  %v674_v45 = vpop.f32.mrb[57].mxu0  ;;  %v802_v46 = vpop.f32.mrb[57].mxu1 }
 0x186   :  { %v675_v47 = vpop.f32.mrb[58].mxu0  ;;  %v2357_v50 = vpop.f32.mrb[58].mxu1 }
 0x187   :  { %v1295_v51 = vadd.f32 %v1294_v37, %v1232_v44  ;;  %v1631_v55 = vpack.c.bf16 %v675_v47, %v672_v40  ;;  %v1163_v56 = vadd.f32 %v1162_v43, %v675_v47  ;;  %v1233_v58 = vmul.f32 %v675_v47, %v675_v47  ;;  %v677_v59 = vpop.f32.mrb[59].mxu0  ;;  %v805_v61 = vpop.f32.mrb[59].mxu1 }
 0x188   :  { %v1711_v63 = vpack.c.bf16 %v2357_v50, %v2355_v41  ;;  %v1238_v43 = vmul.f32 %v2199_v32, %v2199_v32 }
 0x189   :  { %1731 = vst [vmem:[%s2480_s2 + $0x70] sm:$0xff] %v1631_v55   ;;  %v1296_v1 = vadd.f32 %v1295_v51, %v1233_v58  ;;  %v1240_v51 = vmul.f32 %v2211_v48, %v2211_v48 }
 0x18a   :  { %1747 = vst [vmem:[%s2480_s2 + $0xf0] sm:$0xff] %v1711_v63  }
 0x18c   :  { %v680_v2 = vpop.f32.mrb[60].mxu0  ;;  %v2367_v3 = vpop.f32.mrb[60].mxu1 }
 0x18d   :  { %v1164_v4 = vadd.f32 %v1163_v56, %v680_v2  ;;  %v1234_v7 = vmul.f32 %v680_v2, %v680_v2  ;;  %v682_v9 = vpop.f32.mrb[61].mxu0  ;;  %v810_v10 = vpop.f32.mrb[61].mxu1 }
 0x18e   :  { %v683_v11 = vpop.f32.mrb[62].mxu0  ;;  %v2369_v15 = vpop.f32.mrb[62].mxu1 }
 0x18f   :  { %v1297_v17 = vadd.f32 %v1296_v1, %v1234_v7  ;;  %v1636_v19 = vpack.c.bf16 %v683_v11, %v680_v2  ;;  %v1165_v20 = vadd.f32 %v1164_v4, %v683_v11  ;;  %v1235_v21 = vmul.f32 %v683_v11, %v683_v11  ;;  %v685_v25 = vpop.f32.mrb[63].mxu0  ;;  %v813_v26 = vpop.f32.mrb[63].mxu1 }
 0x190   :  { %v1716_v27 = vpack.c.bf16 %v2369_v15, %v2367_v3 }
 0x191   :  { %1732 = vst [vmem:[%s2480_s2 + $0x78] sm:$0xff] %v1636_v19   ;;  %v1166_v31 = vadd.f32 %v1165_v20, %v2187_v18  ;;  %v1298_v33 = vadd.f32 %v1297_v17, %v1235_v21  ;;  %v1239_v18 = vmul.f32 %v2201_v38, %v2201_v38 }
 0x192   :  { %1748 = vst [vmem:[%s2480_s2 + $0xf8] sm:$0xff] %v1716_v27  }
 0x193   :  { %v1167_v37 = vadd.f32 %v1166_v31, %v2189_v23  ;;  %v1299_v40 = vadd.f32 %v1298_v33, %v1236_v30  ;;  %v1241_v23 = vmul.f32 %v2213_v54, %v2213_v54 }
 0x195   :  { %v1168_v44 = vadd.f32 %v1167_v37, %v2199_v32  ;;  %v1300_v45 = vadd.f32 %v1299_v40, %v1237_v34  ;;  %v1242_v32 = vmul.f32 %v2223_v0, %v2223_v0  ;;  %v1252_v37 = vmul.f32 %v2283_v28, %v2283_v28 }
 0x197   :  { %v1169_v46 = vadd.f32 %v1168_v44, %v2201_v38  ;;  %v1301_v47 = vadd.f32 %v1300_v45, %v1238_v43  ;;  %v1243_v38 = vmul.f32 %v2225_v6, %v2225_v6  ;;  %v1253_v44 = vmul.f32 %v2285_v36, %v2285_v36 }
 0x199   :  { %v1170_v55 = vadd.f32 %v1169_v46, %v2211_v48  ;;  %v1302_v56 = vadd.f32 %v1301_v47, %v1239_v18  ;;  %v1244_v48 = vmul.f32 %v2235_v16, %v2235_v16  ;;  %v1254_v18 = vmul.f32 %v2295_v49, %v2295_v49 }
 0x19a   :  { %v1255_v47 = vmul.f32 %v2297_v57, %v2297_v57 }
 0x19b   :  { %v1171_v58 = vadd.f32 %v1170_v55, %v2213_v54  ;;  %v1303_v59 = vadd.f32 %v1302_v56, %v1240_v51  ;;  %v1245_v54 = vmul.f32 %v2237_v24, %v2237_v24  ;;  %v1256_v55 = vmul.f32 %v2307_v5, %v2307_v5 }
 0x19d   :  { %v1172_v61 = vadd.f32 %v1171_v58, %v2223_v0  ;;  %v1304_v63 = vadd.f32 %v1303_v59, %v1241_v23  ;;  %v1246_v0 = vmul.f32 %v2247_v35, %v2247_v35  ;;  %v1257_v23 = vmul.f32 %v2309_v13, %v2309_v13 }
 0x19e   :  { %v1258_v59 = vmul.f32 %v2319_v29, %v2319_v29 }
 0x19f   :  { %v1173_v1 = vadd.f32 %v1172_v61, %v2225_v6  ;;  %v1305_v2 = vadd.f32 %v1304_v63, %v1242_v32  ;;  %v1247_v6 = vmul.f32 %v2249_v42, %v2249_v42  ;;  %v1259_v61 = vmul.f32 %v2321_v39, %v2321_v39 }
 0x1a1   :  { %v1306_v4 = vadd.f32 %v1305_v2, %v1243_v38  ;;  %v1174_v7 = vadd.f32 %v1173_v1, %v2235_v16  ;;  %v1248_v16 = vmul.f32 %v2259_v53, %v2259_v53  ;;  %v1260_v38 = vmul.f32 %v2331_v52, %v2331_v52 }
 0x1a2   :  { %v1261_v2 = vmul.f32 %v2333_v62, %v2333_v62 }
 0x1a3   :  { %v1175_v9 = vadd.f32 %v1174_v7, %v2237_v24  ;;  %v1307_v10 = vadd.f32 %v1306_v4, %v1244_v48  ;;  %v1249_v24 = vmul.f32 %v2261_v60, %v2261_v60  ;;  %v1262_v4 = vmul.f32 %v2343_v12, %v2343_v12 }
 0x1a5   :  { %v1176_v11 = vadd.f32 %v1175_v9, %v2247_v35  ;;  %v1308_v17 = vadd.f32 %v1307_v10, %v1245_v54  ;;  %v1250_v35 = vmul.f32 %v2271_v8, %v2271_v8  ;;  %v1263_v54 = vmul.f32 %v2345_v22, %v2345_v22 }
 0x1a6   :  { %v1264_v10 = vmul.f32 %v2355_v41, %v2355_v41 }
 0x1a7   :  { %v1177_v19 = vadd.f32 %v1176_v11, %v2249_v42  ;;  %v1309_v20 = vadd.f32 %v1308_v17, %v1246_v0  ;;  %v1251_v42 = vmul.f32 %v2273_v14, %v2273_v14  ;;  %v1265_v11 = vmul.f32 %v2357_v50, %v2357_v50 }
 0x1a9   :  { %v1178_v21 = vadd.f32 %v1177_v19, %v2259_v53  ;;  %v1310_v25 = vadd.f32 %v1309_v20, %v1247_v6  ;;  %v1267_v20 = vmul.f32 %v2369_v15, %v2369_v15 }
 0x1ab   :  { %v1179_v26 = vadd.f32 %v1178_v21, %v2261_v60  ;;  %v1311_v27 = vadd.f32 %v1310_v25, %v1248_v16 }
 0x1ad   :  { %v1180_v30 = vadd.f32 %v1179_v26, %v2271_v8  ;;  %v1312_v31 = vadd.f32 %v1311_v27, %v1249_v24 }
 0x1af   :  { %v1181_v33 = vadd.f32 %v1180_v30, %v2273_v14  ;;  %v1313_v34 = vadd.f32 %v1312_v31, %v1250_v35 }
 0x1b1   :  { %v1182_v53 = vadd.f32 %v1181_v33, %v2283_v28  ;;  %v1314_v40 = vadd.f32 %v1313_v34, %v1251_v42 }
 0x1b3   :  { %v1315_v60 = vadd.f32 %v1314_v40, %v1252_v37  ;;  %v1183_v43 = vadd.f32 %v1182_v53, %v2285_v36 }
 0x1b5   :  { %v1316_v8 = vadd.f32 %v1315_v60, %v1253_v44  ;;  %v1184_v45 = vadd.f32 %v1183_v43, %v2295_v49 }
 0x1b7   :  { %v1317_v14 = vadd.f32 %v1316_v8, %v1254_v18  ;;  %v1185_v46 = vadd.f32 %v1184_v45, %v2297_v57 }
 0x1b9   :  { %v1318_v28 = vadd.f32 %v1317_v14, %v1255_v47  ;;  %v1186_v51 = vadd.f32 %v1185_v46, %v2307_v5 }
 0x1bb   :  { %v1319_v56 = vadd.f32 %v1318_v28, %v1256_v55  ;;  %v1187_v36 = vadd.f32 %v1186_v51, %v2309_v13 }
 0x1bd   :  { %v1320_v58 = vadd.f32 %v1319_v56, %v1257_v23  ;;  %v1188_v49 = vadd.f32 %v1187_v36, %v2319_v29 }
 0x1bf   :  { %v1321_v32 = vadd.f32 %v1320_v58, %v1258_v59  ;;  %v1189_v57 = vadd.f32 %v1188_v49, %v2321_v39 }
 0x1c1   :  { %v1322_v63 = vadd.f32 %v1321_v32, %v1259_v61  ;;  %v1190_v5 = vadd.f32 %v1189_v57, %v2331_v52 }
 0x1c3   :  { %v1323_v1 = vadd.f32 %v1322_v63, %v1260_v38  ;;  %v1191_v13 = vadd.f32 %v1190_v5, %v2333_v62 }
 0x1c5   :  { %v1324_v48 = vadd.f32 %v1323_v1, %v1261_v2  ;;  %v1192_v29 = vadd.f32 %v1191_v13, %v2343_v12  ;;  %v1266_v12 = vmul.f32 %v2367_v3, %v2367_v3 }
 0x1c7   :  { %v1325_v7 = vadd.f32 %v1324_v48, %v1262_v4  ;;  %v1193_v39 = vadd.f32 %v1192_v29, %v2345_v22 }
 0x1c9   :  { %v1326_v9 = vadd.f32 %v1325_v7, %v1263_v54  ;;  %v1194_v52 = vadd.f32 %v1193_v39, %v2355_v41 }
 0x1cb   :  { %v1327_v0 = vadd.f32 %v1326_v9, %v1264_v10  ;;  %v1195_v62 = vadd.f32 %v1194_v52, %v2357_v50 }
 0x1cd   :  { %v1328_v17 = vadd.f32 %v1327_v0, %v1265_v11  ;;  %v1196_v6 = vadd.f32 %v1195_v62, %v2367_v3 }
 0x1cf   :  { %v1329_v19 = vadd.f32 %v1328_v17, %v1266_v12  ;;  %v1197_v22 = vadd.f32 %v1196_v6, %v2369_v15 }
 0x1d1   :  { %v1198_v16 = vrot.slane %v1197_v22, 4  ;;  %v1330_v41 = vadd.f32 %v1329_v19, %v1267_v20 }
 0x1d3   :  { %v1199_v21 = vadd.f32 %v1198_v16, %v1197_v22  ;;  %v1331_v25 = vrot.slane %v1330_v41, 4 }
 0x1d5   :  { %v1200_v24 = vrot.slane %v1199_v21, 2  ;;  %v1332_v26 = vadd.f32 %v1331_v25, %v1330_v41 }
 0x1d7   :  { %v1201_v27 = vadd.f32 %v1200_v24, %v1199_v21  ;;  %v1333_v50 = vrot.slane %v1332_v26, 2 }
 0x1d9   :  { %v1202_v35 = vrot.slane %v1201_v27, 1  ;;  %v1334_v30 = vadd.f32 %v1333_v50, %v1332_v26 }
 0x1db   :  { %v1335_v31 = vrot.slane %v1334_v30, 1  ;;  %v1203_v42 = vadd.f32 %v1202_v35, %v1201_v27 }
 0x1dd   :  { %v1336_v3 = vadd.f32 %v1335_v31, %v1334_v30 }
 0x1df   :  { %v1338_v33 = vsel %vm1337_vm0, %v1203_v42, %v1336_v3 }
 0x1e0   :  { %v1340_v34 = vsel %vm1339_vm1, %v1338_v33, 0.0 }
 0x1e1   :  { %1341 = vst [vmem:[%s2481_s3] sm:$0xff] %v1340_v34 }

// kernel: image_transform_net.34
= control target key start
LH: loop header
LB: loop body
LE: loop exit
PB: predicated region body
PF: predicated region fallthrough
CT: control target
= control target key end

     0   :  { %s422_s0 = inlined_call_operand.vmem [shape: bf16[128,128], index: 0, kind: input, shape index: {}]   ;;  %s423_s1 = inlined_call_operand.vmem [shape: f32[1,128], index: 1, kind: input, shape index: {}]   ;;  %s424_s2 = inlined_call_operand.vmem [shape: f32[1,128], index: 2, kind: input, shape index: {}]   ;;  %s425_s3 = inlined_call_operand.vmem [shape: bf16[128,128], index: 3, kind: output, shape index: {}]  }
   0x1   :  { %v227_v0 = vld [vmem:[%s422_s0] sm:$0xff]   ;;  %v298_v4 = vld [vmem:[%s422_s0 + $0x8] sm:$0xff]   ;;  %v299_v5 = vld [vmem:[%s422_s0 + $0x10] sm:$0xff]  }
   0x2   :  { %v338_v1 = vld [vmem:[%s423_s1] ss:$0 sm:$0xff]  ;;  %v228_v2 = vunpack.c.l.bf16 %v227_v0  ;;  %v229_v3 = vunpack.c.h.bf16 %v227_v0  ;;  %v300_v6 = vld [vmem:[%s422_s0 + $0x18] sm:$0xff]   ;;  %v232_v8 = vunpack.c.l.bf16 %v298_v4  ;;  %v233_v9 = vunpack.c.h.bf16 %v298_v4  ;;  %v302_v33 = vld [vmem:[%s422_s0 + $0x28] sm:$0xff]  }
   0x3   :  { %v352_v7 = vld [vmem:[%s424_s2] ss:$0 sm:$0xff]  ;;  %v236_v10 = vunpack.c.l.bf16 %v299_v5  ;;  %v237_v11 = vunpack.c.h.bf16 %v299_v5  ;;  %v240_v14 = vunpack.c.l.bf16 %v300_v6  ;;  %v241_v15 = vunpack.c.h.bf16 %v300_v6  ;;  %v303_v38 = vld [vmem:[%s422_s0 + $0x30] sm:$0xff]   ;;  %v304_v43 = vld [vmem:[%s422_s0 + $0x38] sm:$0xff]  }
   0x4   :  { %v53_v12 = vmul.f32 %v228_v2, %v338_v1  ;;  %v54_v13 = vmul.f32 %v229_v3, %v338_v1  ;;  %v55_v16 = vmul.f32 %v232_v8, %v338_v1  ;;  %v56_v17 = vmul.f32 %v233_v9, %v338_v1  ;;  %v301_v28 = vld [vmem:[%s422_s0 + $0x20] sm:$0xff]  }
   0x5   :  { %v57_v18 = vmul.f32 %v236_v10, %v338_v1  ;;  %v58_v19 = vmul.f32 %v237_v11, %v338_v1  ;;  %v59_v22 = vmul.f32 %v240_v14, %v338_v1  ;;  %v60_v23 = vmul.f32 %v241_v15, %v338_v1 }
   0x6   :  { %v76_v20 = vadd.f32 %v352_v7, %v53_v12  ;;  %v77_v21 = vadd.f32 %v352_v7, %v54_v13  ;;  %v78_v24 = vadd.f32 %v352_v7, %v55_v16  ;;  %v79_v25 = vadd.f32 %v352_v7, %v56_v17 }
   0x7   :  { %v80_v26 = vadd.f32 %v352_v7, %v57_v18  ;;  %v81_v27 = vadd.f32 %v352_v7, %v58_v19  ;;  %v82_v31 = vadd.f32 %v352_v7, %v59_v22  ;;  %v83_v32 = vadd.f32 %v352_v7, %v60_v23 }
   0x8   :  { %v92_v29 = vmax.f32 %v76_v20, 0.0  ;;  %v93_v30 = vmax.f32 %v77_v21, 0.0  ;;  %v94_v34 = vmax.f32 %v78_v24, 0.0  ;;  %v95_v35 = vmax.f32 %v79_v25, 0.0 }
   0x9   :  { %v96_v36 = vmax.f32 %v80_v26, 0.0  ;;  %v97_v37 = vmax.f32 %v81_v27, 0.0  ;;  %v98_v40 = vmax.f32 %v82_v31, 0.0  ;;  %v99_v41 = vmax.f32 %v83_v32, 0.0 }
   0xa   :  { %v261_v39 = vpack.c.bf16 %v93_v30, %v92_v29  ;;  %v244_v42 = vunpack.c.l.bf16 %v301_v28  ;;  %v266_v44 = vpack.c.bf16 %v95_v35, %v94_v34  ;;  %v245_v46 = vunpack.c.h.bf16 %v301_v28 }
   0xb   :  { %v271_v45 = vpack.c.bf16 %v97_v37, %v96_v36  ;;  %v248_v47 = vunpack.c.l.bf16 %v302_v33  ;;  %v276_v48 = vpack.c.bf16 %v99_v41, %v98_v40  ;;  %v249_v50 = vunpack.c.h.bf16 %v302_v33 }
   0xc   :  { %262 = vst [vmem:[%s425_s3] sm:$0xff] %v261_v39   ;;  %v61_v49 = vmul.f32 %v244_v42, %v338_v1  ;;  %v252_v51 = vunpack.c.l.bf16 %v303_v38  ;;  %305 = vst [vmem:[%s425_s3 + $0x8] sm:$0xff] %v266_v44   ;;  %v62_v52 = vmul.f32 %v245_v46, %v338_v1  ;;  %v253_v54 = vunpack.c.h.bf16 %v303_v38 }
   0xd   :  { %306 = vst [vmem:[%s425_s3 + $0x10] sm:$0xff] %v271_v45   ;;  %v63_v53 = vmul.f32 %v248_v47, %v338_v1  ;;  %v256_v55 = vunpack.c.l.bf16 %v304_v43  ;;  %307 = vst [vmem:[%s425_s3 + $0x18] sm:$0xff] %v276_v48   ;;  %v64_v57 = vmul.f32 %v249_v50, %v338_v1  ;;  %v257_v59 = vunpack.c.h.bf16 %v304_v43 }
   0xe   :  { %v84_v56 = vadd.f32 %v352_v7, %v61_v49  ;;  %v65_v58 = vmul.f32 %v252_v51, %v338_v1  ;;  %v85_v60 = vadd.f32 %v352_v7, %v62_v52  ;;  %v66_v62 = vmul.f32 %v253_v54, %v338_v1 }
   0xf   :  { %v86_v61 = vadd.f32 %v352_v7, %v63_v53  ;;  %v67_v63 = vmul.f32 %v256_v55, %v338_v1  ;;  %v87_v2 = vadd.f32 %v352_v7, %v64_v57  ;;  %v68_v4 = vmul.f32 %v257_v59, %v338_v1 }
  0x10   :  { %v100_v0 = vmax.f32 %v84_v56, 0.0  ;;  %v88_v3 = vadd.f32 %v352_v7, %v65_v58  ;;  %v101_v5 = vmax.f32 %v85_v60, 0.0  ;;  %v89_v8 = vadd.f32 %v352_v7, %v66_v62 }
  0x11   :  { %v102_v6 = vmax.f32 %v86_v61, 0.0  ;;  %v90_v9 = vadd.f32 %v352_v7, %v67_v63  ;;  %v103_v10 = vmax.f32 %v87_v2, 0.0  ;;  %v91_v12 = vadd.f32 %v352_v7, %v68_v4 }
  0x12   :  { %v104_v11 = vmax.f32 %v88_v3, 0.0  ;;  %v281_v13 = vpack.c.bf16 %v101_v5, %v100_v0  ;;  %v105_v14 = vmax.f32 %v89_v8, 0.0 }
  0x13   :  { %v106_v15 = vmax.f32 %v90_v9, 0.0  ;;  %v286_v16 = vpack.c.bf16 %v103_v10, %v102_v6  ;;  %v107_v17 = vmax.f32 %v91_v12, 0.0 }
  0x14   :  { %308 = vst [vmem:[%s425_s3 + $0x20] sm:$0xff] %v281_v13   ;;  %v291_v1 = vpack.c.bf16 %v105_v14, %v104_v11 }
  0x15   :  { %309 = vst [vmem:[%s425_s3 + $0x28] sm:$0xff] %v286_v16   ;;  %v296_v18 = vpack.c.bf16 %v107_v17, %v106_v15 }
  0x16   :  { %310 = vst [vmem:[%s425_s3 + $0x30] sm:$0xff] %v291_v1  }
  0x17   :  { %311 = vst [vmem:[%s425_s3 + $0x38] sm:$0xff] %v296_v18  }

// kernel: image_transform_net.33
= control target key start
LH: loop header
LB: loop body
LE: loop exit
PB: predicated region body
PF: predicated region fallthrough
CT: control target
= control target key end

     0   :  { %vm794_vm0 = vcmask 1040384   ;;  %vm796_vm1 = vcmask 1041408   ;;  %s1397_s1 = inlined_call_operand.vmem [shape: bf16[512,128], index: 1, kind: input, shape index: {}]   ;;  %s1398_s0 = inlined_call_operand.vmem [shape: bf16[128,512], index: 0, kind: input, shape index: {}]   ;;  %s1399_s2 = inlined_call_operand.vmem [shape: bf16[128,128], index: 2, kind: output, shape index: {0}]   ;;  %s1400_s3 = inlined_call_operand.vmem [shape: f32[8,128], index: 3, kind: output, shape index: {1}]  }
   0x1   :  { %v1078_v0 = vld [vmem:[%s1397_s1 + $0x40] sm:$0xff]   ;;  %v1082_v4 = vld [vmem:[%s1397_s1 + $0x48] sm:$0xff]   ;;  %v1086_v8 = vld [vmem:[%s1397_s1 + $0x50] sm:$0xff]  }
   0x2   :  { %v1079_v1 = vld [vmem:[%s1397_s1 + $0xc0] sm:$0xff]   ;;  %950 = vmatprep.subr.bf16.mxu0 %v1078_v0  ;;  %v1083_v5 = vld [vmem:[%s1397_s1 + $0xc8] sm:$0xff]   ;;  %v1087_v9 = vld [vmem:[%s1397_s1 + $0xd0] sm:$0xff]  }
   0x3   :  { %v1080_v2 = vld [vmem:[%s1397_s1] sm:$0xff]   ;;  %1014 = vmatprep.subr.bf16.mxu1 %v1079_v1  ;;  %v1084_v6 = vld [vmem:[%s1397_s1 + $0x8] sm:$0xff]   ;;  %v1088_v10 = vld [vmem:[%s1397_s1 + $0x10] sm:$0xff]  }
   0x4   :  { %v1081_v3 = vld [vmem:[%s1397_s1 + $0x80] sm:$0xff]   ;;  %951 = vmatpush3.bf16.msra.mxu0 %v1080_v2  ;;  %v1085_v7 = vld [vmem:[%s1397_s1 + $0x88] sm:$0xff]   ;;  %v1089_v11 = vld [vmem:[%s1397_s1 + $0x90] sm:$0xff]  }
   0x5   :  { %1015 = vmatpush3.bf16.msra.mxu1 %v1081_v3  ;;  %952 = vmatprep.subr.bf16.mxu0 %v1082_v4  ;;  %v1090_v12 = vld [vmem:[%s1397_s1 + $0x58] sm:$0xff]   ;;  %v1094_v16 = vld [vmem:[%s1397_s1 + $0x60] sm:$0xff]   ;;  %v1098_v20 = vld [vmem:[%s1397_s1 + $0x68] sm:$0xff]  }
   0x6   :  { %1016 = vmatprep.subr.bf16.mxu1 %v1083_v5  ;;  %v1091_v13 = vld [vmem:[%s1397_s1 + $0xd8] sm:$0xff]   ;;  %v1095_v17 = vld [vmem:[%s1397_s1 + $0xe0] sm:$0xff]   ;;  %v1099_v21 = vld [vmem:[%s1397_s1 + $0xe8] sm:$0xff]  }
   0x7   :  { %v1092_v14 = vld [vmem:[%s1397_s1 + $0x18] sm:$0xff]   ;;  %v1096_v18 = vld [vmem:[%s1397_s1 + $0x20] sm:$0xff]   ;;  %v1100_v22 = vld [vmem:[%s1397_s1 + $0x28] sm:$0xff]  }
   0x8   :  { %953 = vmatpush3.bf16.msra.mxu0 %v1084_v6  ;;  %v1093_v15 = vld [vmem:[%s1397_s1 + $0x98] sm:$0xff]   ;;  %v1097_v19 = vld [vmem:[%s1397_s1 + $0xa0] sm:$0xff]   ;;  %v1101_v23 = vld [vmem:[%s1397_s1 + $0xa8] sm:$0xff]  }
   0x9   :  { %1017 = vmatpush3.bf16.msra.mxu1 %v1085_v7  ;;  %954 = vmatprep.subr.bf16.mxu0 %v1086_v8  ;;  %v1102_v24 = vld [vmem:[%s1397_s1 + $0x70] sm:$0xff]   ;;  %v1106_v28 = vld [vmem:[%s1397_s1 + $0x78] sm:$0xff]  }
   0xa   :  { %1018 = vmatprep.subr.bf16.mxu1 %v1087_v9  ;;  %v1103_v25 = vld [vmem:[%s1397_s1 + $0xf0] sm:$0xff]   ;;  %v1107_v29 = vld [vmem:[%s1397_s1 + $0xf8] sm:$0xff]  }
   0xb   :  { %v1104_v26 = vld [vmem:[%s1397_s1 + $0x30] sm:$0xff]   ;;  %v1108_v30 = vld [vmem:[%s1397_s1 + $0x38] sm:$0xff]  }
   0xc   :  { %955 = vmatpush3.bf16.msra.mxu0 %v1088_v10  ;;  %v1105_v27 = vld [vmem:[%s1397_s1 + $0xb0] sm:$0xff]   ;;  %v1109_v31 = vld [vmem:[%s1397_s1 + $0xb8] sm:$0xff]  }
   0xd   :  { %1019 = vmatpush3.bf16.msra.mxu1 %v1089_v11  ;;  %956 = vmatprep.subr.bf16.mxu0 %v1090_v12  ;;  %v1110_v32 = vld [vmem:[%s1398_s0] ss:$16 sps:$4 sm:$0xff]   ;;  %v1112_v33 = vld [vmem:[%s1398_s0 + $0x4] ss:$16 sps:$4 sm:$0xff]   ;;  %v1113_v34 = vld [vmem:[%s1398_s0 + $0x8] ss:$16 sps:$4 sm:$0xff]  }
   0xe   :  { %1020 = vmatprep.subr.bf16.mxu1 %v1091_v13  ;;  %v1115_v35 = vld [vmem:[%s1398_s0 + $0xc] ss:$16 sps:$4 sm:$0xff]   ;;  %494 = vmatprep.mubr.bf16.mxu0 %v1112_v33  ;;  %v1116_v36 = vld [vmem:[%s1398_s0 + $0x24] ss:$16 sps:$4 sm:$0xff]   ;;  %v1120_v38 = vld [vmem:[%s1398_s0 + $0x20] ss:$16 sps:$4 sm:$0xff]  }
   0xf   :  { %591 = vmatprep.mubr.bf16.mxu1 %v1115_v35  ;;  %v1118_v37 = vld [vmem:[%s1398_s0 + $0x2c] ss:$16 sps:$4 sm:$0xff]   ;;  %v1121_v39 = vld [vmem:[%s1398_s0 + $0x28] ss:$16 sps:$4 sm:$0xff]   ;;  %v1122_v40 = vld [vmem:[%s1398_s0 + $0x44] ss:$16 sps:$4 sm:$0xff]  }
  0x10   :  { %957 = vmatpush3.bf16.msra.mxu0 %v1092_v14  ;;  %v1124_v41 = vld [vmem:[%s1398_s0 + $0x4c] ss:$16 sps:$4 sm:$0xff]   ;;  %v1126_v42 = vld [vmem:[%s1398_s0 + $0x40] ss:$16 sps:$4 sm:$0xff]   ;;  %v1127_v43 = vld [vmem:[%s1398_s0 + $0x48] ss:$16 sps:$4 sm:$0xff]  }
  0x11   :  { %1021 = vmatpush3.bf16.msra.mxu1 %v1093_v15  ;;  %958 = vmatprep.subr.bf16.mxu0 %v1094_v16  ;;  %v1128_v44 = vld [vmem:[%s1398_s0 + $0x64] ss:$16 sps:$4 sm:$0xff]   ;;  %v1130_v45 = vld [vmem:[%s1398_s0 + $0x6c] ss:$16 sps:$4 sm:$0xff]   ;;  %v1132_v46 = vld [vmem:[%s1398_s0 + $0x60] ss:$16 sps:$4 sm:$0xff]  }
  0x12   :  { %1022 = vmatprep.subr.bf16.mxu1 %v1095_v17  ;;  %v1133_v47 = vld [vmem:[%s1398_s0 + $0x68] ss:$16 sps:$4 sm:$0xff]   ;;  %v1134_v48 = vld [vmem:[%s1398_s0 + $0x84] ss:$16 sps:$4 sm:$0xff]   ;;  %v1136_v49 = vld [vmem:[%s1398_s0 + $0x8c] ss:$16 sps:$4 sm:$0xff]  }
  0x13   :  { %v1138_v50 = vld [vmem:[%s1398_s0 + $0x80] ss:$16 sps:$4 sm:$0xff]   ;;  %v1139_v51 = vld [vmem:[%s1398_s0 + $0x88] ss:$16 sps:$4 sm:$0xff]   ;;  %v1140_v52 = vld [vmem:[%s1398_s0 + $0xa4] ss:$16 sps:$4 sm:$0xff]  }
  0x14   :  { %959 = vmatpush3.bf16.msra.mxu0 %v1096_v18  ;;  %v1142_v53 = vld [vmem:[%s1398_s0 + $0xac] ss:$16 sps:$4 sm:$0xff]   ;;  %v1144_v54 = vld [vmem:[%s1398_s0 + $0xa0] ss:$16 sps:$4 sm:$0xff]   ;;  %v1145_v55 = vld [vmem:[%s1398_s0 + $0xa8] ss:$16 sps:$4 sm:$0xff]  }
  0x15   :  { %1023 = vmatpush3.bf16.msra.mxu1 %v1097_v19  ;;  %960 = vmatprep.subr.bf16.mxu0 %v1098_v20  ;;  %v1146_v56 = vld [vmem:[%s1398_s0 + $0xc4] ss:$16 sps:$4 sm:$0xff]   ;;  %v1148_v57 = vld [vmem:[%s1398_s0 + $0xcc] ss:$16 sps:$4 sm:$0xff]   ;;  %v1150_v58 = vld [vmem:[%s1398_s0 + $0xc0] ss:$16 sps:$4 sm:$0xff]  }
  0x16   :  { %1024 = vmatprep.subr.bf16.mxu1 %v1099_v21  ;;  %v1151_v59 = vld [vmem:[%s1398_s0 + $0xc8] ss:$16 sps:$4 sm:$0xff]   ;;  %v1152_v60 = vld [vmem:[%s1398_s0 + $0xe4] ss:$16 sps:$4 sm:$0xff]   ;;  %v1154_v61 = vld [vmem:[%s1398_s0 + $0xec] ss:$16 sps:$4 sm:$0xff]  }
  0x17   :  { %v1156_v62 = vld [vmem:[%s1398_s0 + $0xe0] ss:$16 sps:$4 sm:$0xff]   ;;  %v1157_v63 = vld [vmem:[%s1398_s0 + $0xe8] ss:$16 sps:$4 sm:$0xff]  }
  0x18   :  { %961 = vmatpush3.bf16.msra.mxu0 %v1100_v22 }
  0x19   :  { %1025 = vmatpush3.bf16.msra.mxu1 %v1101_v23  ;;  %962 = vmatprep.subr.bf16.mxu0 %v1102_v24 }
  0x1a   :  { %1026 = vmatprep.subr.bf16.mxu1 %v1103_v25 }
  0x1c   :  { %963 = vmatpush3.bf16.msra.mxu0 %v1104_v26 }
  0x1d   :  { %1027 = vmatpush3.bf16.msra.mxu1 %v1105_v27  ;;  %964 = vmatprep.subr.bf16.mxu0 %v1106_v28 }
  0x1e   :  { %1028 = vmatprep.subr.bf16.mxu1 %v1107_v29 }
  0x20   :  { %965 = vmatpush3.bf16.msra.mxu0 %v1108_v30 }
  0x21   :  { %1029 = vmatpush3.bf16.msra.mxu1 %v1109_v31 }
  0x23   :  { %495 = vmatmul.mubr.bf16.vlgmr.msra.gmra.mrb[0].mxu0 %v1110_v32 }
  0x24   :  { %592 = vmatmul.mubr.bf16.vlgmr.msra.gmra.mrb[0].mxu1 %v1113_v34  ;;  %502 = vmatprep.mubr.bf16.mxu0 %v1116_v36 }
  0x25   :  { %599 = vmatprep.mubr.bf16.mxu1 %v1118_v37 }
  0x2b   :  { %503 = vmatmul.mubr.bf16.gmra.mrb[4].mxu0 %v1120_v38 }
  0x2c   :  { %600 = vmatmul.mubr.bf16.gmra.mrb[4].mxu1 %v1121_v39  ;;  %510 = vmatprep.mubr.bf16.mxu0 %v1122_v40 }
  0x2d   :  { %607 = vmatprep.mubr.bf16.mxu1 %v1124_v41 }
  0x33   :  { %511 = vmatmul.mubr.bf16.gmra.mrb[8].mxu0 %v1126_v42 }
  0x34   :  { %608 = vmatmul.mubr.bf16.gmra.mrb[8].mxu1 %v1127_v43  ;;  %518 = vmatprep.mubr.bf16.mxu0 %v1128_v44 }
  0x35   :  { %615 = vmatprep.mubr.bf16.mxu1 %v1130_v45 }
  0x3b   :  { %519 = vmatmul.mubr.bf16.gmra.mrb[12].mxu0 %v1132_v46 }
  0x3c   :  { %616 = vmatmul.mubr.bf16.gmra.mrb[12].mxu1 %v1133_v47  ;;  %526 = vmatprep.mubr.bf16.mxu0 %v1134_v48 }
  0x3d   :  { %623 = vmatprep.mubr.bf16.mxu1 %v1136_v49 }
  0x43   :  { %527 = vmatmul.mubr.bf16.gmra.mrb[16].mxu0 %v1138_v50 }
  0x44   :  { %624 = vmatmul.mubr.bf16.gmra.mrb[16].mxu1 %v1139_v51  ;;  %534 = vmatprep.mubr.bf16.mxu0 %v1140_v52 }
  0x45   :  { %631 = vmatprep.mubr.bf16.mxu1 %v1142_v53 }
  0x4b   :  { %535 = vmatmul.mubr.bf16.gmra.mrb[20].mxu0 %v1144_v54 }
  0x4c   :  { %632 = vmatmul.mubr.bf16.gmra.mrb[20].mxu1 %v1145_v55  ;;  %542 = vmatprep.mubr.bf16.mxu0 %v1146_v56 }
  0x4d   :  { %639 = vmatprep.mubr.bf16.mxu1 %v1148_v57 }
  0x53   :  { %543 = vmatmul.mubr.bf16.gmra.mrb[24].mxu0 %v1150_v58 }
  0x54   :  { %640 = vmatmul.mubr.bf16.gmra.mrb[24].mxu1 %v1151_v59  ;;  %550 = vmatprep.mubr.bf16.mxu0 %v1152_v60 }
  0x55   :  { %647 = vmatprep.mubr.bf16.mxu1 %v1154_v61 }
  0x5b   :  { %551 = vmatmul.mubr.bf16.gmra.mrb[28].mxu0 %v1156_v62 }
  0x5c   :  { %648 = vmatmul.mubr.bf16.gmra.mrb[28].mxu1 %v1157_v63 }
  0xf6   :  { %v966_v0 = vpop.f32.mrb[0].mxu0 }
  0xf7   :  { %v1030_v1 = vpop.f32.mrb[0].mxu1  ;;  %v967_v2 = vpop.f32.mrb[1].mxu0 }
  0xf8   :  { %v968_v3 = vadd.f32 %v967_v2, %v966_v0  ;;  %v1031_v4 = vpop.f32.mrb[1].mxu1  ;;  %v969_v5 = vpop.f32.mrb[2].mxu0 }
  0xf9   :  { %v1032_v6 = vadd.f32 %v1031_v4, %v1030_v1  ;;  %v1033_v7 = vpop.f32.mrb[2].mxu1  ;;  %v970_v8 = vpop.f32.mrb[3].mxu0 }
  0xfa   :  { %v971_v9 = vadd.f32 %v970_v8, %v969_v5  ;;  %v1034_v10 = vpop.f32.mrb[3].mxu1 }
  0xfb   :  { %v594_v11 = vadd.f32 %v1032_v6, %v968_v3  ;;  %v1035_v12 = vadd.f32 %v1034_v10, %v1033_v7 }
  0xfd   :  { %v597_v13 = vadd.f32 %v1035_v12, %v971_v9  ;;  %v757_v15 = vmul.f32 %v594_v11, %v594_v11 }
  0xfe   :  { %v972_v14 = vpop.f32.mrb[4].mxu0 }
  0xff   :  { %v906_v16 = vpack.c.bf16 %v597_v13, %v594_v11  ;;  %v736_v17 = vadd.f32 %v597_v13, %v594_v11  ;;  %v758_v18 = vmul.f32 %v597_v13, %v597_v13  ;;  %v1036_v19 = vpop.f32.mrb[4].mxu1  ;;  %v973_v20 = vpop.f32.mrb[5].mxu0 }
 0x100   :  { %v974_v21 = vadd.f32 %v973_v20, %v972_v14  ;;  %v1037_v22 = vpop.f32.mrb[5].mxu1  ;;  %v975_v23 = vpop.f32.mrb[6].mxu0 }
 0x101   :  { %907 = vst [vmem:[%s1399_s2] sm:$0xff] %v906_v16   ;;  %v773_v24 = vadd.f32 %v758_v18, %v757_v15  ;;  %v1038_v25 = vadd.f32 %v1037_v22, %v1036_v19  ;;  %v1039_v26 = vpop.f32.mrb[6].mxu1  ;;  %v976_v27 = vpop.f32.mrb[7].mxu0 }
 0x102   :  { %v977_v28 = vadd.f32 %v976_v27, %v975_v23  ;;  %v1040_v29 = vpop.f32.mrb[7].mxu1 }
 0x103   :  { %v602_v30 = vadd.f32 %v1038_v25, %v974_v21  ;;  %v1041_v31 = vadd.f32 %v1040_v29, %v1039_v26 }
 0x105   :  { %v737_v32 = vadd.f32 %v736_v17, %v602_v30  ;;  %v759_v33 = vmul.f32 %v602_v30, %v602_v30  ;;  %v605_v34 = vadd.f32 %v1041_v31, %v977_v28 }
 0x106   :  { %v978_v35 = vpop.f32.mrb[8].mxu0 }
 0x107   :  { %v774_v36 = vadd.f32 %v773_v24, %v759_v33  ;;  %v911_v37 = vpack.c.bf16 %v605_v34, %v602_v30  ;;  %v738_v38 = vadd.f32 %v737_v32, %v605_v34  ;;  %v760_v39 = vmul.f32 %v605_v34, %v605_v34  ;;  %v1042_v40 = vpop.f32.mrb[8].mxu1  ;;  %v979_v41 = vpop.f32.mrb[9].mxu0 }
 0x108   :  { %v980_v42 = vadd.f32 %v979_v41, %v978_v35  ;;  %v1043_v43 = vpop.f32.mrb[9].mxu1  ;;  %v981_v44 = vpop.f32.mrb[10].mxu0 }
 0x109   :  { %943 = vst [vmem:[%s1399_s2 + $0x8] sm:$0xff] %v911_v37   ;;  %v775_v45 = vadd.f32 %v774_v36, %v760_v39  ;;  %v1044_v46 = vadd.f32 %v1043_v43, %v1042_v40  ;;  %v1045_v47 = vpop.f32.mrb[10].mxu1  ;;  %v982_v48 = vpop.f32.mrb[11].mxu0 }
 0x10a   :  { %v983_v49 = vadd.f32 %v982_v48, %v981_v44  ;;  %v1046_v50 = vpop.f32.mrb[11].mxu1 }
 0x10b   :  { %v610_v51 = vadd.f32 %v1044_v46, %v980_v42  ;;  %v1047_v52 = vadd.f32 %v1046_v50, %v1045_v47 }
 0x10d   :  { %v739_v53 = vadd.f32 %v738_v38, %v610_v51  ;;  %v761_v54 = vmul.f32 %v610_v51, %v610_v51  ;;  %v613_v55 = vadd.f32 %v1047_v52, %v983_v49 }
 0x10e   :  { %v984_v56 = vpop.f32.mrb[12].mxu0 }
 0x10f   :  { %v776_v57 = vadd.f32 %v775_v45, %v761_v54  ;;  %v916_v58 = vpack.c.bf16 %v613_v55, %v610_v51  ;;  %v740_v59 = vadd.f32 %v739_v53, %v613_v55  ;;  %v762_v60 = vmul.f32 %v613_v55, %v613_v55  ;;  %v1048_v61 = vpop.f32.mrb[12].mxu1  ;;  %v985_v62 = vpop.f32.mrb[13].mxu0 }
 0x110   :  { %v986_v63 = vadd.f32 %v985_v62, %v984_v56  ;;  %v1049_v0 = vpop.f32.mrb[13].mxu1  ;;  %v987_v1 = vpop.f32.mrb[14].mxu0 }
 0x111   :  { %944 = vst [vmem:[%s1399_s2 + $0x10] sm:$0xff] %v916_v58   ;;  %v777_v2 = vadd.f32 %v776_v57, %v762_v60  ;;  %v1050_v3 = vadd.f32 %v1049_v0, %v1048_v61  ;;  %v1051_v4 = vpop.f32.mrb[14].mxu1  ;;  %v988_v5 = vpop.f32.mrb[15].mxu0 }
 0x112   :  { %v989_v6 = vadd.f32 %v988_v5, %v987_v1  ;;  %v1052_v7 = vpop.f32.mrb[15].mxu1 }
 0x113   :  { %v618_v8 = vadd.f32 %v1050_v3, %v986_v63  ;;  %v1053_v9 = vadd.f32 %v1052_v7, %v1051_v4 }
 0x115   :  { %v741_v10 = vadd.f32 %v740_v59, %v618_v8  ;;  %v763_v11 = vmul.f32 %v618_v8, %v618_v8  ;;  %v621_v12 = vadd.f32 %v1053_v9, %v989_v6 }
 0x116   :  { %v990_v13 = vpop.f32.mrb[16].mxu0 }
 0x117   :  { %v778_v14 = vadd.f32 %v777_v2, %v763_v11  ;;  %v921_v15 = vpack.c.bf16 %v621_v12, %v618_v8  ;;  %v742_v16 = vadd.f32 %v741_v10, %v621_v12  ;;  %v764_v17 = vmul.f32 %v621_v12, %v621_v12  ;;  %v1054_v18 = vpop.f32.mrb[16].mxu1  ;;  %v991_v19 = vpop.f32.mrb[17].mxu0 }
 0x118   :  { %v992_v20 = vadd.f32 %v991_v19, %v990_v13  ;;  %v1055_v21 = vpop.f32.mrb[17].mxu1  ;;  %v993_v22 = vpop.f32.mrb[18].mxu0 }
 0x119   :  { %945 = vst [vmem:[%s1399_s2 + $0x18] sm:$0xff] %v921_v15   ;;  %v779_v23 = vadd.f32 %v778_v14, %v764_v17  ;;  %v1056_v24 = vadd.f32 %v1055_v21, %v1054_v18  ;;  %v1057_v25 = vpop.f32.mrb[18].mxu1  ;;  %v994_v26 = vpop.f32.mrb[19].mxu0 }
 0x11a   :  { %v995_v27 = vadd.f32 %v994_v26, %v993_v22  ;;  %v1058_v28 = vpop.f32.mrb[19].mxu1 }
 0x11b   :  { %v626_v29 = vadd.f32 %v1056_v24, %v992_v20  ;;  %v1059_v30 = vadd.f32 %v1058_v28, %v1057_v25 }
 0x11d   :  { %v743_v31 = vadd.f32 %v742_v16, %v626_v29  ;;  %v765_v32 = vmul.f32 %v626_v29, %v626_v29  ;;  %v629_v33 = vadd.f32 %v1059_v30, %v995_v27 }
 0x11e   :  { %v996_v34 = vpop.f32.mrb[20].mxu0 }
 0x11f   :  { %v780_v35 = vadd.f32 %v779_v23, %v765_v32  ;;  %v926_v36 = vpack.c.bf16 %v629_v33, %v626_v29  ;;  %v744_v37 = vadd.f32 %v743_v31, %v629_v33  ;;  %v766_v38 = vmul.f32 %v629_v33, %v629_v33  ;;  %v1060_v39 = vpop.f32.mrb[20].mxu1  ;;  %v997_v40 = vpop.f32.mrb[21].mxu0 }
 0x120   :  { %v998_v41 = vadd.f32 %v997_v40, %v996_v34  ;;  %v1061_v42 = vpop.f32.mrb[21].mxu1  ;;  %v999_v43 = vpop.f32.mrb[22].mxu0 }
 0x121   :  { %946 = vst [vmem:[%s1399_s2 + $0x20] sm:$0xff] %v926_v36   ;;  %v781_v44 = vadd.f32 %v780_v35, %v766_v38  ;;  %v1062_v45 = vadd.f32 %v1061_v42, %v1060_v39  ;;  %v1063_v46 = vpop.f32.mrb[22].mxu1  ;;  %v1000_v47 = vpop.f32.mrb[23].mxu0 }
 0x122   :  { %v1001_v48 = vadd.f32 %v1000_v47, %v999_v43  ;;  %v1064_v49 = vpop.f32.mrb[23].mxu1 }
 0x123   :  { %v634_v50 = vadd.f32 %v1062_v45, %v998_v41  ;;  %v1065_v51 = vadd.f32 %v1064_v49, %v1063_v46 }
 0x125   :  { %v745_v52 = vadd.f32 %v744_v37, %v634_v50  ;;  %v767_v53 = vmul.f32 %v634_v50, %v634_v50  ;;  %v637_v54 = vadd.f32 %v1065_v51, %v1001_v48 }
 0x126   :  { %v1002_v55 = vpop.f32.mrb[24].mxu0 }
 0x127   :  { %v782_v56 = vadd.f32 %v781_v44, %v767_v53  ;;  %v931_v57 = vpack.c.bf16 %v637_v54, %v634_v50  ;;  %v746_v58 = vadd.f32 %v745_v52, %v637_v54  ;;  %v768_v59 = vmul.f32 %v637_v54, %v637_v54  ;;  %v1066_v60 = vpop.f32.mrb[24].mxu1  ;;  %v1003_v61 = vpop.f32.mrb[25].mxu0 }
 0x128   :  { %v1004_v62 = vadd.f32 %v1003_v61, %v1002_v55  ;;  %v1067_v63 = vpop.f32.mrb[25].mxu1  ;;  %v1005_v0 = vpop.f32.mrb[26].mxu0 }
 0x129   :  { %947 = vst [vmem:[%s1399_s2 + $0x28] sm:$0xff] %v931_v57   ;;  %v783_v1 = vadd.f32 %v782_v56, %v768_v59  ;;  %v1068_v2 = vadd.f32 %v1067_v63, %v1066_v60  ;;  %v1069_v3 = vpop.f32.mrb[26].mxu1  ;;  %v1006_v4 = vpop.f32.mrb[27].mxu0 }
 0x12a   :  { %v1007_v5 = vadd.f32 %v1006_v4, %v1005_v0  ;;  %v1070_v6 = vpop.f32.mrb[27].mxu1 }
 0x12b   :  { %v642_v7 = vadd.f32 %v1068_v2, %v1004_v62  ;;  %v1071_v8 = vadd.f32 %v1070_v6, %v1069_v3 }
 0x12d   :  { %v747_v9 = vadd.f32 %v746_v58, %v642_v7  ;;  %v769_v10 = vmul.f32 %v642_v7, %v642_v7  ;;  %v645_v11 = vadd.f32 %v1071_v8, %v1007_v5 }
 0x12e   :  { %v1008_v12 = vpop.f32.mrb[28].mxu0 }
 0x12f   :  { %v784_v13 = vadd.f32 %v783_v1, %v769_v10  ;;  %v936_v14 = vpack.c.bf16 %v645_v11, %v642_v7  ;;  %v748_v15 = vadd.f32 %v747_v9, %v645_v11  ;;  %v770_v16 = vmul.f32 %v645_v11, %v645_v11  ;;  %v1072_v17 = vpop.f32.mrb[28].mxu1  ;;  %v1009_v18 = vpop.f32.mrb[29].mxu0 }
 0x130   :  { %v1010_v19 = vadd.f32 %v1009_v18, %v1008_v12  ;;  %v1073_v20 = vpop.f32.mrb[29].mxu1  ;;  %v1011_v21 = vpop.f32.mrb[30].mxu0 }
 0x131   :  { %948 = vst [vmem:[%s1399_s2 + $0x30] sm:$0xff] %v936_v14   ;;  %v785_v22 = vadd.f32 %v784_v13, %v770_v16  ;;  %v1074_v23 = vadd.f32 %v1073_v20, %v1072_v17  ;;  %v1075_v24 = vpop.f32.mrb[30].mxu1  ;;  %v1012_v25 = vpop.f32.mrb[31].mxu0 }
 0x132   :  { %v1013_v26 = vadd.f32 %v1012_v25, %v1011_v21  ;;  %v1076_v27 = vpop.f32.mrb[31].mxu1 }
 0x133   :  { %v650_v28 = vadd.f32 %v1074_v23, %v1010_v19  ;;  %v1077_v29 = vadd.f32 %v1076_v27, %v1075_v24 }
 0x135   :  { %v749_v30 = vadd.f32 %v748_v15, %v650_v28  ;;  %v771_v31 = vmul.f32 %v650_v28, %v650_v28  ;;  %v653_v32 = vadd.f32 %v1077_v29, %v1013_v26 }
 0x137   :  { %v786_v33 = vadd.f32 %v785_v22, %v771_v31  ;;  %v941_v34 = vpack.c.bf16 %v653_v32, %v650_v28  ;;  %v750_v35 = vadd.f32 %v749_v30, %v653_v32  ;;  %v772_v36 = vmul.f32 %v653_v32, %v653_v32 }
 0x139   :  { %949 = vst [vmem:[%s1399_s2 + $0x38] sm:$0xff] %v941_v34   ;;  %v751_v37 = vrot.slane %v750_v35, 4  ;;  %v787_v38 = vadd.f32 %v786_v33, %v772_v36 }
 0x13b   :  { %v752_v39 = vadd.f32 %v751_v37, %v750_v35  ;;  %v788_v40 = vrot.slane %v787_v38, 4 }
 0x13d   :  { %v753_v41 = vrot.slane %v752_v39, 2  ;;  %v789_v42 = vadd.f32 %v788_v40, %v787_v38 }
 0x13f   :  { %v754_v43 = vadd.f32 %v753_v41, %v752_v39  ;;  %v790_v44 = vrot.slane %v789_v42, 2 }
 0x141   :  { %v755_v45 = vrot.slane %v754_v43, 1  ;;  %v791_v46 = vadd.f32 %v790_v44, %v789_v42 }
 0x143   :  { %v792_v47 = vrot.slane %v791_v46, 1  ;;  %v756_v48 = vadd.f32 %v755_v45, %v754_v43 }
 0x145   :  { %v793_v49 = vadd.f32 %v792_v47, %v791_v46 }
 0x147   :  { %v795_v50 = vsel %vm794_vm0, %v756_v48, %v793_v49 }
 0x148   :  { %v797_v51 = vsel %vm796_vm1, %v795_v50, 0.0 }
 0x149   :  { %798 = vst [vmem:[%s1400_s3] sm:$0xff] %v797_v51 }

// kernel: image_transform_net.36
= control target key start
LH: loop header
LB: loop body
LE: loop exit
PB: predicated region body
PF: predicated region fallthrough
CT: control target
= control target key end

     0   :  { %s140_s0 = inlined_call_operand.vmem [shape: bf16[32,128], index: 0, kind: input, shape index: {}]   ;;  %s141_s1 = inlined_call_operand.vmem [shape: f32[1,128], index: 1, kind: input, shape index: {}]   ;;  %s142_s2 = inlined_call_operand.vmem [shape: f32[1,128], index: 2, kind: input, shape index: {}]   ;;  %s143_s3 = inlined_call_operand.vmem [shape: bf16[32,128], index: 3, kind: output, shape index: {}]  }
   0x1   :  { %v83_v0 = vld [vmem:[%s140_s0] sm:$0xff]   ;;  %v100_v4 = vld [vmem:[%s140_s0 + $0x8] sm:$0xff]  }
   0x2   :  { %v72_v1 = vld [vmem:[%s141_s1] ss:$0 sm:$0xff]  ;;  %v84_v2 = vunpack.c.l.bf16 %v83_v0  ;;  %v85_v3 = vunpack.c.h.bf16 %v83_v0  ;;  %v88_v6 = vunpack.c.l.bf16 %v100_v4  ;;  %v89_v7 = vunpack.c.h.bf16 %v100_v4 }
   0x3   :  { %v73_v5 = vld [vmem:[%s142_s2] ss:$0 sm:$0xff] }
   0x4   :  { %v29_v8 = vmul.f32 %v84_v2, %v72_v1  ;;  %v30_v9 = vmul.f32 %v85_v3, %v72_v1  ;;  %v31_v10 = vmul.f32 %v88_v6, %v72_v1  ;;  %v32_v11 = vmul.f32 %v89_v7, %v72_v1 }
   0x6   :  { %v40_v12 = vadd.f32 %v73_v5, %v29_v8  ;;  %v41_v13 = vadd.f32 %v73_v5, %v30_v9  ;;  %v42_v14 = vadd.f32 %v73_v5, %v31_v10  ;;  %v43_v15 = vadd.f32 %v73_v5, %v32_v11 }
   0x8   :  { %v44_v16 = vmax.f32 %v40_v12, 0.0  ;;  %v45_v17 = vmax.f32 %v41_v13, 0.0  ;;  %v46_v18 = vmax.f32 %v42_v14, 0.0  ;;  %v47_v19 = vmax.f32 %v43_v15, 0.0 }
   0xa   :  { %v93_v20 = vpack.c.bf16 %v45_v17, %v44_v16  ;;  %v98_v21 = vpack.c.bf16 %v47_v19, %v46_v18 }
   0xc   :  { %94 = vst [vmem:[%s143_s3] sm:$0xff] %v93_v20   ;;  %101 = vst [vmem:[%s143_s3 + $0x8] sm:$0xff] %v98_v21  }

// kernel: image_transform_net.35
= control target key start
LH: loop header
LB: loop body
LE: loop exit
PB: predicated region body
PF: predicated region fallthrough
CT: control target
= control target key end

     0   :  { %vm860_vm0 = vcmask 1040384   ;;  %vm862_vm1 = vcmask 1041408   ;;  %s1417_s1 = inlined_call_operand.vmem [shape: bf16[1024,128], index: 1, kind: input, shape index: {}]   ;;  %s1418_s0 = inlined_call_operand.vmem [shape: bf16[32,1024], index: 0, kind: input, shape index: {}]   ;;  %s1419_s2 = inlined_call_operand.vmem [shape: bf16[32,128], index: 2, kind: output, shape index: {0}]   ;;  %s1420_s3 = inlined_call_operand.vmem [shape: f32[8,128], index: 3, kind: output, shape index: {1}]  }
   0x1   :  { %v1084_v0 = vld [vmem:[%s1417_s1 + $0x40] sm:$0xff]   ;;  %v1088_v4 = vld [vmem:[%s1417_s1 + $0x48] sm:$0xff]   ;;  %v1092_v8 = vld [vmem:[%s1417_s1 + $0x50] sm:$0xff]  }
   0x2   :  { %v1085_v1 = vld [vmem:[%s1417_s1 + $0xc0] sm:$0xff]   ;;  %972 = vmatprep.subr.bf16.mxu0 %v1084_v0  ;;  %v1089_v5 = vld [vmem:[%s1417_s1 + $0xc8] sm:$0xff]   ;;  %v1093_v9 = vld [vmem:[%s1417_s1 + $0xd0] sm:$0xff]  }
   0x3   :  { %v1086_v2 = vld [vmem:[%s1417_s1] sm:$0xff]   ;;  %1000 = vmatprep.subr.bf16.mxu1 %v1085_v1  ;;  %v1090_v6 = vld [vmem:[%s1417_s1 + $0x8] sm:$0xff]   ;;  %v1094_v10 = vld [vmem:[%s1417_s1 + $0x10] sm:$0xff]  }
   0x4   :  { %v1087_v3 = vld [vmem:[%s1417_s1 + $0x80] sm:$0xff]   ;;  %973 = vmatpush3.bf16.msra.mxu0 %v1086_v2  ;;  %v1091_v7 = vld [vmem:[%s1417_s1 + $0x88] sm:$0xff]   ;;  %v1095_v11 = vld [vmem:[%s1417_s1 + $0x90] sm:$0xff]  }
   0x5   :  { %1001 = vmatpush3.bf16.msra.mxu1 %v1087_v3  ;;  %974 = vmatprep.subr.bf16.mxu0 %v1088_v4  ;;  %v1096_v12 = vld [vmem:[%s1417_s1 + $0x58] sm:$0xff]   ;;  %v1100_v16 = vld [vmem:[%s1417_s1 + $0x60] sm:$0xff]   ;;  %v1104_v20 = vld [vmem:[%s1417_s1 + $0x68] sm:$0xff]  }
   0x6   :  { %1002 = vmatprep.subr.bf16.mxu1 %v1089_v5  ;;  %v1097_v13 = vld [vmem:[%s1417_s1 + $0xd8] sm:$0xff]   ;;  %v1101_v17 = vld [vmem:[%s1417_s1 + $0xe0] sm:$0xff]   ;;  %v1105_v21 = vld [vmem:[%s1417_s1 + $0xe8] sm:$0xff]  }
   0x7   :  { %v1098_v14 = vld [vmem:[%s1417_s1 + $0x18] sm:$0xff]   ;;  %v1102_v18 = vld [vmem:[%s1417_s1 + $0x20] sm:$0xff]   ;;  %v1106_v22 = vld [vmem:[%s1417_s1 + $0x28] sm:$0xff]  }
   0x8   :  { %975 = vmatpush3.bf16.msra.mxu0 %v1090_v6  ;;  %v1099_v15 = vld [vmem:[%s1417_s1 + $0x98] sm:$0xff]   ;;  %v1103_v19 = vld [vmem:[%s1417_s1 + $0xa0] sm:$0xff]   ;;  %v1107_v23 = vld [vmem:[%s1417_s1 + $0xa8] sm:$0xff]  }
   0x9   :  { %1003 = vmatpush3.bf16.msra.mxu1 %v1091_v7  ;;  %976 = vmatprep.subr.bf16.mxu0 %v1092_v8  ;;  %v1108_v24 = vld [vmem:[%s1417_s1 + $0x70] sm:$0xff]   ;;  %v1112_v28 = vld [vmem:[%s1417_s1 + $0x78] sm:$0xff]   ;;  %v14_v32 = vld [vmem:[%s1418_s0] sm:$0xff] }
   0xa   :  { %1004 = vmatprep.subr.bf16.mxu1 %v1093_v9  ;;  %v1109_v25 = vld [vmem:[%s1417_s1 + $0xf0] sm:$0xff]   ;;  %v1113_v29 = vld [vmem:[%s1417_s1 + $0xf8] sm:$0xff]   ;;  %v18_v33 = vld [vmem:[%s1418_s0 + $0x20] sm:$0xff] }
   0xb   :  { %v1110_v26 = vld [vmem:[%s1417_s1 + $0x30] sm:$0xff]   ;;  %v1114_v30 = vld [vmem:[%s1417_s1 + $0x38] sm:$0xff]   ;;  %v15_v34 = vld [vmem:[%s1418_s0 + $0x8] sm:$0xff]  ;;  %v873_v35 = vcombine.low %v14_v32, %v18_v33  ;;  %v874_v36 = vcombine.high %v14_v32, %v18_v33 }
   0xc   :  { %977 = vmatpush3.bf16.msra.mxu0 %v1094_v10  ;;  %v1111_v27 = vld [vmem:[%s1417_s1 + $0xb0] sm:$0xff]   ;;  %v1115_v31 = vld [vmem:[%s1417_s1 + $0xb8] sm:$0xff]   ;;  %v19_v37 = vld [vmem:[%s1418_s0 + $0x28] sm:$0xff] }
   0xd   :  { %1005 = vmatpush3.bf16.msra.mxu1 %v1095_v11  ;;  %978 = vmatprep.subr.bf16.mxu0 %v1096_v12  ;;  %v875_v38 = vcombine.low %v15_v34, %v19_v37  ;;  %v876_v39 = vcombine.high %v15_v34, %v19_v37  ;;  %v1116_v40 = vld [vmem:[%s1417_s1 + $0x140] sm:$0xff]   ;;  %v1120_v44 = vld [vmem:[%s1417_s1 + $0x148] sm:$0xff]   ;;  %v1124_v48 = vld [vmem:[%s1417_s1 + $0x150] sm:$0xff]  }
   0xe   :  { %1006 = vmatprep.subr.bf16.mxu1 %v1097_v13  ;;  %654 = vmatprep.mubr.bf16.mxu0 %v874_v36  ;;  %v1117_v41 = vld [vmem:[%s1417_s1 + $0x1c0] sm:$0xff]   ;;  %v1121_v45 = vld [vmem:[%s1417_s1 + $0x1c8] sm:$0xff]   ;;  %v1125_v49 = vld [vmem:[%s1417_s1 + $0x1d0] sm:$0xff]  }
   0xf   :  { %703 = vmatprep.mubr.bf16.mxu1 %v876_v39  ;;  %v1118_v42 = vld [vmem:[%s1417_s1 + $0x100] sm:$0xff]   ;;  %v1122_v46 = vld [vmem:[%s1417_s1 + $0x108] sm:$0xff]   ;;  %v1126_v50 = vld [vmem:[%s1417_s1 + $0x110] sm:$0xff]  }
  0x10   :  { %979 = vmatpush3.bf16.msra.mxu0 %v1098_v14  ;;  %v1119_v43 = vld [vmem:[%s1417_s1 + $0x180] sm:$0xff]   ;;  %v1123_v47 = vld [vmem:[%s1417_s1 + $0x188] sm:$0xff]   ;;  %v1127_v51 = vld [vmem:[%s1417_s1 + $0x190] sm:$0xff]  }
  0x11   :  { %1007 = vmatpush3.bf16.msra.mxu1 %v1099_v15  ;;  %980 = vmatprep.subr.bf16.mxu0 %v1100_v16  ;;  %v1128_v52 = vld [vmem:[%s1417_s1 + $0x158] sm:$0xff]   ;;  %v1132_v56 = vld [vmem:[%s1417_s1 + $0x160] sm:$0xff]   ;;  %v23_v63 = vld [vmem:[%s1418_s0 + $0x48] sm:$0xff] }
  0x12   :  { %1008 = vmatprep.subr.bf16.mxu1 %v1101_v17  ;;  %v1129_v53 = vld [vmem:[%s1417_s1 + $0x1d8] sm:$0xff]   ;;  %v1133_v57 = vld [vmem:[%s1417_s1 + $0x1e0] sm:$0xff]   ;;  %v27_v0 = vld [vmem:[%s1418_s0 + $0x68] sm:$0xff] }
  0x13   :  { %v1130_v54 = vld [vmem:[%s1417_s1 + $0x118] sm:$0xff]   ;;  %v1134_v58 = vld [vmem:[%s1417_s1 + $0x120] sm:$0xff]   ;;  %v884_v2 = vcombine.high %v23_v63, %v27_v0  ;;  %v1136_v3 = vld [vmem:[%s1417_s1 + $0x168] sm:$0xff]   ;;  %v883_v4 = vcombine.low %v23_v63, %v27_v0 }
  0x14   :  { %981 = vmatpush3.bf16.msra.mxu0 %v1102_v18  ;;  %v1131_v55 = vld [vmem:[%s1417_s1 + $0x198] sm:$0xff]   ;;  %v1135_v59 = vld [vmem:[%s1417_s1 + $0x1a0] sm:$0xff]   ;;  %v1137_v5 = vld [vmem:[%s1417_s1 + $0x1e8] sm:$0xff]  }
  0x15   :  { %1009 = vmatpush3.bf16.msra.mxu1 %v1103_v19  ;;  %982 = vmatprep.subr.bf16.mxu0 %v1104_v20  ;;  %v22_v60 = vld [vmem:[%s1418_s0 + $0x40] sm:$0xff]  ;;  %v1138_v6 = vld [vmem:[%s1417_s1 + $0x128] sm:$0xff]   ;;  %v1140_v8 = vld [vmem:[%s1417_s1 + $0x170] sm:$0xff]  }
  0x16   :  { %1010 = vmatprep.subr.bf16.mxu1 %v1105_v21  ;;  %v26_v61 = vld [vmem:[%s1418_s0 + $0x60] sm:$0xff]  ;;  %v1139_v7 = vld [vmem:[%s1417_s1 + $0x1a8] sm:$0xff]   ;;  %v1141_v9 = vld [vmem:[%s1417_s1 + $0x1f0] sm:$0xff]  }
  0x17   :  { %v882_v62 = vcombine.high %v22_v60, %v26_v61  ;;  %v881_v1 = vcombine.low %v22_v60, %v26_v61  ;;  %v1142_v10 = vld [vmem:[%s1417_s1 + $0x130] sm:$0xff]   ;;  %v1144_v12 = vld [vmem:[%s1417_s1 + $0x178] sm:$0xff]  }
  0x18   :  { %983 = vmatpush3.bf16.msra.mxu0 %v1106_v22  ;;  %v1143_v11 = vld [vmem:[%s1417_s1 + $0x1b0] sm:$0xff]   ;;  %v1145_v13 = vld [vmem:[%s1417_s1 + $0x1f8] sm:$0xff]  }
  0x19   :  { %1011 = vmatpush3.bf16.msra.mxu1 %v1107_v23  ;;  %984 = vmatprep.subr.bf16.mxu0 %v1108_v24  ;;  %v1146_v14 = vld [vmem:[%s1417_s1 + $0x138] sm:$0xff]   ;;  %v16_v16 = vld [vmem:[%s1418_s0 + $0x10] sm:$0xff] }
  0x1a   :  { %1012 = vmatprep.subr.bf16.mxu1 %v1109_v25  ;;  %v1147_v15 = vld [vmem:[%s1417_s1 + $0x1b8] sm:$0xff]   ;;  %v20_v17 = vld [vmem:[%s1418_s0 + $0x30] sm:$0xff] }
  0x1b   :  { %v17_v18 = vld [vmem:[%s1418_s0 + $0x18] sm:$0xff]  ;;  %v877_v20 = vcombine.low %v16_v16, %v20_v17  ;;  %v878_v21 = vcombine.high %v16_v16, %v20_v17  ;;  %v24_v24 = vld [vmem:[%s1418_s0 + $0x50] sm:$0xff] }
  0x1c   :  { %985 = vmatpush3.bf16.msra.mxu0 %v1110_v26  ;;  %v21_v19 = vld [vmem:[%s1418_s0 + $0x38] sm:$0xff]  ;;  %v28_v25 = vld [vmem:[%s1418_s0 + $0x70] sm:$0xff] }
  0x1d   :  { %1013 = vmatpush3.bf16.msra.mxu1 %v1111_v27  ;;  %986 = vmatprep.subr.bf16.mxu0 %v1112_v28  ;;  %v879_v22 = vcombine.low %v17_v18, %v21_v19  ;;  %v880_v23 = vcombine.high %v17_v18, %v21_v19  ;;  %v25_v26 = vld [vmem:[%s1418_s0 + $0x58] sm:$0xff]  ;;  %v886_v27 = vcombine.high %v24_v24, %v28_v25 }
  0x1e   :  { %1014 = vmatprep.subr.bf16.mxu1 %v1113_v29  ;;  %v29_v28 = vld [vmem:[%s1418_s0 + $0x78] sm:$0xff] }
  0x1f   :  { %v888_v29 = vcombine.high %v25_v26, %v29_v28 }
  0x20   :  { %987 = vmatpush3.bf16.msra.mxu0 %v1114_v30  ;;  %v885_v30 = vcombine.low %v24_v24, %v28_v25 }
  0x21   :  { %1015 = vmatpush3.bf16.msra.mxu1 %v1115_v31  ;;  %1028 = vmatprep.subr.bf16.mxu0 %v1116_v40  ;;  %v887_v31 = vcombine.low %v25_v26, %v29_v28 }
  0x22   :  { %1056 = vmatprep.subr.bf16.mxu1 %v1117_v41 }
  0x23   :  { %655 = vmatmul.mubr.bf16.vlgmr.msra.gmra.mrb[0].mxu0 %v873_v35 }
  0x24   :  { %704 = vmatmul.mubr.bf16.vlgmr.msra.gmra.mrb[0].mxu1 %v875_v38  ;;  %1029 = vmatpush3.bf16.msra.mxu0 %v1118_v42 }
  0x25   :  { %1057 = vmatpush3.bf16.msra.mxu1 %v1119_v43  ;;  %1030 = vmatprep.subr.bf16.mxu0 %v1120_v44 }
  0x26   :  { %1058 = vmatprep.subr.bf16.mxu1 %v1121_v45  ;;  %662 = vmatprep.mubr.bf16.mxu0 %v882_v62 }
  0x27   :  { %711 = vmatprep.mubr.bf16.mxu1 %v884_v2 }
  0x28   :  { %1031 = vmatpush3.bf16.msra.mxu0 %v1122_v46 }
  0x29   :  { %1059 = vmatpush3.bf16.msra.mxu1 %v1123_v47  ;;  %1032 = vmatprep.subr.bf16.mxu0 %v1124_v48 }
  0x2a   :  { %1060 = vmatprep.subr.bf16.mxu1 %v1125_v49 }
  0x2b   :  { %663 = vmatmul.mubr.bf16.gmra.mrb[4].mxu0 %v881_v1 }
  0x2c   :  { %1033 = vmatpush3.bf16.msra.mxu0 %v1126_v50  ;;  %712 = vmatmul.mubr.bf16.gmra.mrb[4].mxu1 %v883_v4 }
  0x2d   :  { %1061 = vmatpush3.bf16.msra.mxu1 %v1127_v51  ;;  %1034 = vmatprep.subr.bf16.mxu0 %v1128_v52 }
  0x2e   :  { %1062 = vmatprep.subr.bf16.mxu1 %v1129_v53  ;;  %752 = vmatprep.mubr.bf16.mxu0 %v878_v21 }
  0x2f   :  { %801 = vmatprep.mubr.bf16.mxu1 %v880_v23 }
  0x30   :  { %1035 = vmatpush3.bf16.msra.mxu0 %v1130_v54 }
  0x31   :  { %1063 = vmatpush3.bf16.msra.mxu1 %v1131_v55  ;;  %1036 = vmatprep.subr.bf16.mxu0 %v1132_v56 }
  0x32   :  { %1064 = vmatprep.subr.bf16.mxu1 %v1133_v57 }
  0x34   :  { %1037 = vmatpush3.bf16.msra.mxu0 %v1134_v58 }
  0x35   :  { %1065 = vmatpush3.bf16.msra.mxu1 %v1135_v59  ;;  %1038 = vmatprep.subr.bf16.mxu0 %v1136_v3 }
  0x36   :  { %1066 = vmatprep.subr.bf16.mxu1 %v1137_v5 }
  0x38   :  { %1039 = vmatpush3.bf16.msra.mxu0 %v1138_v6 }
  0x39   :  { %1067 = vmatpush3.bf16.msra.mxu1 %v1139_v7  ;;  %1040 = vmatprep.subr.bf16.mxu0 %v1140_v8 }
  0x3a   :  { %1068 = vmatprep.subr.bf16.mxu1 %v1141_v9 }
  0x3c   :  { %1041 = vmatpush3.bf16.msra.mxu0 %v1142_v10 }
  0x3d   :  { %1069 = vmatpush3.bf16.msra.mxu1 %v1143_v11  ;;  %1042 = vmatprep.subr.bf16.mxu0 %v1144_v12 }
  0x3e   :  { %1070 = vmatprep.subr.bf16.mxu1 %v1145_v13 }
  0x40   :  { %1043 = vmatpush3.bf16.msra.mxu0 %v1146_v14 }
  0x41   :  { %1071 = vmatpush3.bf16.msra.mxu1 %v1147_v15 }
  0x43   :  { %753 = vmatmul.mubr.bf16.vlgmr.msra.gmra.mrb[8].mxu0 %v877_v20 }
  0x44   :  { %802 = vmatmul.mubr.bf16.vlgmr.msra.gmra.mrb[8].mxu1 %v879_v22  ;;  %760 = vmatprep.mubr.bf16.mxu0 %v886_v27 }
  0x45   :  { %809 = vmatprep.mubr.bf16.mxu1 %v888_v29 }
  0x4b   :  { %761 = vmatmul.mubr.bf16.gmra.mrb[12].mxu0 %v885_v30 }
  0x4c   :  { %810 = vmatmul.mubr.bf16.gmra.mrb[12].mxu1 %v887_v31 }
  0xf6   :  { %v988_v32 = vpop.f32.mrb[0].mxu0 }
  0xf7   :  { %v1016_v33 = vpop.f32.mrb[0].mxu1  ;;  %v989_v34 = vpop.f32.mrb[1].mxu0 }
  0xf8   :  { %v990_v35 = vadd.f32 %v989_v34, %v988_v32  ;;  %v1017_v36 = vpop.f32.mrb[1].mxu1  ;;  %v991_v37 = vpop.f32.mrb[2].mxu0 }
  0xf9   :  { %v1018_v38 = vadd.f32 %v1017_v36, %v1016_v33  ;;  %v1019_v39 = vpop.f32.mrb[2].mxu1  ;;  %v992_v40 = vpop.f32.mrb[3].mxu0 }
  0xfa   :  { %v993_v41 = vadd.f32 %v992_v40, %v991_v37  ;;  %v1020_v42 = vpop.f32.mrb[3].mxu1 }
  0xfb   :  { %v706_v43 = vadd.f32 %v1018_v38, %v990_v35  ;;  %v1021_v44 = vadd.f32 %v1020_v42, %v1019_v39 }
  0xfd   :  { %v709_v45 = vadd.f32 %v1021_v44, %v993_v41 }
  0xfe   :  { %v994_v46 = vpop.f32.mrb[4].mxu0 }
  0xff   :  { %v1022_v47 = vpop.f32.mrb[4].mxu1  ;;  %v995_v48 = vpop.f32.mrb[5].mxu0 }
 0x100   :  { %v996_v49 = vadd.f32 %v995_v48, %v994_v46  ;;  %v1023_v50 = vpop.f32.mrb[5].mxu1  ;;  %v997_v51 = vpop.f32.mrb[6].mxu0 }
 0x101   :  { %v1024_v52 = vadd.f32 %v1023_v50, %v1022_v47  ;;  %v1025_v53 = vpop.f32.mrb[6].mxu1  ;;  %v998_v54 = vpop.f32.mrb[7].mxu0 }
 0x102   :  { %v999_v55 = vadd.f32 %v998_v54, %v997_v51  ;;  %v1026_v56 = vpop.f32.mrb[7].mxu1 }
 0x103   :  { %v714_v57 = vadd.f32 %v1024_v52, %v996_v49  ;;  %v1027_v58 = vadd.f32 %v1026_v56, %v1025_v53 }
 0x105   :  { %v717_v59 = vadd.f32 %v1027_v58, %v999_v55 }
 0x116   :  { %v1044_v60 = vpop.f32.mrb[8].mxu0 }
 0x117   :  { %v1072_v61 = vpop.f32.mrb[8].mxu1  ;;  %v1045_v62 = vpop.f32.mrb[9].mxu0 }
 0x118   :  { %v1073_v63 = vpop.f32.mrb[9].mxu1  ;;  %v1046_v0 = vadd.f32 %v1045_v62, %v1044_v60  ;;  %v1047_v2 = vpop.f32.mrb[10].mxu0 }
 0x119   :  { %v1074_v1 = vadd.f32 %v1073_v63, %v1072_v61  ;;  %v1075_v3 = vpop.f32.mrb[10].mxu1  ;;  %v1048_v4 = vpop.f32.mrb[11].mxu0 }
 0x11a   :  { %v1076_v5 = vpop.f32.mrb[11].mxu1  ;;  %v755_v6 = vadd.f32 %v1046_v0, %v706_v43  ;;  %v1049_v7 = vadd.f32 %v1048_v4, %v1047_v2 }
 0x11b   :  { %v1077_v8 = vadd.f32 %v1076_v5, %v1075_v3 }
 0x11c   :  { %v804_v9 = vadd.f32 %v1074_v1, %v755_v6  ;;  %v758_v10 = vadd.f32 %v1049_v7, %v709_v45 }
 0x11e   :  { %v807_v11 = vadd.f32 %v1077_v8, %v758_v10  ;;  %v1050_v12 = vpop.f32.mrb[12].mxu0  ;;  %v847_v14 = vmul.f32 %v804_v9, %v804_v9 }
 0x11f   :  { %v1078_v13 = vpop.f32.mrb[12].mxu1  ;;  %v1051_v15 = vpop.f32.mrb[13].mxu0 }
 0x120   :  { %v1079_v16 = vpop.f32.mrb[13].mxu1  ;;  %v964_v17 = vpack.c.bf16 %v807_v11, %v804_v9  ;;  %v838_v18 = vadd.f32 %v807_v11, %v804_v9  ;;  %v848_v19 = vmul.f32 %v807_v11, %v807_v11  ;;  %v1052_v20 = vadd.f32 %v1051_v15, %v1050_v12  ;;  %v1053_v21 = vpop.f32.mrb[14].mxu0 }
 0x121   :  { %v1081_v22 = vpop.f32.mrb[14].mxu1  ;;  %v1080_v23 = vadd.f32 %v1079_v16, %v1078_v13  ;;  %v1054_v24 = vpop.f32.mrb[15].mxu0 }
 0x122   :  { %v1082_v25 = vpop.f32.mrb[15].mxu1  ;;  %965 = vst [vmem:[%s1419_s2] sm:$0xff] %v964_v17   ;;  %v851_v26 = vadd.f32 %v848_v19, %v847_v14  ;;  %v763_v27 = vadd.f32 %v1052_v20, %v714_v57  ;;  %v1055_v28 = vadd.f32 %v1054_v24, %v1053_v21 }
 0x123   :  { %v1083_v29 = vadd.f32 %v1082_v25, %v1081_v22 }
 0x124   :  { %v812_v30 = vadd.f32 %v1080_v23, %v763_v27  ;;  %v766_v31 = vadd.f32 %v1055_v28, %v717_v59 }
 0x126   :  { %v839_v32 = vadd.f32 %v838_v18, %v812_v30  ;;  %v849_v33 = vmul.f32 %v812_v30, %v812_v30  ;;  %v815_v34 = vadd.f32 %v1083_v29, %v766_v31 }
 0x128   :  { %v852_v35 = vadd.f32 %v851_v26, %v849_v33  ;;  %v969_v36 = vpack.c.bf16 %v815_v34, %v812_v30  ;;  %v840_v37 = vadd.f32 %v839_v32, %v815_v34  ;;  %v850_v38 = vmul.f32 %v815_v34, %v815_v34 }
 0x12a   :  { %971 = vst [vmem:[%s1419_s2 + $0x8] sm:$0xff] %v969_v36   ;;  %v841_v39 = vrot.slane %v840_v37, 4  ;;  %v853_v40 = vadd.f32 %v852_v35, %v850_v38 }
 0x12c   :  { %v842_v41 = vadd.f32 %v841_v39, %v840_v37  ;;  %v854_v42 = vrot.slane %v853_v40, 4 }
 0x12e   :  { %v843_v43 = vrot.slane %v842_v41, 2  ;;  %v855_v44 = vadd.f32 %v854_v42, %v853_v40 }
 0x130   :  { %v844_v45 = vadd.f32 %v843_v43, %v842_v41  ;;  %v856_v46 = vrot.slane %v855_v44, 2 }
 0x132   :  { %v845_v47 = vrot.slane %v844_v45, 1  ;;  %v857_v48 = vadd.f32 %v856_v46, %v855_v44 }
 0x134   :  { %v858_v49 = vrot.slane %v857_v48, 1  ;;  %v846_v50 = vadd.f32 %v845_v47, %v844_v45 }
 0x136   :  { %v859_v51 = vadd.f32 %v858_v49, %v857_v48 }
 0x138   :  { %v861_v52 = vsel %vm860_vm0, %v846_v50, %v859_v51 }
 0x139   :  { %v863_v53 = vsel %vm862_vm1, %v861_v52, 0.0 }
 0x13a   :  { %864 = vst [vmem:[%s1420_s3] sm:$0xff] %v863_v53 }

// kernel: image_transform_net.40
= control target key start
LH: loop header
LB: loop body
LE: loop exit
PB: predicated region body
PF: predicated region fallthrough
CT: control target
= control target key end

     0   :  { %s171_s0 = inlined_call_operand.vmem [shape: bf16[32,128], index: 0, kind: input, shape index: {}]   ;;  %s172_s1 = inlined_call_operand.vmem [shape: bf16[32,128], index: 1, kind: input, shape index: {}]   ;;  %s173_s2 = inlined_call_operand.vmem [shape: f32[1,128], index: 2, kind: input, shape index: {}]   ;;  %s174_s3 = inlined_call_operand.vmem [shape: f32[1,128], index: 3, kind: input, shape index: {}]   ;;  %s175_s4 = inlined_call_operand.vmem [shape: bf16[32,128], index: 4, kind: output, shape index: {}]  }
   0x1   :  { %v94_v0 = vld [vmem:[%s171_s0] sm:$0xff]   ;;  %v119_v5 = vld [vmem:[%s171_s0 + $0x8] sm:$0xff]  }
   0x2   :  { %v83_v1 = vld [vmem:[%s173_s2] ss:$0 sm:$0xff]  ;;  %v95_v2 = vunpack.c.l.bf16 %v94_v0  ;;  %v96_v3 = vunpack.c.h.bf16 %v94_v0  ;;  %v120_v6 = vld [vmem:[%s172_s1 + $0x8] sm:$0xff]   ;;  %v99_v8 = vunpack.c.l.bf16 %v119_v5  ;;  %v100_v9 = vunpack.c.h.bf16 %v119_v5 }
   0x3   :  { %v102_v4 = vld [vmem:[%s172_s1] sm:$0xff]   ;;  %v107_v16 = vunpack.c.l.bf16 %v120_v6  ;;  %v108_v17 = vunpack.c.h.bf16 %v120_v6 }
   0x4   :  { %v84_v7 = vld [vmem:[%s174_s3] ss:$0 sm:$0xff]  ;;  %v32_v10 = vmul.f32 %v95_v2, %v83_v1  ;;  %v33_v11 = vmul.f32 %v96_v3, %v83_v1  ;;  %v103_v12 = vunpack.c.l.bf16 %v102_v4  ;;  %v104_v13 = vunpack.c.h.bf16 %v102_v4 }
   0x5   :  { %v34_v14 = vmul.f32 %v99_v8, %v83_v1  ;;  %v35_v15 = vmul.f32 %v100_v9, %v83_v1 }
   0x6   :  { %v43_v18 = vadd.f32 %v84_v7, %v32_v10  ;;  %v44_v19 = vadd.f32 %v84_v7, %v33_v11 }
   0x7   :  { %v45_v20 = vadd.f32 %v84_v7, %v34_v14  ;;  %v46_v21 = vadd.f32 %v84_v7, %v35_v15 }
   0x8   :  { %v55_v22 = vadd.f32 %v103_v12, %v43_v18  ;;  %v56_v23 = vadd.f32 %v104_v13, %v44_v19 }
   0x9   :  { %v57_v24 = vadd.f32 %v107_v16, %v45_v20  ;;  %v58_v25 = vadd.f32 %v108_v17, %v46_v21 }
   0xa   :  { %v112_v26 = vpack.c.bf16 %v56_v23, %v55_v22 }
   0xb   :  { %v117_v27 = vpack.c.bf16 %v58_v25, %v57_v24 }
   0xc   :  { %113 = vst [vmem:[%s175_s4] sm:$0xff] %v112_v26  }
   0xd   :  { %121 = vst [vmem:[%s175_s4 + $0x8] sm:$0xff] %v117_v27  }

// kernel: image_transform_net.37
= control target key start
LH: loop header
LB: loop body
LE: loop exit
PB: predicated region body
PF: predicated region fallthrough
CT: control target
= control target key end

     0   :  { %vm989_vm0 = vcmask 1040384   ;;  %vm991_vm1 = vcmask 1041408   ;;  %s1650_s1 = inlined_call_operand.vmem [shape: bf16[1152,128], index: 1, kind: input, shape index: {}]   ;;  %s1651_s0 = inlined_call_operand.vmem [shape: bf16[32,1152], index: 0, kind: input, shape index: {}]   ;;  %s1652_s2 = inlined_call_operand.vmem [shape: bf16[32,128], index: 2, kind: output, shape index: {0}]   ;;  %s1653_s3 = inlined_call_operand.vmem [shape: f32[8,128], index: 3, kind: output, shape index: {1}]  }
   0x1   :  { %v1253_v0 = vld [vmem:[%s1650_s1 + $0x40] sm:$0xff]   ;;  %v1257_v4 = vld [vmem:[%s1650_s1 + $0x48] sm:$0xff]   ;;  %v1261_v8 = vld [vmem:[%s1650_s1 + $0x50] sm:$0xff]  }
   0x2   :  { %v1254_v1 = vld [vmem:[%s1650_s1 + $0xc0] sm:$0xff]   ;;  %1111 = vmatprep.subr.bf16.mxu0 %v1253_v0  ;;  %v1258_v5 = vld [vmem:[%s1650_s1 + $0xc8] sm:$0xff]   ;;  %v1262_v9 = vld [vmem:[%s1650_s1 + $0xd0] sm:$0xff]  }
   0x3   :  { %v1255_v2 = vld [vmem:[%s1650_s1] sm:$0xff]   ;;  %1139 = vmatprep.subr.bf16.mxu1 %v1254_v1  ;;  %v1259_v6 = vld [vmem:[%s1650_s1 + $0x8] sm:$0xff]   ;;  %v1263_v10 = vld [vmem:[%s1650_s1 + $0x10] sm:$0xff]  }
   0x4   :  { %v1256_v3 = vld [vmem:[%s1650_s1 + $0x80] sm:$0xff]   ;;  %1112 = vmatpush3.bf16.msra.mxu0 %v1255_v2  ;;  %v1260_v7 = vld [vmem:[%s1650_s1 + $0x88] sm:$0xff]   ;;  %v1264_v11 = vld [vmem:[%s1650_s1 + $0x90] sm:$0xff]  }
   0x5   :  { %1140 = vmatpush3.bf16.msra.mxu1 %v1256_v3  ;;  %1113 = vmatprep.subr.bf16.mxu0 %v1257_v4  ;;  %v1265_v12 = vld [vmem:[%s1650_s1 + $0x58] sm:$0xff]   ;;  %v1269_v16 = vld [vmem:[%s1650_s1 + $0x60] sm:$0xff]   ;;  %v1273_v20 = vld [vmem:[%s1650_s1 + $0x68] sm:$0xff]  }
   0x6   :  { %1141 = vmatprep.subr.bf16.mxu1 %v1258_v5  ;;  %v1266_v13 = vld [vmem:[%s1650_s1 + $0xd8] sm:$0xff]   ;;  %v1270_v17 = vld [vmem:[%s1650_s1 + $0xe0] sm:$0xff]   ;;  %v1274_v21 = vld [vmem:[%s1650_s1 + $0xe8] sm:$0xff]  }
   0x7   :  { %v1267_v14 = vld [vmem:[%s1650_s1 + $0x18] sm:$0xff]   ;;  %v1271_v18 = vld [vmem:[%s1650_s1 + $0x20] sm:$0xff]   ;;  %v1275_v22 = vld [vmem:[%s1650_s1 + $0x28] sm:$0xff]  }
   0x8   :  { %1114 = vmatpush3.bf16.msra.mxu0 %v1259_v6  ;;  %v1268_v15 = vld [vmem:[%s1650_s1 + $0x98] sm:$0xff]   ;;  %v1272_v19 = vld [vmem:[%s1650_s1 + $0xa0] sm:$0xff]   ;;  %v1276_v23 = vld [vmem:[%s1650_s1 + $0xa8] sm:$0xff]  }
   0x9   :  { %1142 = vmatpush3.bf16.msra.mxu1 %v1260_v7  ;;  %1115 = vmatprep.subr.bf16.mxu0 %v1261_v8  ;;  %v1277_v24 = vld [vmem:[%s1650_s1 + $0x70] sm:$0xff]   ;;  %v1281_v28 = vld [vmem:[%s1650_s1 + $0x78] sm:$0xff]   ;;  %v1285_v32 = vld [vmem:[%s1651_s0] ss:$36 sps:$4 sm:$0xff]  }
   0xa   :  { %1143 = vmatprep.subr.bf16.mxu1 %v1262_v9  ;;  %v1278_v25 = vld [vmem:[%s1650_s1 + $0xf0] sm:$0xff]   ;;  %v1282_v29 = vld [vmem:[%s1650_s1 + $0xf8] sm:$0xff]   ;;  %v1287_v33 = vld [vmem:[%s1651_s0 + $0x4] ss:$36 sps:$4 sm:$0xff]  }
   0xb   :  { %v1279_v26 = vld [vmem:[%s1650_s1 + $0x30] sm:$0xff]   ;;  %v1283_v30 = vld [vmem:[%s1650_s1 + $0x38] sm:$0xff]   ;;  %v1288_v34 = vld [vmem:[%s1651_s0 + $0x8] ss:$36 sps:$4 sm:$0xff]   ;;  %734 = vmatprep.mubr.bf16.mxu0 %v1287_v33 }
   0xc   :  { %1116 = vmatpush3.bf16.msra.mxu0 %v1263_v10  ;;  %v1280_v27 = vld [vmem:[%s1650_s1 + $0xb0] sm:$0xff]   ;;  %v1284_v31 = vld [vmem:[%s1650_s1 + $0xb8] sm:$0xff]   ;;  %v1291_v36 = vld [vmem:[%s1650_s1 + $0x140] sm:$0xff]  }
   0xd   :  { %1144 = vmatpush3.bf16.msra.mxu1 %v1264_v11  ;;  %1117 = vmatprep.subr.bf16.mxu0 %v1265_v12  ;;  %v1290_v35 = vld [vmem:[%s1651_s0 + $0xc] ss:$36 sps:$4 sm:$0xff]   ;;  %v1292_v37 = vld [vmem:[%s1650_s1 + $0x100] sm:$0xff]   ;;  %v1303_v48 = vld [vmem:[%s1650_s1 + $0x158] sm:$0xff]  }
   0xe   :  { %1145 = vmatprep.subr.bf16.mxu1 %v1266_v13  ;;  %783 = vmatprep.mubr.bf16.mxu1 %v1290_v35  ;;  %v1293_v38 = vld [vmem:[%s1650_s1 + $0x1c0] sm:$0xff]   ;;  %v1295_v40 = vld [vmem:[%s1650_s1 + $0x148] sm:$0xff]   ;;  %v1299_v44 = vld [vmem:[%s1650_s1 + $0x150] sm:$0xff]  }
   0xf   :  { %v1294_v39 = vld [vmem:[%s1650_s1 + $0x180] sm:$0xff]   ;;  %v1296_v41 = vld [vmem:[%s1650_s1 + $0x108] sm:$0xff]   ;;  %v1300_v45 = vld [vmem:[%s1650_s1 + $0x110] sm:$0xff]  }
  0x10   :  { %1118 = vmatpush3.bf16.msra.mxu0 %v1267_v14  ;;  %v1297_v42 = vld [vmem:[%s1650_s1 + $0x1c8] sm:$0xff]   ;;  %v1301_v46 = vld [vmem:[%s1650_s1 + $0x1d0] sm:$0xff]   ;;  %v1304_v49 = vld [vmem:[%s1650_s1 + $0x118] sm:$0xff]  }
  0x11   :  { %1146 = vmatpush3.bf16.msra.mxu1 %v1268_v15  ;;  %1119 = vmatprep.subr.bf16.mxu0 %v1269_v16  ;;  %v1298_v43 = vld [vmem:[%s1650_s1 + $0x188] sm:$0xff]   ;;  %v1302_v47 = vld [vmem:[%s1650_s1 + $0x190] sm:$0xff]   ;;  %v1305_v50 = vld [vmem:[%s1650_s1 + $0x1d8] sm:$0xff]  }
  0x12   :  { %1147 = vmatprep.subr.bf16.mxu1 %v1270_v17  ;;  %v1306_v51 = vld [vmem:[%s1650_s1 + $0x198] sm:$0xff]   ;;  %v1307_v52 = vld [vmem:[%s1650_s1 + $0x160] sm:$0xff]   ;;  %v1311_v56 = vld [vmem:[%s1650_s1 + $0x168] sm:$0xff]  }
  0x13   :  { %v1308_v53 = vld [vmem:[%s1650_s1 + $0x120] sm:$0xff]   ;;  %v1312_v57 = vld [vmem:[%s1651_s0 + $0x4c] ss:$36 sps:$4 sm:$0xff]   ;;  %v1314_v58 = vld [vmem:[%s1651_s0 + $0x54] ss:$36 sps:$4 sm:$0xff]  }
  0x14   :  { %1120 = vmatpush3.bf16.msra.mxu0 %v1271_v18  ;;  %v1309_v54 = vld [vmem:[%s1650_s1 + $0x1e0] sm:$0xff]   ;;  %v1316_v59 = vld [vmem:[%s1650_s1 + $0x128] sm:$0xff]   ;;  %v1318_v61 = vld [vmem:[%s1651_s0 + $0x50] ss:$36 sps:$4 sm:$0xff]  }
  0x15   :  { %1148 = vmatpush3.bf16.msra.mxu1 %v1272_v19  ;;  %1121 = vmatprep.subr.bf16.mxu0 %v1273_v20  ;;  %v1310_v55 = vld [vmem:[%s1650_s1 + $0x1a0] sm:$0xff]   ;;  %v1317_v60 = vld [vmem:[%s1651_s0 + $0x48] ss:$36 sps:$4 sm:$0xff]   ;;  %v1321_v0 = vld [vmem:[%s1650_s1 + $0x170] sm:$0xff]  }
  0x16   :  { %1149 = vmatprep.subr.bf16.mxu1 %v1274_v21  ;;  %v1319_v62 = vld [vmem:[%s1650_s1 + $0x1e8] sm:$0xff]   ;;  %v1322_v1 = vld [vmem:[%s1650_s1 + $0x130] sm:$0xff]   ;;  %v1325_v4 = vld [vmem:[%s1650_s1 + $0x178] sm:$0xff]  }
  0x17   :  { %v1320_v63 = vld [vmem:[%s1650_s1 + $0x1a8] sm:$0xff]   ;;  %v1323_v2 = vld [vmem:[%s1650_s1 + $0x1f0] sm:$0xff]   ;;  %v1326_v5 = vld [vmem:[%s1650_s1 + $0x138] sm:$0xff]  }
  0x18   :  { %1122 = vmatpush3.bf16.msra.mxu0 %v1275_v22  ;;  %v1324_v3 = vld [vmem:[%s1650_s1 + $0x1b0] sm:$0xff]   ;;  %v1327_v6 = vld [vmem:[%s1650_s1 + $0x1f8] sm:$0xff]   ;;  %v1332_v10 = vld [vmem:[%s1650_s1 + $0x200] sm:$0xff]  }
  0x19   :  { %1150 = vmatpush3.bf16.msra.mxu1 %v1276_v23  ;;  %1123 = vmatprep.subr.bf16.mxu0 %v1277_v24  ;;  %v1328_v7 = vld [vmem:[%s1651_s0 + $0x10] ss:$36 sps:$4 sm:$0xff]   ;;  %v1331_v9 = vld [vmem:[%s1650_s1 + $0x1b8] sm:$0xff]   ;;  %v1336_v13 = vld [vmem:[%s1650_s1 + $0x208] sm:$0xff]  }
  0x1a   :  { %1151 = vmatprep.subr.bf16.mxu1 %v1278_v25  ;;  %v1330_v8 = vld [vmem:[%s1651_s0 + $0x14] ss:$36 sps:$4 sm:$0xff]   ;;  %v1335_v12 = vld [vmem:[%s1651_s0 + $0x1c] ss:$36 sps:$4 sm:$0xff]   ;;  %v1341_v17 = vld [vmem:[%s1651_s0 + $0x64] ss:$36 sps:$4 sm:$0xff]  }
  0x1b   :  { %v1333_v11 = vld [vmem:[%s1651_s0 + $0x18] ss:$36 sps:$4 sm:$0xff]   ;;  %v1340_v16 = vld [vmem:[%s1650_s1 + $0x210] sm:$0xff]   ;;  %v1343_v18 = vld [vmem:[%s1651_s0 + $0x60] ss:$36 sps:$4 sm:$0xff]  }
  0x1c   :  { %1124 = vmatpush3.bf16.msra.mxu0 %v1279_v26  ;;  %v1337_v14 = vld [vmem:[%s1651_s0 + $0x5c] ss:$36 sps:$4 sm:$0xff]   ;;  %v1346_v22 = vld [vmem:[%s1650_s1 + $0x228] sm:$0xff]   ;;  %v1347_v23 = vld [vmem:[%s1650_s1 + $0x230] sm:$0xff]  }
  0x1d   :  { %1152 = vmatpush3.bf16.msra.mxu1 %v1280_v27  ;;  %1125 = vmatprep.subr.bf16.mxu0 %v1281_v28  ;;  %v1339_v15 = vld [vmem:[%s1651_s0 + $0x58] ss:$36 sps:$4 sm:$0xff]   ;;  %v1345_v20 = vld [vmem:[%s1650_s1 + $0x220] sm:$0xff]   ;;  %v1350_v25 = vld [vmem:[%s1651_s0 + $0x68] ss:$36 sps:$4 sm:$0xff]  }
  0x1e   :  { %1153 = vmatprep.subr.bf16.mxu1 %v1282_v29  ;;  %v1344_v19 = vld [vmem:[%s1650_s1 + $0x218] sm:$0xff]   ;;  %v1349_v21 = vld [vmem:[%s1651_s0 + $0x20] ss:$36 sps:$4 sm:$0xff]  }
  0x1f   :  { %v1348_v24 = vld [vmem:[%s1650_s1 + $0x238] sm:$0xff]  }
  0x20   :  { %1126 = vmatpush3.bf16.msra.mxu0 %v1283_v30 }
  0x21   :  { %1154 = vmatpush3.bf16.msra.mxu1 %v1284_v31  ;;  %1167 = vmatprep.subr.bf16.mxu0 %v1291_v36 }
  0x22   :  { %1195 = vmatprep.subr.bf16.mxu1 %v1293_v38 }
  0x23   :  { %735 = vmatmul.mubr.bf16.vlgmr.msra.gmra.mrb[0].mxu0 %v1285_v32 }
  0x24   :  { %784 = vmatmul.mubr.bf16.vlgmr.msra.gmra.mrb[0].mxu1 %v1288_v34  ;;  %1168 = vmatpush3.bf16.msra.mxu0 %v1292_v37 }
  0x25   :  { %1196 = vmatpush3.bf16.msra.mxu1 %v1294_v39  ;;  %1169 = vmatprep.subr.bf16.mxu0 %v1295_v40 }
  0x26   :  { %1197 = vmatprep.subr.bf16.mxu1 %v1297_v42  ;;  %742 = vmatprep.mubr.bf16.mxu0 %v1312_v57 }
  0x27   :  { %791 = vmatprep.mubr.bf16.mxu1 %v1314_v58 }
  0x28   :  { %1170 = vmatpush3.bf16.msra.mxu0 %v1296_v41 }
  0x29   :  { %1198 = vmatpush3.bf16.msra.mxu1 %v1298_v43  ;;  %1171 = vmatprep.subr.bf16.mxu0 %v1299_v44 }
  0x2a   :  { %1199 = vmatprep.subr.bf16.mxu1 %v1301_v46 }
  0x2b   :  { %743 = vmatmul.mubr.bf16.gmra.mrb[4].mxu0 %v1317_v60 }
  0x2c   :  { %1172 = vmatpush3.bf16.msra.mxu0 %v1300_v45  ;;  %792 = vmatmul.mubr.bf16.gmra.mrb[4].mxu1 %v1318_v61 }
  0x2d   :  { %1200 = vmatpush3.bf16.msra.mxu1 %v1302_v47  ;;  %1173 = vmatprep.subr.bf16.mxu0 %v1303_v48 }
  0x2e   :  { %1201 = vmatprep.subr.bf16.mxu1 %v1305_v50  ;;  %832 = vmatprep.mubr.bf16.mxu0 %v1330_v8 }
  0x2f   :  { %881 = vmatprep.mubr.bf16.mxu1 %v1335_v12 }
  0x30   :  { %1174 = vmatpush3.bf16.msra.mxu0 %v1304_v49 }
  0x31   :  { %1202 = vmatpush3.bf16.msra.mxu1 %v1306_v51  ;;  %1175 = vmatprep.subr.bf16.mxu0 %v1307_v52 }
  0x32   :  { %1203 = vmatprep.subr.bf16.mxu1 %v1309_v54 }
  0x34   :  { %1176 = vmatpush3.bf16.msra.mxu0 %v1308_v53 }
  0x35   :  { %1204 = vmatpush3.bf16.msra.mxu1 %v1310_v55  ;;  %1177 = vmatprep.subr.bf16.mxu0 %v1311_v56 }
  0x36   :  { %1205 = vmatprep.subr.bf16.mxu1 %v1319_v62 }
  0x38   :  { %1178 = vmatpush3.bf16.msra.mxu0 %v1316_v59 }
  0x39   :  { %1206 = vmatpush3.bf16.msra.mxu1 %v1320_v63  ;;  %1179 = vmatprep.subr.bf16.mxu0 %v1321_v0 }
  0x3a   :  { %1207 = vmatprep.subr.bf16.mxu1 %v1323_v2 }
  0x3c   :  { %1180 = vmatpush3.bf16.msra.mxu0 %v1322_v1 }
  0x3d   :  { %1208 = vmatpush3.bf16.msra.mxu1 %v1324_v3  ;;  %1181 = vmatprep.subr.bf16.mxu0 %v1325_v4 }
  0x3e   :  { %1209 = vmatprep.subr.bf16.mxu1 %v1327_v6 }
  0x40   :  { %1182 = vmatpush3.bf16.msra.mxu0 %v1326_v5 }
  0x41   :  { %1210 = vmatpush3.bf16.msra.mxu1 %v1331_v9  ;;  %1233 = vmatprep.subr.bf16.mxu0 %v1332_v10 }
  0x43   :  { %833 = vmatmul.mubr.bf16.vlgmr.msra.gmra.mrb[8].mxu0 %v1328_v7 }
  0x44   :  { %1234 = vmatpush3.bf16.msra.mxu0 %v1332_v10  ;;  %882 = vmatmul.mubr.bf16.vlgmr.msra.gmra.mrb[8].mxu1 %v1333_v11 }
  0x45   :  { %1235 = vmatprep.subr.bf16.mxu0 %v1336_v13  ;;  %840 = vmatprep.mubr.bf16.mxu0 %v1337_v14 }
  0x46   :  { %889 = vmatprep.mubr.bf16.mxu1 %v1341_v17 }
  0x48   :  { %1236 = vmatpush3.bf16.msra.mxu0 %v1336_v13 }
  0x49   :  { %1237 = vmatprep.subr.bf16.mxu0 %v1340_v16 }
  0x4b   :  { %841 = vmatmul.mubr.bf16.gmra.mrb[12].mxu0 %v1339_v15 }
  0x4c   :  { %1238 = vmatpush3.bf16.msra.mxu0 %v1340_v16  ;;  %890 = vmatmul.mubr.bf16.gmra.mrb[12].mxu1 %v1343_v18 }
  0x4d   :  { %1239 = vmatprep.subr.bf16.mxu0 %v1344_v19  ;;  %1249 = vmatprep.mubr.bf16.mxu0 %v1349_v21 }
  0x50   :  { %1240 = vmatpush3.bf16.msra.mxu0 %v1344_v19 }
  0x51   :  { %1241 = vmatprep.subr.bf16.mxu0 %v1345_v20 }
  0x54   :  { %1242 = vmatpush3.bf16.msra.mxu0 %v1345_v20 }
  0x55   :  { %1243 = vmatprep.subr.bf16.mxu0 %v1346_v22 }
  0x58   :  { %1244 = vmatpush3.bf16.msra.mxu0 %v1346_v22 }
  0x59   :  { %1245 = vmatprep.subr.bf16.mxu0 %v1347_v23 }
  0x5c   :  { %1246 = vmatpush3.bf16.msra.mxu0 %v1347_v23 }
  0x5d   :  { %1247 = vmatprep.subr.bf16.mxu0 %v1348_v24 }
  0x60   :  { %1248 = vmatpush3.bf16.msra.mxu0 %v1348_v24 }
  0x63   :  { %1250 = vmatmul.mubr.bf16.vlgmr.msra.gmra.mrb[16].mxu0 %v1350_v25 }
  0xf6   :  { %v1127_v26 = vpop.f32.mrb[0].mxu0 }
  0xf7   :  { %v1155_v27 = vpop.f32.mrb[0].mxu1  ;;  %v1128_v28 = vpop.f32.mrb[1].mxu0 }
  0xf8   :  { %v1129_v29 = vadd.f32 %v1128_v28, %v1127_v26  ;;  %v1156_v30 = vpop.f32.mrb[1].mxu1  ;;  %v1130_v31 = vpop.f32.mrb[2].mxu0 }
  0xf9   :  { %v1157_v32 = vadd.f32 %v1156_v30, %v1155_v27  ;;  %v1158_v33 = vpop.f32.mrb[2].mxu1  ;;  %v1131_v34 = vpop.f32.mrb[3].mxu0 }
  0xfa   :  { %v1132_v35 = vadd.f32 %v1131_v34, %v1130_v31  ;;  %v1159_v36 = vpop.f32.mrb[3].mxu1 }
  0xfb   :  { %v786_v37 = vadd.f32 %v1157_v32, %v1129_v29  ;;  %v1160_v38 = vadd.f32 %v1159_v36, %v1158_v33 }
  0xfd   :  { %v789_v39 = vadd.f32 %v1160_v38, %v1132_v35 }
  0xfe   :  { %v1133_v40 = vpop.f32.mrb[4].mxu0 }
  0xff   :  { %v1161_v41 = vpop.f32.mrb[4].mxu1  ;;  %v1134_v42 = vpop.f32.mrb[5].mxu0 }
 0x100   :  { %v1162_v43 = vpop.f32.mrb[5].mxu1  ;;  %v1135_v44 = vadd.f32 %v1134_v42, %v1133_v40  ;;  %v1136_v46 = vpop.f32.mrb[6].mxu0 }
 0x101   :  { %v1163_v45 = vadd.f32 %v1162_v43, %v1161_v41  ;;  %v1164_v47 = vpop.f32.mrb[6].mxu1  ;;  %v1137_v48 = vpop.f32.mrb[7].mxu0 }
 0x102   :  { %v1165_v49 = vpop.f32.mrb[7].mxu1  ;;  %v1138_v51 = vadd.f32 %v1137_v48, %v1136_v46 }
 0x103   :  { %v794_v50 = vadd.f32 %v1163_v45, %v1135_v44  ;;  %v1166_v52 = vadd.f32 %v1165_v49, %v1164_v47 }
 0x105   :  { %v797_v53 = vadd.f32 %v1166_v52, %v1138_v51 }
 0x116   :  { %v1183_v54 = vpop.f32.mrb[8].mxu0 }
 0x117   :  { %v1184_v55 = vpop.f32.mrb[9].mxu0  ;;  %v1211_v58 = vpop.f32.mrb[8].mxu1 }
 0x118   :  { %v1185_v56 = vadd.f32 %v1184_v55, %v1183_v54  ;;  %v1186_v57 = vpop.f32.mrb[10].mxu0  ;;  %v1212_v62 = vpop.f32.mrb[9].mxu1 }
 0x119   :  { %v1187_v59 = vpop.f32.mrb[11].mxu0  ;;  %v1213_v63 = vadd.f32 %v1212_v62, %v1211_v58  ;;  %v1214_v0 = vpop.f32.mrb[10].mxu1 }
 0x11a   :  { %v835_v60 = vadd.f32 %v1185_v56, %v786_v37  ;;  %v1188_v61 = vadd.f32 %v1187_v59, %v1186_v57  ;;  %v1215_v2 = vpop.f32.mrb[11].mxu1 }
 0x11b   :  { %v1216_v3 = vadd.f32 %v1215_v2, %v1214_v0 }
 0x11c   :  { %v838_v1 = vadd.f32 %v1188_v61, %v789_v39  ;;  %v884_v4 = vadd.f32 %v1213_v63, %v835_v60 }
 0x11e   :  { %v1189_v5 = vpop.f32.mrb[12].mxu0  ;;  %v887_v7 = vadd.f32 %v1216_v3, %v838_v1 }
 0x11f   :  { %v1190_v6 = vpop.f32.mrb[13].mxu0  ;;  %v1217_v10 = vpop.f32.mrb[12].mxu1 }
 0x120   :  { %v1191_v8 = vadd.f32 %v1190_v6, %v1189_v5  ;;  %v1192_v9 = vpop.f32.mrb[14].mxu0  ;;  %v1218_v14 = vpop.f32.mrb[13].mxu1 }
 0x121   :  { %v1193_v11 = vpop.f32.mrb[15].mxu0  ;;  %v1219_v15 = vadd.f32 %v1218_v14, %v1217_v10  ;;  %v1220_v16 = vpop.f32.mrb[14].mxu1 }
 0x122   :  { %v843_v12 = vadd.f32 %v1191_v8, %v794_v50  ;;  %v1194_v13 = vadd.f32 %v1193_v11, %v1192_v9  ;;  %v1221_v18 = vpop.f32.mrb[15].mxu1 }
 0x123   :  { %v1222_v19 = vadd.f32 %v1221_v18, %v1220_v16 }
 0x124   :  { %v846_v17 = vadd.f32 %v1194_v13, %v797_v53  ;;  %v892_v20 = vadd.f32 %v1219_v15, %v843_v12 }
 0x126   :  { %v895_v21 = vadd.f32 %v1222_v19, %v846_v17 }
 0x136   :  { %v1251_v22 = vpop.f32.mrb[16].mxu0 }
 0x137   :  { %v941_v23 = vadd.f32 %v1251_v22, %v892_v20  ;;  %v932_v24 = vpop.f32.mrb[17].mxu0 }
 0x138   :  { %v933_v25 = vadd.f32 %v932_v24, %v884_v4  ;;  %v1252_v26 = vpop.f32.mrb[18].mxu0 }
 0x139   :  { %v944_v27 = vadd.f32 %v1252_v26, %v895_v21  ;;  %v935_v28 = vpop.f32.mrb[19].mxu0  ;;  %v978_v35 = vmul.f32 %v941_v23, %v941_v23 }
 0x13a   :  { %v936_v29 = vadd.f32 %v935_v28, %v887_v7  ;;  %v976_v31 = vmul.f32 %v933_v25, %v933_v25 }
 0x13b   :  { %v1108_v30 = vpack.c.bf16 %v944_v27, %v941_v23  ;;  %v979_v38 = vmul.f32 %v944_v27, %v944_v27 }
 0x13c   :  { %v1103_v32 = vpack.c.bf16 %v936_v29, %v933_v25  ;;  %v967_v33 = vadd.f32 %v936_v29, %v933_v25  ;;  %v977_v34 = vmul.f32 %v936_v29, %v936_v29 }
 0x13d   :  { %1110 = vst [vmem:[%s1652_s2 + $0x8] sm:$0xff] %v1108_v30  }
 0x13e   :  { %1104 = vst [vmem:[%s1652_s2] sm:$0xff] %v1103_v32   ;;  %v968_v36 = vadd.f32 %v967_v33, %v941_v23  ;;  %v980_v37 = vadd.f32 %v977_v34, %v976_v31 }
 0x140   :  { %v969_v39 = vadd.f32 %v968_v36, %v944_v27  ;;  %v981_v40 = vadd.f32 %v980_v37, %v978_v35 }
 0x142   :  { %v970_v41 = vrot.slane %v969_v39, 4  ;;  %v982_v42 = vadd.f32 %v981_v40, %v979_v38 }
 0x144   :  { %v971_v43 = vadd.f32 %v970_v41, %v969_v39  ;;  %v983_v44 = vrot.slane %v982_v42, 4 }
 0x146   :  { %v972_v45 = vrot.slane %v971_v43, 2  ;;  %v984_v46 = vadd.f32 %v983_v44, %v982_v42 }
 0x148   :  { %v973_v47 = vadd.f32 %v972_v45, %v971_v43  ;;  %v985_v48 = vrot.slane %v984_v46, 2 }
 0x14a   :  { %v974_v49 = vrot.slane %v973_v47, 1  ;;  %v986_v50 = vadd.f32 %v985_v48, %v984_v46 }
 0x14c   :  { %v987_v51 = vrot.slane %v986_v50, 1  ;;  %v975_v52 = vadd.f32 %v974_v49, %v973_v47 }
 0x14e   :  { %v988_v53 = vadd.f32 %v987_v51, %v986_v50 }
 0x150   :  { %v990_v54 = vsel %vm989_vm0, %v975_v52, %v988_v53 }
 0x151   :  { %v992_v55 = vsel %vm991_vm1, %v990_v54, 0.0 }
 0x152   :  { %993 = vst [vmem:[%s1653_s3] sm:$0xff] %v992_v55 }

// kernel: tile.23
= control target key start
LH: loop header
LB: loop body
LE: loop exit
PB: predicated region body
PF: predicated region fallthrough
CT: control target
= control target key end

     0   :  { %s22_s0 = inlined_call_operand.vmem [shape: f32[64], index: 0, kind: input, shape index: {}]   ;;  %s23_s1 = inlined_call_operand.vmem [shape: f32[4,64], index: 1, kind: output, shape index: {}]  }
   0x1   :  { %v4_v0 = vld [vmem:[%s22_s0] ss:$0 sm:$0xff] }
   0x2   :  { %5 = vst [vmem:[%s23_s1] sm:$0xf] %v4_v0 }

// kernel: image_transform_net.58
= control target key start
LH: loop header
LB: loop body
LE: loop exit
PB: predicated region body
PF: predicated region fallthrough
CT: control target
= control target key end

     0   :  { %v28_v0 = vlaneseq  ;;  %s164_s0 = inlined_call_operand.vmem [shape: bf16[32,256], index: 0, kind: input, shape index: {}]   ;;  %s165_s1 = inlined_call_operand.vmem [shape: f32[1,256], index: 1, kind: input, shape index: {}]   ;;  %s166_s2 = inlined_call_operand.vmem [shape: f32[1,256], index: 2, kind: input, shape index: {}]   ;;  %s167_s3 = inlined_call_operand.vmem [shape: bf16[32,256], index: 3, kind: output, shape index: {}]  }
   0x1   :  { %v14_v1 = vld [vmem:[%s164_s0] sm:$0xff]  ;;  %v15_v3 = vld [vmem:[%s164_s0 + $0x8] sm:$0xff]  ;;  %v16_v4 = vld [vmem:[%s164_s0 + $0x10] sm:$0xff] }
   0x2   :  { %v29_v2 = vshrl.u32 %v28_v0, 7  ;;  %v17_v5 = vld [vmem:[%s164_s0 + $0x18] sm:$0xff]  ;;  %v18_v6 = vunpack.c.l.bf16 %v14_v1  ;;  %v19_v7 = vunpack.c.h.bf16 %v14_v1  ;;  %v26_v8 = vld [vmem:[%s165_s1] sm:$0x3]  ;;  %v20_v12 = vunpack.c.l.bf16 %v15_v3 }
   0x3   :  { %v46_v9 = vld [vmem:[%s166_s2] sm:$0x3]  ;;  %v21_v13 = vunpack.c.h.bf16 %v15_v3  ;;  %v22_v14 = vunpack.c.l.bf16 %v16_v4  ;;  %v23_v15 = vunpack.c.h.bf16 %v16_v4  ;;  %v24_v16 = vunpack.c.l.bf16 %v17_v5 }
   0x4   :  { %v30_v10 = vsub.s32 0, %v29_v2  ;;  %v34_v11 = vsub.s32 1, %v29_v2  ;;  %v25_v17 = vunpack.c.h.bf16 %v17_v5 }
   0x6   :  { %v31_v18 = vrot.slane %v26_v8, %v30_v10  ;;  %v35_v19 = vrot.slane %v26_v8, %v34_v11  ;;  %v51_v20 = vrot.slane %v46_v9, %v30_v10  ;;  %v55_v21 = vrot.slane %v46_v9, %v34_v11 }
   0x8   :  { %v38_v22 = vmul.f32 %v31_v18, %v18_v6  ;;  %v39_v23 = vmul.f32 %v35_v19, %v19_v7  ;;  %v40_v24 = vmul.f32 %v31_v18, %v20_v12  ;;  %v41_v25 = vmul.f32 %v35_v19, %v21_v13 }
   0x9   :  { %v42_v26 = vmul.f32 %v31_v18, %v22_v14  ;;  %v43_v27 = vmul.f32 %v35_v19, %v23_v15  ;;  %v44_v28 = vmul.f32 %v31_v18, %v24_v16  ;;  %v45_v29 = vmul.f32 %v35_v19, %v25_v17 }
   0xa   :  { %v58_v30 = vadd.f32 %v51_v20, %v38_v22  ;;  %v59_v31 = vadd.f32 %v55_v21, %v39_v23  ;;  %v60_v32 = vadd.f32 %v51_v20, %v40_v24  ;;  %v61_v33 = vadd.f32 %v55_v21, %v41_v25 }
   0xb   :  { %v62_v34 = vadd.f32 %v51_v20, %v42_v26  ;;  %v63_v35 = vadd.f32 %v55_v21, %v43_v27  ;;  %v64_v36 = vadd.f32 %v51_v20, %v44_v28  ;;  %v65_v37 = vadd.f32 %v55_v21, %v45_v29 }
   0xc   :  { %v66_v38 = vmax.f32 %v58_v30, 0.0  ;;  %v67_v39 = vmax.f32 %v59_v31, 0.0  ;;  %v68_v40 = vmax.f32 %v60_v32, 0.0  ;;  %v69_v41 = vmax.f32 %v61_v33, 0.0 }
   0xd   :  { %v70_v42 = vmax.f32 %v62_v34, 0.0  ;;  %v71_v43 = vmax.f32 %v63_v35, 0.0  ;;  %v72_v44 = vmax.f32 %v64_v36, 0.0  ;;  %v73_v45 = vmax.f32 %v65_v37, 0.0 }
   0xe   :  { %v110_v46 = vpack.c.bf16 %v67_v39, %v66_v38  ;;  %v111_v47 = vpack.c.bf16 %v69_v41, %v68_v40 }
   0xf   :  { %v112_v48 = vpack.c.bf16 %v71_v43, %v70_v42  ;;  %v113_v49 = vpack.c.bf16 %v73_v45, %v72_v44 }
  0x10   :  { %98 = vst [vmem:[%s167_s3] sm:$0xff] %v110_v46  ;;  %99 = vst [vmem:[%s167_s3 + $0x8] sm:$0xff] %v111_v47 }
  0x11   :  { %100 = vst [vmem:[%s167_s3 + $0x10] sm:$0xff] %v112_v48  ;;  %101 = vst [vmem:[%s167_s3 + $0x18] sm:$0xff] %v113_v49 }

// kernel: image_transform_net.57
= control target key start
LH: loop header
LB: loop body
LE: loop exit
PB: predicated region body
PF: predicated region fallthrough
CT: control target
= control target key end

     0   :  { %vm1327_vm0 = vcmask 1040384   ;;  %vm1330_vm1 = vcmask 1041408   ;;  %s2329_s1 = inlined_call_operand.vmem [shape: bf16[1152,256], index: 1, kind: input, shape index: {}]   ;;  %s2330_s0 = inlined_call_operand.vmem [shape: bf16[32,1152], index: 0, kind: input, shape index: {}]   ;;  %s2331_s2 = inlined_call_operand.vmem [shape: bf16[32,256], index: 2, kind: output, shape index: {0}]   ;;  %s2332_s3 = inlined_call_operand.vmem [shape: f32[8,256], index: 3, kind: output, shape index: {1}]  }
   0x1   :  { %v1562_v0 = vld [vmem:[%s2329_s1 + $0x4] ss:$8 sps:$4 sm:$0xff]   ;;  %v1566_v2 = vld [vmem:[%s2329_s1] ss:$8 sps:$4 sm:$0xff]   ;;  %v1568_v4 = vld [vmem:[%s2329_s1 + $0x14] ss:$8 sps:$4 sm:$0xff]  }
   0x2   :  { %v1564_v1 = vld [vmem:[%s2329_s1 + $0x204] ss:$8 sps:$4 sm:$0xff]   ;;  %990 = vmatprep.subr.bf16.mxu1 %v1562_v0  ;;  %v1567_v3 = vld [vmem:[%s2329_s1 + $0x200] ss:$8 sps:$4 sm:$0xff]   ;;  %v1570_v5 = vld [vmem:[%s2329_s1 + $0x214] ss:$8 sps:$4 sm:$0xff]  }
   0x3   :  { %1096 = vmatprep.subr.bf16.mxu0 %v1564_v1  ;;  %991 = vmatpush1.bf16.msra.mxu1 %v1566_v2  ;;  %v1572_v6 = vld [vmem:[%s2329_s1 + $0x10] ss:$8 sps:$4 sm:$0xff]   ;;  %v1574_v8 = vld [vmem:[%s2329_s1 + $0x24] ss:$8 sps:$4 sm:$0xff]   ;;  %v1578_v10 = vld [vmem:[%s2329_s1 + $0x20] ss:$8 sps:$4 sm:$0xff]  }
   0x4   :  { %1097 = vmatpush1.bf16.msra.mxu0 %v1567_v3  ;;  %992 = vmatprep.subr.bf16.mxu1 %v1568_v4  ;;  %v1573_v7 = vld [vmem:[%s2329_s1 + $0x210] ss:$8 sps:$4 sm:$0xff]   ;;  %v1576_v9 = vld [vmem:[%s2329_s1 + $0x224] ss:$8 sps:$4 sm:$0xff]   ;;  %v1579_v11 = vld [vmem:[%s2329_s1 + $0x220] ss:$8 sps:$4 sm:$0xff]  }
   0x5   :  { %1098 = vmatprep.subr.bf16.mxu0 %v1570_v5  ;;  %v1580_v12 = vld [vmem:[%s2329_s1 + $0x34] ss:$8 sps:$4 sm:$0xff]   ;;  %v1584_v14 = vld [vmem:[%s2329_s1 + $0x30] ss:$8 sps:$4 sm:$0xff]   ;;  %v1586_v16 = vld [vmem:[%s2329_s1 + $0x44] ss:$8 sps:$4 sm:$0xff]  }
   0x6   :  { %v1582_v13 = vld [vmem:[%s2329_s1 + $0x234] ss:$8 sps:$4 sm:$0xff]   ;;  %v1585_v15 = vld [vmem:[%s2329_s1 + $0x230] ss:$8 sps:$4 sm:$0xff]   ;;  %v1588_v17 = vld [vmem:[%s2329_s1 + $0x244] ss:$8 sps:$4 sm:$0xff]  }
   0x7   :  { %993 = vmatpush1.bf16.msra.mxu1 %v1572_v6  ;;  %v1590_v18 = vld [vmem:[%s2329_s1 + $0x40] ss:$8 sps:$4 sm:$0xff]   ;;  %v1592_v20 = vld [vmem:[%s2329_s1 + $0x54] ss:$8 sps:$4 sm:$0xff]   ;;  %v1596_v22 = vld [vmem:[%s2329_s1 + $0x50] ss:$8 sps:$4 sm:$0xff]  }
   0x8   :  { %1099 = vmatpush1.bf16.msra.mxu0 %v1573_v7  ;;  %994 = vmatprep.subr.bf16.mxu1 %v1574_v8  ;;  %v1591_v19 = vld [vmem:[%s2329_s1 + $0x240] ss:$8 sps:$4 sm:$0xff]   ;;  %v1594_v21 = vld [vmem:[%s2329_s1 + $0x254] ss:$8 sps:$4 sm:$0xff]   ;;  %v1597_v23 = vld [vmem:[%s2329_s1 + $0x250] ss:$8 sps:$4 sm:$0xff]  }
   0x9   :  { %1100 = vmatprep.subr.bf16.mxu0 %v1576_v9  ;;  %v1598_v24 = vld [vmem:[%s2329_s1 + $0x64] ss:$8 sps:$4 sm:$0xff]   ;;  %v1602_v26 = vld [vmem:[%s2329_s1 + $0x60] ss:$8 sps:$4 sm:$0xff]   ;;  %v1604_v28 = vld [vmem:[%s2329_s1 + $0x74] ss:$8 sps:$4 sm:$0xff]  }
   0xa   :  { %v1600_v25 = vld [vmem:[%s2329_s1 + $0x264] ss:$8 sps:$4 sm:$0xff]   ;;  %v1603_v27 = vld [vmem:[%s2329_s1 + $0x260] ss:$8 sps:$4 sm:$0xff]   ;;  %v1606_v29 = vld [vmem:[%s2329_s1 + $0x274] ss:$8 sps:$4 sm:$0xff]  }
   0xb   :  { %995 = vmatpush1.bf16.msra.mxu1 %v1578_v10  ;;  %v1608_v30 = vld [vmem:[%s2329_s1 + $0x70] ss:$8 sps:$4 sm:$0xff]   ;;  %v1610_v32 = vld [vmem:[%s2329_s1 + $0x84] ss:$8 sps:$4 sm:$0xff]   ;;  %v1614_v34 = vld [vmem:[%s2329_s1 + $0x80] ss:$8 sps:$4 sm:$0xff]  }
   0xc   :  { %1101 = vmatpush1.bf16.msra.mxu0 %v1579_v11  ;;  %996 = vmatprep.subr.bf16.mxu1 %v1580_v12  ;;  %v1609_v31 = vld [vmem:[%s2329_s1 + $0x270] ss:$8 sps:$4 sm:$0xff]   ;;  %v1612_v33 = vld [vmem:[%s2329_s1 + $0x284] ss:$8 sps:$4 sm:$0xff]   ;;  %v1615_v35 = vld [vmem:[%s2329_s1 + $0x280] ss:$8 sps:$4 sm:$0xff]  }
   0xd   :  { %1102 = vmatprep.subr.bf16.mxu0 %v1582_v13  ;;  %v1616_v36 = vld [vmem:[%s2329_s1 + $0x94] ss:$8 sps:$4 sm:$0xff]   ;;  %v1620_v38 = vld [vmem:[%s2329_s1 + $0x90] ss:$8 sps:$4 sm:$0xff]   ;;  %v1622_v40 = vld [vmem:[%s2329_s1 + $0xa4] ss:$8 sps:$4 sm:$0xff]  }
   0xe   :  { %v1618_v37 = vld [vmem:[%s2329_s1 + $0x294] ss:$8 sps:$4 sm:$0xff]   ;;  %v1621_v39 = vld [vmem:[%s2329_s1 + $0x290] ss:$8 sps:$4 sm:$0xff]   ;;  %v1624_v41 = vld [vmem:[%s2329_s1 + $0x2a4] ss:$8 sps:$4 sm:$0xff]  }
   0xf   :  { %997 = vmatpush1.bf16.msra.mxu1 %v1584_v14  ;;  %v1626_v42 = vld [vmem:[%s2329_s1 + $0xa0] ss:$8 sps:$4 sm:$0xff]   ;;  %v1628_v44 = vld [vmem:[%s2329_s1 + $0xb4] ss:$8 sps:$4 sm:$0xff]   ;;  %v1632_v46 = vld [vmem:[%s2329_s1 + $0xb0] ss:$8 sps:$4 sm:$0xff]  }
  0x10   :  { %1103 = vmatpush1.bf16.msra.mxu0 %v1585_v15  ;;  %998 = vmatprep.subr.bf16.mxu1 %v1586_v16  ;;  %v1627_v43 = vld [vmem:[%s2329_s1 + $0x2a0] ss:$8 sps:$4 sm:$0xff]   ;;  %v1630_v45 = vld [vmem:[%s2329_s1 + $0x2b4] ss:$8 sps:$4 sm:$0xff]   ;;  %v1633_v47 = vld [vmem:[%s2329_s1 + $0x2b0] ss:$8 sps:$4 sm:$0xff]  }
  0x11   :  { %1104 = vmatprep.subr.bf16.mxu0 %v1588_v17  ;;  %v1660_v48 = vld [vmem:[%s2330_s0 + $0x4] ss:$36 sps:$4 sm:$0xff]   ;;  %v1666_v51 = vld [vmem:[%s2330_s0 + $0x14] ss:$36 sps:$4 sm:$0xff]  }
  0x12   :  { %v1634_v49 = vld [vmem:[%s2329_s1 + $0xc4] ss:$8 sps:$4 sm:$0xff]   ;;  %1022 = vmatprep.mubr.bf16.mxu1 %v1660_v48  ;;  %v1638_v52 = vld [vmem:[%s2329_s1 + $0xc0] ss:$8 sps:$4 sm:$0xff]   ;;  %v1640_v54 = vld [vmem:[%s2329_s1 + $0xd4] ss:$8 sps:$4 sm:$0xff]   ;;  %1128 = vmatprep.mubr.bf16.mxu0 %v1666_v51 }
  0x13   :  { %999 = vmatpush1.bf16.msra.mxu1 %v1590_v18  ;;  %v1636_v50 = vld [vmem:[%s2329_s1 + $0x2c4] ss:$8 sps:$4 sm:$0xff]   ;;  %v1639_v53 = vld [vmem:[%s2329_s1 + $0x2c0] ss:$8 sps:$4 sm:$0xff]   ;;  %v1642_v55 = vld [vmem:[%s2329_s1 + $0x2d4] ss:$8 sps:$4 sm:$0xff]  }
  0x14   :  { %1105 = vmatpush1.bf16.msra.mxu0 %v1591_v19  ;;  %1000 = vmatprep.subr.bf16.mxu1 %v1592_v20  ;;  %v1644_v56 = vld [vmem:[%s2329_s1 + $0xd0] ss:$8 sps:$4 sm:$0xff]   ;;  %v1646_v58 = vld [vmem:[%s2329_s1 + $0xe4] ss:$8 sps:$4 sm:$0xff]   ;;  %v1650_v60 = vld [vmem:[%s2329_s1 + $0xe0] ss:$8 sps:$4 sm:$0xff]  }
  0x15   :  { %1106 = vmatprep.subr.bf16.mxu0 %v1594_v21  ;;  %v1645_v57 = vld [vmem:[%s2329_s1 + $0x2d0] ss:$8 sps:$4 sm:$0xff]   ;;  %v1648_v59 = vld [vmem:[%s2329_s1 + $0x2e4] ss:$8 sps:$4 sm:$0xff]   ;;  %v1651_v61 = vld [vmem:[%s2329_s1 + $0x2e0] ss:$8 sps:$4 sm:$0xff]  }
  0x16   :  { %v1652_v62 = vld [vmem:[%s2329_s1 + $0xf4] ss:$8 sps:$4 sm:$0xff]   ;;  %v1656_v0 = vld [vmem:[%s2329_s1 + $0xf0] ss:$8 sps:$4 sm:$0xff]   ;;  %v1663_v2 = vld [vmem:[%s2329_s1 + $0x104] ss:$8 sps:$4 sm:$0xff]  }
  0x17   :  { %1001 = vmatpush1.bf16.msra.mxu1 %v1596_v22  ;;  %v1654_v63 = vld [vmem:[%s2329_s1 + $0x2f4] ss:$8 sps:$4 sm:$0xff]   ;;  %v1657_v1 = vld [vmem:[%s2329_s1 + $0x2f0] ss:$8 sps:$4 sm:$0xff]   ;;  %v1669_v3 = vld [vmem:[%s2329_s1 + $0x304] ss:$8 sps:$4 sm:$0xff]  }
  0x18   :  { %1107 = vmatpush1.bf16.msra.mxu0 %v1597_v23  ;;  %1002 = vmatprep.subr.bf16.mxu1 %v1598_v24  ;;  %v1658_v4 = vld [vmem:[%s2330_s0] ss:$36 sps:$4 sm:$0xff]   ;;  %v1664_v6 = vld [vmem:[%s2330_s0 + $0x10] ss:$36 sps:$4 sm:$0xff]  }
  0x19   :  { %1108 = vmatprep.subr.bf16.mxu0 %v1600_v25  ;;  %v1661_v5 = vld [vmem:[%s2329_s1 + $0x100] ss:$8 sps:$4 sm:$0xff]   ;;  %v1672_v8 = vld [vmem:[%s2329_s1 + $0x114] ss:$8 sps:$4 sm:$0xff]   ;;  %v1670_v10 = vld [vmem:[%s2329_s1 + $0x110] ss:$8 sps:$4 sm:$0xff]  }
  0x1a   :  { %v1667_v7 = vld [vmem:[%s2329_s1 + $0x300] ss:$8 sps:$4 sm:$0xff]   ;;  %v1675_v9 = vld [vmem:[%s2329_s1 + $0x314] ss:$8 sps:$4 sm:$0xff]   ;;  %v1673_v11 = vld [vmem:[%s2329_s1 + $0x310] ss:$8 sps:$4 sm:$0xff]  }
  0x1b   :  { %1003 = vmatpush1.bf16.msra.mxu1 %v1602_v26  ;;  %v1678_v12 = vld [vmem:[%s2329_s1 + $0x124] ss:$8 sps:$4 sm:$0xff]   ;;  %v1676_v14 = vld [vmem:[%s2329_s1 + $0x120] ss:$8 sps:$4 sm:$0xff]   ;;  %v1684_v16 = vld [vmem:[%s2329_s1 + $0x134] ss:$8 sps:$4 sm:$0xff]  }
  0x1c   :  { %1109 = vmatpush1.bf16.msra.mxu0 %v1603_v27  ;;  %1004 = vmatprep.subr.bf16.mxu1 %v1604_v28  ;;  %v1681_v13 = vld [vmem:[%s2329_s1 + $0x324] ss:$8 sps:$4 sm:$0xff]   ;;  %v1679_v15 = vld [vmem:[%s2329_s1 + $0x320] ss:$8 sps:$4 sm:$0xff]   ;;  %v1687_v17 = vld [vmem:[%s2329_s1 + $0x334] ss:$8 sps:$4 sm:$0xff]  }
  0x1d   :  { %1110 = vmatprep.subr.bf16.mxu0 %v1606_v29  ;;  %v1682_v18 = vld [vmem:[%s2329_s1 + $0x130] ss:$8 sps:$4 sm:$0xff]   ;;  %v1690_v20 = vld [vmem:[%s2329_s1 + $0x144] ss:$8 sps:$4 sm:$0xff]   ;;  %v1688_v22 = vld [vmem:[%s2329_s1 + $0x140] ss:$8 sps:$4 sm:$0xff]  }
  0x1e   :  { %v1685_v19 = vld [vmem:[%s2329_s1 + $0x330] ss:$8 sps:$4 sm:$0xff]   ;;  %v1693_v21 = vld [vmem:[%s2329_s1 + $0x344] ss:$8 sps:$4 sm:$0xff]   ;;  %v1691_v23 = vld [vmem:[%s2329_s1 + $0x340] ss:$8 sps:$4 sm:$0xff]  }
  0x1f   :  { %1005 = vmatpush1.bf16.msra.mxu1 %v1608_v30  ;;  %v1696_v24 = vld [vmem:[%s2329_s1 + $0x154] ss:$8 sps:$4 sm:$0xff]   ;;  %v1694_v26 = vld [vmem:[%s2329_s1 + $0x150] ss:$8 sps:$4 sm:$0xff]   ;;  %v1702_v28 = vld [vmem:[%s2329_s1 + $0x164] ss:$8 sps:$4 sm:$0xff]  }
  0x20   :  { %1111 = vmatpush1.bf16.msra.mxu0 %v1609_v31  ;;  %1006 = vmatprep.subr.bf16.mxu1 %v1610_v32  ;;  %v1699_v25 = vld [vmem:[%s2329_s1 + $0x354] ss:$8 sps:$4 sm:$0xff]   ;;  %v1697_v27 = vld [vmem:[%s2329_s1 + $0x350] ss:$8 sps:$4 sm:$0xff]   ;;  %v1752_v31 = vld [vmem:[%s2330_s0 + $0x48] ss:$36 sps:$4 sm:$0xff]  }
  0x21   :  { %1112 = vmatprep.subr.bf16.mxu0 %v1612_v33  ;;  %v1748_v29 = vld [vmem:[%s2330_s0 + $0x4c] ss:$36 sps:$4 sm:$0xff]   ;;  %v1750_v30 = vld [vmem:[%s2330_s0 + $0x5c] ss:$36 sps:$4 sm:$0xff]  }
  0x22   :  { %v1705_v32 = vld [vmem:[%s2329_s1 + $0x364] ss:$8 sps:$4 sm:$0xff]   ;;  %v1756_v33 = vld [vmem:[%s2330_s0 + $0x58] ss:$36 sps:$4 sm:$0xff]  }
  0x23   :  { %1007 = vmatpush1.bf16.msra.mxu1 %v1614_v34  ;;  %v1700_v34 = vld [vmem:[%s2329_s1 + $0x160] ss:$8 sps:$4 sm:$0xff]   ;;  %v1718_v48 = vld [vmem:[%s2329_s1 + $0x190] ss:$8 sps:$4 sm:$0xff]   ;;  %v1729_v51 = vld [vmem:[%s2329_s1 + $0x3a4] ss:$8 sps:$4 sm:$0xff]  }
  0x24   :  { %1113 = vmatpush1.bf16.msra.mxu0 %v1615_v35  ;;  %1008 = vmatprep.subr.bf16.mxu1 %v1616_v36  ;;  %v1703_v35 = vld [vmem:[%s2329_s1 + $0x360] ss:$8 sps:$4 sm:$0xff]   ;;  %v1708_v36 = vld [vmem:[%s2329_s1 + $0x174] ss:$8 sps:$4 sm:$0xff]  }
  0x25   :  { %1114 = vmatprep.subr.bf16.mxu0 %v1618_v37  ;;  %v1711_v37 = vld [vmem:[%s2329_s1 + $0x374] ss:$8 sps:$4 sm:$0xff]  }
  0x27   :  { %1009 = vmatpush1.bf16.msra.mxu1 %v1620_v38  ;;  %v1706_v38 = vld [vmem:[%s2329_s1 + $0x170] ss:$8 sps:$4 sm:$0xff]  }
  0x28   :  { %1115 = vmatpush1.bf16.msra.mxu0 %v1621_v39  ;;  %1010 = vmatprep.subr.bf16.mxu1 %v1622_v40  ;;  %v1709_v39 = vld [vmem:[%s2329_s1 + $0x370] ss:$8 sps:$4 sm:$0xff]   ;;  %v1714_v40 = vld [vmem:[%s2329_s1 + $0x184] ss:$8 sps:$4 sm:$0xff]  }
  0x29   :  { %1116 = vmatprep.subr.bf16.mxu0 %v1624_v41  ;;  %v1768_v41 = vld [vmem:[%s2330_s0 + $0xc] ss:$36 sps:$4 sm:$0xff]  }
  0x2b   :  { %1011 = vmatpush1.bf16.msra.mxu1 %v1626_v42  ;;  %v1717_v42 = vld [vmem:[%s2329_s1 + $0x384] ss:$8 sps:$4 sm:$0xff]  }
  0x2c   :  { %1117 = vmatpush1.bf16.msra.mxu0 %v1627_v43  ;;  %1012 = vmatprep.subr.bf16.mxu1 %v1628_v44  ;;  %v1771_v43 = vld [vmem:[%s2330_s0 + $0x1c] ss:$36 sps:$4 sm:$0xff]  }
  0x2d   :  { %1118 = vmatprep.subr.bf16.mxu0 %v1630_v45  ;;  %v1712_v44 = vld [vmem:[%s2329_s1 + $0x180] ss:$8 sps:$4 sm:$0xff]  }
  0x2e   :  { %v1715_v45 = vld [vmem:[%s2329_s1 + $0x380] ss:$8 sps:$4 sm:$0xff]  }
  0x2f   :  { %1013 = vmatpush1.bf16.msra.mxu1 %v1632_v46  ;;  %v1720_v46 = vld [vmem:[%s2329_s1 + $0x194] ss:$8 sps:$4 sm:$0xff]  }
  0x30   :  { %1119 = vmatpush1.bf16.msra.mxu0 %v1633_v47  ;;  %1014 = vmatprep.subr.bf16.mxu1 %v1634_v49  ;;  %v1723_v47 = vld [vmem:[%s2329_s1 + $0x394] ss:$8 sps:$4 sm:$0xff]   ;;  %v1721_v49 = vld [vmem:[%s2329_s1 + $0x390] ss:$8 sps:$4 sm:$0xff]  }
  0x31   :  { %1120 = vmatprep.subr.bf16.mxu0 %v1636_v50  ;;  %v1726_v50 = vld [vmem:[%s2329_s1 + $0x1a4] ss:$8 sps:$4 sm:$0xff]  }
  0x33   :  { %1015 = vmatpush1.bf16.msra.mxu1 %v1638_v52  ;;  %v1724_v52 = vld [vmem:[%s2329_s1 + $0x1a0] ss:$8 sps:$4 sm:$0xff]  }
  0x34   :  { %1121 = vmatpush1.bf16.msra.mxu0 %v1639_v53  ;;  %1016 = vmatprep.subr.bf16.mxu1 %v1640_v54  ;;  %v1727_v53 = vld [vmem:[%s2329_s1 + $0x3a0] ss:$8 sps:$4 sm:$0xff]   ;;  %v1732_v54 = vld [vmem:[%s2329_s1 + $0x1b4] ss:$8 sps:$4 sm:$0xff]  }
  0x35   :  { %1122 = vmatprep.subr.bf16.mxu0 %v1642_v55  ;;  %v1735_v55 = vld [vmem:[%s2329_s1 + $0x3b4] ss:$8 sps:$4 sm:$0xff]  }
  0x37   :  { %1017 = vmatpush1.bf16.msra.mxu1 %v1644_v56  ;;  %v1730_v56 = vld [vmem:[%s2329_s1 + $0x1b0] ss:$8 sps:$4 sm:$0xff]  }
  0x38   :  { %1123 = vmatpush1.bf16.msra.mxu0 %v1645_v57  ;;  %1018 = vmatprep.subr.bf16.mxu1 %v1646_v58  ;;  %v1733_v57 = vld [vmem:[%s2329_s1 + $0x3b0] ss:$8 sps:$4 sm:$0xff]   ;;  %v1738_v58 = vld [vmem:[%s2329_s1 + $0x1c4] ss:$8 sps:$4 sm:$0xff]  }
  0x39   :  { %1124 = vmatprep.subr.bf16.mxu0 %v1648_v59  ;;  %v1741_v59 = vld [vmem:[%s2329_s1 + $0x3c4] ss:$8 sps:$4 sm:$0xff]  }
  0x3b   :  { %1019 = vmatpush1.bf16.msra.mxu1 %v1650_v60  ;;  %v1736_v60 = vld [vmem:[%s2329_s1 + $0x1c0] ss:$8 sps:$4 sm:$0xff]  }
  0x3c   :  { %1125 = vmatpush1.bf16.msra.mxu0 %v1651_v61  ;;  %1020 = vmatprep.subr.bf16.mxu1 %v1652_v62  ;;  %v1739_v61 = vld [vmem:[%s2329_s1 + $0x3c0] ss:$8 sps:$4 sm:$0xff]   ;;  %v1744_v62 = vld [vmem:[%s2329_s1 + $0x1d4] ss:$8 sps:$4 sm:$0xff]  }
  0x3d   :  { %1126 = vmatprep.subr.bf16.mxu0 %v1654_v63  ;;  %v1747_v63 = vld [vmem:[%s2329_s1 + $0x3d4] ss:$8 sps:$4 sm:$0xff]  }
  0x3f   :  { %1021 = vmatpush1.bf16.msra.mxu1 %v1656_v0  ;;  %v1742_v0 = vld [vmem:[%s2329_s1 + $0x1d0] ss:$8 sps:$4 sm:$0xff]  }
  0x40   :  { %1127 = vmatpush1.bf16.msra.mxu0 %v1657_v1  ;;  %1043 = vmatprep.subr.bf16.mxu1 %v1663_v2  ;;  %v1745_v1 = vld [vmem:[%s2329_s1 + $0x3d0] ss:$8 sps:$4 sm:$0xff]   ;;  %v1755_v2 = vld [vmem:[%s2329_s1 + $0x1e4] ss:$8 sps:$4 sm:$0xff]  }
  0x41   :  { %1149 = vmatprep.subr.bf16.mxu0 %v1669_v3  ;;  %v1759_v3 = vld [vmem:[%s2329_s1 + $0x3e4] ss:$8 sps:$4 sm:$0xff]  }
  0x42   :  { %1023 = vmatmul.mubr.bf16.vlgmr.msra.gmra.mrb[0].mxu1 %v1658_v4  ;;  %v1753_v4 = vld [vmem:[%s2329_s1 + $0x1e0] ss:$8 sps:$4 sm:$0xff]  }
  0x43   :  { %1129 = vmatmul.mubr.bf16.vlgmr.msra.gmra.mrb[0].mxu0 %v1664_v6  ;;  %1044 = vmatpush1.bf16.msra.mxu1 %v1661_v5  ;;  %v1757_v5 = vld [vmem:[%s2329_s1 + $0x3e0] ss:$8 sps:$4 sm:$0xff]   ;;  %v1762_v6 = vld [vmem:[%s2329_s1 + $0x1f4] ss:$8 sps:$4 sm:$0xff]  }
  0x44   :  { %1150 = vmatpush1.bf16.msra.mxu0 %v1667_v7  ;;  %1045 = vmatprep.subr.bf16.mxu1 %v1672_v8  ;;  %v1765_v7 = vld [vmem:[%s2329_s1 + $0x3f4] ss:$8 sps:$4 sm:$0xff]   ;;  %v1760_v8 = vld [vmem:[%s2329_s1 + $0x1f0] ss:$8 sps:$4 sm:$0xff]  }
  0x45   :  { %1151 = vmatprep.subr.bf16.mxu0 %v1675_v9  ;;  %1032 = vmatprep.mubr.bf16.mxu1 %v1748_v29  ;;  %v1763_v9 = vld [vmem:[%s2329_s1 + $0x3f0] ss:$8 sps:$4 sm:$0xff]   ;;  %v1798_v29 = vld [vmem:[%s2329_s1 + $0x464] ss:$8 sps:$4 sm:$0xff]  }
  0x46   :  { %1138 = vmatprep.mubr.bf16.mxu0 %v1750_v30  ;;  %v1796_v30 = vld [vmem:[%s2329_s1 + $0x460] ss:$8 sps:$4 sm:$0xff]  }
  0x47   :  { %1046 = vmatpush1.bf16.msra.mxu1 %v1670_v10  ;;  %v1774_v10 = vld [vmem:[%s2329_s1 + $0x404] ss:$8 sps:$4 sm:$0xff]  }
  0x48   :  { %1152 = vmatpush1.bf16.msra.mxu0 %v1673_v11  ;;  %1047 = vmatprep.subr.bf16.mxu1 %v1678_v12  ;;  %v1766_v11 = vld [vmem:[%s2330_s0 + $0x8] ss:$36 sps:$4 sm:$0xff]   ;;  %v1769_v12 = vld [vmem:[%s2330_s0 + $0x18] ss:$36 sps:$4 sm:$0xff]  }
  0x49   :  { %1153 = vmatprep.subr.bf16.mxu0 %v1681_v13  ;;  %v1772_v13 = vld [vmem:[%s2329_s1 + $0x400] ss:$8 sps:$4 sm:$0xff]  }
  0x4a   :  { %1033 = vmatmul.mubr.bf16.gmra.mrb[4].mxu1 %v1752_v31  ;;  %v1801_v31 = vld [vmem:[%s2329_s1 + $0x474] ss:$8 sps:$4 sm:$0xff]  }
  0x4b   :  { %1048 = vmatpush1.bf16.msra.mxu1 %v1676_v14  ;;  %1139 = vmatmul.mubr.bf16.gmra.mrb[4].mxu0 %v1756_v33  ;;  %v1777_v14 = vld [vmem:[%s2329_s1 + $0x414] ss:$8 sps:$4 sm:$0xff]   ;;  %v1802_v33 = vld [vmem:[%s2330_s0 + $0x20] ss:$36 sps:$4 sm:$0xff]  }
  0x4c   :  { %1154 = vmatpush1.bf16.msra.mxu0 %v1679_v15  ;;  %1049 = vmatprep.subr.bf16.mxu1 %v1684_v16  ;;  %v1778_v15 = vld [vmem:[%s2330_s0 + $0x54] ss:$36 sps:$4 sm:$0xff]   ;;  %v1780_v16 = vld [vmem:[%s2330_s0 + $0x64] ss:$36 sps:$4 sm:$0xff]  }
  0x4d   :  { %1155 = vmatprep.subr.bf16.mxu0 %v1687_v17  ;;  %1075 = vmatprep.mubr.bf16.mxu1 %v1768_v41  ;;  %v1775_v17 = vld [vmem:[%s2329_s1 + $0x410] ss:$8 sps:$4 sm:$0xff]  }
  0x4e   :  { %1181 = vmatprep.mubr.bf16.mxu0 %v1771_v43 }
  0x4f   :  { %1050 = vmatpush1.bf16.msra.mxu1 %v1682_v18  ;;  %v1786_v18 = vld [vmem:[%s2329_s1 + $0x424] ss:$8 sps:$4 sm:$0xff]  }
  0x50   :  { %1156 = vmatpush1.bf16.msra.mxu0 %v1685_v19  ;;  %1051 = vmatprep.subr.bf16.mxu1 %v1690_v20  ;;  %v1782_v19 = vld [vmem:[%s2330_s0 + $0x50] ss:$36 sps:$4 sm:$0xff]   ;;  %v1783_v20 = vld [vmem:[%s2330_s0 + $0x60] ss:$36 sps:$4 sm:$0xff]  }
  0x51   :  { %1157 = vmatprep.subr.bf16.mxu0 %v1693_v21  ;;  %v1784_v21 = vld [vmem:[%s2329_s1 + $0x420] ss:$8 sps:$4 sm:$0xff]  }
  0x53   :  { %1052 = vmatpush1.bf16.msra.mxu1 %v1688_v22  ;;  %v1789_v22 = vld [vmem:[%s2329_s1 + $0x434] ss:$8 sps:$4 sm:$0xff]  }
  0x54   :  { %1158 = vmatpush1.bf16.msra.mxu0 %v1691_v23  ;;  %1053 = vmatprep.subr.bf16.mxu1 %v1696_v24  ;;  %v1787_v23 = vld [vmem:[%s2329_s1 + $0x430] ss:$8 sps:$4 sm:$0xff]   ;;  %v1792_v24 = vld [vmem:[%s2329_s1 + $0x444] ss:$8 sps:$4 sm:$0xff]  }
  0x55   :  { %1159 = vmatprep.subr.bf16.mxu0 %v1699_v25  ;;  %v1804_v25 = vmov 0  }
  0x57   :  { %1054 = vmatpush1.bf16.msra.mxu1 %v1694_v26  ;;  %v1790_v26 = vld [vmem:[%s2329_s1 + $0x440] ss:$8 sps:$4 sm:$0xff]  }
  0x58   :  { %1160 = vmatpush1.bf16.msra.mxu0 %v1697_v27  ;;  %1055 = vmatprep.subr.bf16.mxu1 %v1702_v28  ;;  %v1795_v27 = vld [vmem:[%s2329_s1 + $0x454] ss:$8 sps:$4 sm:$0xff]   ;;  %v1793_v28 = vld [vmem:[%s2329_s1 + $0x450] ss:$8 sps:$4 sm:$0xff]  }
  0x59   :  { %1161 = vmatprep.subr.bf16.mxu0 %v1705_v32  ;;  %v1799_v32 = vld [vmem:[%s2329_s1 + $0x470] ss:$8 sps:$4 sm:$0xff]  }
  0x5b   :  { %1056 = vmatpush1.bf16.msra.mxu1 %v1700_v34  ;;  %v1803_v34 = vld [vmem:[%s2330_s0 + $0x68] ss:$36 sps:$4 sm:$0xff]  }
  0x5c   :  { %1162 = vmatpush1.bf16.msra.mxu0 %v1703_v35  ;;  %1057 = vmatprep.subr.bf16.mxu1 %v1708_v36 }
  0x5d   :  { %1163 = vmatprep.subr.bf16.mxu0 %v1711_v37 }
  0x5f   :  { %1058 = vmatpush1.bf16.msra.mxu1 %v1706_v38 }
  0x60   :  { %1164 = vmatpush1.bf16.msra.mxu0 %v1709_v39  ;;  %1059 = vmatprep.subr.bf16.mxu1 %v1714_v40 }
  0x61   :  { %1165 = vmatprep.subr.bf16.mxu0 %v1717_v42 }
  0x63   :  { %1060 = vmatpush1.bf16.msra.mxu1 %v1712_v44 }
  0x64   :  { %1166 = vmatpush1.bf16.msra.mxu0 %v1715_v45  ;;  %1061 = vmatprep.subr.bf16.mxu1 %v1720_v46 }
  0x65   :  { %1167 = vmatprep.subr.bf16.mxu0 %v1723_v47 }
  0x67   :  { %1062 = vmatpush1.bf16.msra.mxu1 %v1718_v48 }
  0x68   :  { %1168 = vmatpush1.bf16.msra.mxu0 %v1721_v49  ;;  %1063 = vmatprep.subr.bf16.mxu1 %v1726_v50 }
  0x69   :  { %1169 = vmatprep.subr.bf16.mxu0 %v1729_v51 }
  0x6b   :  { %1064 = vmatpush1.bf16.msra.mxu1 %v1724_v52 }
  0x6c   :  { %1170 = vmatpush1.bf16.msra.mxu0 %v1727_v53  ;;  %1065 = vmatprep.subr.bf16.mxu1 %v1732_v54 }
  0x6d   :  { %1171 = vmatprep.subr.bf16.mxu0 %v1735_v55 }
  0x6f   :  { %1066 = vmatpush1.bf16.msra.mxu1 %v1730_v56 }
  0x70   :  { %1172 = vmatpush1.bf16.msra.mxu0 %v1733_v57  ;;  %1067 = vmatprep.subr.bf16.mxu1 %v1738_v58 }
  0x71   :  { %1173 = vmatprep.subr.bf16.mxu0 %v1741_v59 }
  0x73   :  { %1068 = vmatpush1.bf16.msra.mxu1 %v1736_v60 }
  0x74   :  { %1174 = vmatpush1.bf16.msra.mxu0 %v1739_v61  ;;  %1069 = vmatprep.subr.bf16.mxu1 %v1744_v62 }
  0x75   :  { %1175 = vmatprep.subr.bf16.mxu0 %v1747_v63 }
  0x77   :  { %1070 = vmatpush1.bf16.msra.mxu1 %v1742_v0 }
  0x78   :  { %1176 = vmatpush1.bf16.msra.mxu0 %v1745_v1  ;;  %1071 = vmatprep.subr.bf16.mxu1 %v1755_v2 }
  0x79   :  { %1177 = vmatprep.subr.bf16.mxu0 %v1759_v3 }
  0x7b   :  { %1072 = vmatpush1.bf16.msra.mxu1 %v1753_v4 }
  0x7c   :  { %1178 = vmatpush1.bf16.msra.mxu0 %v1757_v5  ;;  %1073 = vmatprep.subr.bf16.mxu1 %v1762_v6 }
  0x7d   :  { %1179 = vmatprep.subr.bf16.mxu0 %v1765_v7 }
  0x7f   :  { %1074 = vmatpush1.bf16.msra.mxu1 %v1760_v8 }
  0x80   :  { %1180 = vmatpush1.bf16.msra.mxu0 %v1763_v9  ;;  %1513 = vmatprep.subr.bf16.mxu1 %v1774_v10 }
  0x81   :  { %1202 = vmatprep.subr.bf16.mxu0 %v1774_v10 }
  0x82   :  { %1076 = vmatmul.mubr.bf16.vlgmr.msra.gmra.mrb[0].mxu1 %v1766_v11 }
  0x83   :  { %1182 = vmatmul.mubr.bf16.vlgmr.msra.gmra.mrb[0].mxu0 %v1769_v12  ;;  %1521 = vmatpush1.bf16.msra.mxu1 %v1772_v13 }
  0x84   :  { %1203 = vmatpush1.bf16.msra.mxu0 %v1772_v13  ;;  %1514 = vmatprep.subr.bf16.mxu1 %v1777_v14 }
  0x85   :  { %1204 = vmatprep.subr.bf16.mxu0 %v1777_v14  ;;  %1085 = vmatprep.mubr.bf16.mxu1 %v1778_v15 }
  0x86   :  { %1191 = vmatprep.mubr.bf16.mxu0 %v1780_v16 }
  0x87   :  { %1522 = vmatpush1.bf16.msra.mxu1 %v1775_v17 }
  0x88   :  { %1205 = vmatpush1.bf16.msra.mxu0 %v1775_v17  ;;  %1515 = vmatprep.subr.bf16.mxu1 %v1786_v18 }
  0x89   :  { %1206 = vmatprep.subr.bf16.mxu0 %v1786_v18 }
  0x8a   :  { %1086 = vmatmul.mubr.bf16.gmra.mrb[4].mxu1 %v1782_v19 }
  0x8b   :  { %1192 = vmatmul.mubr.bf16.gmra.mrb[4].mxu0 %v1783_v20  ;;  %1523 = vmatpush1.bf16.msra.mxu1 %v1784_v21 }
  0x8c   :  { %1207 = vmatpush1.bf16.msra.mxu0 %v1784_v21  ;;  %1516 = vmatprep.subr.bf16.mxu1 %v1789_v22 }
  0x8d   :  { %1208 = vmatprep.subr.bf16.mxu0 %v1789_v22  ;;  %1234 = vmatprep.mubr.bf16.mxu0 %v1804_v25 }
  0x8e   :  { %1244 = vmatprep.mubr.bf16.mxu1 %v1804_v25 }
  0x8f   :  { %1524 = vmatpush1.bf16.msra.mxu1 %v1787_v23 }
  0x90   :  { %1209 = vmatpush1.bf16.msra.mxu0 %v1787_v23  ;;  %1517 = vmatprep.subr.bf16.mxu1 %v1792_v24 }
  0x91   :  { %1210 = vmatprep.subr.bf16.mxu0 %v1792_v24 }
  0x93   :  { %1525 = vmatpush1.bf16.msra.mxu1 %v1790_v26 }
  0x94   :  { %1211 = vmatpush1.bf16.msra.mxu0 %v1790_v26  ;;  %1518 = vmatprep.subr.bf16.mxu1 %v1795_v27 }
  0x95   :  { %1212 = vmatprep.subr.bf16.mxu0 %v1795_v27 }
  0x97   :  { %1526 = vmatpush1.bf16.msra.mxu1 %v1793_v28 }
  0x98   :  { %1213 = vmatpush1.bf16.msra.mxu0 %v1793_v28  ;;  %1519 = vmatprep.subr.bf16.mxu1 %v1798_v29 }
  0x99   :  { %1214 = vmatprep.subr.bf16.mxu0 %v1798_v29 }
  0x9b   :  { %1527 = vmatpush1.bf16.msra.mxu1 %v1796_v30 }
  0x9c   :  { %1215 = vmatpush1.bf16.msra.mxu0 %v1796_v30  ;;  %1520 = vmatprep.subr.bf16.mxu1 %v1801_v31 }
  0x9d   :  { %1216 = vmatprep.subr.bf16.mxu0 %v1801_v31 }
  0x9f   :  { %1528 = vmatpush1.bf16.msra.mxu1 %v1799_v32 }
  0xa0   :  { %1217 = vmatpush1.bf16.msra.mxu0 %v1799_v32 }
  0xa2   :  { %1245 = vmatmul.mubr.bf16.vlgmr.msra.gmra.mrb[8].mxu1 %v1803_v34 }
  0xa3   :  { %1235 = vmatmul.mubr.bf16.vlgmr.msra.gmra.mrb[0].mxu0 %v1802_v33 }
 0x155   :  { %v1077_v35 = vpop.f32.mrb[0].mxu1 }
 0x156   :  { %v1079_v36 = vpop.f32.mrb[1].mxu1 }
 0x157   :  { %v1081_v37 = vpop.f32.mrb[2].mxu1 }
 0x158   :  { %v1083_v38 = vpop.f32.mrb[3].mxu1 }
 0x15d   :  { %v1087_v39 = vpop.f32.mrb[4].mxu1 }
 0x15e   :  { %v1193_v40 = vpop.f32.mrb[4].mxu0  ;;  %v1089_v42 = vpop.f32.mrb[5].mxu1 }
 0x15f   :  { %v1533_v41 = vadd.f32 %v1193_v40, %v1087_v39  ;;  %v1195_v43 = vpop.f32.mrb[5].mxu0  ;;  %v1091_v45 = vpop.f32.mrb[6].mxu1 }
 0x160   :  { %v1535_v44 = vadd.f32 %v1195_v43, %v1089_v42  ;;  %v1197_v46 = vpop.f32.mrb[6].mxu0  ;;  %v1093_v48 = vpop.f32.mrb[7].mxu1 }
 0x161   :  { %v1537_v47 = vadd.f32 %v1197_v46, %v1091_v45  ;;  %v1199_v49 = vpop.f32.mrb[7].mxu0 }
 0x162   :  { %v1539_v50 = vadd.f32 %v1199_v49, %v1093_v48 }
 0x175   :  { %v1246_v52 = vpop.f32.mrb[8].mxu1 }
 0x176   :  { %v1236_v51 = vpop.f32.mrb[0].mxu0  ;;  %v1534_v54 = vadd.f32 %v1533_v41, %v1246_v52  ;;  %v1248_v56 = vpop.f32.mrb[9].mxu1 }
 0x177   :  { %v1529_v53 = vadd.f32 %v1236_v51, %v1077_v35  ;;  %v1238_v55 = vpop.f32.mrb[1].mxu0  ;;  %v1536_v58 = vadd.f32 %v1535_v44, %v1248_v56  ;;  %v1250_v60 = vpop.f32.mrb[10].mxu1 }
 0x178   :  { %v1530_v57 = vadd.f32 %v1238_v55, %v1079_v36  ;;  %v1240_v59 = vpop.f32.mrb[2].mxu0  ;;  %v1538_v62 = vadd.f32 %v1537_v47, %v1250_v60  ;;  %v1252_v0 = vpop.f32.mrb[11].mxu1  ;;  %v1305_v7 = vmul.f32 %v1534_v54, %v1534_v54 }
 0x179   :  { %v1531_v61 = vadd.f32 %v1240_v59, %v1081_v37  ;;  %v1242_v63 = vpop.f32.mrb[3].mxu0  ;;  %v1511_v2 = vpack.c.bf16 %v1536_v58, %v1534_v54  ;;  %v1301_v3 = vmul.f32 %v1529_v53, %v1529_v53  ;;  %v1540_v8 = vadd.f32 %v1539_v50, %v1252_v0 }
 0x17a   :  { %v1509_v1 = vpack.c.bf16 %v1530_v57, %v1529_v53  ;;  %v1532_v6 = vadd.f32 %v1242_v63, %v1083_v38  ;;  %v1302_v13 = vmul.f32 %v1530_v57, %v1530_v57  ;;  %v1307_v17 = vmul.f32 %v1538_v62, %v1538_v62 }
 0x17b   :  { %v1283_v4 = vadd.f32 %v1531_v61, %v1529_v53  ;;  %v1303_v5 = vmul.f32 %v1531_v61, %v1531_v61  ;;  %1281 = vst [vmem:[%s2331_s2 + $0x10] sm:$0xff] %v1511_v2  ;;  %v1512_v15 = vpack.c.bf16 %v1540_v8, %v1538_v62  ;;  %v1306_v20 = vmul.f32 %v1536_v58, %v1536_v58 }
 0x17c   :  { %1279 = vst [vmem:[%s2331_s2] sm:$0xff] %v1509_v1  ;;  %v1510_v11 = vpack.c.bf16 %v1532_v6, %v1531_v61  ;;  %v1292_v12 = vadd.f32 %v1532_v6, %v1530_v57  ;;  %v1304_v14 = vmul.f32 %v1532_v6, %v1532_v6  ;;  %v1308_v25 = vmul.f32 %v1540_v8, %v1540_v8 }
 0x17d   :  { %v1309_v9 = vadd.f32 %v1303_v5, %v1301_v3  ;;  %v1284_v10 = vadd.f32 %v1534_v54, %v1283_v4  ;;  %1282 = vst [vmem:[%s2331_s2 + $0x18] sm:$0xff] %v1512_v15 }
 0x17e   :  { %1280 = vst [vmem:[%s2331_s2 + $0x8] sm:$0xff] %v1510_v11  ;;  %v1293_v19 = vadd.f32 %v1536_v58, %v1292_v12  ;;  %v1318_v21 = vadd.f32 %v1304_v14, %v1302_v13 }
 0x17f   :  { %v1285_v16 = vadd.f32 %v1538_v62, %v1284_v10  ;;  %v1310_v18 = vadd.f32 %v1309_v9, %v1305_v7 }
 0x180   :  { %v1294_v24 = vadd.f32 %v1540_v8, %v1293_v19  ;;  %v1319_v26 = vadd.f32 %v1318_v21, %v1306_v20 }
 0x181   :  { %v1286_v22 = vrot.slane %v1285_v16, 4  ;;  %v1311_v23 = vadd.f32 %v1310_v18, %v1307_v17 }
 0x182   :  { %v1295_v29 = vrot.slane %v1294_v24, 4  ;;  %v1320_v30 = vadd.f32 %v1319_v26, %v1308_v25 }
 0x183   :  { %v1287_v27 = vadd.f32 %v1286_v22, %v1285_v16  ;;  %v1312_v28 = vrot.slane %v1311_v23, 4 }
 0x184   :  { %v1296_v33 = vadd.f32 %v1295_v29, %v1294_v24  ;;  %v1321_v34 = vrot.slane %v1320_v30, 4 }
 0x185   :  { %v1288_v31 = vrot.slane %v1287_v27, 2  ;;  %v1313_v32 = vadd.f32 %v1312_v28, %v1311_v23 }
 0x186   :  { %v1297_v37 = vrot.slane %v1296_v33, 2  ;;  %v1322_v38 = vadd.f32 %v1321_v34, %v1320_v30 }
 0x187   :  { %v1289_v35 = vadd.f32 %v1288_v31, %v1287_v27  ;;  %v1314_v36 = vrot.slane %v1313_v32, 2 }
 0x188   :  { %v1298_v41 = vadd.f32 %v1297_v37, %v1296_v33  ;;  %v1323_v42 = vrot.slane %v1322_v38, 2 }
 0x189   :  { %v1290_v39 = vrot.slane %v1289_v35, 1  ;;  %v1315_v40 = vadd.f32 %v1314_v36, %v1313_v32 }
 0x18a   :  { %v1299_v44 = vrot.slane %v1298_v41, 1  ;;  %v1324_v45 = vadd.f32 %v1323_v42, %v1322_v38 }
 0x18b   :  { %v1316_v43 = vrot.slane %v1315_v40, 1  ;;  %v1291_v46 = vadd.f32 %v1290_v39, %v1289_v35 }
 0x18c   :  { %v1325_v48 = vrot.slane %v1324_v45, 1  ;;  %v1300_v51 = vadd.f32 %v1299_v44, %v1298_v41 }
 0x18d   :  { %v1317_v47 = vadd.f32 %v1316_v43, %v1315_v40 }
 0x18e   :  { %v1326_v52 = vadd.f32 %v1325_v48, %v1324_v45 }
 0x18f   :  { %v1328_v49 = vsel %vm1327_vm0, %v1291_v46, %v1317_v47 }
 0x190   :  { %v1331_v50 = vsel %vm1330_vm1, %v1328_v49, 0.0  ;;  %v1329_v53 = vsel %vm1327_vm0, %v1300_v51, %v1326_v52 }
 0x191   :  { %1333 = vst [vmem:[%s2332_s3] sm:$0xff] %v1331_v50  ;;  %v1332_v54 = vsel %vm1330_vm1, %v1329_v53, 0.0 }
 0x192   :  { %1334 = vst [vmem:[%s2332_s3 + $0x8] sm:$0xff] %v1332_v54 }

// kernel: tile.33
= control target key start
LH: loop header
LB: loop body
LE: loop exit
PB: predicated region body
PF: predicated region fallthrough
CT: control target
= control target key end

     0   :  { %s22_s0 = inlined_call_operand.vmem [shape: f32[32], index: 0, kind: input, shape index: {}]   ;;  %s23_s1 = inlined_call_operand.vmem [shape: f32[4,32], index: 1, kind: output, shape index: {}]  }
   0x1   :  { %v4_v0 = vld [vmem:[%s22_s0] ss:$0 sm:$0xff] }
   0x2   :  { %5 = vst [vmem:[%s23_s1] sm:$0xf] %v4_v0 }

// kernel: image_transform_net.59
= control target key start
LH: loop header
LB: loop body
LE: loop exit
PB: predicated region body
PF: predicated region fallthrough
CT: control target
= control target key end

     0   :  { %vm1019_vm0 = vcmask 1040384   ;;  %vm1021_vm1 = vcmask 1041408   ;;  %s1811_s1 = inlined_call_operand.vmem [shape: bf16[640,128], index: 1, kind: input, shape index: {}]   ;;  %s1812_s0 = inlined_call_operand.vmem [shape: bf16[128,640], index: 0, kind: input, shape index: {}]   ;;  %s1813_s2 = inlined_call_operand.vmem [shape: bf16[128,128], index: 2, kind: output, shape index: {0}]   ;;  %s1814_s3 = inlined_call_operand.vmem [shape: f32[8,128], index: 3, kind: output, shape index: {1}]  }
   0x1   :  { %v1383_v0 = vld [vmem:[%s1811_s1 + $0x40] sm:$0xff]   ;;  %v1387_v4 = vld [vmem:[%s1811_s1 + $0x48] sm:$0xff]   ;;  %v1391_v8 = vld [vmem:[%s1811_s1 + $0x50] sm:$0xff]  }
   0x2   :  { %v1384_v1 = vld [vmem:[%s1811_s1 + $0xc0] sm:$0xff]   ;;  %1191 = vmatprep.subr.bf16.mxu0 %v1383_v0  ;;  %v1388_v5 = vld [vmem:[%s1811_s1 + $0xc8] sm:$0xff]   ;;  %v1392_v9 = vld [vmem:[%s1811_s1 + $0xd0] sm:$0xff]  }
   0x3   :  { %v1385_v2 = vld [vmem:[%s1811_s1] sm:$0xff]   ;;  %1255 = vmatprep.subr.bf16.mxu1 %v1384_v1  ;;  %v1389_v6 = vld [vmem:[%s1811_s1 + $0x8] sm:$0xff]   ;;  %v1393_v10 = vld [vmem:[%s1811_s1 + $0x10] sm:$0xff]  }
   0x4   :  { %v1386_v3 = vld [vmem:[%s1811_s1 + $0x80] sm:$0xff]   ;;  %1192 = vmatpush3.bf16.msra.mxu0 %v1385_v2  ;;  %v1390_v7 = vld [vmem:[%s1811_s1 + $0x88] sm:$0xff]   ;;  %v1394_v11 = vld [vmem:[%s1811_s1 + $0x90] sm:$0xff]  }
   0x5   :  { %1256 = vmatpush3.bf16.msra.mxu1 %v1386_v3  ;;  %1193 = vmatprep.subr.bf16.mxu0 %v1387_v4  ;;  %v1395_v12 = vld [vmem:[%s1811_s1 + $0x58] sm:$0xff]   ;;  %v1399_v16 = vld [vmem:[%s1811_s1 + $0x60] sm:$0xff]   ;;  %v1403_v20 = vld [vmem:[%s1811_s1 + $0x68] sm:$0xff]  }
   0x6   :  { %1257 = vmatprep.subr.bf16.mxu1 %v1388_v5  ;;  %v1396_v13 = vld [vmem:[%s1811_s1 + $0xd8] sm:$0xff]   ;;  %v1400_v17 = vld [vmem:[%s1811_s1 + $0xe0] sm:$0xff]   ;;  %v1404_v21 = vld [vmem:[%s1811_s1 + $0xe8] sm:$0xff]  }
   0x7   :  { %v1397_v14 = vld [vmem:[%s1811_s1 + $0x18] sm:$0xff]   ;;  %v1401_v18 = vld [vmem:[%s1811_s1 + $0x20] sm:$0xff]   ;;  %v1405_v22 = vld [vmem:[%s1811_s1 + $0x28] sm:$0xff]  }
   0x8   :  { %1194 = vmatpush3.bf16.msra.mxu0 %v1389_v6  ;;  %v1398_v15 = vld [vmem:[%s1811_s1 + $0x98] sm:$0xff]   ;;  %v1402_v19 = vld [vmem:[%s1811_s1 + $0xa0] sm:$0xff]   ;;  %v1406_v23 = vld [vmem:[%s1811_s1 + $0xa8] sm:$0xff]  }
   0x9   :  { %1258 = vmatpush3.bf16.msra.mxu1 %v1390_v7  ;;  %1195 = vmatprep.subr.bf16.mxu0 %v1391_v8  ;;  %v1407_v24 = vld [vmem:[%s1811_s1 + $0x70] sm:$0xff]   ;;  %v1411_v28 = vld [vmem:[%s1811_s1 + $0x78] sm:$0xff]   ;;  %v1420_v35 = vld [vmem:[%s1812_s0 + $0xc] ss:$20 sps:$4 sm:$0xff]  }
   0xa   :  { %1259 = vmatprep.subr.bf16.mxu1 %v1392_v9  ;;  %v1408_v25 = vld [vmem:[%s1811_s1 + $0xf0] sm:$0xff]   ;;  %v1412_v29 = vld [vmem:[%s1811_s1 + $0xf8] sm:$0xff]   ;;  %v1421_v36 = vld [vmem:[%s1811_s1 + $0x100] sm:$0xff]   ;;  %719 = vmatprep.mubr.bf16.mxu1 %v1420_v35 }
   0xb   :  { %v1409_v26 = vld [vmem:[%s1811_s1 + $0x30] sm:$0xff]   ;;  %v1413_v30 = vld [vmem:[%s1811_s1 + $0x38] sm:$0xff]   ;;  %v1422_v37 = vld [vmem:[%s1812_s0 + $0x2c] ss:$20 sps:$4 sm:$0xff]  }
   0xc   :  { %1196 = vmatpush3.bf16.msra.mxu0 %v1393_v10  ;;  %v1410_v27 = vld [vmem:[%s1811_s1 + $0xb0] sm:$0xff]   ;;  %v1414_v31 = vld [vmem:[%s1811_s1 + $0xb8] sm:$0xff]   ;;  %v1428_v39 = vld [vmem:[%s1811_s1 + $0x108] sm:$0xff]  }
   0xd   :  { %1260 = vmatpush3.bf16.msra.mxu1 %v1394_v11  ;;  %1197 = vmatprep.subr.bf16.mxu0 %v1395_v12  ;;  %v1415_v32 = vld [vmem:[%s1812_s0] ss:$20 sps:$4 sm:$0xff]   ;;  %v1417_v33 = vld [vmem:[%s1812_s0 + $0x4] ss:$20 sps:$4 sm:$0xff]   ;;  %v1418_v34 = vld [vmem:[%s1812_s0 + $0x8] ss:$20 sps:$4 sm:$0xff]  }
   0xe   :  { %1261 = vmatprep.subr.bf16.mxu1 %v1396_v13  ;;  %622 = vmatprep.mubr.bf16.mxu0 %v1417_v33  ;;  %v1424_v38 = vld [vmem:[%s1812_s0 + $0x34] ss:$20 sps:$4 sm:$0xff]   ;;  %v1427_v41 = vld [vmem:[%s1812_s0 + $0x30] ss:$20 sps:$4 sm:$0xff]   ;;  %v1442_v45 = vld [vmem:[%s1811_s1 + $0x118] sm:$0xff]  }
   0xf   :  { %v1426_v40 = vld [vmem:[%s1812_s0 + $0x28] ss:$20 sps:$4 sm:$0xff]   ;;  %v1435_v44 = vld [vmem:[%s1811_s1 + $0x110] sm:$0xff]   ;;  %v1434_v47 = vld [vmem:[%s1812_s0 + $0x58] ss:$20 sps:$4 sm:$0xff]  }
  0x10   :  { %1198 = vmatpush3.bf16.msra.mxu0 %v1397_v14  ;;  %v1429_v42 = vld [vmem:[%s1812_s0 + $0x54] ss:$20 sps:$4 sm:$0xff]   ;;  %v1431_v43 = vld [vmem:[%s1812_s0 + $0x5c] ss:$20 sps:$4 sm:$0xff]   ;;  %v1438_v49 = vld [vmem:[%s1812_s0 + $0x84] ss:$20 sps:$4 sm:$0xff]  }
  0x11   :  { %1262 = vmatpush3.bf16.msra.mxu1 %v1398_v15  ;;  %1199 = vmatprep.subr.bf16.mxu0 %v1399_v16  ;;  %v1433_v46 = vld [vmem:[%s1812_s0 + $0x50] ss:$20 sps:$4 sm:$0xff]   ;;  %v1456_v51 = vld [vmem:[%s1811_s1 + $0x128] sm:$0xff]   ;;  %v1441_v53 = vld [vmem:[%s1812_s0 + $0x80] ss:$20 sps:$4 sm:$0xff]  }
  0x12   :  { %1263 = vmatprep.subr.bf16.mxu1 %v1400_v17  ;;  %v1436_v48 = vld [vmem:[%s1812_s0 + $0x7c] ss:$20 sps:$4 sm:$0xff]   ;;  %v1449_v50 = vld [vmem:[%s1811_s1 + $0x120] sm:$0xff]   ;;  %v1440_v52 = vld [vmem:[%s1812_s0 + $0x78] ss:$20 sps:$4 sm:$0xff]  }
  0x13   :  { %v1443_v54 = vld [vmem:[%s1812_s0 + $0xa4] ss:$20 sps:$4 sm:$0xff]   ;;  %v1463_v55 = vld [vmem:[%s1811_s1 + $0x130] sm:$0xff]   ;;  %v1445_v56 = vld [vmem:[%s1812_s0 + $0xac] ss:$20 sps:$4 sm:$0xff]  }
  0x14   :  { %1200 = vmatpush3.bf16.msra.mxu0 %v1401_v18  ;;  %v1470_v57 = vld [vmem:[%s1811_s1 + $0x138] sm:$0xff]   ;;  %v1447_v58 = vld [vmem:[%s1812_s0 + $0xa0] ss:$20 sps:$4 sm:$0xff]   ;;  %v1455_v63 = vld [vmem:[%s1812_s0 + $0xd0] ss:$20 sps:$4 sm:$0xff]  }
  0x15   :  { %1264 = vmatpush3.bf16.msra.mxu1 %v1402_v19  ;;  %1201 = vmatprep.subr.bf16.mxu0 %v1403_v20  ;;  %v1448_v59 = vld [vmem:[%s1812_s0 + $0xa8] ss:$20 sps:$4 sm:$0xff]   ;;  %v1450_v60 = vld [vmem:[%s1812_s0 + $0xcc] ss:$20 sps:$4 sm:$0xff]   ;;  %v1461_v2 = vld [vmem:[%s1812_s0 + $0xf0] ss:$20 sps:$4 sm:$0xff]  }
  0x16   :  { %1265 = vmatprep.subr.bf16.mxu1 %v1404_v21  ;;  %v1452_v61 = vld [vmem:[%s1812_s0 + $0xd4] ss:$20 sps:$4 sm:$0xff]   ;;  %v1459_v1 = vld [vmem:[%s1812_s0 + $0xfc] ss:$20 sps:$4 sm:$0xff]   ;;  %v1462_v3 = vld [vmem:[%s1812_s0 + $0xf8] ss:$20 sps:$4 sm:$0xff]  }
  0x17   :  { %v1454_v62 = vld [vmem:[%s1812_s0 + $0xc8] ss:$20 sps:$4 sm:$0xff]   ;;  %v1466_v5 = vld [vmem:[%s1812_s0 + $0x124] ss:$20 sps:$4 sm:$0xff]   ;;  %v1469_v7 = vld [vmem:[%s1812_s0 + $0x120] ss:$20 sps:$4 sm:$0xff]  }
  0x18   :  { %1202 = vmatpush3.bf16.msra.mxu0 %v1405_v22  ;;  %v1457_v0 = vld [vmem:[%s1812_s0 + $0xf4] ss:$20 sps:$4 sm:$0xff]   ;;  %v1464_v4 = vld [vmem:[%s1812_s0 + $0x11c] ss:$20 sps:$4 sm:$0xff]   ;;  %v1468_v6 = vld [vmem:[%s1812_s0 + $0x118] ss:$20 sps:$4 sm:$0xff]  }
  0x19   :  { %1266 = vmatpush3.bf16.msra.mxu1 %v1406_v23  ;;  %1203 = vmatprep.subr.bf16.mxu0 %v1407_v24  ;;  %v1471_v8 = vld [vmem:[%s1812_s0 + $0x10] ss:$20 sps:$4 sm:$0xff]   ;;  %v1473_v10 = vld [vmem:[%s1812_s0 + $0x38] ss:$20 sps:$4 sm:$0xff]   ;;  %v1475_v12 = vld [vmem:[%s1812_s0 + $0x60] ss:$20 sps:$4 sm:$0xff]  }
  0x1a   :  { %1267 = vmatprep.subr.bf16.mxu1 %v1408_v25  ;;  %v1472_v9 = vld [vmem:[%s1812_s0 + $0xb0] ss:$20 sps:$4 sm:$0xff]   ;;  %v1474_v11 = vld [vmem:[%s1812_s0 + $0xd8] ss:$20 sps:$4 sm:$0xff]   ;;  %v1476_v13 = vld [vmem:[%s1812_s0 + $0x100] ss:$20 sps:$4 sm:$0xff]  }
  0x1b   :  { %v1477_v14 = vld [vmem:[%s1812_s0 + $0x88] ss:$20 sps:$4 sm:$0xff]  }
  0x1c   :  { %1204 = vmatpush3.bf16.msra.mxu0 %v1409_v26  ;;  %v1478_v15 = vld [vmem:[%s1812_s0 + $0x128] ss:$20 sps:$4 sm:$0xff]  }
  0x1d   :  { %1268 = vmatpush3.bf16.msra.mxu1 %v1410_v27  ;;  %1205 = vmatprep.subr.bf16.mxu0 %v1411_v28 }
  0x1e   :  { %1269 = vmatprep.subr.bf16.mxu1 %v1412_v29 }
  0x20   :  { %1206 = vmatpush3.bf16.msra.mxu0 %v1413_v30 }
  0x21   :  { %1270 = vmatpush3.bf16.msra.mxu1 %v1414_v31  ;;  %1335 = vmatprep.subr.bf16.mxu0 %v1421_v36 }
  0x22   :  { %1367 = vmatprep.subr.bf16.mxu1 %v1421_v36 }
  0x23   :  { %623 = vmatmul.mubr.bf16.vlgmr.msra.gmra.mrb[0].mxu0 %v1415_v32 }
  0x24   :  { %720 = vmatmul.mubr.bf16.vlgmr.msra.gmra.mrb[0].mxu1 %v1418_v34  ;;  %1336 = vmatpush3.bf16.msra.mxu0 %v1421_v36 }
  0x25   :  { %630 = vmatprep.mubr.bf16.mxu0 %v1422_v37  ;;  %727 = vmatprep.mubr.bf16.mxu1 %v1424_v38 }
  0x26   :  { %1375 = vmatpush3.bf16.msra.mxu1 %v1421_v36  ;;  %1337 = vmatprep.subr.bf16.mxu0 %v1428_v39 }
  0x27   :  { %1368 = vmatprep.subr.bf16.mxu1 %v1428_v39 }
  0x28   :  { %1338 = vmatpush3.bf16.msra.mxu0 %v1428_v39 }
  0x29   :  { %1339 = vmatprep.subr.bf16.mxu0 %v1435_v44 }
  0x2a   :  { %1376 = vmatpush3.bf16.msra.mxu1 %v1428_v39 }
  0x2b   :  { %631 = vmatmul.mubr.bf16.gmra.mrb[4].mxu0 %v1426_v40  ;;  %1369 = vmatprep.subr.bf16.mxu1 %v1435_v44 }
  0x2c   :  { %728 = vmatmul.mubr.bf16.gmra.mrb[4].mxu1 %v1427_v41  ;;  %638 = vmatprep.mubr.bf16.mxu0 %v1429_v42 }
  0x2d   :  { %735 = vmatprep.mubr.bf16.mxu1 %v1431_v43  ;;  %1340 = vmatpush3.bf16.msra.mxu0 %v1435_v44 }
  0x2e   :  { %1341 = vmatprep.subr.bf16.mxu0 %v1442_v45  ;;  %1377 = vmatpush3.bf16.msra.mxu1 %v1435_v44 }
  0x2f   :  { %1370 = vmatprep.subr.bf16.mxu1 %v1442_v45 }
  0x31   :  { %1342 = vmatpush3.bf16.msra.mxu0 %v1442_v45 }
  0x32   :  { %1343 = vmatprep.subr.bf16.mxu0 %v1449_v50  ;;  %1378 = vmatpush3.bf16.msra.mxu1 %v1442_v45 }
  0x33   :  { %639 = vmatmul.mubr.bf16.gmra.mrb[8].mxu0 %v1433_v46  ;;  %1371 = vmatprep.subr.bf16.mxu1 %v1449_v50 }
  0x34   :  { %736 = vmatmul.mubr.bf16.gmra.mrb[8].mxu1 %v1434_v47  ;;  %646 = vmatprep.mubr.bf16.mxu0 %v1436_v48 }
  0x35   :  { %743 = vmatprep.mubr.bf16.mxu1 %v1438_v49  ;;  %1344 = vmatpush3.bf16.msra.mxu0 %v1449_v50 }
  0x36   :  { %1345 = vmatprep.subr.bf16.mxu0 %v1456_v51  ;;  %1379 = vmatpush3.bf16.msra.mxu1 %v1449_v50 }
  0x37   :  { %1372 = vmatprep.subr.bf16.mxu1 %v1456_v51 }
  0x39   :  { %1346 = vmatpush3.bf16.msra.mxu0 %v1456_v51 }
  0x3a   :  { %1347 = vmatprep.subr.bf16.mxu0 %v1463_v55  ;;  %1380 = vmatpush3.bf16.msra.mxu1 %v1456_v51 }
  0x3b   :  { %647 = vmatmul.mubr.bf16.gmra.mrb[12].mxu0 %v1440_v52  ;;  %1373 = vmatprep.subr.bf16.mxu1 %v1463_v55 }
  0x3c   :  { %744 = vmatmul.mubr.bf16.gmra.mrb[12].mxu1 %v1441_v53  ;;  %654 = vmatprep.mubr.bf16.mxu0 %v1443_v54 }
  0x3d   :  { %751 = vmatprep.mubr.bf16.mxu1 %v1445_v56  ;;  %1348 = vmatpush3.bf16.msra.mxu0 %v1463_v55 }
  0x3e   :  { %1349 = vmatprep.subr.bf16.mxu0 %v1470_v57  ;;  %1381 = vmatpush3.bf16.msra.mxu1 %v1463_v55 }
  0x3f   :  { %1374 = vmatprep.subr.bf16.mxu1 %v1470_v57 }
  0x41   :  { %1350 = vmatpush3.bf16.msra.mxu0 %v1470_v57 }
  0x42   :  { %1382 = vmatpush3.bf16.msra.mxu1 %v1470_v57 }
  0x43   :  { %655 = vmatmul.mubr.bf16.gmra.mrb[16].mxu0 %v1447_v58 }
  0x44   :  { %752 = vmatmul.mubr.bf16.gmra.mrb[16].mxu1 %v1448_v59  ;;  %662 = vmatprep.mubr.bf16.mxu0 %v1450_v60 }
  0x45   :  { %759 = vmatprep.mubr.bf16.mxu1 %v1452_v61 }
  0x4b   :  { %663 = vmatmul.mubr.bf16.gmra.mrb[20].mxu0 %v1454_v62 }
  0x4c   :  { %760 = vmatmul.mubr.bf16.gmra.mrb[20].mxu1 %v1455_v63  ;;  %670 = vmatprep.mubr.bf16.mxu0 %v1457_v0 }
  0x4d   :  { %767 = vmatprep.mubr.bf16.mxu1 %v1459_v1 }
  0x53   :  { %671 = vmatmul.mubr.bf16.gmra.mrb[24].mxu0 %v1461_v2 }
  0x54   :  { %768 = vmatmul.mubr.bf16.gmra.mrb[24].mxu1 %v1462_v3  ;;  %678 = vmatprep.mubr.bf16.mxu0 %v1464_v4 }
  0x55   :  { %775 = vmatprep.mubr.bf16.mxu1 %v1466_v5 }
  0x5b   :  { %679 = vmatmul.mubr.bf16.gmra.mrb[28].mxu0 %v1468_v6 }
  0x5c   :  { %776 = vmatmul.mubr.bf16.gmra.mrb[28].mxu1 %v1469_v7  ;;  %1351 = vmatprep.mubr.bf16.mxu0 %v1471_v8 }
  0x5d   :  { %1359 = vmatprep.mubr.bf16.mxu1 %v1472_v9 }
  0x63   :  { %1352 = vmatmul.mubr.bf16.vlgmr.msra.gmra.mrb[32].mxu0 %v1473_v10 }
  0x64   :  { %1360 = vmatmul.mubr.bf16.vlgmr.msra.gmra.mrb[32].mxu1 %v1474_v11  ;;  %1355 = vmatprep.mubr.bf16.mxu0 %v1475_v12 }
  0x65   :  { %1363 = vmatprep.mubr.bf16.mxu1 %v1476_v13 }
  0x6b   :  { %1356 = vmatmul.mubr.bf16.gmra.mrb[36].mxu0 %v1477_v14 }
  0x6c   :  { %1364 = vmatmul.mubr.bf16.gmra.mrb[36].mxu1 %v1478_v15 }
  0xf6   :  { %v1207_v16 = vpop.f32.mrb[0].mxu0 }
  0xf7   :  { %v1271_v17 = vpop.f32.mrb[0].mxu1  ;;  %v1208_v18 = vpop.f32.mrb[1].mxu0 }
  0xf8   :  { %v1209_v19 = vadd.f32 %v1208_v18, %v1207_v16  ;;  %v1272_v20 = vpop.f32.mrb[1].mxu1  ;;  %v1210_v21 = vpop.f32.mrb[2].mxu0 }
  0xf9   :  { %v1273_v22 = vadd.f32 %v1272_v20, %v1271_v17  ;;  %v1274_v23 = vpop.f32.mrb[2].mxu1  ;;  %v1211_v24 = vpop.f32.mrb[3].mxu0 }
  0xfa   :  { %v1212_v25 = vadd.f32 %v1211_v24, %v1210_v21  ;;  %v1275_v26 = vpop.f32.mrb[3].mxu1 }
  0xfb   :  { %v1276_v27 = vadd.f32 %v1275_v26, %v1274_v23  ;;  %v1739_v28 = vadd.f32 %v1273_v22, %v1209_v19 }
  0xfd   :  { %v1741_v29 = vadd.f32 %v1276_v27, %v1212_v25 }
  0xfe   :  { %v1213_v30 = vpop.f32.mrb[4].mxu0 }
  0xff   :  { %v1277_v31 = vpop.f32.mrb[4].mxu1  ;;  %v1214_v32 = vpop.f32.mrb[5].mxu0 }
 0x100   :  { %v1215_v33 = vadd.f32 %v1214_v32, %v1213_v30  ;;  %v1278_v34 = vpop.f32.mrb[5].mxu1  ;;  %v1216_v35 = vpop.f32.mrb[6].mxu0 }
 0x101   :  { %v1279_v36 = vadd.f32 %v1278_v34, %v1277_v31  ;;  %v1280_v37 = vpop.f32.mrb[6].mxu1  ;;  %v1217_v38 = vpop.f32.mrb[7].mxu0 }
 0x102   :  { %v1218_v39 = vadd.f32 %v1217_v38, %v1216_v35  ;;  %v1281_v40 = vpop.f32.mrb[7].mxu1 }
 0x103   :  { %v1282_v41 = vadd.f32 %v1281_v40, %v1280_v37  ;;  %v1743_v42 = vadd.f32 %v1279_v36, %v1215_v33 }
 0x105   :  { %v1745_v43 = vadd.f32 %v1282_v41, %v1218_v39 }
 0x106   :  { %v1219_v44 = vpop.f32.mrb[8].mxu0 }
 0x107   :  { %v1283_v45 = vpop.f32.mrb[8].mxu1  ;;  %v1220_v46 = vpop.f32.mrb[9].mxu0 }
 0x108   :  { %v1221_v47 = vadd.f32 %v1220_v46, %v1219_v44  ;;  %v1284_v48 = vpop.f32.mrb[9].mxu1  ;;  %v1222_v49 = vpop.f32.mrb[10].mxu0 }
 0x109   :  { %v1285_v50 = vadd.f32 %v1284_v48, %v1283_v45  ;;  %v1286_v51 = vpop.f32.mrb[10].mxu1  ;;  %v1223_v52 = vpop.f32.mrb[11].mxu0 }
 0x10a   :  { %v1224_v53 = vadd.f32 %v1223_v52, %v1222_v49  ;;  %v1287_v54 = vpop.f32.mrb[11].mxu1 }
 0x10b   :  { %v1288_v55 = vadd.f32 %v1287_v54, %v1286_v51  ;;  %v1747_v56 = vadd.f32 %v1285_v50, %v1221_v47 }
 0x10d   :  { %v1749_v57 = vadd.f32 %v1288_v55, %v1224_v53 }
 0x10e   :  { %v1225_v58 = vpop.f32.mrb[12].mxu0 }
 0x10f   :  { %v1289_v59 = vpop.f32.mrb[12].mxu1  ;;  %v1226_v60 = vpop.f32.mrb[13].mxu0 }
 0x110   :  { %v1227_v61 = vadd.f32 %v1226_v60, %v1225_v58  ;;  %v1290_v62 = vpop.f32.mrb[13].mxu1  ;;  %v1228_v63 = vpop.f32.mrb[14].mxu0 }
 0x111   :  { %v1291_v0 = vadd.f32 %v1290_v62, %v1289_v59  ;;  %v1292_v1 = vpop.f32.mrb[14].mxu1  ;;  %v1229_v2 = vpop.f32.mrb[15].mxu0 }
 0x112   :  { %v1230_v3 = vadd.f32 %v1229_v2, %v1228_v63  ;;  %v1293_v4 = vpop.f32.mrb[15].mxu1 }
 0x113   :  { %v1294_v5 = vadd.f32 %v1293_v4, %v1292_v1  ;;  %v1751_v6 = vadd.f32 %v1291_v0, %v1227_v61 }
 0x115   :  { %v1753_v7 = vadd.f32 %v1294_v5, %v1230_v3 }
 0x116   :  { %v1231_v8 = vpop.f32.mrb[16].mxu0 }
 0x117   :  { %v1295_v9 = vpop.f32.mrb[16].mxu1  ;;  %v1232_v10 = vpop.f32.mrb[17].mxu0 }
 0x118   :  { %v1233_v11 = vadd.f32 %v1232_v10, %v1231_v8  ;;  %v1296_v12 = vpop.f32.mrb[17].mxu1  ;;  %v1234_v13 = vpop.f32.mrb[18].mxu0 }
 0x119   :  { %v1297_v14 = vadd.f32 %v1296_v12, %v1295_v9  ;;  %v1298_v15 = vpop.f32.mrb[18].mxu1  ;;  %v1235_v16 = vpop.f32.mrb[19].mxu0 }
 0x11a   :  { %v1236_v17 = vadd.f32 %v1235_v16, %v1234_v13  ;;  %v1299_v18 = vpop.f32.mrb[19].mxu1 }
 0x11b   :  { %v1300_v19 = vadd.f32 %v1299_v18, %v1298_v15  ;;  %v754_v20 = vadd.f32 %v1297_v14, %v1233_v11 }
 0x11d   :  { %v757_v21 = vadd.f32 %v1300_v19, %v1236_v17 }
 0x11e   :  { %v1237_v22 = vpop.f32.mrb[20].mxu0 }
 0x11f   :  { %v1301_v23 = vpop.f32.mrb[20].mxu1  ;;  %v1238_v24 = vpop.f32.mrb[21].mxu0 }
 0x120   :  { %v1239_v25 = vadd.f32 %v1238_v24, %v1237_v22  ;;  %v1302_v26 = vpop.f32.mrb[21].mxu1  ;;  %v1240_v27 = vpop.f32.mrb[22].mxu0 }
 0x121   :  { %v1303_v30 = vadd.f32 %v1302_v26, %v1301_v23  ;;  %v1304_v31 = vpop.f32.mrb[22].mxu1  ;;  %v1241_v32 = vpop.f32.mrb[23].mxu0 }
 0x122   :  { %v1242_v33 = vadd.f32 %v1241_v32, %v1240_v27  ;;  %v1305_v34 = vpop.f32.mrb[23].mxu1 }
 0x123   :  { %v1306_v35 = vadd.f32 %v1305_v34, %v1304_v31  ;;  %v762_v36 = vadd.f32 %v1303_v30, %v1239_v25 }
 0x125   :  { %v765_v37 = vadd.f32 %v1306_v35, %v1242_v33 }
 0x126   :  { %v1243_v38 = vpop.f32.mrb[24].mxu0 }
 0x127   :  { %v1307_v39 = vpop.f32.mrb[24].mxu1  ;;  %v1244_v40 = vpop.f32.mrb[25].mxu0 }
 0x128   :  { %v1245_v41 = vadd.f32 %v1244_v40, %v1243_v38  ;;  %v1308_v44 = vpop.f32.mrb[25].mxu1  ;;  %v1246_v45 = vpop.f32.mrb[26].mxu0 }
 0x129   :  { %v1309_v46 = vadd.f32 %v1308_v44, %v1307_v39  ;;  %v1310_v47 = vpop.f32.mrb[26].mxu1  ;;  %v1247_v48 = vpop.f32.mrb[27].mxu0 }
 0x12a   :  { %v1248_v49 = vadd.f32 %v1247_v48, %v1246_v45  ;;  %v1311_v50 = vpop.f32.mrb[27].mxu1 }
 0x12b   :  { %v1312_v51 = vadd.f32 %v1311_v50, %v1310_v47  ;;  %v770_v52 = vadd.f32 %v1309_v46, %v1245_v41 }
 0x12d   :  { %v1755_v53 = vadd.f32 %v1312_v51, %v1248_v49 }
 0x12e   :  { %v1249_v54 = vpop.f32.mrb[28].mxu0 }
 0x12f   :  { %v1313_v55 = vpop.f32.mrb[28].mxu1  ;;  %v1250_v58 = vpop.f32.mrb[29].mxu0 }
 0x130   :  { %v1251_v59 = vadd.f32 %v1250_v58, %v1249_v54  ;;  %v1314_v60 = vpop.f32.mrb[29].mxu1  ;;  %v1252_v61 = vpop.f32.mrb[30].mxu0 }
 0x131   :  { %v1315_v62 = vadd.f32 %v1314_v60, %v1313_v55  ;;  %v1316_v63 = vpop.f32.mrb[30].mxu1  ;;  %v1253_v0 = vpop.f32.mrb[31].mxu0 }
 0x132   :  { %v1254_v1 = vadd.f32 %v1253_v0, %v1252_v61  ;;  %v1317_v2 = vpop.f32.mrb[31].mxu1 }
 0x133   :  { %v1318_v3 = vadd.f32 %v1317_v2, %v1316_v63  ;;  %v778_v4 = vadd.f32 %v1315_v62, %v1251_v59 }
 0x135   :  { %v781_v5 = vadd.f32 %v1318_v3, %v1254_v1 }
 0x136   :  { %v1353_v8 = vpop.f32.mrb[32].mxu0 }
 0x137   :  { %v827_v9 = vadd.f32 %v1353_v8, %v1743_v42  ;;  %v1361_v10 = vpop.f32.mrb[32].mxu1  ;;  %v818_v11 = vpop.f32.mrb[33].mxu0 }
 0x138   :  { %v1758_v12 = vadd.f32 %v1361_v10, %v762_v36  ;;  %v819_v13 = vadd.f32 %v818_v11, %v1739_v28  ;;  %v850_v14 = vpop.f32.mrb[33].mxu1  ;;  %v1354_v15 = vpop.f32.mrb[34].mxu0 }
 0x139   :  { %v1761_v16 = vadd.f32 %v850_v14, %v754_v20  ;;  %v830_v17 = vadd.f32 %v1354_v15, %v1745_v43  ;;  %v1362_v18 = vpop.f32.mrb[34].mxu1  ;;  %v821_v19 = vpop.f32.mrb[35].mxu0  ;;  %v984_v31 = vmul.f32 %v827_v9, %v827_v9 }
 0x13a   :  { %v1764_v22 = vadd.f32 %v1362_v18, %v765_v37  ;;  %v822_v23 = vadd.f32 %v821_v19, %v1741_v29  ;;  %v853_v24 = vpop.f32.mrb[35].mxu1  ;;  %v982_v30 = vmul.f32 %v819_v13, %v819_v13  ;;  %v992_v11 = vmul.f32 %v1758_v12, %v1758_v12 }
 0x13b   :  { %v1152_v42 = vpack.c.bf16 %v830_v17, %v827_v9  ;;  %v854_v25 = vadd.f32 %v853_v24, %v757_v21  ;;  %v985_v41 = vmul.f32 %v830_v17, %v830_v17  ;;  %v990_v3 = vmul.f32 %v1761_v16, %v1761_v16 }
 0x13c   :  { %v1172_v26 = vpack.c.bf16 %v1764_v22, %v1758_v12  ;;  %v1147_v27 = vpack.c.bf16 %v822_v23, %v819_v13  ;;  %v961_v28 = vadd.f32 %v822_v23, %v819_v13  ;;  %v983_v43 = vmul.f32 %v822_v23, %v822_v23 }
 0x13d   :  { %1184 = vst [vmem:[%s1813_s2 + $0x8] sm:$0xff] %v1152_v42   ;;  %v1167_v20 = vpack.c.bf16 %v854_v25, %v1761_v16  ;;  %v991_v8 = vmul.f32 %v854_v25, %v854_v25  ;;  %v993_v15 = vmul.f32 %v1764_v22, %v1764_v22 }
 0x13e   :  { %1188 = vst [vmem:[%s1813_s2 + $0x28] sm:$0xff] %v1172_v26   ;;  %1148 = vst [vmem:[%s1813_s2] sm:$0xff] %v1147_v27   ;;  %v962_v29 = vadd.f32 %v961_v28, %v827_v9  ;;  %v1357_v21 = vpop.f32.mrb[36].mxu0  ;;  %v998_v32 = vadd.f32 %v983_v43, %v982_v30 }
 0x13f   :  { %1187 = vst [vmem:[%s1813_s2 + $0x20] sm:$0xff] %v1167_v20   ;;  %v843_v33 = vadd.f32 %v1357_v21, %v1751_v6  ;;  %v1365_v34 = vpop.f32.mrb[36].mxu1  ;;  %v834_v35 = vpop.f32.mrb[37].mxu0 }
 0x140   :  { %v875_v36 = vadd.f32 %v1365_v34, %v778_v4  ;;  %v835_v37 = vadd.f32 %v834_v35, %v1747_v56  ;;  %v963_v38 = vadd.f32 %v962_v29, %v830_v17  ;;  %v866_v39 = vpop.f32.mrb[37].mxu1  ;;  %v1358_v40 = vpop.f32.mrb[38].mxu0  ;;  %v999_v44 = vadd.f32 %v998_v32, %v984_v31 }
 0x141   :  { %v867_v45 = vadd.f32 %v866_v39, %v770_v52  ;;  %v846_v46 = vadd.f32 %v1358_v40, %v1753_v7  ;;  %v1366_v47 = vpop.f32.mrb[38].mxu1  ;;  %v837_v48 = vpop.f32.mrb[39].mxu0  ;;  %v988_v63 = vmul.f32 %v843_v33, %v843_v33 }
 0x142   :  { %v964_v49 = vadd.f32 %v963_v38, %v835_v37  ;;  %v986_v50 = vmul.f32 %v835_v37, %v835_v37  ;;  %v878_v51 = vadd.f32 %v1366_v47, %v781_v5  ;;  %v869_v54 = vpop.f32.mrb[39].mxu1  ;;  %v1000_v6 = vadd.f32 %v999_v44, %v985_v41 }
 0x143   :  { %v1162_v55 = vpack.c.bf16 %v846_v46, %v843_v33  ;;  %v838_v59 = vadd.f32 %v837_v48, %v1749_v57  ;;  %v870_v56 = vadd.f32 %v869_v54, %v1755_v53  ;;  %v989_v0 = vmul.f32 %v846_v46, %v846_v46 }
 0x144   :  { %v1182_v58 = vpack.c.bf16 %v878_v51, %v875_v36  ;;  %v1001_v60 = vadd.f32 %v1000_v6, %v986_v50  ;;  %v994_v19 = vmul.f32 %v867_v45, %v867_v45  ;;  %v996_v27 = vmul.f32 %v875_v36, %v875_v36 }
 0x145   :  { %1186 = vst [vmem:[%s1813_s2 + $0x18] sm:$0xff] %v1162_v55   ;;  %v1157_v7 = vpack.c.bf16 %v838_v59, %v835_v37  ;;  %v965_v52 = vadd.f32 %v964_v49, %v838_v59  ;;  %v987_v61 = vmul.f32 %v838_v59, %v838_v59  ;;  %v1177_v62 = vpack.c.bf16 %v870_v56, %v867_v45 }
 0x146   :  { %1190 = vst [vmem:[%s1813_s2 + $0x38] sm:$0xff] %v1182_v58   ;;  %v995_v42 = vmul.f32 %v870_v56, %v870_v56  ;;  %v997_v30 = vmul.f32 %v878_v51, %v878_v51 }
 0x147   :  { %1185 = vst [vmem:[%s1813_s2 + $0x10] sm:$0xff] %v1157_v7   ;;  %v966_v57 = vadd.f32 %v965_v52, %v843_v33  ;;  %v1002_v53 = vadd.f32 %v1001_v60, %v987_v61  ;;  %1189 = vst [vmem:[%s1813_s2 + $0x30] sm:$0xff] %v1177_v62  }
 0x149   :  { %v967_v1 = vadd.f32 %v966_v57, %v846_v46  ;;  %v1003_v2 = vadd.f32 %v1002_v53, %v988_v63 }
 0x14b   :  { %v968_v4 = vadd.f32 %v967_v1, %v1761_v16  ;;  %v1004_v5 = vadd.f32 %v1003_v2, %v989_v0 }
 0x14d   :  { %v1005_v9 = vadd.f32 %v1004_v5, %v990_v3  ;;  %v969_v10 = vadd.f32 %v968_v4, %v854_v25 }
 0x14f   :  { %v970_v13 = vadd.f32 %v969_v10, %v1758_v12  ;;  %v1006_v14 = vadd.f32 %v1005_v9, %v991_v8 }
 0x151   :  { %v971_v17 = vadd.f32 %v970_v13, %v1764_v22  ;;  %v1007_v18 = vadd.f32 %v1006_v14, %v992_v11 }
 0x153   :  { %v972_v23 = vadd.f32 %v971_v17, %v867_v45  ;;  %v1008_v24 = vadd.f32 %v1007_v18, %v993_v15 }
 0x155   :  { %v973_v16 = vadd.f32 %v972_v23, %v870_v56  ;;  %v1009_v26 = vadd.f32 %v1008_v24, %v994_v19 }
 0x157   :  { %v974_v25 = vadd.f32 %v973_v16, %v875_v36  ;;  %v1010_v28 = vadd.f32 %v1009_v26, %v995_v42 }
 0x159   :  { %v975_v43 = vadd.f32 %v974_v25, %v878_v51  ;;  %v1011_v20 = vadd.f32 %v1010_v28, %v996_v27 }
 0x15b   :  { %v976_v12 = vrot.slane %v975_v43, 4  ;;  %v1012_v29 = vadd.f32 %v1011_v20, %v997_v30 }
 0x15d   :  { %v977_v21 = vadd.f32 %v976_v12, %v975_v43  ;;  %v1013_v31 = vrot.slane %v1012_v29, 4 }
 0x15f   :  { %v978_v32 = vrot.slane %v977_v21, 2  ;;  %v1014_v33 = vadd.f32 %v1013_v31, %v1012_v29 }
 0x161   :  { %v979_v22 = vadd.f32 %v978_v32, %v977_v21  ;;  %v1015_v34 = vrot.slane %v1014_v33, 2 }
 0x163   :  { %v980_v35 = vrot.slane %v979_v22, 1  ;;  %v1016_v37 = vadd.f32 %v1015_v34, %v1014_v33 }
 0x165   :  { %v1017_v38 = vrot.slane %v1016_v37, 1  ;;  %v981_v39 = vadd.f32 %v980_v35, %v979_v22 }
 0x167   :  { %v1018_v40 = vadd.f32 %v1017_v38, %v1016_v37 }
 0x169   :  { %v1020_v36 = vsel %vm1019_vm0, %v981_v39, %v1018_v40 }
 0x16a   :  { %v1022_v41 = vsel %vm1021_vm1, %v1020_v36, 0.0 }
 0x16b   :  { %1023 = vst [vmem:[%s1814_s3] sm:$0xff] %v1022_v41 }

// kernel: image_transform_net.61
= control target key start
LH: loop header
LB: loop body
LE: loop exit
PB: predicated region body
PF: predicated region fallthrough
CT: control target
= control target key end

     0   :  { %v12032_v0 = vmov 0   ;;  %s15403_s1 = inlined_call_operand.vmem [shape: bf16[2688,128], index: 1, kind: input, shape index: {}]   ;;  %s15404_s0 = inlined_call_operand.vmem [shape: bf16[512,2688], index: 0, kind: input, shape index: {}]   ;;  %s15405_s2 = inlined_call_operand.vmem [shape: f32[1,128], index: 2, kind: input, shape index: {}]   ;;  %s15406_s3 = inlined_call_operand.vmem [shape: f32[512,128], index: 3, kind: output, shape index: {}]  }
   0x1   :  { %5462 = vmatprep.subr.bf16.mxu1 %v12032_v0  ;;  %6618 = vmatprep.subr.bf16.mxu0 %v12032_v0  ;;  %v10855_v1 = vld [vmem:[%s15403_s1] sm:$0xff]   ;;  %v10857_v3 = vld [vmem:[%s15403_s1 + $0x8] sm:$0xff]   ;;  %v10859_v5 = vld [vmem:[%s15403_s1 + $0x10] sm:$0xff]  }
   0x2   :  { %v10856_v2 = vld [vmem:[%s15403_s1 + $0x200] sm:$0xff]   ;;  %5463 = vmatpush1.bf16.msra.mxu1 %v10855_v1  ;;  %v10858_v4 = vld [vmem:[%s15403_s1 + $0x208] sm:$0xff]   ;;  %v10860_v6 = vld [vmem:[%s15403_s1 + $0x210] sm:$0xff]  }
   0x3   :  { %6619 = vmatpush1.bf16.msra.mxu0 %v10856_v2  ;;  %5464 = vmatprep.subr.bf16.mxu1 %v12032_v0  ;;  %v10861_v7 = vld [vmem:[%s15403_s1 + $0x18] sm:$0xff]   ;;  %v10863_v9 = vld [vmem:[%s15403_s1 + $0x20] sm:$0xff]   ;;  %v10865_v11 = vld [vmem:[%s15403_s1 + $0x28] sm:$0xff]  }
   0x4   :  { %6620 = vmatprep.subr.bf16.mxu0 %v12032_v0  ;;  %v10862_v8 = vld [vmem:[%s15403_s1 + $0x218] sm:$0xff]   ;;  %v10864_v10 = vld [vmem:[%s15403_s1 + $0x220] sm:$0xff]   ;;  %v10866_v12 = vld [vmem:[%s15403_s1 + $0x228] sm:$0xff]  }
   0x5   :  { %v10867_v13 = vld [vmem:[%s15403_s1 + $0x30] sm:$0xff]   ;;  %v10869_v15 = vld [vmem:[%s15403_s1 + $0x38] sm:$0xff]   ;;  %v10871_v17 = vld [vmem:[%s15403_s1 + $0x40] sm:$0xff]  }
   0x6   :  { %5465 = vmatpush1.bf16.msra.mxu1 %v10857_v3  ;;  %v10868_v14 = vld [vmem:[%s15403_s1 + $0x230] sm:$0xff]   ;;  %v10870_v16 = vld [vmem:[%s15403_s1 + $0x238] sm:$0xff]   ;;  %v10872_v18 = vld [vmem:[%s15403_s1 + $0x240] sm:$0xff]  }
   0x7   :  { %6621 = vmatpush1.bf16.msra.mxu0 %v10858_v4  ;;  %5466 = vmatprep.subr.bf16.mxu1 %v12032_v0  ;;  %v10889_v19 = vld [vmem:[%s15404_s0 + $0x4] ss:$84 sps:$4 sm:$0xff]   ;;  %v10873_v20 = vld [vmem:[%s15403_s1 + $0x48] sm:$0xff]   ;;  %v10875_v23 = vld [vmem:[%s15403_s1 + $0x50] sm:$0xff]  }
   0x8   :  { %6622 = vmatprep.subr.bf16.mxu0 %v12032_v0  ;;  %v10892_v21 = vld [vmem:[%s15404_s0 + $0x24] ss:$84 sps:$4 sm:$0xff]   ;;  %v10874_v22 = vld [vmem:[%s15403_s1 + $0x248] sm:$0xff]   ;;  %5494 = vmatprep.mubr.bf16.mxu1 %v10889_v19  ;;  %v10876_v24 = vld [vmem:[%s15403_s1 + $0x250] sm:$0xff]  }
   0x9   :  { %6650 = vmatprep.mubr.bf16.mxu0 %v10892_v21  ;;  %v10877_v25 = vld [vmem:[%s15403_s1 + $0x58] sm:$0xff]   ;;  %v10879_v27 = vld [vmem:[%s15403_s1 + $0x60] sm:$0xff]   ;;  %v10881_v29 = vld [vmem:[%s15403_s1 + $0x68] sm:$0xff]  }
   0xa   :  { %5467 = vmatpush1.bf16.msra.mxu1 %v10859_v5  ;;  %v10878_v26 = vld [vmem:[%s15403_s1 + $0x258] sm:$0xff]   ;;  %v10880_v28 = vld [vmem:[%s15403_s1 + $0x260] sm:$0xff]   ;;  %v10882_v30 = vld [vmem:[%s15403_s1 + $0x268] sm:$0xff]  }
   0xb   :  { %6623 = vmatpush1.bf16.msra.mxu0 %v10860_v6  ;;  %5468 = vmatprep.subr.bf16.mxu1 %v12032_v0  ;;  %v10883_v31 = vld [vmem:[%s15403_s1 + $0x70] sm:$0xff]   ;;  %v10885_v33 = vld [vmem:[%s15403_s1 + $0x78] sm:$0xff]   ;;  %v10893_v37 = vld [vmem:[%s15403_s1 + $0x280] sm:$0xff]  }
   0xc   :  { %6624 = vmatprep.subr.bf16.mxu0 %v12032_v0  ;;  %v10884_v32 = vld [vmem:[%s15403_s1 + $0x270] sm:$0xff]   ;;  %v10886_v34 = vld [vmem:[%s15403_s1 + $0x278] sm:$0xff]   ;;  %v10894_v38 = vld [vmem:[%s15403_s1 + $0x80] sm:$0xff]  }
   0xd   :  { %v10887_v35 = vld [vmem:[%s15404_s0] ss:$84 sps:$4 sm:$0xff]   ;;  %v10911_v41 = vld [vmem:[%s15403_s1 + $0x88] sm:$0xff]   ;;  %v10903_v49 = vld [vmem:[%s15403_s1 + $0x298] sm:$0xff]  }
   0xe   :  { %5469 = vmatpush1.bf16.msra.mxu1 %v10861_v7  ;;  %v10890_v36 = vld [vmem:[%s15404_s0 + $0x20] ss:$84 sps:$4 sm:$0xff]   ;;  %v10895_v42 = vld [vmem:[%s15403_s1 + $0x288] sm:$0xff]   ;;  %v10908_v50 = vld [vmem:[%s15404_s0 + $0x150] ss:$84 sps:$4 sm:$0xff]  }
   0xf   :  { %6625 = vmatpush1.bf16.msra.mxu0 %v10862_v8  ;;  %5470 = vmatprep.subr.bf16.mxu1 %v12032_v0  ;;  %v10896_v39 = vld [vmem:[%s15404_s0 + $0xac] ss:$84 sps:$4 sm:$0xff]   ;;  %v10900_v43 = vld [vmem:[%s15404_s0 + $0xa8] ss:$84 sps:$4 sm:$0xff]   ;;  %v10902_v45 = vld [vmem:[%s15403_s1 + $0x290] sm:$0xff]  }
  0x10   :  { %6626 = vmatprep.subr.bf16.mxu0 %v12032_v0  ;;  %v10898_v40 = vld [vmem:[%s15404_s0 + $0xcc] ss:$84 sps:$4 sm:$0xff]   ;;  %v10901_v44 = vld [vmem:[%s15404_s0 + $0xc8] ss:$84 sps:$4 sm:$0xff]   ;;  %v10928_v48 = vld [vmem:[%s15403_s1 + $0x90] sm:$0xff]  }
  0x11   :  { %v10904_v46 = vld [vmem:[%s15404_s0 + $0x154] ss:$84 sps:$4 sm:$0xff]   ;;  %v10909_v51 = vld [vmem:[%s15404_s0 + $0x170] ss:$84 sps:$4 sm:$0xff]   ;;  %v10945_v52 = vld [vmem:[%s15403_s1 + $0x98] sm:$0xff]  }
  0x12   :  { %5471 = vmatpush1.bf16.msra.mxu1 %v10863_v9  ;;  %v10906_v47 = vld [vmem:[%s15404_s0 + $0x174] ss:$84 sps:$4 sm:$0xff]   ;;  %v10910_v53 = vld [vmem:[%s15403_s1 + $0x2a0] sm:$0xff]   ;;  %v10913_v54 = vld [vmem:[%s15404_s0 + $0x1fc] ss:$84 sps:$4 sm:$0xff]  }
  0x13   :  { %6627 = vmatpush1.bf16.msra.mxu0 %v10864_v10  ;;  %5472 = vmatprep.subr.bf16.mxu1 %v12032_v0  ;;  %v10915_v55 = vld [vmem:[%s15404_s0 + $0x21c] ss:$84 sps:$4 sm:$0xff]   ;;  %v10962_v56 = vld [vmem:[%s15403_s1 + $0xa0] sm:$0xff]   ;;  %v10912_v57 = vld [vmem:[%s15403_s1 + $0x2a8] sm:$0xff]  }
  0x14   :  { %6628 = vmatprep.subr.bf16.mxu0 %v12032_v0  ;;  %v10917_v58 = vld [vmem:[%s15404_s0 + $0x1f8] ss:$84 sps:$4 sm:$0xff]   ;;  %v10919_v62 = vld [vmem:[%s15403_s1 + $0x2b0] sm:$0xff]   ;;  %v10927_v5 = vld [vmem:[%s15403_s1 + $0x2c0] sm:$0xff]  }
  0x15   :  { %v10918_v59 = vld [vmem:[%s15404_s0 + $0x218] ss:$84 sps:$4 sm:$0xff]   ;;  %v10925_v2 = vld [vmem:[%s15404_s0 + $0x2a0] ss:$84 sps:$4 sm:$0xff]   ;;  %v10934_v10 = vld [vmem:[%s15404_s0 + $0x348] ss:$84 sps:$4 sm:$0xff]  }
  0x16   :  { %5473 = vmatpush1.bf16.msra.mxu1 %v10865_v11  ;;  %v10976_v60 = vld [vmem:[%s15403_s1 + $0xa8] sm:$0xff]   ;;  %v10921_v61 = vld [vmem:[%s15404_s0 + $0x2a4] ss:$84 sps:$4 sm:$0xff]   ;;  %v10990_v3 = vld [vmem:[%s15403_s1 + $0xb0] sm:$0xff]  }
  0x17   :  { %6629 = vmatpush1.bf16.msra.mxu0 %v10866_v12  ;;  %5474 = vmatprep.subr.bf16.mxu1 %v12032_v0  ;;  %v10923_v63 = vld [vmem:[%s15404_s0 + $0x2c4] ss:$84 sps:$4 sm:$0xff]   ;;  %v10926_v4 = vld [vmem:[%s15404_s0 + $0x2c0] ss:$84 sps:$4 sm:$0xff]   ;;  %v10929_v8 = vld [vmem:[%s15403_s1 + $0x2c8] sm:$0xff]  }
  0x18   :  { %6630 = vmatprep.subr.bf16.mxu0 %v12032_v0  ;;  %v10920_v1 = vld [vmem:[%s15403_s1 + $0x2b8] sm:$0xff]   ;;  %v10930_v6 = vld [vmem:[%s15404_s0 + $0x34c] ss:$84 sps:$4 sm:$0xff]   ;;  %v10936_v12 = vld [vmem:[%s15403_s1 + $0x2d0] sm:$0xff]  }
  0x19   :  { %v10932_v7 = vld [vmem:[%s15404_s0 + $0x36c] ss:$84 sps:$4 sm:$0xff]   ;;  %v11004_v9 = vld [vmem:[%s15403_s1 + $0xb8] sm:$0xff]  }
  0x1a   :  { %5475 = vmatpush1.bf16.msra.mxu1 %v10867_v13  ;;  %v10935_v11 = vld [vmem:[%s15404_s0 + $0x368] ss:$84 sps:$4 sm:$0xff]   ;;  %v10944_v19 = vld [vmem:[%s15403_s1 + $0x2e0] sm:$0xff]  }
  0x1b   :  { %6631 = vmatpush1.bf16.msra.mxu0 %v10868_v14  ;;  %5476 = vmatprep.subr.bf16.mxu1 %v12032_v0  ;;  %v10938_v13 = vld [vmem:[%s15404_s0 + $0x3f4] ss:$84 sps:$4 sm:$0xff]   ;;  %v10949_v21 = vld [vmem:[%s15404_s0 + $0x4bc] ss:$84 sps:$4 sm:$0xff]  }
  0x1c   :  { %6632 = vmatprep.subr.bf16.mxu0 %v12032_v0  ;;  %v10940_v14 = vld [vmem:[%s15404_s0 + $0x414] ss:$84 sps:$4 sm:$0xff]  }
  0x1e   :  { %5477 = vmatpush1.bf16.msra.mxu1 %v10869_v15  ;;  %v10937_v15 = vld [vmem:[%s15403_s1 + $0x2d8] sm:$0xff]  }
  0x1f   :  { %6633 = vmatpush1.bf16.msra.mxu0 %v10870_v16  ;;  %5478 = vmatprep.subr.bf16.mxu1 %v12032_v0  ;;  %v11018_v16 = vld [vmem:[%s15403_s1 + $0xc0] sm:$0xff]  }
  0x20   :  { %6634 = vmatprep.subr.bf16.mxu0 %v12032_v0 }
  0x22   :  { %5479 = vmatpush1.bf16.msra.mxu1 %v10871_v17  ;;  %v10942_v17 = vld [vmem:[%s15404_s0 + $0x3f0] ss:$84 sps:$4 sm:$0xff]  }
  0x23   :  { %6635 = vmatpush1.bf16.msra.mxu0 %v10872_v18  ;;  %5480 = vmatprep.subr.bf16.mxu1 %v12032_v0  ;;  %v10943_v18 = vld [vmem:[%s15404_s0 + $0x410] ss:$84 sps:$4 sm:$0xff]  }
  0x24   :  { %6636 = vmatprep.subr.bf16.mxu0 %v12032_v0 }
  0x26   :  { %5481 = vmatpush1.bf16.msra.mxu1 %v10873_v20  ;;  %v10947_v20 = vld [vmem:[%s15404_s0 + $0x49c] ss:$84 sps:$4 sm:$0xff]  }
  0x27   :  { %6637 = vmatpush1.bf16.msra.mxu0 %v10874_v22  ;;  %5482 = vmatprep.subr.bf16.mxu1 %v12032_v0  ;;  %v11032_v22 = vld [vmem:[%s15403_s1 + $0xc8] sm:$0xff]  }
  0x28   :  { %6638 = vmatprep.subr.bf16.mxu0 %v12032_v0 }
  0x2a   :  { %5483 = vmatpush1.bf16.msra.mxu1 %v10875_v23  ;;  %v10946_v23 = vld [vmem:[%s15403_s1 + $0x2e8] sm:$0xff]  }
  0x2b   :  { %6639 = vmatpush1.bf16.msra.mxu0 %v10876_v24  ;;  %5484 = vmatprep.subr.bf16.mxu1 %v12032_v0  ;;  %v10951_v24 = vld [vmem:[%s15404_s0 + $0x498] ss:$84 sps:$4 sm:$0xff]  }
  0x2c   :  { %6640 = vmatprep.subr.bf16.mxu0 %v12032_v0 }
  0x2e   :  { %5485 = vmatpush1.bf16.msra.mxu1 %v10877_v25  ;;  %v10952_v25 = vld [vmem:[%s15404_s0 + $0x4b8] ss:$84 sps:$4 sm:$0xff]  }
  0x2f   :  { %6641 = vmatpush1.bf16.msra.mxu0 %v10878_v26  ;;  %5486 = vmatprep.subr.bf16.mxu1 %v12032_v0  ;;  %v10955_v26 = vld [vmem:[%s15404_s0 + $0x544] ss:$84 sps:$4 sm:$0xff]  }
  0x30   :  { %6642 = vmatprep.subr.bf16.mxu0 %v12032_v0 }
  0x32   :  { %5487 = vmatpush1.bf16.msra.mxu1 %v10879_v27  ;;  %v10953_v27 = vld [vmem:[%s15403_s1 + $0x2f0] sm:$0xff]  }
  0x33   :  { %6643 = vmatpush1.bf16.msra.mxu0 %v10880_v28  ;;  %5488 = vmatprep.subr.bf16.mxu1 %v12032_v0  ;;  %v10959_v28 = vld [vmem:[%s15404_s0 + $0x2c] ss:$84 sps:$4 sm:$0xff]  }
  0x34   :  { %6644 = vmatprep.subr.bf16.mxu0 %v12032_v0 }
  0x36   :  { %5489 = vmatpush1.bf16.msra.mxu1 %v10881_v29  ;;  %v11046_v29 = vld [vmem:[%s15403_s1 + $0xd0] sm:$0xff]  }
  0x37   :  { %6645 = vmatpush1.bf16.msra.mxu0 %v10882_v30  ;;  %5490 = vmatprep.subr.bf16.mxu1 %v12032_v0  ;;  %v10954_v30 = vld [vmem:[%s15403_s1 + $0x2f8] sm:$0xff]  }
  0x38   :  { %6646 = vmatprep.subr.bf16.mxu0 %v12032_v0 }
  0x3a   :  { %5491 = vmatpush1.bf16.msra.mxu1 %v10883_v31  ;;  %v10957_v31 = vld [vmem:[%s15404_s0 + $0x28] ss:$84 sps:$4 sm:$0xff]  }
  0x3b   :  { %6647 = vmatpush1.bf16.msra.mxu0 %v10884_v32  ;;  %5492 = vmatprep.subr.bf16.mxu1 %v12032_v0  ;;  %v10960_v32 = vld [vmem:[%s15404_s0 + $0x540] ss:$84 sps:$4 sm:$0xff]  }
  0x3c   :  { %6648 = vmatprep.subr.bf16.mxu0 %v12032_v0 }
  0x3e   :  { %5493 = vmatpush1.bf16.msra.mxu1 %v10885_v33  ;;  %v10961_v33 = vld [vmem:[%s15403_s1 + $0x300] sm:$0xff]  }
  0x3f   :  { %6649 = vmatpush1.bf16.msra.mxu0 %v10886_v34  ;;  %5751 = vmatprep.subr.bf16.mxu1 %v12032_v0  ;;  %v10963_v34 = vld [vmem:[%s15404_s0 + $0x5ec] ss:$84 sps:$4 sm:$0xff]  }
  0x40   :  { %6907 = vmatprep.subr.bf16.mxu0 %v12032_v0 }
  0x41   :  { %5495 = vmatmul.mubr.bf16.vlgmr.msra.gmra.mrb[0].mxu1 %v10887_v35  ;;  %v10965_v35 = vld [vmem:[%s15404_s0 + $0xd4] ss:$84 sps:$4 sm:$0xff]  }
  0x42   :  { %6651 = vmatmul.mubr.bf16.vlgmr.msra.gmra.mrb[0].mxu0 %v10890_v36  ;;  %5752 = vmatpush1.bf16.msra.mxu1 %v10894_v38  ;;  %v11060_v36 = vld [vmem:[%s15403_s1 + $0xd8] sm:$0xff]  }
  0x43   :  { %6908 = vmatpush1.bf16.msra.mxu0 %v10893_v37  ;;  %5502 = vmatprep.mubr.bf16.mxu1 %v10896_v39  ;;  %v10975_v37 = vld [vmem:[%s15403_s1 + $0x308] sm:$0xff]   ;;  %v10968_v39 = vld [vmem:[%s15404_s0 + $0xd0] ss:$84 sps:$4 sm:$0xff]  }
  0x44   :  { %6909 = vmatprep.subr.bf16.mxu0 %v12032_v0  ;;  %6658 = vmatprep.mubr.bf16.mxu0 %v10898_v40  ;;  %v10967_v38 = vld [vmem:[%s15404_s0 + $0x5e8] ss:$84 sps:$4 sm:$0xff]  }
  0x45   :  { %5753 = vmatprep.subr.bf16.mxu1 %v12032_v0  ;;  %v10969_v40 = vld [vmem:[%s15404_s0 + $0x694] ss:$84 sps:$4 sm:$0xff]  }
  0x46   :  { %5754 = vmatpush1.bf16.msra.mxu1 %v10911_v41  ;;  %v10971_v41 = vld [vmem:[%s15404_s0 + $0x17c] ss:$84 sps:$4 sm:$0xff]  }
  0x47   :  { %6910 = vmatpush1.bf16.msra.mxu0 %v10895_v42  ;;  %5755 = vmatprep.subr.bf16.mxu1 %v12032_v0  ;;  %v10989_v42 = vld [vmem:[%s15403_s1 + $0x310] sm:$0xff]  }
  0x48   :  { %6911 = vmatprep.subr.bf16.mxu0 %v12032_v0 }
  0x49   :  { %5503 = vmatmul.mubr.bf16.gmra.mrb[4].mxu1 %v10900_v43  ;;  %v11074_v43 = vld [vmem:[%s15403_s1 + $0xe0] sm:$0xff]  }
  0x4a   :  { %6659 = vmatmul.mubr.bf16.gmra.mrb[4].mxu0 %v10901_v44  ;;  %5510 = vmatprep.mubr.bf16.mxu1 %v10904_v46  ;;  %v10973_v44 = vld [vmem:[%s15404_s0 + $0x690] ss:$84 sps:$4 sm:$0xff]   ;;  %v10974_v46 = vld [vmem:[%s15404_s0 + $0x178] ss:$84 sps:$4 sm:$0xff]  }
  0x4b   :  { %6912 = vmatpush1.bf16.msra.mxu0 %v10902_v45  ;;  %6666 = vmatprep.mubr.bf16.mxu0 %v10906_v47  ;;  %v11003_v45 = vld [vmem:[%s15403_s1 + $0x318] sm:$0xff]  }
  0x4c   :  { %6913 = vmatprep.subr.bf16.mxu0 %v12032_v0  ;;  %5756 = vmatpush1.bf16.msra.mxu1 %v10928_v48  ;;  %v10977_v47 = vld [vmem:[%s15404_s0 + $0x73c] ss:$84 sps:$4 sm:$0xff]   ;;  %v10979_v48 = vld [vmem:[%s15404_s0 + $0x224] ss:$84 sps:$4 sm:$0xff]  }
  0x4d   :  { %5757 = vmatprep.subr.bf16.mxu1 %v12032_v0 }
  0x4f   :  { %6914 = vmatpush1.bf16.msra.mxu0 %v10903_v49  ;;  %v11017_v49 = vld [vmem:[%s15403_s1 + $0x320] sm:$0xff]  }
  0x50   :  { %6915 = vmatprep.subr.bf16.mxu0 %v12032_v0  ;;  %5758 = vmatpush1.bf16.msra.mxu1 %v10945_v52  ;;  %v11031_v52 = vld [vmem:[%s15403_s1 + $0x328] sm:$0xff]  }
  0x51   :  { %5511 = vmatmul.mubr.bf16.gmra.mrb[8].mxu1 %v10908_v50  ;;  %5759 = vmatprep.subr.bf16.mxu1 %v12032_v0  ;;  %v11088_v50 = vld [vmem:[%s15403_s1 + $0xe8] sm:$0xff]  }
  0x52   :  { %6667 = vmatmul.mubr.bf16.gmra.mrb[8].mxu0 %v10909_v51  ;;  %5518 = vmatprep.mubr.bf16.mxu1 %v10913_v54  ;;  %v10981_v51 = vld [vmem:[%s15404_s0 + $0x738] ss:$84 sps:$4 sm:$0xff]  }
  0x53   :  { %6916 = vmatpush1.bf16.msra.mxu0 %v10910_v53  ;;  %6674 = vmatprep.mubr.bf16.mxu0 %v10915_v55  ;;  %v10982_v53 = vld [vmem:[%s15404_s0 + $0x220] ss:$84 sps:$4 sm:$0xff]   ;;  %v10983_v54 = vld [vmem:[%s15404_s0 + $0x7e4] ss:$84 sps:$4 sm:$0xff]  }
  0x54   :  { %6917 = vmatprep.subr.bf16.mxu0 %v12032_v0  ;;  %5760 = vmatpush1.bf16.msra.mxu1 %v10962_v56  ;;  %v10985_v55 = vld [vmem:[%s15404_s0 + $0x2cc] ss:$84 sps:$4 sm:$0xff]   ;;  %v11045_v56 = vld [vmem:[%s15403_s1 + $0x330] sm:$0xff]  }
  0x55   :  { %5761 = vmatprep.subr.bf16.mxu1 %v12032_v0 }
  0x57   :  { %6918 = vmatpush1.bf16.msra.mxu0 %v10912_v57  ;;  %v10987_v57 = vld [vmem:[%s15404_s0 + $0x7e0] ss:$84 sps:$4 sm:$0xff]  }
  0x58   :  { %6919 = vmatprep.subr.bf16.mxu0 %v12032_v0  ;;  %5762 = vmatpush1.bf16.msra.mxu1 %v10976_v60  ;;  %v10991_v60 = vld [vmem:[%s15404_s0 + $0x88c] ss:$84 sps:$4 sm:$0xff]  }
  0x59   :  { %5519 = vmatmul.mubr.bf16.gmra.mrb[12].mxu1 %v10917_v58  ;;  %5763 = vmatprep.subr.bf16.mxu1 %v12032_v0  ;;  %v11059_v58 = vld [vmem:[%s15403_s1 + $0x338] sm:$0xff]  }
  0x5a   :  { %6675 = vmatmul.mubr.bf16.gmra.mrb[12].mxu0 %v10918_v59  ;;  %5526 = vmatprep.mubr.bf16.mxu1 %v10921_v61  ;;  %v10988_v59 = vld [vmem:[%s15404_s0 + $0x2c8] ss:$84 sps:$4 sm:$0xff]  }
  0x5b   :  { %6920 = vmatpush1.bf16.msra.mxu0 %v10919_v62  ;;  %6682 = vmatprep.mubr.bf16.mxu0 %v10923_v63  ;;  %v10993_v61 = vld [vmem:[%s15404_s0 + $0x374] ss:$84 sps:$4 sm:$0xff]   ;;  %v11073_v62 = vld [vmem:[%s15403_s1 + $0x340] sm:$0xff]  }
  0x5c   :  { %6921 = vmatprep.subr.bf16.mxu0 %v12032_v0  ;;  %5764 = vmatpush1.bf16.msra.mxu1 %v10990_v3  ;;  %v11102_v63 = vld [vmem:[%s15403_s1 + $0xf0] sm:$0xff]  }
  0x5d   :  { %5765 = vmatprep.subr.bf16.mxu1 %v12032_v0  ;;  %v10996_v3 = vld [vmem:[%s15404_s0 + $0x370] ss:$84 sps:$4 sm:$0xff]  }
  0x5f   :  { %6922 = vmatpush1.bf16.msra.mxu0 %v10920_v1  ;;  %v10995_v1 = vld [vmem:[%s15404_s0 + $0x888] ss:$84 sps:$4 sm:$0xff]  }
  0x60   :  { %6923 = vmatprep.subr.bf16.mxu0 %v12032_v0  ;;  %5766 = vmatpush1.bf16.msra.mxu1 %v11004_v9  ;;  %v11005_v9 = vld [vmem:[%s15404_s0 + $0x9dc] ss:$84 sps:$4 sm:$0xff]  }
  0x61   :  { %5527 = vmatmul.mubr.bf16.gmra.mrb[16].mxu1 %v10925_v2  ;;  %5767 = vmatprep.subr.bf16.mxu1 %v12032_v0  ;;  %v11087_v2 = vld [vmem:[%s15403_s1 + $0x348] sm:$0xff]  }
  0x62   :  { %6683 = vmatmul.mubr.bf16.gmra.mrb[16].mxu0 %v10926_v4  ;;  %5534 = vmatprep.mubr.bf16.mxu1 %v10930_v6  ;;  %v10997_v4 = vld [vmem:[%s15404_s0 + $0x934] ss:$84 sps:$4 sm:$0xff]  }
  0x63   :  { %6924 = vmatpush1.bf16.msra.mxu0 %v10927_v5  ;;  %6690 = vmatprep.mubr.bf16.mxu0 %v10932_v7  ;;  %v10999_v5 = vld [vmem:[%s15404_s0 + $0x41c] ss:$84 sps:$4 sm:$0xff]  }
  0x64   :  { %6925 = vmatprep.subr.bf16.mxu0 %v12032_v0  ;;  %5768 = vmatpush1.bf16.msra.mxu1 %v11018_v16  ;;  %v11101_v6 = vld [vmem:[%s15403_s1 + $0x350] sm:$0xff]   ;;  %v11013_v16 = vld [vmem:[%s15404_s0 + $0x56c] ss:$84 sps:$4 sm:$0xff]  }
  0x65   :  { %5769 = vmatprep.subr.bf16.mxu1 %v12032_v0  ;;  %v11001_v7 = vld [vmem:[%s15404_s0 + $0x930] ss:$84 sps:$4 sm:$0xff]  }
  0x67   :  { %6926 = vmatpush1.bf16.msra.mxu0 %v10929_v8  ;;  %v11002_v8 = vld [vmem:[%s15404_s0 + $0x418] ss:$84 sps:$4 sm:$0xff]  }
  0x68   :  { %6927 = vmatprep.subr.bf16.mxu0 %v12032_v0  ;;  %5770 = vmatpush1.bf16.msra.mxu1 %v11032_v22  ;;  %v11023_v22 = vld [vmem:[%s15404_s0 + $0xb28] ss:$84 sps:$4 sm:$0xff]  }
  0x69   :  { %5535 = vmatmul.mubr.bf16.gmra.mrb[20].mxu1 %v10934_v10  ;;  %5771 = vmatprep.subr.bf16.mxu1 %v12032_v0  ;;  %v11007_v10 = vld [vmem:[%s15404_s0 + $0x4c4] ss:$84 sps:$4 sm:$0xff]  }
  0x6a   :  { %6691 = vmatmul.mubr.bf16.gmra.mrb[20].mxu0 %v10935_v11  ;;  %5542 = vmatprep.mubr.bf16.mxu1 %v10938_v13  ;;  %v11115_v11 = vld [vmem:[%s15403_s1 + $0x358] sm:$0xff]  }
  0x6b   :  { %6928 = vmatpush1.bf16.msra.mxu0 %v10936_v12  ;;  %6698 = vmatprep.mubr.bf16.mxu0 %v10940_v14  ;;  %v11116_v12 = vld [vmem:[%s15403_s1 + $0xf8] sm:$0xff]   ;;  %v11010_v14 = vld [vmem:[%s15404_s0 + $0x4c0] ss:$84 sps:$4 sm:$0xff]  }
  0x6c   :  { %6929 = vmatprep.subr.bf16.mxu0 %v12032_v0  ;;  %5772 = vmatpush1.bf16.msra.mxu1 %v11046_v29  ;;  %v11009_v13 = vld [vmem:[%s15404_s0 + $0x9d8] ss:$84 sps:$4 sm:$0xff]  }
  0x6d   :  { %5773 = vmatprep.subr.bf16.mxu1 %v12032_v0  ;;  %v11035_v29 = vld [vmem:[%s15404_s0 + $0x764] ss:$84 sps:$4 sm:$0xff]  }
  0x6f   :  { %6930 = vmatpush1.bf16.msra.mxu0 %v10937_v15  ;;  %v11011_v15 = vld [vmem:[%s15404_s0 + $0xa84] ss:$84 sps:$4 sm:$0xff]  }
  0x70   :  { %6931 = vmatprep.subr.bf16.mxu0 %v12032_v0  ;;  %5774 = vmatpush1.bf16.msra.mxu1 %v11060_v36  ;;  %v11044_v36 = vld [vmem:[%s15404_s0 + $0x808] ss:$84 sps:$4 sm:$0xff]  }
  0x71   :  { %5543 = vmatmul.mubr.bf16.gmra.mrb[24].mxu1 %v10942_v17  ;;  %5775 = vmatprep.subr.bf16.mxu1 %v12032_v0  ;;  %v11015_v17 = vld [vmem:[%s15404_s0 + $0xa80] ss:$84 sps:$4 sm:$0xff]  }
  0x72   :  { %6699 = vmatmul.mubr.bf16.gmra.mrb[24].mxu0 %v10943_v18  ;;  %5550 = vmatprep.mubr.bf16.mxu1 %v10947_v20  ;;  %v11016_v18 = vld [vmem:[%s15404_s0 + $0x568] ss:$84 sps:$4 sm:$0xff]  }
  0x73   :  { %6932 = vmatpush1.bf16.msra.mxu0 %v10944_v19  ;;  %6706 = vmatprep.mubr.bf16.mxu0 %v10949_v21  ;;  %v11019_v19 = vld [vmem:[%s15404_s0 + $0xb2c] ss:$84 sps:$4 sm:$0xff]   ;;  %v11021_v20 = vld [vmem:[%s15404_s0 + $0x614] ss:$84 sps:$4 sm:$0xff]  }
  0x74   :  { %6933 = vmatprep.subr.bf16.mxu0 %v12032_v0  ;;  %5776 = vmatpush1.bf16.msra.mxu1 %v11074_v43  ;;  %v11129_v21 = vld [vmem:[%s15403_s1 + $0x360] sm:$0xff]   ;;  %v11055_v43 = vld [vmem:[%s15404_s0 + $0x95c] ss:$84 sps:$4 sm:$0xff]  }
  0x75   :  { %5777 = vmatprep.subr.bf16.mxu1 %v12032_v0 }
  0x77   :  { %6934 = vmatpush1.bf16.msra.mxu0 %v10946_v23  ;;  %v11024_v23 = vld [vmem:[%s15404_s0 + $0x610] ss:$84 sps:$4 sm:$0xff]  }
  0x78   :  { %6935 = vmatprep.subr.bf16.mxu0 %v12032_v0  ;;  %5778 = vmatpush1.bf16.msra.mxu1 %v11088_v50  ;;  %v11066_v50 = vld [vmem:[%s15404_s0 + $0xa00] ss:$84 sps:$4 sm:$0xff]  }
  0x79   :  { %5551 = vmatmul.mubr.bf16.gmra.mrb[28].mxu1 %v10951_v24  ;;  %5779 = vmatprep.subr.bf16.mxu1 %v12032_v0  ;;  %v11025_v24 = vld [vmem:[%s15404_s0 + $0xbd4] ss:$84 sps:$4 sm:$0xff]  }
  0x7a   :  { %6707 = vmatmul.mubr.bf16.gmra.mrb[28].mxu0 %v10952_v25  ;;  %5558 = vmatprep.mubr.bf16.mxu1 %v10955_v26  ;;  %v11027_v25 = vld [vmem:[%s15404_s0 + $0x6bc] ss:$84 sps:$4 sm:$0xff]  }
  0x7b   :  { %6936 = vmatpush1.bf16.msra.mxu0 %v10953_v27  ;;  %6939 = vmatprep.mubr.bf16.mxu0 %v10959_v28  ;;  %v11029_v26 = vld [vmem:[%s15404_s0 + $0xbd0] ss:$84 sps:$4 sm:$0xff]   ;;  %v11030_v27 = vld [vmem:[%s15404_s0 + $0x6b8] ss:$84 sps:$4 sm:$0xff]  }
  0x7c   :  { %6937 = vmatprep.subr.bf16.mxu0 %v12032_v0  ;;  %5780 = vmatpush1.bf16.msra.mxu1 %v11102_v63  ;;  %v11033_v28 = vld [vmem:[%s15404_s0 + $0xc7c] ss:$84 sps:$4 sm:$0xff]  }
  0x7d   :  { %5781 = vmatprep.subr.bf16.mxu1 %v12032_v0  ;;  %v11089_v63 = vld [vmem:[%s15404_s0 + $0x11bc] ss:$84 sps:$4 sm:$0xff]  }
  0x7f   :  { %6938 = vmatpush1.bf16.msra.mxu0 %v10954_v30  ;;  %v11143_v30 = vld [vmem:[%s15403_s1 + $0x368] sm:$0xff]  }
  0x80   :  { %7196 = vmatprep.subr.bf16.mxu0 %v12032_v0  ;;  %5782 = vmatpush1.bf16.msra.mxu1 %v11116_v12  ;;  %v11109_v12 = vld [vmem:[%s15404_s0 + $0x13b4] ss:$84 sps:$4 sm:$0xff]  }
  0x81   :  { %5559 = vmatmul.mubr.bf16.gmra.mrb[32].mxu1 %v10960_v32  ;;  %6040 = vmatprep.subr.bf16.mxu1 %v12032_v0  ;;  %v11038_v32 = vld [vmem:[%s15404_s0 + $0x760] ss:$84 sps:$4 sm:$0xff]  }
  0x82   :  { %6940 = vmatmul.mubr.bf16.vlgmr.msra.gmra.mrb[0].mxu0 %v10957_v31  ;;  %5566 = vmatprep.mubr.bf16.mxu1 %v10963_v34  ;;  %v11037_v31 = vld [vmem:[%s15404_s0 + $0xc78] ss:$84 sps:$4 sm:$0xff]  }
  0x83   :  { %7197 = vmatpush1.bf16.msra.mxu0 %v10961_v33  ;;  %6947 = vmatprep.mubr.bf16.mxu0 %v10965_v35  ;;  %v11039_v33 = vld [vmem:[%s15404_s0 + $0xd24] ss:$84 sps:$4 sm:$0xff]   ;;  %v11041_v34 = vld [vmem:[%s15404_s0 + $0x80c] ss:$84 sps:$4 sm:$0xff]  }
  0x84   :  { %7198 = vmatprep.subr.bf16.mxu0 %v12032_v0  ;;  %v11043_v35 = vld [vmem:[%s15404_s0 + $0xd20] ss:$84 sps:$4 sm:$0xff]  }
  0x87   :  { %7199 = vmatpush1.bf16.msra.mxu0 %v10975_v37  ;;  %v11047_v37 = vld [vmem:[%s15404_s0 + $0xdcc] ss:$84 sps:$4 sm:$0xff]  }
  0x88   :  { %7200 = vmatprep.subr.bf16.mxu0 %v12032_v0 }
  0x89   :  { %5567 = vmatmul.mubr.bf16.gmra.mrb[36].mxu1 %v10967_v38  ;;  %v11049_v38 = vld [vmem:[%s15404_s0 + $0x8b4] ss:$84 sps:$4 sm:$0xff]  }
  0x8a   :  { %6948 = vmatmul.mubr.bf16.gmra.mrb[4].mxu0 %v10968_v39  ;;  %5574 = vmatprep.mubr.bf16.mxu1 %v10969_v40  ;;  %v11157_v39 = vld [vmem:[%s15403_s1 + $0x370] sm:$0xff]   ;;  %v11051_v40 = vld [vmem:[%s15404_s0 + $0xdc8] ss:$84 sps:$4 sm:$0xff]  }
  0x8b   :  { %6955 = vmatprep.mubr.bf16.mxu0 %v10971_v41  ;;  %7201 = vmatpush1.bf16.msra.mxu0 %v10989_v42  ;;  %v11052_v41 = vld [vmem:[%s15404_s0 + $0x8b0] ss:$84 sps:$4 sm:$0xff]   ;;  %v11053_v42 = vld [vmem:[%s15404_s0 + $0xe74] ss:$84 sps:$4 sm:$0xff]  }
  0x8c   :  { %7202 = vmatprep.subr.bf16.mxu0 %v12032_v0 }
  0x8f   :  { %7203 = vmatpush1.bf16.msra.mxu0 %v11003_v45  ;;  %v11058_v45 = vld [vmem:[%s15404_s0 + $0x958] ss:$84 sps:$4 sm:$0xff]  }
  0x90   :  { %7204 = vmatprep.subr.bf16.mxu0 %v12032_v0 }
  0x91   :  { %5575 = vmatmul.mubr.bf16.gmra.mrb[40].mxu1 %v10973_v44  ;;  %v11057_v44 = vld [vmem:[%s15404_s0 + $0xe70] ss:$84 sps:$4 sm:$0xff]  }
  0x92   :  { %6956 = vmatmul.mubr.bf16.gmra.mrb[8].mxu0 %v10974_v46  ;;  %5582 = vmatprep.mubr.bf16.mxu1 %v10977_v47  ;;  %v11061_v46 = vld [vmem:[%s15404_s0 + $0xf1c] ss:$84 sps:$4 sm:$0xff]   ;;  %v11063_v47 = vld [vmem:[%s15404_s0 + $0xa04] ss:$84 sps:$4 sm:$0xff]  }
  0x93   :  { %6963 = vmatprep.mubr.bf16.mxu0 %v10979_v48  ;;  %7205 = vmatpush1.bf16.msra.mxu0 %v11017_v49  ;;  %v11171_v48 = vld [vmem:[%s15403_s1 + $0x378] sm:$0xff]  }
  0x94   :  { %7206 = vmatprep.subr.bf16.mxu0 %v12032_v0  ;;  %v11065_v49 = vld [vmem:[%s15404_s0 + $0xf18] ss:$84 sps:$4 sm:$0xff]  }
  0x97   :  { %7207 = vmatpush1.bf16.msra.mxu0 %v11031_v52  ;;  %v11069_v52 = vld [vmem:[%s15404_s0 + $0xaac] ss:$84 sps:$4 sm:$0xff]  }
  0x98   :  { %7208 = vmatprep.subr.bf16.mxu0 %v12032_v0 }
  0x99   :  { %5583 = vmatmul.mubr.bf16.gmra.mrb[44].mxu1 %v10981_v51  ;;  %v11067_v51 = vld [vmem:[%s15404_s0 + $0xfc4] ss:$84 sps:$4 sm:$0xff]  }
  0x9a   :  { %6964 = vmatmul.mubr.bf16.gmra.mrb[12].mxu0 %v10982_v53  ;;  %5590 = vmatprep.mubr.bf16.mxu1 %v10983_v54  ;;  %v11071_v53 = vld [vmem:[%s15404_s0 + $0xfc0] ss:$84 sps:$4 sm:$0xff]   ;;  %v11072_v54 = vld [vmem:[%s15404_s0 + $0xaa8] ss:$84 sps:$4 sm:$0xff]  }
  0x9b   :  { %6971 = vmatprep.mubr.bf16.mxu0 %v10985_v55  ;;  %7209 = vmatpush1.bf16.msra.mxu0 %v11045_v56  ;;  %v11075_v55 = vld [vmem:[%s15404_s0 + $0x106c] ss:$84 sps:$4 sm:$0xff]   ;;  %v11077_v56 = vld [vmem:[%s15404_s0 + $0xb54] ss:$84 sps:$4 sm:$0xff]  }
  0x9c   :  { %7210 = vmatprep.subr.bf16.mxu0 %v12032_v0 }
  0x9f   :  { %7211 = vmatpush1.bf16.msra.mxu0 %v11059_v58  ;;  %v11080_v58 = vld [vmem:[%s15404_s0 + $0xb50] ss:$84 sps:$4 sm:$0xff]  }
  0xa0   :  { %7212 = vmatprep.subr.bf16.mxu0 %v12032_v0 }
  0xa1   :  { %5591 = vmatmul.mubr.bf16.gmra.mrb[48].mxu1 %v10987_v57  ;;  %v11079_v57 = vld [vmem:[%s15404_s0 + $0x1068] ss:$84 sps:$4 sm:$0xff]  }
  0xa2   :  { %6972 = vmatmul.mubr.bf16.gmra.mrb[16].mxu0 %v10988_v59  ;;  %5598 = vmatprep.mubr.bf16.mxu1 %v10991_v60  ;;  %v11081_v59 = vld [vmem:[%s15404_s0 + $0x1114] ss:$84 sps:$4 sm:$0xff]   ;;  %v11083_v60 = vld [vmem:[%s15404_s0 + $0xbfc] ss:$84 sps:$4 sm:$0xff]  }
  0xa3   :  { %6979 = vmatprep.mubr.bf16.mxu0 %v10993_v61  ;;  %7213 = vmatpush1.bf16.msra.mxu0 %v11073_v62  ;;  %v11085_v61 = vld [vmem:[%s15404_s0 + $0x1110] ss:$84 sps:$4 sm:$0xff]   ;;  %v11086_v62 = vld [vmem:[%s15404_s0 + $0xbf8] ss:$84 sps:$4 sm:$0xff]  }
  0xa4   :  { %7214 = vmatprep.subr.bf16.mxu0 %v12032_v0 }
  0xa7   :  { %7215 = vmatpush1.bf16.msra.mxu0 %v11087_v2  ;;  %v11093_v2 = vld [vmem:[%s15404_s0 + $0x11b8] ss:$84 sps:$4 sm:$0xff]  }
  0xa8   :  { %7216 = vmatprep.subr.bf16.mxu0 %v12032_v0 }
  0xa9   :  { %5599 = vmatmul.mubr.bf16.gmra.mrb[52].mxu1 %v10995_v1  ;;  %v11091_v1 = vld [vmem:[%s15404_s0 + $0xca4] ss:$84 sps:$4 sm:$0xff]  }
  0xaa   :  { %6980 = vmatmul.mubr.bf16.gmra.mrb[20].mxu0 %v10996_v3  ;;  %5606 = vmatprep.mubr.bf16.mxu1 %v10997_v4  ;;  %v11094_v3 = vld [vmem:[%s15404_s0 + $0xca0] ss:$84 sps:$4 sm:$0xff]   ;;  %v11095_v4 = vld [vmem:[%s15404_s0 + $0x1264] ss:$84 sps:$4 sm:$0xff]  }
  0xab   :  { %6987 = vmatprep.mubr.bf16.mxu0 %v10999_v5  ;;  %7217 = vmatpush1.bf16.msra.mxu0 %v11101_v6  ;;  %v11097_v5 = vld [vmem:[%s15404_s0 + $0xd4c] ss:$84 sps:$4 sm:$0xff]  }
  0xac   :  { %7218 = vmatprep.subr.bf16.mxu0 %v12032_v0  ;;  %v11099_v6 = vld [vmem:[%s15404_s0 + $0x1260] ss:$84 sps:$4 sm:$0xff]  }
  0xaf   :  { %7219 = vmatpush1.bf16.msra.mxu0 %v11115_v11  ;;  %v11108_v11 = vld [vmem:[%s15404_s0 + $0xdf0] ss:$84 sps:$4 sm:$0xff]  }
  0xb0   :  { %7220 = vmatprep.subr.bf16.mxu0 %v12032_v0 }
  0xb1   :  { %5607 = vmatmul.mubr.bf16.gmra.mrb[56].mxu1 %v11001_v7  ;;  %v11100_v7 = vld [vmem:[%s15404_s0 + $0xd48] ss:$84 sps:$4 sm:$0xff]  }
  0xb2   :  { %6988 = vmatmul.mubr.bf16.gmra.mrb[24].mxu0 %v11002_v8  ;;  %5614 = vmatprep.mubr.bf16.mxu1 %v11005_v9  ;;  %v11103_v8 = vld [vmem:[%s15404_s0 + $0x130c] ss:$84 sps:$4 sm:$0xff]   ;;  %v11105_v9 = vld [vmem:[%s15404_s0 + $0xdf4] ss:$84 sps:$4 sm:$0xff]  }
  0xb3   :  { %6995 = vmatprep.mubr.bf16.mxu0 %v11007_v10  ;;  %7221 = vmatpush1.bf16.msra.mxu0 %v11129_v21  ;;  %v11107_v10 = vld [vmem:[%s15404_s0 + $0x1308] ss:$84 sps:$4 sm:$0xff]   ;;  %v11126_v21 = vld [vmem:[%s15404_s0 + $0xfec] ss:$84 sps:$4 sm:$0xff]  }
  0xb4   :  { %7222 = vmatprep.subr.bf16.mxu0 %v12032_v0 }
  0xb7   :  { %7223 = vmatpush1.bf16.msra.mxu0 %v11143_v30  ;;  %v11137_v30 = vld [vmem:[%s15404_s0 + $0x15c] ss:$84 sps:$4 sm:$0xff]  }
  0xb8   :  { %7224 = vmatprep.subr.bf16.mxu0 %v12032_v0 }
  0xb9   :  { %5615 = vmatmul.mubr.bf16.gmra.mrb[60].mxu1 %v11009_v13  ;;  %v11111_v13 = vld [vmem:[%s15404_s0 + $0xe9c] ss:$84 sps:$4 sm:$0xff]  }
  0xba   :  { %6996 = vmatmul.mubr.bf16.gmra.mrb[28].mxu0 %v11010_v14  ;;  %5622 = vmatprep.mubr.bf16.mxu1 %v11011_v15  ;;  %v11113_v14 = vld [vmem:[%s15404_s0 + $0x13b0] ss:$84 sps:$4 sm:$0xff]   ;;  %v11114_v15 = vld [vmem:[%s15404_s0 + $0xe98] ss:$84 sps:$4 sm:$0xff]  }
  0xbb   :  { %7003 = vmatprep.mubr.bf16.mxu0 %v11013_v16  ;;  %7225 = vmatpush1.bf16.msra.mxu0 %v11157_v39  ;;  %v11117_v16 = vld [vmem:[%s15404_s0 + $0x145c] ss:$84 sps:$4 sm:$0xff]   ;;  %v11149_v39 = vld [vmem:[%s15404_s0 + $0x200] ss:$84 sps:$4 sm:$0xff]  }
  0xbc   :  { %7226 = vmatprep.subr.bf16.mxu0 %v12032_v0 }
  0xbf   :  { %7227 = vmatpush1.bf16.msra.mxu0 %v11171_v48  ;;  %v11159_v48 = vld [vmem:[%s15404_s0 + $0x354] ss:$84 sps:$4 sm:$0xff]  }
  0xc0   :  { %7485 = vmatprep.subr.bf16.mxu0 %v12032_v0 }
  0xc1   :  { %5623 = vmatmul.mubr.bf16.gmra.mrb[64].mxu1 %v11015_v17  ;;  %v11119_v17 = vld [vmem:[%s15404_s0 + $0xf44] ss:$84 sps:$4 sm:$0xff]  }
  0xc2   :  { %7004 = vmatmul.mubr.bf16.gmra.mrb[32].mxu0 %v11016_v18  ;;  %5630 = vmatprep.mubr.bf16.mxu1 %v11019_v19  ;;  %v11121_v18 = vld [vmem:[%s15404_s0 + $0x1458] ss:$84 sps:$4 sm:$0xff]   ;;  %v11122_v19 = vld [vmem:[%s15404_s0 + $0xf40] ss:$84 sps:$4 sm:$0xff]  }
  0xc3   :  { %7011 = vmatprep.mubr.bf16.mxu0 %v11021_v20  ;;  %v11125_v20 = vld [vmem:[%s15404_s0 + $0xc] ss:$84 sps:$4 sm:$0xff]  }
  0xc9   :  { %5631 = vmatmul.mubr.bf16.gmra.mrb[68].mxu1 %v11023_v22  ;;  %v11123_v22 = vld [vmem:[%s15404_s0 + $0x8] ss:$84 sps:$4 sm:$0xff]  }
  0xca   :  { %7012 = vmatmul.mubr.bf16.gmra.mrb[36].mxu0 %v11024_v23  ;;  %5638 = vmatprep.mubr.bf16.mxu1 %v11025_v24  ;;  %v11128_v23 = vld [vmem:[%s15404_s0 + $0xfe8] ss:$84 sps:$4 sm:$0xff]   ;;  %v11130_v24 = vld [vmem:[%s15403_s1 + $0x100] sm:$0xff]  }
  0xcb   :  { %7019 = vmatprep.mubr.bf16.mxu0 %v11027_v25  ;;  %v11131_v25 = vld [vmem:[%s15404_s0 + $0xb4] ss:$84 sps:$4 sm:$0xff]  }
  0xd1   :  { %5639 = vmatmul.mubr.bf16.gmra.mrb[72].mxu1 %v11029_v26  ;;  %v11133_v26 = vld [vmem:[%s15404_s0 + $0x1094] ss:$84 sps:$4 sm:$0xff]  }
  0xd2   :  { %7020 = vmatmul.mubr.bf16.gmra.mrb[40].mxu0 %v11030_v27  ;;  %5646 = vmatprep.mubr.bf16.mxu1 %v11033_v28  ;;  %v11144_v27 = vld [vmem:[%s15403_s1 + $0x108] sm:$0xff]   ;;  %v11135_v28 = vld [vmem:[%s15404_s0 + $0xb0] ss:$84 sps:$4 sm:$0xff]  }
  0xd3   :  { %7027 = vmatprep.mubr.bf16.mxu0 %v11035_v29  ;;  %v11136_v29 = vld [vmem:[%s15404_s0 + $0x1090] ss:$84 sps:$4 sm:$0xff]  }
  0xd9   :  { %5647 = vmatmul.mubr.bf16.gmra.mrb[76].mxu1 %v11037_v31  ;;  %v11139_v31 = vld [vmem:[%s15404_s0 + $0x113c] ss:$84 sps:$4 sm:$0xff]  }
  0xda   :  { %7028 = vmatmul.mubr.bf16.gmra.mrb[44].mxu0 %v11038_v32  ;;  %5654 = vmatprep.mubr.bf16.mxu1 %v11039_v33  ;;  %v11158_v32 = vld [vmem:[%s15403_s1 + $0x110] sm:$0xff]   ;;  %v11141_v33 = vld [vmem:[%s15404_s0 + $0x158] ss:$84 sps:$4 sm:$0xff]  }
  0xdb   :  { %7035 = vmatprep.mubr.bf16.mxu0 %v11041_v34  ;;  %v11172_v34 = vld [vmem:[%s15403_s1 + $0x118] sm:$0xff]  }
  0xe1   :  { %5655 = vmatmul.mubr.bf16.gmra.mrb[80].mxu1 %v11043_v35  ;;  %v11142_v35 = vld [vmem:[%s15404_s0 + $0x1138] ss:$84 sps:$4 sm:$0xff]  }
  0xe2   :  { %7036 = vmatmul.mubr.bf16.gmra.mrb[48].mxu0 %v11044_v36  ;;  %5662 = vmatprep.mubr.bf16.mxu1 %v11047_v37  ;;  %v11145_v36 = vld [vmem:[%s15404_s0 + $0x204] ss:$84 sps:$4 sm:$0xff]  }
  0xe3   :  { %7043 = vmatprep.mubr.bf16.mxu0 %v11049_v38  ;;  %v11147_v37 = vld [vmem:[%s15404_s0 + $0x11e4] ss:$84 sps:$4 sm:$0xff]  }
  0xe4   :  { %v11186_v38 = vld [vmem:[%s15403_s1 + $0x120] sm:$0xff]  }
  0xe9   :  { %5663 = vmatmul.mubr.bf16.gmra.mrb[84].mxu1 %v11051_v40  ;;  %v11200_v40 = vld [vmem:[%s15403_s1 + $0x128] sm:$0xff]  }
  0xea   :  { %7044 = vmatmul.mubr.bf16.gmra.mrb[52].mxu0 %v11052_v41  ;;  %5670 = vmatprep.mubr.bf16.mxu1 %v11053_v42  ;;  %v11150_v41 = vld [vmem:[%s15404_s0 + $0x11e0] ss:$84 sps:$4 sm:$0xff]  }
  0xeb   :  { %7051 = vmatprep.mubr.bf16.mxu0 %v11055_v43  ;;  %v11151_v42 = vld [vmem:[%s15404_s0 + $0x2ac] ss:$84 sps:$4 sm:$0xff]  }
  0xec   :  { %v11153_v43 = vld [vmem:[%s15404_s0 + $0x128c] ss:$84 sps:$4 sm:$0xff]  }
  0xf1   :  { %5671 = vmatmul.mubr.bf16.gmra.mrb[88].mxu1 %v11057_v44  ;;  %v11214_v44 = vld [vmem:[%s15403_s1 + $0x130] sm:$0xff]  }
  0xf2   :  { %7052 = vmatmul.mubr.bf16.gmra.mrb[56].mxu0 %v11058_v45  ;;  %5678 = vmatprep.mubr.bf16.mxu1 %v11061_v46  ;;  %v11155_v45 = vld [vmem:[%s15404_s0 + $0x2a8] ss:$84 sps:$4 sm:$0xff]  }
  0xf3   :  { %7059 = vmatprep.mubr.bf16.mxu0 %v11063_v47  ;;  %v11228_v46 = vld [vmem:[%s15403_s1 + $0x138] sm:$0xff]  }
  0xf4   :  { %v11156_v47 = vld [vmem:[%s15404_s0 + $0x1288] ss:$84 sps:$4 sm:$0xff]  }
  0xf9   :  { %5679 = vmatmul.mubr.bf16.gmra.mrb[92].mxu1 %v11065_v49  ;;  %v11161_v49 = vld [vmem:[%s15404_s0 + $0x1334] ss:$84 sps:$4 sm:$0xff]  }
  0xfa   :  { %7060 = vmatmul.mubr.bf16.gmra.mrb[60].mxu0 %v11066_v50  ;;  %5686 = vmatprep.mubr.bf16.mxu1 %v11067_v51  ;;  %v11242_v50 = vld [vmem:[%s15403_s1 + $0x140] sm:$0xff]  }
  0xfb   :  { %7067 = vmatprep.mubr.bf16.mxu0 %v11069_v52  ;;  %v11163_v51 = vld [vmem:[%s15404_s0 + $0x350] ss:$84 sps:$4 sm:$0xff]   ;;  %v11256_v52 = vld [vmem:[%s15403_s1 + $0x148] sm:$0xff]  }
 0x101   :  { %5687 = vmatmul.mubr.bf16.gmra.mrb[96].mxu1 %v11071_v53  ;;  %v11164_v53 = vld [vmem:[%s15404_s0 + $0x1330] ss:$84 sps:$4 sm:$0xff]  }
 0x102   :  { %7068 = vmatmul.mubr.bf16.gmra.mrb[64].mxu0 %v11072_v54  ;;  %5694 = vmatprep.mubr.bf16.mxu1 %v11075_v55  ;;  %v11165_v54 = vld [vmem:[%s15404_s0 + $0x3fc] ss:$84 sps:$4 sm:$0xff]  }
 0x103   :  { %7075 = vmatprep.mubr.bf16.mxu0 %v11077_v56  ;;  %v11167_v55 = vld [vmem:[%s15404_s0 + $0x13dc] ss:$84 sps:$4 sm:$0xff]  }
 0x104   :  { %v11270_v56 = vld [vmem:[%s15403_s1 + $0x150] sm:$0xff]  }
 0x109   :  { %5695 = vmatmul.mubr.bf16.gmra.mrb[100].mxu1 %v11079_v57  ;;  %v11169_v57 = vld [vmem:[%s15404_s0 + $0x3f8] ss:$84 sps:$4 sm:$0xff]  }
 0x10a   :  { %7076 = vmatmul.mubr.bf16.gmra.mrb[68].mxu0 %v11080_v58  ;;  %5702 = vmatprep.mubr.bf16.mxu1 %v11081_v59  ;;  %v11170_v58 = vld [vmem:[%s15404_s0 + $0x13d8] ss:$84 sps:$4 sm:$0xff]  }
 0x10b   :  { %7083 = vmatprep.mubr.bf16.mxu0 %v11083_v60  ;;  %v11173_v59 = vld [vmem:[%s15404_s0 + $0x4a4] ss:$84 sps:$4 sm:$0xff]  }
 0x10c   :  { %v11175_v60 = vld [vmem:[%s15404_s0 + $0x1484] ss:$84 sps:$4 sm:$0xff]  }
 0x111   :  { %5703 = vmatmul.mubr.bf16.gmra.mrb[104].mxu1 %v11085_v61  ;;  %v11284_v61 = vld [vmem:[%s15403_s1 + $0x158] sm:$0xff]  }
 0x112   :  { %7084 = vmatmul.mubr.bf16.gmra.mrb[72].mxu0 %v11086_v62  ;;  %5710 = vmatprep.mubr.bf16.mxu1 %v11089_v63  ;;  %v11177_v62 = vld [vmem:[%s15404_s0 + $0x4a0] ss:$84 sps:$4 sm:$0xff]  }
 0x113   :  { %7091 = vmatprep.mubr.bf16.mxu0 %v11091_v1  ;;  %v11178_v63 = vld [vmem:[%s15404_s0 + $0x1480] ss:$84 sps:$4 sm:$0xff]  }
 0x114   :  { %v11179_v1 = vld [vmem:[%s15404_s0 + $0x54c] ss:$84 sps:$4 sm:$0xff]  }
 0x119   :  { %5711 = vmatmul.mubr.bf16.gmra.mrb[108].mxu1 %v11093_v2  ;;  %v11183_v2 = vld [vmem:[%s15404_s0 + $0x34] ss:$84 sps:$4 sm:$0xff]  }
 0x11a   :  { %7092 = vmatmul.mubr.bf16.gmra.mrb[76].mxu0 %v11094_v3  ;;  %5718 = vmatprep.mubr.bf16.mxu1 %v11095_v4  ;;  %v11184_v3 = vld [vmem:[%s15404_s0 + $0x548] ss:$84 sps:$4 sm:$0xff]   ;;  %v11181_v4 = vld [vmem:[%s15404_s0 + $0x30] ss:$84 sps:$4 sm:$0xff]  }
 0x11b   :  { %7099 = vmatprep.mubr.bf16.mxu0 %v11097_v5  ;;  %v11187_v5 = vld [vmem:[%s15404_s0 + $0x5f4] ss:$84 sps:$4 sm:$0xff]  }
 0x121   :  { %5719 = vmatmul.mubr.bf16.gmra.mrb[112].mxu1 %v11099_v6  ;;  %v11185_v6 = vld [vmem:[%s15403_s1 + $0x380] sm:$0xff]  }
 0x122   :  { %7100 = vmatmul.mubr.bf16.gmra.mrb[80].mxu0 %v11100_v7  ;;  %5726 = vmatprep.mubr.bf16.mxu1 %v11103_v8  ;;  %v11189_v7 = vld [vmem:[%s15404_s0 + $0xdc] ss:$84 sps:$4 sm:$0xff]   ;;  %v11298_v8 = vld [vmem:[%s15403_s1 + $0x160] sm:$0xff]  }
 0x123   :  { %7107 = vmatprep.mubr.bf16.mxu0 %v11105_v9  ;;  %v11191_v9 = vld [vmem:[%s15404_s0 + $0x5f0] ss:$84 sps:$4 sm:$0xff]  }
 0x129   :  { %5727 = vmatmul.mubr.bf16.gmra.mrb[116].mxu1 %v11107_v10  ;;  %v11199_v10 = vld [vmem:[%s15403_s1 + $0x388] sm:$0xff]  }
 0x12a   :  { %7108 = vmatmul.mubr.bf16.gmra.mrb[84].mxu0 %v11108_v11  ;;  %5734 = vmatprep.mubr.bf16.mxu1 %v11109_v12  ;;  %v11192_v11 = vld [vmem:[%s15404_s0 + $0xd8] ss:$84 sps:$4 sm:$0xff]   ;;  %v11193_v12 = vld [vmem:[%s15404_s0 + $0x69c] ss:$84 sps:$4 sm:$0xff]  }
 0x12b   :  { %7115 = vmatprep.mubr.bf16.mxu0 %v11111_v13  ;;  %v11195_v13 = vld [vmem:[%s15404_s0 + $0x184] ss:$84 sps:$4 sm:$0xff]  }
 0x131   :  { %5735 = vmatmul.mubr.bf16.gmra.mrb[120].mxu1 %v11113_v14  ;;  %v11213_v14 = vld [vmem:[%s15403_s1 + $0x390] sm:$0xff]  }
 0x132   :  { %7116 = vmatmul.mubr.bf16.gmra.mrb[88].mxu0 %v11114_v15  ;;  %5742 = vmatprep.mubr.bf16.mxu1 %v11117_v16  ;;  %v11197_v15 = vld [vmem:[%s15404_s0 + $0x698] ss:$84 sps:$4 sm:$0xff]  }
 0x133   :  { %7123 = vmatprep.mubr.bf16.mxu0 %v11119_v17  ;;  %v11227_v16 = vld [vmem:[%s15403_s1 + $0x398] sm:$0xff]   ;;  %v11198_v17 = vld [vmem:[%s15404_s0 + $0x180] ss:$84 sps:$4 sm:$0xff]  }
 0x139   :  { %5743 = vmatmul.mubr.bf16.gmra.mrb[124].mxu1 %v11121_v18  ;;  %v11201_v18 = vld [vmem:[%s15404_s0 + $0x744] ss:$84 sps:$4 sm:$0xff]  }
 0x13a   :  { %7124 = vmatmul.mubr.bf16.gmra.mrb[92].mxu0 %v11122_v19  ;;  %5783 = vmatprep.mubr.bf16.mxu1 %v11125_v20  ;;  %v11203_v19 = vld [vmem:[%s15404_s0 + $0x22c] ss:$84 sps:$4 sm:$0xff]  }
 0x13b   :  { %7131 = vmatprep.mubr.bf16.mxu0 %v11126_v21  ;;  %v11241_v20 = vld [vmem:[%s15403_s1 + $0x3a0] sm:$0xff]   ;;  %v11312_v21 = vld [vmem:[%s15403_s1 + $0x168] sm:$0xff]  }
 0x141   :  { %5784 = vmatmul.mubr.bf16.vlgmr.msra.gmra.mrb[0].mxu1 %v11123_v22  ;;  %v11205_v22 = vld [vmem:[%s15404_s0 + $0x740] ss:$84 sps:$4 sm:$0xff]  }
 0x142   :  { %7132 = vmatmul.mubr.bf16.gmra.mrb[96].mxu0 %v11128_v23  ;;  %6041 = vmatpush1.bf16.msra.mxu1 %v11130_v24  ;;  %v11255_v23 = vld [vmem:[%s15403_s1 + $0x3a8] sm:$0xff]  }
 0x143   :  { %5791 = vmatprep.mubr.bf16.mxu1 %v11131_v25  ;;  %7139 = vmatprep.mubr.bf16.mxu0 %v11133_v26  ;;  %v11206_v24 = vld [vmem:[%s15404_s0 + $0x228] ss:$84 sps:$4 sm:$0xff]   ;;  %v11207_v25 = vld [vmem:[%s15404_s0 + $0x7ec] ss:$84 sps:$4 sm:$0xff]  }
 0x144   :  { %6042 = vmatprep.subr.bf16.mxu1 %v12032_v0  ;;  %v11209_v26 = vld [vmem:[%s15404_s0 + $0x2d4] ss:$84 sps:$4 sm:$0xff]  }
 0x146   :  { %6043 = vmatpush1.bf16.msra.mxu1 %v11144_v27  ;;  %v11269_v27 = vld [vmem:[%s15403_s1 + $0x3b0] sm:$0xff]  }
 0x147   :  { %6044 = vmatprep.subr.bf16.mxu1 %v12032_v0 }
 0x149   :  { %5792 = vmatmul.mubr.bf16.gmra.mrb[4].mxu1 %v11135_v28  ;;  %v11211_v28 = vld [vmem:[%s15404_s0 + $0x7e8] ss:$84 sps:$4 sm:$0xff]  }
 0x14a   :  { %7140 = vmatmul.mubr.bf16.gmra.mrb[100].mxu0 %v11136_v29  ;;  %5799 = vmatprep.mubr.bf16.mxu1 %v11137_v30  ;;  %v11283_v29 = vld [vmem:[%s15403_s1 + $0x3b8] sm:$0xff]   ;;  %v11212_v30 = vld [vmem:[%s15404_s0 + $0x2d0] ss:$84 sps:$4 sm:$0xff]  }
 0x14b   :  { %7147 = vmatprep.mubr.bf16.mxu0 %v11139_v31  ;;  %6045 = vmatpush1.bf16.msra.mxu1 %v11158_v32  ;;  %v11215_v31 = vld [vmem:[%s15404_s0 + $0x894] ss:$84 sps:$4 sm:$0xff]   ;;  %v11217_v32 = vld [vmem:[%s15404_s0 + $0x37c] ss:$84 sps:$4 sm:$0xff]  }
 0x14c   :  { %6046 = vmatprep.subr.bf16.mxu1 %v12032_v0 }
 0x14f   :  { %6047 = vmatpush1.bf16.msra.mxu1 %v11172_v34  ;;  %v11326_v34 = vld [vmem:[%s15403_s1 + $0x170] sm:$0xff]  }
 0x150   :  { %6048 = vmatprep.subr.bf16.mxu1 %v12032_v0 }
 0x151   :  { %5800 = vmatmul.mubr.bf16.gmra.mrb[8].mxu1 %v11141_v33  ;;  %v11297_v33 = vld [vmem:[%s15403_s1 + $0x3c0] sm:$0xff]  }
 0x152   :  { %7148 = vmatmul.mubr.bf16.gmra.mrb[104].mxu0 %v11142_v35  ;;  %5807 = vmatprep.mubr.bf16.mxu1 %v11145_v36  ;;  %v11219_v35 = vld [vmem:[%s15404_s0 + $0x890] ss:$84 sps:$4 sm:$0xff]   ;;  %v11311_v36 = vld [vmem:[%s15403_s1 + $0x3c8] sm:$0xff]  }
 0x153   :  { %7155 = vmatprep.mubr.bf16.mxu0 %v11147_v37  ;;  %6049 = vmatpush1.bf16.msra.mxu1 %v11186_v38  ;;  %v11220_v37 = vld [vmem:[%s15404_s0 + $0x378] ss:$84 sps:$4 sm:$0xff]   ;;  %v11221_v38 = vld [vmem:[%s15404_s0 + $0x93c] ss:$84 sps:$4 sm:$0xff]  }
 0x154   :  { %6050 = vmatprep.subr.bf16.mxu1 %v12032_v0 }
 0x157   :  { %6051 = vmatpush1.bf16.msra.mxu1 %v11200_v40  ;;  %v11325_v40 = vld [vmem:[%s15403_s1 + $0x3d0] sm:$0xff]  }
 0x158   :  { %6052 = vmatprep.subr.bf16.mxu1 %v12032_v0 }
 0x159   :  { %5808 = vmatmul.mubr.bf16.gmra.mrb[12].mxu1 %v11149_v39  ;;  %v11223_v39 = vld [vmem:[%s15404_s0 + $0x424] ss:$84 sps:$4 sm:$0xff]  }
 0x15a   :  { %7156 = vmatmul.mubr.bf16.gmra.mrb[108].mxu0 %v11150_v41  ;;  %5815 = vmatprep.mubr.bf16.mxu1 %v11151_v42  ;;  %v11225_v41 = vld [vmem:[%s15404_s0 + $0x938] ss:$84 sps:$4 sm:$0xff]   ;;  %v11226_v42 = vld [vmem:[%s15404_s0 + $0x420] ss:$84 sps:$4 sm:$0xff]  }
 0x15b   :  { %7163 = vmatprep.mubr.bf16.mxu0 %v11153_v43  ;;  %6053 = vmatpush1.bf16.msra.mxu1 %v11214_v44  ;;  %v11229_v43 = vld [vmem:[%s15404_s0 + $0x9e4] ss:$84 sps:$4 sm:$0xff]   ;;  %v11231_v44 = vld [vmem:[%s15404_s0 + $0x4cc] ss:$84 sps:$4 sm:$0xff]  }
 0x15c   :  { %6054 = vmatprep.subr.bf16.mxu1 %v12032_v0 }
 0x15f   :  { %6055 = vmatpush1.bf16.msra.mxu1 %v11228_v46  ;;  %v11340_v46 = vld [vmem:[%s15403_s1 + $0x178] sm:$0xff]  }
 0x160   :  { %6056 = vmatprep.subr.bf16.mxu1 %v12032_v0 }
 0x161   :  { %5816 = vmatmul.mubr.bf16.gmra.mrb[16].mxu1 %v11155_v45  ;;  %v11339_v45 = vld [vmem:[%s15403_s1 + $0x3d8] sm:$0xff]  }
 0x162   :  { %7164 = vmatmul.mubr.bf16.gmra.mrb[112].mxu0 %v11156_v47  ;;  %5823 = vmatprep.mubr.bf16.mxu1 %v11159_v48  ;;  %v11233_v47 = vld [vmem:[%s15404_s0 + $0x9e0] ss:$84 sps:$4 sm:$0xff]   ;;  %v11234_v48 = vld [vmem:[%s15404_s0 + $0x4c8] ss:$84 sps:$4 sm:$0xff]  }
 0x163   :  { %7171 = vmatprep.mubr.bf16.mxu0 %v11161_v49  ;;  %6057 = vmatpush1.bf16.msra.mxu1 %v11242_v50  ;;  %v11235_v49 = vld [vmem:[%s15404_s0 + $0xa8c] ss:$84 sps:$4 sm:$0xff]   ;;  %v11237_v50 = vld [vmem:[%s15404_s0 + $0x574] ss:$84 sps:$4 sm:$0xff]  }
 0x164   :  { %6058 = vmatprep.subr.bf16.mxu1 %v12032_v0 }
 0x167   :  { %6059 = vmatpush1.bf16.msra.mxu1 %v11256_v52  ;;  %v11240_v52 = vld [vmem:[%s15404_s0 + $0x570] ss:$84 sps:$4 sm:$0xff]  }
 0x168   :  { %6060 = vmatprep.subr.bf16.mxu1 %v12032_v0 }
 0x169   :  { %5824 = vmatmul.mubr.bf16.gmra.mrb[20].mxu1 %v11163_v51  ;;  %v11239_v51 = vld [vmem:[%s15404_s0 + $0xa88] ss:$84 sps:$4 sm:$0xff]  }
 0x16a   :  { %7172 = vmatmul.mubr.bf16.gmra.mrb[116].mxu0 %v11164_v53  ;;  %5831 = vmatprep.mubr.bf16.mxu1 %v11165_v54  ;;  %v11243_v53 = vld [vmem:[%s15404_s0 + $0xb34] ss:$84 sps:$4 sm:$0xff]   ;;  %v11245_v54 = vld [vmem:[%s15404_s0 + $0x61c] ss:$84 sps:$4 sm:$0xff]  }
 0x16b   :  { %7179 = vmatprep.mubr.bf16.mxu0 %v11167_v55  ;;  %6061 = vmatpush1.bf16.msra.mxu1 %v11270_v56  ;;  %v11353_v55 = vld [vmem:[%s15403_s1 + $0x3e0] sm:$0xff]  }
 0x16c   :  { %6062 = vmatprep.subr.bf16.mxu1 %v12032_v0  ;;  %v11247_v56 = vld [vmem:[%s15404_s0 + $0xb30] ss:$84 sps:$4 sm:$0xff]  }
 0x16f   :  { %6063 = vmatpush1.bf16.msra.mxu1 %v11284_v61  ;;  %v11254_v61 = vld [vmem:[%s15404_s0 + $0x6c0] ss:$84 sps:$4 sm:$0xff]  }
 0x170   :  { %6064 = vmatprep.subr.bf16.mxu1 %v12032_v0 }
 0x171   :  { %5832 = vmatmul.mubr.bf16.gmra.mrb[24].mxu1 %v11169_v57  ;;  %v11248_v57 = vld [vmem:[%s15404_s0 + $0x618] ss:$84 sps:$4 sm:$0xff]  }
 0x172   :  { %7180 = vmatmul.mubr.bf16.gmra.mrb[120].mxu0 %v11170_v58  ;;  %5839 = vmatprep.mubr.bf16.mxu1 %v11173_v59  ;;  %v11249_v58 = vld [vmem:[%s15404_s0 + $0xbdc] ss:$84 sps:$4 sm:$0xff]   ;;  %v11251_v59 = vld [vmem:[%s15404_s0 + $0x6c4] ss:$84 sps:$4 sm:$0xff]  }
 0x173   :  { %7187 = vmatprep.mubr.bf16.mxu0 %v11175_v60  ;;  %6065 = vmatpush1.bf16.msra.mxu1 %v11298_v8  ;;  %v11253_v60 = vld [vmem:[%s15404_s0 + $0xbd8] ss:$84 sps:$4 sm:$0xff]   ;;  %v11271_v8 = vld [vmem:[%s15404_s0 + $0xdd4] ss:$84 sps:$4 sm:$0xff]  }
 0x174   :  { %6066 = vmatprep.subr.bf16.mxu1 %v12032_v0 }
 0x177   :  { %6067 = vmatpush1.bf16.msra.mxu1 %v11312_v21  ;;  %v11290_v21 = vld [vmem:[%s15404_s0 + $0xa08] ss:$84 sps:$4 sm:$0xff]  }
 0x178   :  { %6068 = vmatprep.subr.bf16.mxu1 %v12032_v0 }
 0x179   :  { %5840 = vmatmul.mubr.bf16.gmra.mrb[28].mxu1 %v11177_v62  ;;  %v11257_v62 = vld [vmem:[%s15404_s0 + $0xc84] ss:$84 sps:$4 sm:$0xff]  }
 0x17a   :  { %7188 = vmatmul.mubr.bf16.gmra.mrb[124].mxu0 %v11178_v63  ;;  %5847 = vmatprep.mubr.bf16.mxu1 %v11179_v1  ;;  %v11259_v63 = vld [vmem:[%s15404_s0 + $0x76c] ss:$84 sps:$4 sm:$0xff]  }
 0x17b   :  { %7228 = vmatprep.mubr.bf16.mxu0 %v11183_v2  ;;  %6069 = vmatpush1.bf16.msra.mxu1 %v11326_v34  ;;  %v11367_v1 = vld [vmem:[%s15403_s1 + $0x3e8] sm:$0xff]   ;;  %v11261_v2 = vld [vmem:[%s15404_s0 + $0xc80] ss:$84 sps:$4 sm:$0xff]   ;;  %v11313_v34 = vld [vmem:[%s15404_s0 + $0x11c4] ss:$84 sps:$4 sm:$0xff]  }
 0x17c   :  { %6070 = vmatprep.subr.bf16.mxu1 %v12032_v0 }
 0x17f   :  { %6071 = vmatpush1.bf16.msra.mxu1 %v11340_v46  ;;  %v11333_v46 = vld [vmem:[%s15404_s0 + $0x13bc] ss:$84 sps:$4 sm:$0xff]  }
 0x180   :  { %6329 = vmatprep.subr.bf16.mxu1 %v12032_v0 }
 0x181   :  { %5848 = vmatmul.mubr.bf16.gmra.mrb[32].mxu1 %v11184_v3  ;;  %v11262_v3 = vld [vmem:[%s15404_s0 + $0x768] ss:$84 sps:$4 sm:$0xff]  }
 0x182   :  { %7229 = vmatmul.mubr.bf16.vlgmr.msra.gmra.mrb[0].mxu0 %v11181_v4  ;;  %5855 = vmatprep.mubr.bf16.mxu1 %v11187_v5  ;;  %v11263_v4 = vld [vmem:[%s15404_s0 + $0xd2c] ss:$84 sps:$4 sm:$0xff]   ;;  %v11265_v5 = vld [vmem:[%s15404_s0 + $0x814] ss:$84 sps:$4 sm:$0xff]  }
 0x183   :  { %7486 = vmatpush1.bf16.msra.mxu0 %v11185_v6  ;;  %7236 = vmatprep.mubr.bf16.mxu0 %v11189_v7  ;;  %v11267_v6 = vld [vmem:[%s15404_s0 + $0xd28] ss:$84 sps:$4 sm:$0xff]   ;;  %v11268_v7 = vld [vmem:[%s15404_s0 + $0x810] ss:$84 sps:$4 sm:$0xff]  }
 0x184   :  { %7487 = vmatprep.subr.bf16.mxu0 %v12032_v0 }
 0x187   :  { %7488 = vmatpush1.bf16.msra.mxu0 %v11199_v10  ;;  %v11381_v10 = vld [vmem:[%s15403_s1 + $0x3f0] sm:$0xff]  }
 0x188   :  { %7489 = vmatprep.subr.bf16.mxu0 %v12032_v0 }
 0x189   :  { %5856 = vmatmul.mubr.bf16.gmra.mrb[36].mxu1 %v11191_v9  ;;  %v11273_v9 = vld [vmem:[%s15404_s0 + $0x8bc] ss:$84 sps:$4 sm:$0xff]  }
 0x18a   :  { %7237 = vmatmul.mubr.bf16.gmra.mrb[4].mxu0 %v11192_v11  ;;  %5863 = vmatprep.mubr.bf16.mxu1 %v11193_v12  ;;  %v11275_v11 = vld [vmem:[%s15404_s0 + $0xdd0] ss:$84 sps:$4 sm:$0xff]   ;;  %v11276_v12 = vld [vmem:[%s15404_s0 + $0x8b8] ss:$84 sps:$4 sm:$0xff]  }
 0x18b   :  { %7244 = vmatprep.mubr.bf16.mxu0 %v11195_v13  ;;  %7490 = vmatpush1.bf16.msra.mxu0 %v11213_v14  ;;  %v11277_v13 = vld [vmem:[%s15404_s0 + $0xe7c] ss:$84 sps:$4 sm:$0xff]   ;;  %v11279_v14 = vld [vmem:[%s15404_s0 + $0x964] ss:$84 sps:$4 sm:$0xff]  }
 0x18c   :  { %7491 = vmatprep.subr.bf16.mxu0 %v12032_v0 }
 0x18f   :  { %7492 = vmatpush1.bf16.msra.mxu0 %v11227_v16  ;;  %v11282_v16 = vld [vmem:[%s15404_s0 + $0x960] ss:$84 sps:$4 sm:$0xff]  }
 0x190   :  { %7493 = vmatprep.subr.bf16.mxu0 %v12032_v0 }
 0x191   :  { %5864 = vmatmul.mubr.bf16.gmra.mrb[40].mxu1 %v11197_v15  ;;  %v11281_v15 = vld [vmem:[%s15404_s0 + $0xe78] ss:$84 sps:$4 sm:$0xff]  }
 0x192   :  { %7245 = vmatmul.mubr.bf16.gmra.mrb[8].mxu0 %v11198_v17  ;;  %5871 = vmatprep.mubr.bf16.mxu1 %v11201_v18  ;;  %v11285_v17 = vld [vmem:[%s15404_s0 + $0xf24] ss:$84 sps:$4 sm:$0xff]   ;;  %v11287_v18 = vld [vmem:[%s15404_s0 + $0xa0c] ss:$84 sps:$4 sm:$0xff]  }
 0x193   :  { %7252 = vmatprep.mubr.bf16.mxu0 %v11203_v19  ;;  %7494 = vmatpush1.bf16.msra.mxu0 %v11241_v20  ;;  %v11395_v19 = vld [vmem:[%s15403_s1 + $0x3f8] sm:$0xff]   ;;  %v11289_v20 = vld [vmem:[%s15404_s0 + $0xf20] ss:$84 sps:$4 sm:$0xff]  }
 0x194   :  { %7495 = vmatprep.subr.bf16.mxu0 %v12032_v0 }
 0x197   :  { %7496 = vmatpush1.bf16.msra.mxu0 %v11255_v23  ;;  %v11293_v23 = vld [vmem:[%s15404_s0 + $0xab4] ss:$84 sps:$4 sm:$0xff]  }
 0x198   :  { %7497 = vmatprep.subr.bf16.mxu0 %v12032_v0 }
 0x199   :  { %5872 = vmatmul.mubr.bf16.gmra.mrb[44].mxu1 %v11205_v22  ;;  %v11291_v22 = vld [vmem:[%s15404_s0 + $0xfcc] ss:$84 sps:$4 sm:$0xff]  }
 0x19a   :  { %7253 = vmatmul.mubr.bf16.gmra.mrb[12].mxu0 %v11206_v24  ;;  %5879 = vmatprep.mubr.bf16.mxu1 %v11207_v25  ;;  %v11295_v24 = vld [vmem:[%s15404_s0 + $0xfc8] ss:$84 sps:$4 sm:$0xff]   ;;  %v11296_v25 = vld [vmem:[%s15404_s0 + $0xab0] ss:$84 sps:$4 sm:$0xff]  }
 0x19b   :  { %7260 = vmatprep.mubr.bf16.mxu0 %v11209_v26  ;;  %7498 = vmatpush1.bf16.msra.mxu0 %v11269_v27  ;;  %v11299_v26 = vld [vmem:[%s15404_s0 + $0x1074] ss:$84 sps:$4 sm:$0xff]   ;;  %v11301_v27 = vld [vmem:[%s15404_s0 + $0xb5c] ss:$84 sps:$4 sm:$0xff]  }
 0x19c   :  { %7499 = vmatprep.subr.bf16.mxu0 %v12032_v0 }
 0x19f   :  { %7500 = vmatpush1.bf16.msra.mxu0 %v11283_v29  ;;  %v11304_v29 = vld [vmem:[%s15404_s0 + $0xb58] ss:$84 sps:$4 sm:$0xff]  }
 0x1a0   :  { %7501 = vmatprep.subr.bf16.mxu0 %v12032_v0 }
 0x1a1   :  { %5880 = vmatmul.mubr.bf16.gmra.mrb[48].mxu1 %v11211_v28  ;;  %v11303_v28 = vld [vmem:[%s15404_s0 + $0x1070] ss:$84 sps:$4 sm:$0xff]  }
 0x1a2   :  { %7261 = vmatmul.mubr.bf16.gmra.mrb[16].mxu0 %v11212_v30  ;;  %5887 = vmatprep.mubr.bf16.mxu1 %v11215_v31  ;;  %v11305_v30 = vld [vmem:[%s15404_s0 + $0x111c] ss:$84 sps:$4 sm:$0xff]   ;;  %v11307_v31 = vld [vmem:[%s15404_s0 + $0xc04] ss:$84 sps:$4 sm:$0xff]  }
 0x1a3   :  { %7268 = vmatprep.mubr.bf16.mxu0 %v11217_v32  ;;  %7502 = vmatpush1.bf16.msra.mxu0 %v11297_v33  ;;  %v11309_v32 = vld [vmem:[%s15404_s0 + $0x1118] ss:$84 sps:$4 sm:$0xff]   ;;  %v11310_v33 = vld [vmem:[%s15404_s0 + $0xc00] ss:$84 sps:$4 sm:$0xff]  }
 0x1a4   :  { %7503 = vmatprep.subr.bf16.mxu0 %v12032_v0 }
 0x1a7   :  { %7504 = vmatpush1.bf16.msra.mxu0 %v11311_v36  ;;  %v11317_v36 = vld [vmem:[%s15404_s0 + $0x11c0] ss:$84 sps:$4 sm:$0xff]  }
 0x1a8   :  { %7505 = vmatprep.subr.bf16.mxu0 %v12032_v0 }
 0x1a9   :  { %5888 = vmatmul.mubr.bf16.gmra.mrb[52].mxu1 %v11219_v35  ;;  %v11315_v35 = vld [vmem:[%s15404_s0 + $0xcac] ss:$84 sps:$4 sm:$0xff]  }
 0x1aa   :  { %7269 = vmatmul.mubr.bf16.gmra.mrb[20].mxu0 %v11220_v37  ;;  %5895 = vmatprep.mubr.bf16.mxu1 %v11221_v38  ;;  %v11318_v37 = vld [vmem:[%s15404_s0 + $0xca8] ss:$84 sps:$4 sm:$0xff]   ;;  %v11319_v38 = vld [vmem:[%s15404_s0 + $0x126c] ss:$84 sps:$4 sm:$0xff]  }
 0x1ab   :  { %7276 = vmatprep.mubr.bf16.mxu0 %v11223_v39  ;;  %7506 = vmatpush1.bf16.msra.mxu0 %v11325_v40  ;;  %v11321_v39 = vld [vmem:[%s15404_s0 + $0xd54] ss:$84 sps:$4 sm:$0xff]  }
 0x1ac   :  { %7507 = vmatprep.subr.bf16.mxu0 %v12032_v0  ;;  %v11323_v40 = vld [vmem:[%s15404_s0 + $0x1268] ss:$84 sps:$4 sm:$0xff]  }
 0x1af   :  { %7508 = vmatpush1.bf16.msra.mxu0 %v11339_v45  ;;  %v11332_v45 = vld [vmem:[%s15404_s0 + $0xdf8] ss:$84 sps:$4 sm:$0xff]  }
 0x1b0   :  { %7509 = vmatprep.subr.bf16.mxu0 %v12032_v0 }
 0x1b1   :  { %5896 = vmatmul.mubr.bf16.gmra.mrb[56].mxu1 %v11225_v41  ;;  %v11324_v41 = vld [vmem:[%s15404_s0 + $0xd50] ss:$84 sps:$4 sm:$0xff]  }
 0x1b2   :  { %7277 = vmatmul.mubr.bf16.gmra.mrb[24].mxu0 %v11226_v42  ;;  %5903 = vmatprep.mubr.bf16.mxu1 %v11229_v43  ;;  %v11327_v42 = vld [vmem:[%s15404_s0 + $0x1314] ss:$84 sps:$4 sm:$0xff]   ;;  %v11329_v43 = vld [vmem:[%s15404_s0 + $0xdfc] ss:$84 sps:$4 sm:$0xff]  }
 0x1b3   :  { %7284 = vmatprep.mubr.bf16.mxu0 %v11231_v44  ;;  %7510 = vmatpush1.bf16.msra.mxu0 %v11353_v55  ;;  %v11331_v44 = vld [vmem:[%s15404_s0 + $0x1310] ss:$84 sps:$4 sm:$0xff]   ;;  %v11350_v55 = vld [vmem:[%s15404_s0 + $0xff4] ss:$84 sps:$4 sm:$0xff]  }
 0x1b4   :  { %7511 = vmatprep.subr.bf16.mxu0 %v12032_v0 }
 0x1b7   :  { %7512 = vmatpush1.bf16.msra.mxu0 %v11367_v1  ;;  %v11361_v1 = vld [vmem:[%s15404_s0 + $0x164] ss:$84 sps:$4 sm:$0xff]  }
 0x1b8   :  { %7513 = vmatprep.subr.bf16.mxu0 %v12032_v0 }
 0x1b9   :  { %5904 = vmatmul.mubr.bf16.gmra.mrb[60].mxu1 %v11233_v47  ;;  %v11335_v47 = vld [vmem:[%s15404_s0 + $0xea4] ss:$84 sps:$4 sm:$0xff]  }
 0x1ba   :  { %7285 = vmatmul.mubr.bf16.gmra.mrb[28].mxu0 %v11234_v48  ;;  %5911 = vmatprep.mubr.bf16.mxu1 %v11235_v49  ;;  %v11337_v48 = vld [vmem:[%s15404_s0 + $0x13b8] ss:$84 sps:$4 sm:$0xff]   ;;  %v11338_v49 = vld [vmem:[%s15404_s0 + $0xea0] ss:$84 sps:$4 sm:$0xff]  }
 0x1bb   :  { %7292 = vmatprep.mubr.bf16.mxu0 %v11237_v50  ;;  %7514 = vmatpush1.bf16.msra.mxu0 %v11381_v10  ;;  %v11341_v50 = vld [vmem:[%s15404_s0 + $0x1464] ss:$84 sps:$4 sm:$0xff]   ;;  %v11424_v10 = vld [vmem:[%s15403_s1 + $0x1a8] sm:$0xff]  }
 0x1bc   :  { %7515 = vmatprep.subr.bf16.mxu0 %v12032_v0 }
 0x1bf   :  { %7516 = vmatpush1.bf16.msra.mxu0 %v11395_v19  ;;  %v11383_v19 = vld [vmem:[%s15404_s0 + $0x35c] ss:$84 sps:$4 sm:$0xff]  }
 0x1c0   :  { %7774 = vmatprep.subr.bf16.mxu0 %v12032_v0 }
 0x1c1   :  { %5912 = vmatmul.mubr.bf16.gmra.mrb[64].mxu1 %v11239_v51  ;;  %v11343_v51 = vld [vmem:[%s15404_s0 + $0xf4c] ss:$84 sps:$4 sm:$0xff]  }
 0x1c2   :  { %7293 = vmatmul.mubr.bf16.gmra.mrb[32].mxu0 %v11240_v52  ;;  %5919 = vmatprep.mubr.bf16.mxu1 %v11243_v53  ;;  %v11345_v52 = vld [vmem:[%s15404_s0 + $0x1460] ss:$84 sps:$4 sm:$0xff]   ;;  %v11346_v53 = vld [vmem:[%s15404_s0 + $0xf48] ss:$84 sps:$4 sm:$0xff]  }
 0x1c3   :  { %7300 = vmatprep.mubr.bf16.mxu0 %v11245_v54  ;;  %v11349_v54 = vld [vmem:[%s15404_s0 + $0x14] ss:$84 sps:$4 sm:$0xff]  }
 0x1c9   :  { %5920 = vmatmul.mubr.bf16.gmra.mrb[68].mxu1 %v11247_v56  ;;  %v11347_v56 = vld [vmem:[%s15404_s0 + $0x10] ss:$84 sps:$4 sm:$0xff]  }
 0x1ca   :  { %7301 = vmatmul.mubr.bf16.gmra.mrb[36].mxu0 %v11248_v57  ;;  %5927 = vmatprep.mubr.bf16.mxu1 %v11249_v58  ;;  %v11352_v57 = vld [vmem:[%s15404_s0 + $0xff0] ss:$84 sps:$4 sm:$0xff]  }
 0x1cb   :  { %7308 = vmatprep.mubr.bf16.mxu0 %v11251_v59  ;;  %v11354_v58 = vld [vmem:[%s15403_s1 + $0x180] sm:$0xff]   ;;  %v11355_v59 = vld [vmem:[%s15404_s0 + $0xbc] ss:$84 sps:$4 sm:$0xff]  }
 0x1d1   :  { %5928 = vmatmul.mubr.bf16.gmra.mrb[72].mxu1 %v11253_v60  ;;  %v11357_v60 = vld [vmem:[%s15404_s0 + $0x109c] ss:$84 sps:$4 sm:$0xff]  }
 0x1d2   :  { %7309 = vmatmul.mubr.bf16.gmra.mrb[40].mxu0 %v11254_v61  ;;  %5935 = vmatprep.mubr.bf16.mxu1 %v11257_v62  ;;  %v11368_v61 = vld [vmem:[%s15403_s1 + $0x188] sm:$0xff]  }
 0x1d3   :  { %7316 = vmatprep.mubr.bf16.mxu0 %v11259_v63  ;;  %v11359_v62 = vld [vmem:[%s15404_s0 + $0xb8] ss:$84 sps:$4 sm:$0xff]  }
 0x1d4   :  { %v11360_v63 = vld [vmem:[%s15404_s0 + $0x1098] ss:$84 sps:$4 sm:$0xff]  }
 0x1d9   :  { %5936 = vmatmul.mubr.bf16.gmra.mrb[76].mxu1 %v11261_v2  ;;  %v11363_v2 = vld [vmem:[%s15404_s0 + $0x1144] ss:$84 sps:$4 sm:$0xff]  }
 0x1da   :  { %7317 = vmatmul.mubr.bf16.gmra.mrb[44].mxu0 %v11262_v3  ;;  %5943 = vmatprep.mubr.bf16.mxu1 %v11263_v4  ;;  %v11382_v3 = vld [vmem:[%s15403_s1 + $0x190] sm:$0xff]   ;;  %v11396_v4 = vld [vmem:[%s15403_s1 + $0x198] sm:$0xff]  }
 0x1db   :  { %7324 = vmatprep.mubr.bf16.mxu0 %v11265_v5  ;;  %v11365_v5 = vld [vmem:[%s15404_s0 + $0x160] ss:$84 sps:$4 sm:$0xff]  }
 0x1e1   :  { %5944 = vmatmul.mubr.bf16.gmra.mrb[80].mxu1 %v11267_v6  ;;  %v11366_v6 = vld [vmem:[%s15404_s0 + $0x1140] ss:$84 sps:$4 sm:$0xff]  }
 0x1e2   :  { %7325 = vmatmul.mubr.bf16.gmra.mrb[48].mxu0 %v11268_v7  ;;  %5951 = vmatprep.mubr.bf16.mxu1 %v11271_v8  ;;  %v11369_v7 = vld [vmem:[%s15404_s0 + $0x20c] ss:$84 sps:$4 sm:$0xff]  }
 0x1e3   :  { %7332 = vmatprep.mubr.bf16.mxu0 %v11273_v9  ;;  %v11371_v8 = vld [vmem:[%s15404_s0 + $0x11ec] ss:$84 sps:$4 sm:$0xff]  }
 0x1e4   :  { %v11410_v9 = vld [vmem:[%s15403_s1 + $0x1a0] sm:$0xff]  }
 0x1e9   :  { %5952 = vmatmul.mubr.bf16.gmra.mrb[84].mxu1 %v11275_v11  ;;  %v11373_v11 = vld [vmem:[%s15404_s0 + $0x208] ss:$84 sps:$4 sm:$0xff]  }
 0x1ea   :  { %7333 = vmatmul.mubr.bf16.gmra.mrb[52].mxu0 %v11276_v12  ;;  %5959 = vmatprep.mubr.bf16.mxu1 %v11277_v13  ;;  %v11374_v12 = vld [vmem:[%s15404_s0 + $0x11e8] ss:$84 sps:$4 sm:$0xff]  }
 0x1eb   :  { %7340 = vmatprep.mubr.bf16.mxu0 %v11279_v14  ;;  %v11375_v13 = vld [vmem:[%s15404_s0 + $0x2b4] ss:$84 sps:$4 sm:$0xff]  }
 0x1ec   :  { %v11377_v14 = vld [vmem:[%s15404_s0 + $0x1294] ss:$84 sps:$4 sm:$0xff]  }
 0x1f1   :  { %5960 = vmatmul.mubr.bf16.gmra.mrb[88].mxu1 %v11281_v15  ;;  %v11438_v15 = vld [vmem:[%s15403_s1 + $0x1b0] sm:$0xff]  }
 0x1f2   :  { %7341 = vmatmul.mubr.bf16.gmra.mrb[56].mxu0 %v11282_v16  ;;  %5967 = vmatprep.mubr.bf16.mxu1 %v11285_v17  ;;  %v11452_v16 = vld [vmem:[%s15403_s1 + $0x1b8] sm:$0xff]   ;;  %v11379_v17 = vld [vmem:[%s15404_s0 + $0x2b0] ss:$84 sps:$4 sm:$0xff]  }
 0x1f3   :  { %7348 = vmatprep.mubr.bf16.mxu0 %v11287_v18  ;;  %v11380_v18 = vld [vmem:[%s15404_s0 + $0x1290] ss:$84 sps:$4 sm:$0xff]  }
 0x1f9   :  { %5968 = vmatmul.mubr.bf16.gmra.mrb[92].mxu1 %v11289_v20  ;;  %v11385_v20 = vld [vmem:[%s15404_s0 + $0x133c] ss:$84 sps:$4 sm:$0xff]  }
 0x1fa   :  { %7349 = vmatmul.mubr.bf16.gmra.mrb[60].mxu0 %v11290_v21  ;;  %5975 = vmatprep.mubr.bf16.mxu1 %v11291_v22  ;;  %v11466_v21 = vld [vmem:[%s15403_s1 + $0x1c0] sm:$0xff]   ;;  %v11480_v22 = vld [vmem:[%s15403_s1 + $0x1c8] sm:$0xff]  }
 0x1fb   :  { %7356 = vmatprep.mubr.bf16.mxu0 %v11293_v23  ;;  %v11387_v23 = vld [vmem:[%s15404_s0 + $0x358] ss:$84 sps:$4 sm:$0xff]  }
 0x201   :  { %5976 = vmatmul.mubr.bf16.gmra.mrb[96].mxu1 %v11295_v24  ;;  %v11388_v24 = vld [vmem:[%s15404_s0 + $0x1338] ss:$84 sps:$4 sm:$0xff]  }
 0x202   :  { %7357 = vmatmul.mubr.bf16.gmra.mrb[64].mxu0 %v11296_v25  ;;  %5983 = vmatprep.mubr.bf16.mxu1 %v11299_v26  ;;  %v11389_v25 = vld [vmem:[%s15404_s0 + $0x404] ss:$84 sps:$4 sm:$0xff]  }
 0x203   :  { %7364 = vmatprep.mubr.bf16.mxu0 %v11301_v27  ;;  %v11391_v26 = vld [vmem:[%s15404_s0 + $0x13e4] ss:$84 sps:$4 sm:$0xff]   ;;  %v11494_v27 = vld [vmem:[%s15403_s1 + $0x1d0] sm:$0xff]  }
 0x209   :  { %5984 = vmatmul.mubr.bf16.gmra.mrb[100].mxu1 %v11303_v28  ;;  %v11393_v28 = vld [vmem:[%s15404_s0 + $0x400] ss:$84 sps:$4 sm:$0xff]  }
 0x20a   :  { %7365 = vmatmul.mubr.bf16.gmra.mrb[68].mxu0 %v11304_v29  ;;  %5991 = vmatprep.mubr.bf16.mxu1 %v11305_v30  ;;  %v11394_v29 = vld [vmem:[%s15404_s0 + $0x13e0] ss:$84 sps:$4 sm:$0xff]  }
 0x20b   :  { %7372 = vmatprep.mubr.bf16.mxu0 %v11307_v31  ;;  %v11397_v30 = vld [vmem:[%s15404_s0 + $0x4ac] ss:$84 sps:$4 sm:$0xff]  }
 0x20c   :  { %v11399_v31 = vld [vmem:[%s15404_s0 + $0x148c] ss:$84 sps:$4 sm:$0xff]  }
 0x211   :  { %5992 = vmatmul.mubr.bf16.gmra.mrb[104].mxu1 %v11309_v32  ;;  %v11508_v32 = vld [vmem:[%s15403_s1 + $0x1d8] sm:$0xff]  }
 0x212   :  { %7373 = vmatmul.mubr.bf16.gmra.mrb[72].mxu0 %v11310_v33  ;;  %5999 = vmatprep.mubr.bf16.mxu1 %v11313_v34  ;;  %v11401_v33 = vld [vmem:[%s15404_s0 + $0x4a8] ss:$84 sps:$4 sm:$0xff]  }
 0x213   :  { %7380 = vmatprep.mubr.bf16.mxu0 %v11315_v35  ;;  %v11402_v34 = vld [vmem:[%s15404_s0 + $0x1488] ss:$84 sps:$4 sm:$0xff]  }
 0x214   :  { %v11403_v35 = vld [vmem:[%s15404_s0 + $0x554] ss:$84 sps:$4 sm:$0xff]  }
 0x219   :  { %6000 = vmatmul.mubr.bf16.gmra.mrb[108].mxu1 %v11317_v36  ;;  %v11407_v36 = vld [vmem:[%s15404_s0 + $0x3c] ss:$84 sps:$4 sm:$0xff]  }
 0x21a   :  { %7381 = vmatmul.mubr.bf16.gmra.mrb[76].mxu0 %v11318_v37  ;;  %6007 = vmatprep.mubr.bf16.mxu1 %v11319_v38  ;;  %v11408_v37 = vld [vmem:[%s15404_s0 + $0x550] ss:$84 sps:$4 sm:$0xff]   ;;  %v11405_v38 = vld [vmem:[%s15404_s0 + $0x38] ss:$84 sps:$4 sm:$0xff]  }
 0x21b   :  { %7388 = vmatprep.mubr.bf16.mxu0 %v11321_v39  ;;  %v11411_v39 = vld [vmem:[%s15404_s0 + $0x5fc] ss:$84 sps:$4 sm:$0xff]  }
 0x221   :  { %6008 = vmatmul.mubr.bf16.gmra.mrb[112].mxu1 %v11323_v40  ;;  %v11409_v40 = vld [vmem:[%s15403_s1 + $0x400] sm:$0xff]  }
 0x222   :  { %7389 = vmatmul.mubr.bf16.gmra.mrb[80].mxu0 %v11324_v41  ;;  %6015 = vmatprep.mubr.bf16.mxu1 %v11327_v42  ;;  %v11413_v41 = vld [vmem:[%s15404_s0 + $0xe4] ss:$84 sps:$4 sm:$0xff]  }
 0x223   :  { %7396 = vmatprep.mubr.bf16.mxu0 %v11329_v43  ;;  %v11522_v42 = vld [vmem:[%s15403_s1 + $0x1e0] sm:$0xff]   ;;  %v11423_v43 = vld [vmem:[%s15403_s1 + $0x408] sm:$0xff]  }
 0x229   :  { %6016 = vmatmul.mubr.bf16.gmra.mrb[116].mxu1 %v11331_v44  ;;  %v11415_v44 = vld [vmem:[%s15404_s0 + $0x5f8] ss:$84 sps:$4 sm:$0xff]  }
 0x22a   :  { %7397 = vmatmul.mubr.bf16.gmra.mrb[84].mxu0 %v11332_v45  ;;  %6023 = vmatprep.mubr.bf16.mxu1 %v11333_v46  ;;  %v11416_v45 = vld [vmem:[%s15404_s0 + $0xe0] ss:$84 sps:$4 sm:$0xff]   ;;  %v11417_v46 = vld [vmem:[%s15404_s0 + $0x6a4] ss:$84 sps:$4 sm:$0xff]  }
 0x22b   :  { %7404 = vmatprep.mubr.bf16.mxu0 %v11335_v47  ;;  %v11419_v47 = vld [vmem:[%s15404_s0 + $0x18c] ss:$84 sps:$4 sm:$0xff]  }
 0x231   :  { %6024 = vmatmul.mubr.bf16.gmra.mrb[120].mxu1 %v11337_v48  ;;  %v11437_v48 = vld [vmem:[%s15403_s1 + $0x410] sm:$0xff]  }
 0x232   :  { %7405 = vmatmul.mubr.bf16.gmra.mrb[88].mxu0 %v11338_v49  ;;  %6031 = vmatprep.mubr.bf16.mxu1 %v11341_v50  ;;  %v11451_v49 = vld [vmem:[%s15403_s1 + $0x418] sm:$0xff]   ;;  %v11421_v50 = vld [vmem:[%s15404_s0 + $0x6a0] ss:$84 sps:$4 sm:$0xff]  }
 0x233   :  { %7412 = vmatprep.mubr.bf16.mxu0 %v11343_v51  ;;  %v11422_v51 = vld [vmem:[%s15404_s0 + $0x188] ss:$84 sps:$4 sm:$0xff]  }
 0x239   :  { %6032 = vmatmul.mubr.bf16.gmra.mrb[124].mxu1 %v11345_v52  ;;  %v11425_v52 = vld [vmem:[%s15404_s0 + $0x74c] ss:$84 sps:$4 sm:$0xff]  }
 0x23a   :  { %7413 = vmatmul.mubr.bf16.gmra.mrb[92].mxu0 %v11346_v53  ;;  %6072 = vmatprep.mubr.bf16.mxu1 %v11349_v54  ;;  %v11427_v53 = vld [vmem:[%s15404_s0 + $0x234] ss:$84 sps:$4 sm:$0xff]   ;;  %v11465_v54 = vld [vmem:[%s15403_s1 + $0x420] sm:$0xff]  }
 0x23b   :  { %7420 = vmatprep.mubr.bf16.mxu0 %v11350_v55  ;;  %v11536_v55 = vld [vmem:[%s15403_s1 + $0x1e8] sm:$0xff]  }
 0x241   :  { %6073 = vmatmul.mubr.bf16.vlgmr.msra.gmra.mrb[0].mxu1 %v11347_v56  ;;  %v11479_v56 = vld [vmem:[%s15403_s1 + $0x428] sm:$0xff]  }
 0x242   :  { %7421 = vmatmul.mubr.bf16.gmra.mrb[96].mxu0 %v11352_v57  ;;  %6330 = vmatpush1.bf16.msra.mxu1 %v11354_v58  ;;  %v11429_v57 = vld [vmem:[%s15404_s0 + $0x748] ss:$84 sps:$4 sm:$0xff]   ;;  %v11430_v58 = vld [vmem:[%s15404_s0 + $0x230] ss:$84 sps:$4 sm:$0xff]  }
 0x243   :  { %6080 = vmatprep.mubr.bf16.mxu1 %v11355_v59  ;;  %7428 = vmatprep.mubr.bf16.mxu0 %v11357_v60  ;;  %v11431_v59 = vld [vmem:[%s15404_s0 + $0x7f4] ss:$84 sps:$4 sm:$0xff]   ;;  %v11433_v60 = vld [vmem:[%s15404_s0 + $0x2dc] ss:$84 sps:$4 sm:$0xff]  }
 0x244   :  { %6331 = vmatprep.subr.bf16.mxu1 %v12032_v0 }
 0x246   :  { %6332 = vmatpush1.bf16.msra.mxu1 %v11368_v61  ;;  %v11493_v61 = vld [vmem:[%s15403_s1 + $0x430] sm:$0xff]  }
 0x247   :  { %6333 = vmatprep.subr.bf16.mxu1 %v12032_v0 }
 0x249   :  { %6081 = vmatmul.mubr.bf16.gmra.mrb[4].mxu1 %v11359_v62  ;;  %v11507_v62 = vld [vmem:[%s15403_s1 + $0x438] sm:$0xff]  }
 0x24a   :  { %7429 = vmatmul.mubr.bf16.gmra.mrb[100].mxu0 %v11360_v63  ;;  %6088 = vmatprep.mubr.bf16.mxu1 %v11361_v1  ;;  %v11435_v63 = vld [vmem:[%s15404_s0 + $0x7f0] ss:$84 sps:$4 sm:$0xff]   ;;  %v11436_v1 = vld [vmem:[%s15404_s0 + $0x2d8] ss:$84 sps:$4 sm:$0xff]  }
 0x24b   :  { %7436 = vmatprep.mubr.bf16.mxu0 %v11363_v2  ;;  %6334 = vmatpush1.bf16.msra.mxu1 %v11382_v3  ;;  %v11439_v2 = vld [vmem:[%s15404_s0 + $0x89c] ss:$84 sps:$4 sm:$0xff]   ;;  %v11441_v3 = vld [vmem:[%s15404_s0 + $0x384] ss:$84 sps:$4 sm:$0xff]  }
 0x24c   :  { %6335 = vmatprep.subr.bf16.mxu1 %v12032_v0 }
 0x24f   :  { %6336 = vmatpush1.bf16.msra.mxu1 %v11396_v4  ;;  %v11521_v4 = vld [vmem:[%s15403_s1 + $0x440] sm:$0xff]  }
 0x250   :  { %6337 = vmatprep.subr.bf16.mxu1 %v12032_v0 }
 0x251   :  { %6089 = vmatmul.mubr.bf16.gmra.mrb[8].mxu1 %v11365_v5  ;;  %v11550_v5 = vld [vmem:[%s15403_s1 + $0x1f0] sm:$0xff]  }
 0x252   :  { %7437 = vmatmul.mubr.bf16.gmra.mrb[104].mxu0 %v11366_v6  ;;  %6096 = vmatprep.mubr.bf16.mxu1 %v11369_v7  ;;  %v11535_v6 = vld [vmem:[%s15403_s1 + $0x448] sm:$0xff]  }
 0x253   :  { %7444 = vmatprep.mubr.bf16.mxu0 %v11371_v8  ;;  %6338 = vmatpush1.bf16.msra.mxu1 %v11410_v9  ;;  %v11443_v7 = vld [vmem:[%s15404_s0 + $0x898] ss:$84 sps:$4 sm:$0xff]   ;;  %v11444_v8 = vld [vmem:[%s15404_s0 + $0x380] ss:$84 sps:$4 sm:$0xff]  }
 0x254   :  { %6339 = vmatprep.subr.bf16.mxu1 %v12032_v0  ;;  %v11445_v9 = vld [vmem:[%s15404_s0 + $0x944] ss:$84 sps:$4 sm:$0xff]  }
 0x257   :  { %6340 = vmatpush1.bf16.msra.mxu1 %v11424_v10  ;;  %v11447_v10 = vld [vmem:[%s15404_s0 + $0x42c] ss:$84 sps:$4 sm:$0xff]  }
 0x258   :  { %6341 = vmatprep.subr.bf16.mxu1 %v12032_v0 }
 0x259   :  { %6097 = vmatmul.mubr.bf16.gmra.mrb[12].mxu1 %v11373_v11  ;;  %v11549_v11 = vld [vmem:[%s15403_s1 + $0x450] sm:$0xff]  }
 0x25a   :  { %7445 = vmatmul.mubr.bf16.gmra.mrb[108].mxu0 %v11374_v12  ;;  %6104 = vmatprep.mubr.bf16.mxu1 %v11375_v13  ;;  %v11449_v12 = vld [vmem:[%s15404_s0 + $0x940] ss:$84 sps:$4 sm:$0xff]   ;;  %v11450_v13 = vld [vmem:[%s15404_s0 + $0x428] ss:$84 sps:$4 sm:$0xff]  }
 0x25b   :  { %7452 = vmatprep.mubr.bf16.mxu0 %v11377_v14  ;;  %6342 = vmatpush1.bf16.msra.mxu1 %v11438_v15  ;;  %v11453_v14 = vld [vmem:[%s15404_s0 + $0x9ec] ss:$84 sps:$4 sm:$0xff]   ;;  %v11455_v15 = vld [vmem:[%s15404_s0 + $0x4d4] ss:$84 sps:$4 sm:$0xff]  }
 0x25c   :  { %6343 = vmatprep.subr.bf16.mxu1 %v12032_v0 }
 0x25f   :  { %6344 = vmatpush1.bf16.msra.mxu1 %v11452_v16  ;;  %v11563_v16 = vld [vmem:[%s15403_s1 + $0x458] sm:$0xff]  }
 0x260   :  { %6345 = vmatprep.subr.bf16.mxu1 %v12032_v0 }
 0x261   :  { %6105 = vmatmul.mubr.bf16.gmra.mrb[16].mxu1 %v11379_v17  ;;  %v11564_v17 = vld [vmem:[%s15403_s1 + $0x1f8] sm:$0xff]  }
 0x262   :  { %7453 = vmatmul.mubr.bf16.gmra.mrb[112].mxu0 %v11380_v18  ;;  %6112 = vmatprep.mubr.bf16.mxu1 %v11383_v19  ;;  %v11457_v18 = vld [vmem:[%s15404_s0 + $0x9e8] ss:$84 sps:$4 sm:$0xff]   ;;  %v11458_v19 = vld [vmem:[%s15404_s0 + $0x4d0] ss:$84 sps:$4 sm:$0xff]  }
 0x263   :  { %7460 = vmatprep.mubr.bf16.mxu0 %v11385_v20  ;;  %6346 = vmatpush1.bf16.msra.mxu1 %v11466_v21  ;;  %v11459_v20 = vld [vmem:[%s15404_s0 + $0xa94] ss:$84 sps:$4 sm:$0xff]   ;;  %v11461_v21 = vld [vmem:[%s15404_s0 + $0x57c] ss:$84 sps:$4 sm:$0xff]  }
 0x264   :  { %6347 = vmatprep.subr.bf16.mxu1 %v12032_v0 }
 0x267   :  { %6348 = vmatpush1.bf16.msra.mxu1 %v11480_v22  ;;  %v11463_v22 = vld [vmem:[%s15404_s0 + $0xa90] ss:$84 sps:$4 sm:$0xff]  }
 0x268   :  { %6349 = vmatprep.subr.bf16.mxu1 %v12032_v0 }
 0x269   :  { %6113 = vmatmul.mubr.bf16.gmra.mrb[20].mxu1 %v11387_v23  ;;  %v11464_v23 = vld [vmem:[%s15404_s0 + $0x578] ss:$84 sps:$4 sm:$0xff]  }
 0x26a   :  { %7461 = vmatmul.mubr.bf16.gmra.mrb[116].mxu0 %v11388_v24  ;;  %6120 = vmatprep.mubr.bf16.mxu1 %v11389_v25  ;;  %v11467_v24 = vld [vmem:[%s15404_s0 + $0xb3c] ss:$84 sps:$4 sm:$0xff]   ;;  %v11469_v25 = vld [vmem:[%s15404_s0 + $0x624] ss:$84 sps:$4 sm:$0xff]  }
 0x26b   :  { %7468 = vmatprep.mubr.bf16.mxu0 %v11391_v26  ;;  %6350 = vmatpush1.bf16.msra.mxu1 %v11494_v27  ;;  %v11577_v26 = vld [vmem:[%s15403_s1 + $0x460] sm:$0xff]   ;;  %v11471_v27 = vld [vmem:[%s15404_s0 + $0xb38] ss:$84 sps:$4 sm:$0xff]  }
 0x26c   :  { %6351 = vmatprep.subr.bf16.mxu1 %v12032_v0 }
 0x26f   :  { %6352 = vmatpush1.bf16.msra.mxu1 %v11508_v32  ;;  %v11478_v32 = vld [vmem:[%s15404_s0 + $0x6c8] ss:$84 sps:$4 sm:$0xff]  }
 0x270   :  { %6353 = vmatprep.subr.bf16.mxu1 %v12032_v0 }
 0x271   :  { %6121 = vmatmul.mubr.bf16.gmra.mrb[24].mxu1 %v11393_v28  ;;  %v11472_v28 = vld [vmem:[%s15404_s0 + $0x620] ss:$84 sps:$4 sm:$0xff]  }
 0x272   :  { %7469 = vmatmul.mubr.bf16.gmra.mrb[120].mxu0 %v11394_v29  ;;  %6128 = vmatprep.mubr.bf16.mxu1 %v11397_v30  ;;  %v11473_v29 = vld [vmem:[%s15404_s0 + $0xbe4] ss:$84 sps:$4 sm:$0xff]   ;;  %v11475_v30 = vld [vmem:[%s15404_s0 + $0x6cc] ss:$84 sps:$4 sm:$0xff]  }
 0x273   :  { %7476 = vmatprep.mubr.bf16.mxu0 %v11399_v31  ;;  %6354 = vmatpush1.bf16.msra.mxu1 %v11522_v42  ;;  %v11477_v31 = vld [vmem:[%s15404_s0 + $0xbe0] ss:$84 sps:$4 sm:$0xff]   ;;  %v11495_v42 = vld [vmem:[%s15404_s0 + $0xddc] ss:$84 sps:$4 sm:$0xff]  }
 0x274   :  { %6355 = vmatprep.subr.bf16.mxu1 %v12032_v0 }
 0x277   :  { %6356 = vmatpush1.bf16.msra.mxu1 %v11536_v55  ;;  %v11514_v55 = vld [vmem:[%s15404_s0 + $0xa10] ss:$84 sps:$4 sm:$0xff]  }
 0x278   :  { %6357 = vmatprep.subr.bf16.mxu1 %v12032_v0 }
 0x279   :  { %6129 = vmatmul.mubr.bf16.gmra.mrb[28].mxu1 %v11401_v33  ;;  %v11481_v33 = vld [vmem:[%s15404_s0 + $0xc8c] ss:$84 sps:$4 sm:$0xff]  }
 0x27a   :  { %7477 = vmatmul.mubr.bf16.gmra.mrb[124].mxu0 %v11402_v34  ;;  %6136 = vmatprep.mubr.bf16.mxu1 %v11403_v35  ;;  %v11483_v34 = vld [vmem:[%s15404_s0 + $0x774] ss:$84 sps:$4 sm:$0xff]  }
 0x27b   :  { %7517 = vmatprep.mubr.bf16.mxu0 %v11407_v36  ;;  %6358 = vmatpush1.bf16.msra.mxu1 %v11550_v5  ;;  %v11590_v35 = vld [vmem:[%s15403_s1 + $0x468] sm:$0xff]  }
 0x27c   :  { %6359 = vmatprep.subr.bf16.mxu1 %v12032_v0  ;;  %v11485_v36 = vld [vmem:[%s15404_s0 + $0xc88] ss:$84 sps:$4 sm:$0xff]   ;;  %v11537_v5 = vld [vmem:[%s15404_s0 + $0x11cc] ss:$84 sps:$4 sm:$0xff]  }
 0x27f   :  { %6360 = vmatpush1.bf16.msra.mxu1 %v11564_v17  ;;  %v11557_v17 = vld [vmem:[%s15404_s0 + $0x13c4] ss:$84 sps:$4 sm:$0xff]  }
 0x280   :  { %9670 = vmatprep.subr.bf16.mxu1 %v12032_v0 }
 0x281   :  { %6137 = vmatmul.mubr.bf16.gmra.mrb[32].mxu1 %v11408_v37  ;;  %v11486_v37 = vld [vmem:[%s15404_s0 + $0x770] ss:$84 sps:$4 sm:$0xff]  }
 0x282   :  { %7518 = vmatmul.mubr.bf16.vlgmr.msra.gmra.mrb[0].mxu0 %v11405_v38  ;;  %6144 = vmatprep.mubr.bf16.mxu1 %v11411_v39  ;;  %v11487_v38 = vld [vmem:[%s15404_s0 + $0xd34] ss:$84 sps:$4 sm:$0xff]   ;;  %v11489_v39 = vld [vmem:[%s15404_s0 + $0x81c] ss:$84 sps:$4 sm:$0xff]  }
 0x283   :  { %7775 = vmatpush1.bf16.msra.mxu0 %v11409_v40  ;;  %7525 = vmatprep.mubr.bf16.mxu0 %v11413_v41  ;;  %v11491_v40 = vld [vmem:[%s15404_s0 + $0xd30] ss:$84 sps:$4 sm:$0xff]   ;;  %v11492_v41 = vld [vmem:[%s15404_s0 + $0x818] ss:$84 sps:$4 sm:$0xff]  }
 0x284   :  { %7776 = vmatprep.subr.bf16.mxu0 %v12032_v0 }
 0x287   :  { %7777 = vmatpush1.bf16.msra.mxu0 %v11423_v43  ;;  %v11497_v43 = vld [vmem:[%s15404_s0 + $0x8c4] ss:$84 sps:$4 sm:$0xff]  }
 0x288   :  { %7778 = vmatprep.subr.bf16.mxu0 %v12032_v0 }
 0x289   :  { %6145 = vmatmul.mubr.bf16.gmra.mrb[36].mxu1 %v11415_v44  ;;  %v11603_v44 = vld [vmem:[%s15403_s1 + $0x470] sm:$0xff]  }
 0x28a   :  { %7526 = vmatmul.mubr.bf16.gmra.mrb[4].mxu0 %v11416_v45  ;;  %6152 = vmatprep.mubr.bf16.mxu1 %v11417_v46  ;;  %v11499_v45 = vld [vmem:[%s15404_s0 + $0xdd8] ss:$84 sps:$4 sm:$0xff]   ;;  %v11500_v46 = vld [vmem:[%s15404_s0 + $0x8c0] ss:$84 sps:$4 sm:$0xff]  }
 0x28b   :  { %7533 = vmatprep.mubr.bf16.mxu0 %v11419_v47  ;;  %7779 = vmatpush1.bf16.msra.mxu0 %v11437_v48  ;;  %v11501_v47 = vld [vmem:[%s15404_s0 + $0xe84] ss:$84 sps:$4 sm:$0xff]   ;;  %v11503_v48 = vld [vmem:[%s15404_s0 + $0x96c] ss:$84 sps:$4 sm:$0xff]  }
 0x28c   :  { %7780 = vmatprep.subr.bf16.mxu0 %v12032_v0 }
 0x28f   :  { %7781 = vmatpush1.bf16.msra.mxu0 %v11451_v49  ;;  %v11505_v49 = vld [vmem:[%s15404_s0 + $0xe80] ss:$84 sps:$4 sm:$0xff]  }
 0x290   :  { %7782 = vmatprep.subr.bf16.mxu0 %v12032_v0 }
 0x291   :  { %6153 = vmatmul.mubr.bf16.gmra.mrb[40].mxu1 %v11421_v50  ;;  %v11506_v50 = vld [vmem:[%s15404_s0 + $0x968] ss:$84 sps:$4 sm:$0xff]  }
 0x292   :  { %7534 = vmatmul.mubr.bf16.gmra.mrb[8].mxu0 %v11422_v51  ;;  %6160 = vmatprep.mubr.bf16.mxu1 %v11425_v52  ;;  %v11509_v51 = vld [vmem:[%s15404_s0 + $0xf2c] ss:$84 sps:$4 sm:$0xff]   ;;  %v11511_v52 = vld [vmem:[%s15404_s0 + $0xa14] ss:$84 sps:$4 sm:$0xff]  }
 0x293   :  { %7541 = vmatprep.mubr.bf16.mxu0 %v11427_v53  ;;  %7783 = vmatpush1.bf16.msra.mxu0 %v11465_v54  ;;  %v11616_v53 = vld [vmem:[%s15403_s1 + $0x478] sm:$0xff]  }
 0x294   :  { %7784 = vmatprep.subr.bf16.mxu0 %v12032_v0  ;;  %v11513_v54 = vld [vmem:[%s15404_s0 + $0xf28] ss:$84 sps:$4 sm:$0xff]  }
 0x297   :  { %7785 = vmatpush1.bf16.msra.mxu0 %v11479_v56  ;;  %v11515_v56 = vld [vmem:[%s15404_s0 + $0xfd4] ss:$84 sps:$4 sm:$0xff]  }
 0x298   :  { %7786 = vmatprep.subr.bf16.mxu0 %v12032_v0 }
 0x299   :  { %6161 = vmatmul.mubr.bf16.gmra.mrb[44].mxu1 %v11429_v57  ;;  %v11517_v57 = vld [vmem:[%s15404_s0 + $0xabc] ss:$84 sps:$4 sm:$0xff]  }
 0x29a   :  { %7542 = vmatmul.mubr.bf16.gmra.mrb[12].mxu0 %v11430_v58  ;;  %6168 = vmatprep.mubr.bf16.mxu1 %v11431_v59  ;;  %v11519_v58 = vld [vmem:[%s15404_s0 + $0xfd0] ss:$84 sps:$4 sm:$0xff]   ;;  %v11520_v59 = vld [vmem:[%s15404_s0 + $0xab8] ss:$84 sps:$4 sm:$0xff]  }
 0x29b   :  { %7549 = vmatprep.mubr.bf16.mxu0 %v11433_v60  ;;  %7787 = vmatpush1.bf16.msra.mxu0 %v11493_v61  ;;  %v11523_v60 = vld [vmem:[%s15404_s0 + $0x107c] ss:$84 sps:$4 sm:$0xff]   ;;  %v11525_v61 = vld [vmem:[%s15404_s0 + $0xb64] ss:$84 sps:$4 sm:$0xff]  }
 0x29c   :  { %7788 = vmatprep.subr.bf16.mxu0 %v12032_v0 }
 0x29f   :  { %7789 = vmatpush1.bf16.msra.mxu0 %v11507_v62  ;;  %v11527_v62 = vld [vmem:[%s15404_s0 + $0x1078] ss:$84 sps:$4 sm:$0xff]  }
 0x2a0   :  { %7790 = vmatprep.subr.bf16.mxu0 %v12032_v0 }
 0x2a1   :  { %6169 = vmatmul.mubr.bf16.gmra.mrb[48].mxu1 %v11435_v63  ;;  %v11528_v63 = vld [vmem:[%s15404_s0 + $0xb60] ss:$84 sps:$4 sm:$0xff]  }
 0x2a2   :  { %7550 = vmatmul.mubr.bf16.gmra.mrb[16].mxu0 %v11436_v1  ;;  %6176 = vmatprep.mubr.bf16.mxu1 %v11439_v2  ;;  %v11529_v1 = vld [vmem:[%s15404_s0 + $0x1124] ss:$84 sps:$4 sm:$0xff]   ;;  %v11531_v2 = vld [vmem:[%s15404_s0 + $0xc0c] ss:$84 sps:$4 sm:$0xff]  }
 0x2a3   :  { %7557 = vmatprep.mubr.bf16.mxu0 %v11441_v3  ;;  %7791 = vmatpush1.bf16.msra.mxu0 %v11521_v4  ;;  %v11533_v3 = vld [vmem:[%s15404_s0 + $0x1120] ss:$84 sps:$4 sm:$0xff]   ;;  %v11534_v4 = vld [vmem:[%s15404_s0 + $0xc08] ss:$84 sps:$4 sm:$0xff]  }
 0x2a4   :  { %7792 = vmatprep.subr.bf16.mxu0 %v12032_v0 }
 0x2a7   :  { %7793 = vmatpush1.bf16.msra.mxu0 %v11535_v6  ;;  %v11539_v6 = vld [vmem:[%s15404_s0 + $0xcb4] ss:$84 sps:$4 sm:$0xff]  }
 0x2a8   :  { %7794 = vmatprep.subr.bf16.mxu0 %v12032_v0 }
 0x2a9   :  { %6177 = vmatmul.mubr.bf16.gmra.mrb[52].mxu1 %v11443_v7  ;;  %v11541_v7 = vld [vmem:[%s15404_s0 + $0x11c8] ss:$84 sps:$4 sm:$0xff]  }
 0x2aa   :  { %7558 = vmatmul.mubr.bf16.gmra.mrb[20].mxu0 %v11444_v8  ;;  %6184 = vmatprep.mubr.bf16.mxu1 %v11445_v9  ;;  %v11542_v8 = vld [vmem:[%s15404_s0 + $0xcb0] ss:$84 sps:$4 sm:$0xff]   ;;  %v11543_v9 = vld [vmem:[%s15404_s0 + $0x1274] ss:$84 sps:$4 sm:$0xff]  }
 0x2ab   :  { %7565 = vmatprep.mubr.bf16.mxu0 %v11447_v10  ;;  %7795 = vmatpush1.bf16.msra.mxu0 %v11549_v11  ;;  %v11545_v10 = vld [vmem:[%s15404_s0 + $0xd5c] ss:$84 sps:$4 sm:$0xff]  }
 0x2ac   :  { %7796 = vmatprep.subr.bf16.mxu0 %v12032_v0  ;;  %v11547_v11 = vld [vmem:[%s15404_s0 + $0x1270] ss:$84 sps:$4 sm:$0xff]  }
 0x2af   :  { %7797 = vmatpush1.bf16.msra.mxu0 %v11563_v16  ;;  %v11556_v16 = vld [vmem:[%s15404_s0 + $0xe00] ss:$84 sps:$4 sm:$0xff]  }
 0x2b0   :  { %7798 = vmatprep.subr.bf16.mxu0 %v12032_v0 }
 0x2b1   :  { %6185 = vmatmul.mubr.bf16.gmra.mrb[56].mxu1 %v11449_v12  ;;  %v11548_v12 = vld [vmem:[%s15404_s0 + $0xd58] ss:$84 sps:$4 sm:$0xff]  }
 0x2b2   :  { %7566 = vmatmul.mubr.bf16.gmra.mrb[24].mxu0 %v11450_v13  ;;  %6192 = vmatprep.mubr.bf16.mxu1 %v11453_v14  ;;  %v11551_v13 = vld [vmem:[%s15404_s0 + $0x131c] ss:$84 sps:$4 sm:$0xff]   ;;  %v11553_v14 = vld [vmem:[%s15404_s0 + $0xe04] ss:$84 sps:$4 sm:$0xff]  }
 0x2b3   :  { %7573 = vmatprep.mubr.bf16.mxu0 %v11455_v15  ;;  %7799 = vmatpush1.bf16.msra.mxu0 %v11577_v26  ;;  %v11555_v15 = vld [vmem:[%s15404_s0 + $0x1318] ss:$84 sps:$4 sm:$0xff]   ;;  %v11574_v26 = vld [vmem:[%s15404_s0 + $0xffc] ss:$84 sps:$4 sm:$0xff]  }
 0x2b4   :  { %7800 = vmatprep.subr.bf16.mxu0 %v12032_v0 }
 0x2b7   :  { %7801 = vmatpush1.bf16.msra.mxu0 %v11590_v35  ;;  %v12016_v35 = vld [vmem:[%s15403_s1 + $0x208] sm:$0xff]  }
 0x2b8   :  { %7802 = vmatprep.subr.bf16.mxu0 %v12032_v0 }
 0x2b9   :  { %6193 = vmatmul.mubr.bf16.gmra.mrb[60].mxu1 %v11457_v18  ;;  %v11559_v18 = vld [vmem:[%s15404_s0 + $0xeac] ss:$84 sps:$4 sm:$0xff]  }
 0x2ba   :  { %7574 = vmatmul.mubr.bf16.gmra.mrb[28].mxu0 %v11458_v19  ;;  %6200 = vmatprep.mubr.bf16.mxu1 %v11459_v20  ;;  %v11561_v19 = vld [vmem:[%s15404_s0 + $0x13c0] ss:$84 sps:$4 sm:$0xff]   ;;  %v11562_v20 = vld [vmem:[%s15404_s0 + $0xea8] ss:$84 sps:$4 sm:$0xff]  }
 0x2bb   :  { %7581 = vmatprep.mubr.bf16.mxu0 %v11461_v21  ;;  %7803 = vmatpush1.bf16.msra.mxu0 %v11603_v44  ;;  %v11565_v21 = vld [vmem:[%s15404_s0 + $0x146c] ss:$84 sps:$4 sm:$0xff]   ;;  %v11595_v44 = vld [vmem:[%s15404_s0 + $0x210] ss:$84 sps:$4 sm:$0xff]  }
 0x2bc   :  { %7804 = vmatprep.subr.bf16.mxu0 %v12032_v0 }
 0x2bf   :  { %7805 = vmatpush1.bf16.msra.mxu0 %v11616_v53  ;;  %v11606_v53 = vld [vmem:[%s15404_s0 + $0x1344] ss:$84 sps:$4 sm:$0xff]  }
 0x2c0   :  { %8063 = vmatprep.subr.bf16.mxu0 %v12032_v0 }
 0x2c1   :  { %6201 = vmatmul.mubr.bf16.gmra.mrb[64].mxu1 %v11463_v22  ;;  %v11567_v22 = vld [vmem:[%s15404_s0 + $0xf54] ss:$84 sps:$4 sm:$0xff]  }
 0x2c2   :  { %7582 = vmatmul.mubr.bf16.gmra.mrb[32].mxu0 %v11464_v23  ;;  %6208 = vmatprep.mubr.bf16.mxu1 %v11467_v24  ;;  %v11569_v23 = vld [vmem:[%s15404_s0 + $0x1468] ss:$84 sps:$4 sm:$0xff]   ;;  %v11570_v24 = vld [vmem:[%s15404_s0 + $0xf50] ss:$84 sps:$4 sm:$0xff]  }
 0x2c3   :  { %7589 = vmatprep.mubr.bf16.mxu0 %v11469_v25  ;;  %v11573_v25 = vld [vmem:[%s15404_s0 + $0x1c] ss:$84 sps:$4 sm:$0xff]  }
 0x2c9   :  { %6209 = vmatmul.mubr.bf16.gmra.mrb[68].mxu1 %v11471_v27  ;;  %v11571_v27 = vld [vmem:[%s15404_s0 + $0x18] ss:$84 sps:$4 sm:$0xff]  }
 0x2ca   :  { %7590 = vmatmul.mubr.bf16.gmra.mrb[36].mxu0 %v11472_v28  ;;  %6216 = vmatprep.mubr.bf16.mxu1 %v11473_v29  ;;  %v11576_v28 = vld [vmem:[%s15404_s0 + $0xff8] ss:$84 sps:$4 sm:$0xff]  }
 0x2cb   :  { %7597 = vmatprep.mubr.bf16.mxu0 %v11475_v30  ;;  %v11578_v29 = vld [vmem:[%s15404_s0 + $0xc4] ss:$84 sps:$4 sm:$0xff]  }
 0x2cc   :  { %v11580_v30 = vld [vmem:[%s15404_s0 + $0x10a4] ss:$84 sps:$4 sm:$0xff]  }
 0x2d1   :  { %6217 = vmatmul.mubr.bf16.gmra.mrb[72].mxu1 %v11477_v31  ;;  %v12015_v31 = vld [vmem:[%s15403_s1 + $0x200] sm:$0xff]  }
 0x2d2   :  { %7598 = vmatmul.mubr.bf16.gmra.mrb[40].mxu0 %v11478_v32  ;;  %6224 = vmatprep.mubr.bf16.mxu1 %v11481_v33  ;;  %v11582_v32 = vld [vmem:[%s15404_s0 + $0xc0] ss:$84 sps:$4 sm:$0xff]  }
 0x2d3   :  { %7605 = vmatprep.mubr.bf16.mxu0 %v11483_v34  ;;  %v11583_v33 = vld [vmem:[%s15404_s0 + $0x10a0] ss:$84 sps:$4 sm:$0xff]  }
 0x2d4   :  { %v11584_v34 = vld [vmem:[%s15404_s0 + $0x16c] ss:$84 sps:$4 sm:$0xff]  }
 0x2d9   :  { %6225 = vmatmul.mubr.bf16.gmra.mrb[76].mxu1 %v11485_v36  ;;  %v11586_v36 = vld [vmem:[%s15404_s0 + $0x114c] ss:$84 sps:$4 sm:$0xff]  }
 0x2da   :  { %7606 = vmatmul.mubr.bf16.gmra.mrb[44].mxu0 %v11486_v37  ;;  %6232 = vmatprep.mubr.bf16.mxu1 %v11487_v38  ;;  %v12017_v37 = vld [vmem:[%s15403_s1 + $0x210] sm:$0xff]   ;;  %v11588_v38 = vld [vmem:[%s15404_s0 + $0x168] ss:$84 sps:$4 sm:$0xff]  }
 0x2db   :  { %7613 = vmatprep.mubr.bf16.mxu0 %v11489_v39  ;;  %v11589_v39 = vld [vmem:[%s15404_s0 + $0x1148] ss:$84 sps:$4 sm:$0xff]  }
 0x2e1   :  { %6233 = vmatmul.mubr.bf16.gmra.mrb[80].mxu1 %v11491_v40  ;;  %v11591_v40 = vld [vmem:[%s15404_s0 + $0x214] ss:$84 sps:$4 sm:$0xff]  }
 0x2e2   :  { %7614 = vmatmul.mubr.bf16.gmra.mrb[48].mxu0 %v11492_v41  ;;  %6240 = vmatprep.mubr.bf16.mxu1 %v11495_v42  ;;  %v11593_v41 = vld [vmem:[%s15404_s0 + $0x11f4] ss:$84 sps:$4 sm:$0xff]   ;;  %v12018_v42 = vld [vmem:[%s15403_s1 + $0x218] sm:$0xff]  }
 0x2e3   :  { %7621 = vmatprep.mubr.bf16.mxu0 %v11497_v43  ;;  %v12019_v43 = vld [vmem:[%s15403_s1 + $0x220] sm:$0xff]  }
 0x2e9   :  { %6241 = vmatmul.mubr.bf16.gmra.mrb[84].mxu1 %v11499_v45  ;;  %v11596_v45 = vld [vmem:[%s15404_s0 + $0x11f0] ss:$84 sps:$4 sm:$0xff]  }
 0x2ea   :  { %7622 = vmatmul.mubr.bf16.gmra.mrb[52].mxu0 %v11500_v46  ;;  %6248 = vmatprep.mubr.bf16.mxu1 %v11501_v47  ;;  %v11597_v46 = vld [vmem:[%s15404_s0 + $0x2bc] ss:$84 sps:$4 sm:$0xff]  }
 0x2eb   :  { %7629 = vmatprep.mubr.bf16.mxu0 %v11503_v48  ;;  %v11599_v47 = vld [vmem:[%s15404_s0 + $0x129c] ss:$84 sps:$4 sm:$0xff]   ;;  %v12020_v48 = vld [vmem:[%s15403_s1 + $0x228] sm:$0xff]  }
 0x2f1   :  { %6249 = vmatmul.mubr.bf16.gmra.mrb[88].mxu1 %v11505_v49  ;;  %v12021_v49 = vld [vmem:[%s15403_s1 + $0x230] sm:$0xff]  }
 0x2f2   :  { %7630 = vmatmul.mubr.bf16.gmra.mrb[56].mxu0 %v11506_v50  ;;  %6256 = vmatprep.mubr.bf16.mxu1 %v11509_v51  ;;  %v11601_v50 = vld [vmem:[%s15404_s0 + $0x2b8] ss:$84 sps:$4 sm:$0xff]  }
 0x2f3   :  { %7637 = vmatprep.mubr.bf16.mxu0 %v11511_v52  ;;  %v11602_v51 = vld [vmem:[%s15404_s0 + $0x1298] ss:$84 sps:$4 sm:$0xff]  }
 0x2f4   :  { %v11604_v52 = vld [vmem:[%s15404_s0 + $0x364] ss:$84 sps:$4 sm:$0xff]  }
 0x2f9   :  { %6257 = vmatmul.mubr.bf16.gmra.mrb[92].mxu1 %v11513_v54  ;;  %v12022_v54 = vld [vmem:[%s15403_s1 + $0x238] sm:$0xff]  }
 0x2fa   :  { %7638 = vmatmul.mubr.bf16.gmra.mrb[60].mxu0 %v11514_v55  ;;  %6264 = vmatprep.mubr.bf16.mxu1 %v11515_v56  ;;  %v12023_v55 = vld [vmem:[%s15403_s1 + $0x240] sm:$0xff]  }
 0x2fb   :  { %7645 = vmatprep.mubr.bf16.mxu0 %v11517_v57  ;;  %v11608_v56 = vld [vmem:[%s15404_s0 + $0x360] ss:$84 sps:$4 sm:$0xff]  }
 0x2fc   :  { %v11609_v57 = vld [vmem:[%s15404_s0 + $0x1340] ss:$84 sps:$4 sm:$0xff]  }
 0x301   :  { %6265 = vmatmul.mubr.bf16.gmra.mrb[96].mxu1 %v11519_v58  ;;  %v11610_v58 = vld [vmem:[%s15404_s0 + $0x40c] ss:$84 sps:$4 sm:$0xff]  }
 0x302   :  { %7646 = vmatmul.mubr.bf16.gmra.mrb[64].mxu0 %v11520_v59  ;;  %6272 = vmatprep.mubr.bf16.mxu1 %v11523_v60  ;;  %v11612_v59 = vld [vmem:[%s15404_s0 + $0x13ec] ss:$84 sps:$4 sm:$0xff]  }
 0x303   :  { %7653 = vmatprep.mubr.bf16.mxu0 %v11525_v61  ;;  %v12024_v60 = vld [vmem:[%s15403_s1 + $0x248] sm:$0xff]   ;;  %v12025_v61 = vld [vmem:[%s15403_s1 + $0x250] sm:$0xff]  }
 0x309   :  { %6273 = vmatmul.mubr.bf16.gmra.mrb[100].mxu1 %v11527_v62  ;;  %v11614_v62 = vld [vmem:[%s15404_s0 + $0x408] ss:$84 sps:$4 sm:$0xff]  }
 0x30a   :  { %7654 = vmatmul.mubr.bf16.gmra.mrb[68].mxu0 %v11528_v63  ;;  %6280 = vmatprep.mubr.bf16.mxu1 %v11529_v1  ;;  %v11615_v63 = vld [vmem:[%s15404_s0 + $0x13e8] ss:$84 sps:$4 sm:$0xff]  }
 0x30b   :  { %7661 = vmatprep.mubr.bf16.mxu0 %v11531_v2  ;;  %v11617_v1 = vld [vmem:[%s15404_s0 + $0x4b4] ss:$84 sps:$4 sm:$0xff]  }
 0x30c   :  { %v11619_v2 = vld [vmem:[%s15404_s0 + $0x1494] ss:$84 sps:$4 sm:$0xff]  }
 0x311   :  { %6281 = vmatmul.mubr.bf16.gmra.mrb[104].mxu1 %v11533_v3  ;;  %v12026_v3 = vld [vmem:[%s15403_s1 + $0x258] sm:$0xff]  }
 0x312   :  { %7662 = vmatmul.mubr.bf16.gmra.mrb[72].mxu0 %v11534_v4  ;;  %6288 = vmatprep.mubr.bf16.mxu1 %v11537_v5  ;;  %v12027_v4 = vld [vmem:[%s15403_s1 + $0x260] sm:$0xff]  }
 0x313   :  { %7669 = vmatprep.mubr.bf16.mxu0 %v11539_v6  ;;  %v11621_v5 = vld [vmem:[%s15404_s0 + $0x4b0] ss:$84 sps:$4 sm:$0xff]  }
 0x314   :  { %v11622_v6 = vld [vmem:[%s15404_s0 + $0x1490] ss:$84 sps:$4 sm:$0xff]  }
 0x319   :  { %6289 = vmatmul.mubr.bf16.gmra.mrb[108].mxu1 %v11541_v7  ;;  %v11623_v7 = vld [vmem:[%s15404_s0 + $0x55c] ss:$84 sps:$4 sm:$0xff]  }
 0x31a   :  { %7670 = vmatmul.mubr.bf16.gmra.mrb[76].mxu0 %v11542_v8  ;;  %6296 = vmatprep.mubr.bf16.mxu1 %v11543_v9  ;;  %v11627_v8 = vld [vmem:[%s15404_s0 + $0x44] ss:$84 sps:$4 sm:$0xff]   ;;  %v12028_v9 = vld [vmem:[%s15403_s1 + $0x268] sm:$0xff]  }
 0x31b   :  { %7677 = vmatprep.mubr.bf16.mxu0 %v11545_v10  ;;  %v12029_v10 = vld [vmem:[%s15403_s1 + $0x270] sm:$0xff]  }
 0x321   :  { %6297 = vmatmul.mubr.bf16.gmra.mrb[112].mxu1 %v11547_v11  ;;  %v11628_v11 = vld [vmem:[%s15404_s0 + $0x558] ss:$84 sps:$4 sm:$0xff]  }
 0x322   :  { %7678 = vmatmul.mubr.bf16.gmra.mrb[80].mxu0 %v11548_v12  ;;  %6304 = vmatprep.mubr.bf16.mxu1 %v11551_v13  ;;  %v11625_v12 = vld [vmem:[%s15404_s0 + $0x40] ss:$84 sps:$4 sm:$0xff]   ;;  %v11630_v13 = vld [vmem:[%s15404_s0 + $0x604] ss:$84 sps:$4 sm:$0xff]  }
 0x323   :  { %7685 = vmatprep.mubr.bf16.mxu0 %v11553_v14  ;;  %v11629_v14 = vld [vmem:[%s15403_s1 + $0x480] sm:$0xff]  }
 0x329   :  { %6305 = vmatmul.mubr.bf16.gmra.mrb[116].mxu1 %v11555_v15  ;;  %v11632_v15 = vld [vmem:[%s15404_s0 + $0xec] ss:$84 sps:$4 sm:$0xff]  }
 0x32a   :  { %7686 = vmatmul.mubr.bf16.gmra.mrb[84].mxu0 %v11556_v16  ;;  %6312 = vmatprep.mubr.bf16.mxu1 %v11557_v17  ;;  %v12030_v16 = vld [vmem:[%s15403_s1 + $0x278] sm:$0xff]   ;;  %v11642_v17 = vld [vmem:[%s15403_s1 + $0x488] sm:$0xff]  }
 0x32b   :  { %7693 = vmatprep.mubr.bf16.mxu0 %v11559_v18  ;;  %v11634_v18 = vld [vmem:[%s15404_s0 + $0x600] ss:$84 sps:$4 sm:$0xff]  }
 0x331   :  { %6313 = vmatmul.mubr.bf16.gmra.mrb[120].mxu1 %v11561_v19  ;;  %v11635_v19 = vld [vmem:[%s15404_s0 + $0xe8] ss:$84 sps:$4 sm:$0xff]  }
 0x332   :  { %7694 = vmatmul.mubr.bf16.gmra.mrb[88].mxu0 %v11562_v20  ;;  %6320 = vmatprep.mubr.bf16.mxu1 %v11565_v21  ;;  %v11636_v20 = vld [vmem:[%s15404_s0 + $0x6ac] ss:$84 sps:$4 sm:$0xff]   ;;  %v11638_v21 = vld [vmem:[%s15404_s0 + $0x194] ss:$84 sps:$4 sm:$0xff]  }
 0x333   :  { %7701 = vmatprep.mubr.bf16.mxu0 %v11567_v22  ;;  %v11655_v22 = vld [vmem:[%s15403_s1 + $0x490] sm:$0xff]  }
 0x339   :  { %6321 = vmatmul.mubr.bf16.gmra.mrb[124].mxu1 %v11569_v23  ;;  %v11668_v23 = vld [vmem:[%s15403_s1 + $0x498] sm:$0xff]  }
 0x33a   :  { %7702 = vmatmul.mubr.bf16.gmra.mrb[92].mxu0 %v11570_v24  ;;  %6361 = vmatprep.mubr.bf16.mxu1 %v11573_v25  ;;  %v11640_v24 = vld [vmem:[%s15404_s0 + $0x6a8] ss:$84 sps:$4 sm:$0xff]   ;;  %v11641_v25 = vld [vmem:[%s15404_s0 + $0x190] ss:$84 sps:$4 sm:$0xff]  }
 0x33b   :  { %7709 = vmatprep.mubr.bf16.mxu0 %v11574_v26  ;;  %v11643_v26 = vld [vmem:[%s15404_s0 + $0x754] ss:$84 sps:$4 sm:$0xff]  }
 0x341   :  { %6362 = vmatmul.mubr.bf16.vlgmr.msra.gmra.mrb[0].mxu1 %v11571_v27  ;;  %v11645_v27 = vld [vmem:[%s15404_s0 + $0x23c] ss:$84 sps:$4 sm:$0xff]  }
 0x342   :  { %7710 = vmatmul.mubr.bf16.gmra.mrb[96].mxu0 %v11576_v28  ;;  %9686 = vmatpush1.bf16.msra.mxu1 %v12015_v31  ;;  %v11681_v28 = vld [vmem:[%s15403_s1 + $0x4a0] sm:$0xff]   ;;  %v11648_v31 = vld [vmem:[%s15404_s0 + $0x238] ss:$84 sps:$4 sm:$0xff]  }
 0x343   :  { %6369 = vmatprep.mubr.bf16.mxu1 %v11578_v29  ;;  %7717 = vmatprep.mubr.bf16.mxu0 %v11580_v30  ;;  %v11694_v29 = vld [vmem:[%s15403_s1 + $0x4a8] sm:$0xff]   ;;  %v11647_v30 = vld [vmem:[%s15404_s0 + $0x750] ss:$84 sps:$4 sm:$0xff]  }
 0x344   :  { %9671 = vmatprep.subr.bf16.mxu1 %v12032_v0 }
 0x346   :  { %9687 = vmatpush1.bf16.msra.mxu1 %v12016_v35  ;;  %v11720_v35 = vld [vmem:[%s15403_s1 + $0x4b8] sm:$0xff]  }
 0x347   :  { %9672 = vmatprep.subr.bf16.mxu1 %v12032_v0 }
 0x349   :  { %6370 = vmatmul.mubr.bf16.gmra.mrb[4].mxu1 %v11582_v32  ;;  %v11649_v32 = vld [vmem:[%s15404_s0 + $0x7fc] ss:$84 sps:$4 sm:$0xff]  }
 0x34a   :  { %7718 = vmatmul.mubr.bf16.gmra.mrb[100].mxu0 %v11583_v33  ;;  %6377 = vmatprep.mubr.bf16.mxu1 %v11584_v34  ;;  %v11651_v33 = vld [vmem:[%s15404_s0 + $0x2e4] ss:$84 sps:$4 sm:$0xff]   ;;  %v11707_v34 = vld [vmem:[%s15403_s1 + $0x4b0] sm:$0xff]  }
 0x34b   :  { %7725 = vmatprep.mubr.bf16.mxu0 %v11586_v36  ;;  %9688 = vmatpush1.bf16.msra.mxu1 %v12017_v37  ;;  %v11653_v36 = vld [vmem:[%s15404_s0 + $0x7f8] ss:$84 sps:$4 sm:$0xff]   ;;  %v11654_v37 = vld [vmem:[%s15404_s0 + $0x2e0] ss:$84 sps:$4 sm:$0xff]  }
 0x34c   :  { %9673 = vmatprep.subr.bf16.mxu1 %v12032_v0 }
 0x34f   :  { %9689 = vmatpush1.bf16.msra.mxu1 %v12018_v42  ;;  %v11660_v42 = vld [vmem:[%s15404_s0 + $0x8a0] ss:$84 sps:$4 sm:$0xff]  }
 0x350   :  { %9674 = vmatprep.subr.bf16.mxu1 %v12032_v0 }
 0x351   :  { %6378 = vmatmul.mubr.bf16.gmra.mrb[8].mxu1 %v11588_v38  ;;  %v11656_v38 = vld [vmem:[%s15404_s0 + $0x8a4] ss:$84 sps:$4 sm:$0xff]  }
 0x352   :  { %7726 = vmatmul.mubr.bf16.gmra.mrb[104].mxu0 %v11589_v39  ;;  %6385 = vmatprep.mubr.bf16.mxu1 %v11591_v40  ;;  %v11658_v39 = vld [vmem:[%s15404_s0 + $0x38c] ss:$84 sps:$4 sm:$0xff]  }
 0x353   :  { %7733 = vmatprep.mubr.bf16.mxu0 %v11593_v41  ;;  %9690 = vmatpush1.bf16.msra.mxu1 %v12019_v43  ;;  %v11733_v40 = vld [vmem:[%s15403_s1 + $0x4c0] sm:$0xff]   ;;  %v11746_v41 = vld [vmem:[%s15403_s1 + $0x4c8] sm:$0xff]  }
 0x354   :  { %9675 = vmatprep.subr.bf16.mxu1 %v12032_v0  ;;  %v11661_v43 = vld [vmem:[%s15404_s0 + $0x388] ss:$84 sps:$4 sm:$0xff]  }
 0x357   :  { %9691 = vmatpush1.bf16.msra.mxu1 %v12020_v48  ;;  %v11667_v48 = vld [vmem:[%s15404_s0 + $0x430] ss:$84 sps:$4 sm:$0xff]  }
 0x358   :  { %9676 = vmatprep.subr.bf16.mxu1 %v12032_v0 }
 0x359   :  { %6386 = vmatmul.mubr.bf16.gmra.mrb[12].mxu1 %v11595_v44  ;;  %v11662_v44 = vld [vmem:[%s15404_s0 + $0x94c] ss:$84 sps:$4 sm:$0xff]  }
 0x35a   :  { %7734 = vmatmul.mubr.bf16.gmra.mrb[108].mxu0 %v11596_v45  ;;  %6393 = vmatprep.mubr.bf16.mxu1 %v11597_v46  ;;  %v11664_v45 = vld [vmem:[%s15404_s0 + $0x434] ss:$84 sps:$4 sm:$0xff]  }
 0x35b   :  { %7741 = vmatprep.mubr.bf16.mxu0 %v11599_v47  ;;  %9692 = vmatpush1.bf16.msra.mxu1 %v12021_v49  ;;  %v11759_v46 = vld [vmem:[%s15403_s1 + $0x4d0] sm:$0xff]   ;;  %v11666_v47 = vld [vmem:[%s15404_s0 + $0x948] ss:$84 sps:$4 sm:$0xff]  }
 0x35c   :  { %9677 = vmatprep.subr.bf16.mxu1 %v12032_v0  ;;  %v11669_v49 = vld [vmem:[%s15404_s0 + $0x9f4] ss:$84 sps:$4 sm:$0xff]  }
 0x35f   :  { %9693 = vmatpush1.bf16.msra.mxu1 %v12022_v54  ;;  %v11675_v54 = vld [vmem:[%s15404_s0 + $0xa9c] ss:$84 sps:$4 sm:$0xff]  }
 0x360   :  { %9678 = vmatprep.subr.bf16.mxu1 %v12032_v0 }
 0x361   :  { %6394 = vmatmul.mubr.bf16.gmra.mrb[16].mxu1 %v11601_v50  ;;  %v11671_v50 = vld [vmem:[%s15404_s0 + $0x4dc] ss:$84 sps:$4 sm:$0xff]  }
 0x362   :  { %7742 = vmatmul.mubr.bf16.gmra.mrb[112].mxu0 %v11602_v51  ;;  %6401 = vmatprep.mubr.bf16.mxu1 %v11604_v52  ;;  %v11772_v51 = vld [vmem:[%s15403_s1 + $0x4d8] sm:$0xff]   ;;  %v11673_v52 = vld [vmem:[%s15404_s0 + $0x9f0] ss:$84 sps:$4 sm:$0xff]  }
 0x363   :  { %7749 = vmatprep.mubr.bf16.mxu0 %v11606_v53  ;;  %9694 = vmatpush1.bf16.msra.mxu1 %v12023_v55  ;;  %v11674_v53 = vld [vmem:[%s15404_s0 + $0x4d8] ss:$84 sps:$4 sm:$0xff]  }
 0x364   :  { %9679 = vmatprep.subr.bf16.mxu1 %v12032_v0  ;;  %v11677_v55 = vld [vmem:[%s15404_s0 + $0x584] ss:$84 sps:$4 sm:$0xff]  }
 0x367   :  { %9695 = vmatpush1.bf16.msra.mxu1 %v12024_v60  ;;  %v11785_v60 = vld [vmem:[%s15403_s1 + $0x4e0] sm:$0xff]  }
 0x368   :  { %9680 = vmatprep.subr.bf16.mxu1 %v12032_v0 }
 0x369   :  { %6402 = vmatmul.mubr.bf16.gmra.mrb[20].mxu1 %v11608_v56  ;;  %v11679_v56 = vld [vmem:[%s15404_s0 + $0xa98] ss:$84 sps:$4 sm:$0xff]  }
 0x36a   :  { %7750 = vmatmul.mubr.bf16.gmra.mrb[116].mxu0 %v11609_v57  ;;  %6409 = vmatprep.mubr.bf16.mxu1 %v11610_v58  ;;  %v11680_v57 = vld [vmem:[%s15404_s0 + $0x580] ss:$84 sps:$4 sm:$0xff]   ;;  %v11682_v58 = vld [vmem:[%s15404_s0 + $0xb44] ss:$84 sps:$4 sm:$0xff]  }
 0x36b   :  { %7757 = vmatprep.mubr.bf16.mxu0 %v11612_v59  ;;  %9696 = vmatpush1.bf16.msra.mxu1 %v12025_v61  ;;  %v11684_v59 = vld [vmem:[%s15404_s0 + $0x62c] ss:$84 sps:$4 sm:$0xff]  }
 0x36c   :  { %9681 = vmatprep.subr.bf16.mxu1 %v12032_v0  ;;  %v14110_v61 = vld [vmem:[%s15403_s1 + $0x500] sm:$0xff]  }
 0x36f   :  { %9697 = vmatpush1.bf16.msra.mxu1 %v12026_v3  ;;  %v11692_v3 = vld [vmem:[%s15404_s0 + $0xbe8] ss:$84 sps:$4 sm:$0xff]  }
 0x370   :  { %9682 = vmatprep.subr.bf16.mxu1 %v12032_v0 }
 0x371   :  { %6410 = vmatmul.mubr.bf16.gmra.mrb[24].mxu1 %v11614_v62  ;;  %v11686_v62 = vld [vmem:[%s15404_s0 + $0xb40] ss:$84 sps:$4 sm:$0xff]  }
 0x372   :  { %7758 = vmatmul.mubr.bf16.gmra.mrb[120].mxu0 %v11615_v63  ;;  %6417 = vmatprep.mubr.bf16.mxu1 %v11617_v1  ;;  %v11687_v63 = vld [vmem:[%s15404_s0 + $0x628] ss:$84 sps:$4 sm:$0xff]   ;;  %v11688_v1 = vld [vmem:[%s15404_s0 + $0xbec] ss:$84 sps:$4 sm:$0xff]  }
 0x373   :  { %7765 = vmatprep.mubr.bf16.mxu0 %v11619_v2  ;;  %9698 = vmatpush1.bf16.msra.mxu1 %v12027_v4  ;;  %v11690_v2 = vld [vmem:[%s15404_s0 + $0x6d4] ss:$84 sps:$4 sm:$0xff]   ;;  %v11693_v4 = vld [vmem:[%s15404_s0 + $0x6d0] ss:$84 sps:$4 sm:$0xff]  }
 0x374   :  { %9683 = vmatprep.subr.bf16.mxu1 %v12032_v0 }
 0x377   :  { %9699 = vmatpush1.bf16.msra.mxu1 %v12028_v9  ;;  %v11700_v9 = vld [vmem:[%s15404_s0 + $0x778] ss:$84 sps:$4 sm:$0xff]  }
 0x378   :  { %9684 = vmatprep.subr.bf16.mxu1 %v12032_v0 }
 0x379   :  { %6418 = vmatmul.mubr.bf16.gmra.mrb[28].mxu1 %v11621_v5  ;;  %v11695_v5 = vld [vmem:[%s15404_s0 + $0xc94] ss:$84 sps:$4 sm:$0xff]  }
 0x37a   :  { %7766 = vmatmul.mubr.bf16.gmra.mrb[124].mxu0 %v11622_v6  ;;  %6425 = vmatprep.mubr.bf16.mxu1 %v11623_v7  ;;  %v11697_v6 = vld [vmem:[%s15404_s0 + $0x77c] ss:$84 sps:$4 sm:$0xff]   ;;  %v11799_v7 = vld [vmem:[%s15403_s1 + $0x4e8] sm:$0xff]  }
 0x37b   :  { %7806 = vmatprep.mubr.bf16.mxu0 %v11627_v8  ;;  %9700 = vmatpush1.bf16.msra.mxu1 %v12029_v10  ;;  %v11699_v8 = vld [vmem:[%s15404_s0 + $0xc90] ss:$84 sps:$4 sm:$0xff]  }
 0x37c   :  { %9685 = vmatprep.subr.bf16.mxu1 %v12032_v0  ;;  %v11701_v10 = vld [vmem:[%s15404_s0 + $0xd3c] ss:$84 sps:$4 sm:$0xff]  }
 0x37f   :  { %9701 = vmatpush1.bf16.msra.mxu1 %v12030_v16  ;;  %v11813_v16 = vld [vmem:[%s15403_s1 + $0x4f0] sm:$0xff]  }
 0x380   :  { %9590 = vmatprep.subr.bf16.mxu1 %v14110_v61 }
 0x381   :  { %6426 = vmatmul.mubr.bf16.gmra.mrb[32].mxu1 %v11628_v11  ;;  %v11703_v11 = vld [vmem:[%s15404_s0 + $0x824] ss:$84 sps:$4 sm:$0xff]  }
 0x382   :  { %7807 = vmatmul.mubr.bf16.vlgmr.msra.gmra.mrb[0].mxu0 %v11625_v12  ;;  %6433 = vmatprep.mubr.bf16.mxu1 %v11630_v13  ;;  %v11705_v12 = vld [vmem:[%s15404_s0 + $0xd38] ss:$84 sps:$4 sm:$0xff]   ;;  %v11706_v13 = vld [vmem:[%s15404_s0 + $0x820] ss:$84 sps:$4 sm:$0xff]  }
 0x383   :  { %8064 = vmatpush1.bf16.msra.mxu0 %v11629_v14  ;;  %7814 = vmatprep.mubr.bf16.mxu0 %v11632_v15  ;;  %v11708_v14 = vld [vmem:[%s15404_s0 + $0xde4] ss:$84 sps:$4 sm:$0xff]   ;;  %v11710_v15 = vld [vmem:[%s15404_s0 + $0x8cc] ss:$84 sps:$4 sm:$0xff]  }
 0x384   :  { %8065 = vmatprep.subr.bf16.mxu0 %v12032_v0 }
 0x387   :  { %8066 = vmatpush1.bf16.msra.mxu0 %v11642_v17  ;;  %v11712_v17 = vld [vmem:[%s15404_s0 + $0xde0] ss:$84 sps:$4 sm:$0xff]  }
 0x388   :  { %8067 = vmatprep.subr.bf16.mxu0 %v12032_v0 }
 0x389   :  { %6434 = vmatmul.mubr.bf16.gmra.mrb[36].mxu1 %v11634_v18  ;;  %v11713_v18 = vld [vmem:[%s15404_s0 + $0x8c8] ss:$84 sps:$4 sm:$0xff]  }
 0x38a   :  { %7815 = vmatmul.mubr.bf16.gmra.mrb[4].mxu0 %v11635_v19  ;;  %6441 = vmatprep.mubr.bf16.mxu1 %v11636_v20  ;;  %v11714_v19 = vld [vmem:[%s15404_s0 + $0xe8c] ss:$84 sps:$4 sm:$0xff]   ;;  %v11716_v20 = vld [vmem:[%s15404_s0 + $0x974] ss:$84 sps:$4 sm:$0xff]  }
 0x38b   :  { %7822 = vmatprep.mubr.bf16.mxu0 %v11638_v21  ;;  %8068 = vmatpush1.bf16.msra.mxu0 %v11655_v22  ;;  %v11719_v21 = vld [vmem:[%s15404_s0 + $0x970] ss:$84 sps:$4 sm:$0xff]   ;;  %v11721_v22 = vld [vmem:[%s15404_s0 + $0xf34] ss:$84 sps:$4 sm:$0xff]  }
 0x38c   :  { %8069 = vmatprep.subr.bf16.mxu0 %v12032_v0 }
 0x38f   :  { %8070 = vmatpush1.bf16.msra.mxu0 %v11668_v23  ;;  %v11723_v23 = vld [vmem:[%s15404_s0 + $0xa1c] ss:$84 sps:$4 sm:$0xff]  }
 0x390   :  { %8071 = vmatprep.subr.bf16.mxu0 %v12032_v0 }
 0x391   :  { %6442 = vmatmul.mubr.bf16.gmra.mrb[40].mxu1 %v11640_v24  ;;  %v11826_v24 = vld [vmem:[%s15403_s1 + $0x4f8] sm:$0xff]  }
 0x392   :  { %7823 = vmatmul.mubr.bf16.gmra.mrb[8].mxu0 %v11641_v25  ;;  %6449 = vmatprep.mubr.bf16.mxu1 %v11643_v26  ;;  %v11725_v25 = vld [vmem:[%s15404_s0 + $0xf30] ss:$84 sps:$4 sm:$0xff]   ;;  %v11726_v26 = vld [vmem:[%s15404_s0 + $0xa18] ss:$84 sps:$4 sm:$0xff]  }
 0x393   :  { %7830 = vmatprep.mubr.bf16.mxu0 %v11645_v27  ;;  %8072 = vmatpush1.bf16.msra.mxu0 %v11681_v28  ;;  %v11727_v27 = vld [vmem:[%s15404_s0 + $0xfdc] ss:$84 sps:$4 sm:$0xff]   ;;  %v11729_v28 = vld [vmem:[%s15404_s0 + $0xac4] ss:$84 sps:$4 sm:$0xff]  }
 0x394   :  { %8073 = vmatprep.subr.bf16.mxu0 %v12032_v0 }
 0x397   :  { %8074 = vmatpush1.bf16.msra.mxu0 %v11694_v29  ;;  %v11731_v29 = vld [vmem:[%s15404_s0 + $0xfd8] ss:$84 sps:$4 sm:$0xff]  }
 0x398   :  { %8075 = vmatprep.subr.bf16.mxu0 %v12032_v0 }
 0x399   :  { %6450 = vmatmul.mubr.bf16.gmra.mrb[44].mxu1 %v11647_v30  ;;  %v11732_v30 = vld [vmem:[%s15404_s0 + $0xac0] ss:$84 sps:$4 sm:$0xff]  }
 0x39a   :  { %7831 = vmatmul.mubr.bf16.gmra.mrb[12].mxu0 %v11648_v31  ;;  %6457 = vmatprep.mubr.bf16.mxu1 %v11649_v32  ;;  %v11734_v31 = vld [vmem:[%s15404_s0 + $0x1084] ss:$84 sps:$4 sm:$0xff]   ;;  %v11736_v32 = vld [vmem:[%s15404_s0 + $0xb6c] ss:$84 sps:$4 sm:$0xff]  }
 0x39b   :  { %7838 = vmatprep.mubr.bf16.mxu0 %v11651_v33  ;;  %8076 = vmatpush1.bf16.msra.mxu0 %v11707_v34  ;;  %v11738_v33 = vld [vmem:[%s15404_s0 + $0x1080] ss:$84 sps:$4 sm:$0xff]   ;;  %v11739_v34 = vld [vmem:[%s15404_s0 + $0xb68] ss:$84 sps:$4 sm:$0xff]  }
 0x39c   :  { %8077 = vmatprep.subr.bf16.mxu0 %v12032_v0 }
 0x39f   :  { %8078 = vmatpush1.bf16.msra.mxu0 %v11720_v35  ;;  %v11740_v35 = vld [vmem:[%s15404_s0 + $0x112c] ss:$84 sps:$4 sm:$0xff]  }
 0x3a0   :  { %8079 = vmatprep.subr.bf16.mxu0 %v12032_v0 }
 0x3a1   :  { %6458 = vmatmul.mubr.bf16.gmra.mrb[48].mxu1 %v11653_v36  ;;  %v11742_v36 = vld [vmem:[%s15404_s0 + $0xc14] ss:$84 sps:$4 sm:$0xff]  }
 0x3a2   :  { %7839 = vmatmul.mubr.bf16.gmra.mrb[16].mxu0 %v11654_v37  ;;  %6465 = vmatprep.mubr.bf16.mxu1 %v11656_v38  ;;  %v11744_v37 = vld [vmem:[%s15404_s0 + $0x1128] ss:$84 sps:$4 sm:$0xff]   ;;  %v11745_v38 = vld [vmem:[%s15404_s0 + $0xc10] ss:$84 sps:$4 sm:$0xff]  }
 0x3a3   :  { %7846 = vmatprep.mubr.bf16.mxu0 %v11658_v39  ;;  %8080 = vmatpush1.bf16.msra.mxu0 %v11733_v40  ;;  %v11747_v39 = vld [vmem:[%s15404_s0 + $0x11d4] ss:$84 sps:$4 sm:$0xff]   ;;  %v11749_v40 = vld [vmem:[%s15404_s0 + $0xcbc] ss:$84 sps:$4 sm:$0xff]  }
 0x3a4   :  { %8081 = vmatprep.subr.bf16.mxu0 %v12032_v0 }
 0x3a7   :  { %8082 = vmatpush1.bf16.msra.mxu0 %v11746_v41 }
 0x3a8   :  { %8083 = vmatprep.subr.bf16.mxu0 %v12032_v0 }
 0x3a9   :  { %6466 = vmatmul.mubr.bf16.gmra.mrb[52].mxu1 %v11660_v42 }
 0x3aa   :  { %7847 = vmatmul.mubr.bf16.gmra.mrb[20].mxu0 %v11661_v43  ;;  %6473 = vmatprep.mubr.bf16.mxu1 %v11662_v44  ;;  %v11751_v43 = vld [vmem:[%s15404_s0 + $0x11d0] ss:$84 sps:$4 sm:$0xff]  }
 0x3ab   :  { %7854 = vmatprep.mubr.bf16.mxu0 %v11664_v45  ;;  %8084 = vmatpush1.bf16.msra.mxu0 %v11759_v46  ;;  %v11752_v45 = vld [vmem:[%s15404_s0 + $0xcb8] ss:$84 sps:$4 sm:$0xff]   ;;  %v11753_v46 = vld [vmem:[%s15404_s0 + $0x127c] ss:$84 sps:$4 sm:$0xff]  }
 0x3ac   :  { %8085 = vmatprep.subr.bf16.mxu0 %v12032_v0 }
 0x3af   :  { %8086 = vmatpush1.bf16.msra.mxu0 %v11772_v51  ;;  %v11757_v51 = vld [vmem:[%s15404_s0 + $0x1278] ss:$84 sps:$4 sm:$0xff]  }
 0x3b0   :  { %8087 = vmatprep.subr.bf16.mxu0 %v12032_v0 }
 0x3b1   :  { %6474 = vmatmul.mubr.bf16.gmra.mrb[56].mxu1 %v11666_v47 }
 0x3b2   :  { %7855 = vmatmul.mubr.bf16.gmra.mrb[24].mxu0 %v11667_v48  ;;  %6481 = vmatprep.mubr.bf16.mxu1 %v11669_v49  ;;  %v11755_v48 = vld [vmem:[%s15404_s0 + $0xd64] ss:$84 sps:$4 sm:$0xff]  }
 0x3b3   :  { %7862 = vmatprep.mubr.bf16.mxu0 %v11671_v50  ;;  %8088 = vmatpush1.bf16.msra.mxu0 %v11785_v60 }
 0x3b4   :  { %8089 = vmatprep.subr.bf16.mxu0 %v12032_v0 }
 0x3b7   :  { %8090 = vmatpush1.bf16.msra.mxu0 %v11799_v7  ;;  %v11771_v7 = vld [vmem:[%s15404_s0 + $0xeb0] ss:$84 sps:$4 sm:$0xff]  }
 0x3b8   :  { %8091 = vmatprep.subr.bf16.mxu0 %v12032_v0 }
 0x3b9   :  { %6482 = vmatmul.mubr.bf16.gmra.mrb[60].mxu1 %v11673_v52 }
 0x3ba   :  { %7863 = vmatmul.mubr.bf16.gmra.mrb[28].mxu0 %v11674_v53  ;;  %6489 = vmatprep.mubr.bf16.mxu1 %v11675_v54  ;;  %v11758_v53 = vld [vmem:[%s15404_s0 + $0xd60] ss:$84 sps:$4 sm:$0xff]   ;;  %v11760_v54 = vld [vmem:[%s15404_s0 + $0x1324] ss:$84 sps:$4 sm:$0xff]  }
 0x3bb   :  { %7870 = vmatprep.mubr.bf16.mxu0 %v11677_v55  ;;  %8092 = vmatpush1.bf16.msra.mxu0 %v11813_v16  ;;  %v11781_v16 = vld [vmem:[%s15404_s0 + $0x564] ss:$84 sps:$4 sm:$0xff]  }
 0x3bc   :  { %8093 = vmatprep.subr.bf16.mxu0 %v12032_v0  ;;  %v11718_v0 = vld [vmem:[%s15404_s0 + $0xe88] ss:$84 sps:$4 sm:$0xff]  }
 0x3bf   :  { %8094 = vmatpush1.bf16.msra.mxu0 %v11826_v24  ;;  %v11787_v24 = vld [vmem:[%s15404_s0 + $0x60c] ss:$84 sps:$4 sm:$0xff]  }
 0x3c1   :  { %6490 = vmatmul.mubr.bf16.gmra.mrb[64].mxu1 %v11679_v56  ;;  %v11762_v56 = vld [vmem:[%s15404_s0 + $0xe0c] ss:$84 sps:$4 sm:$0xff]  }
 0x3c2   :  { %7871 = vmatmul.mubr.bf16.gmra.mrb[32].mxu0 %v11680_v57  ;;  %6497 = vmatprep.mubr.bf16.mxu1 %v11682_v58 }
 0x3c3   :  { %7878 = vmatprep.mubr.bf16.mxu0 %v11684_v59  ;;  %v11764_v59 = vld [vmem:[%s15404_s0 + $0x1320] ss:$84 sps:$4 sm:$0xff]  }
 0x3c9   :  { %6498 = vmatmul.mubr.bf16.gmra.mrb[68].mxu1 %v11686_v62  ;;  %v11765_v62 = vld [vmem:[%s15404_s0 + $0xe08] ss:$84 sps:$4 sm:$0xff]  }
 0x3ca   :  { %7879 = vmatmul.mubr.bf16.gmra.mrb[36].mxu0 %v11687_v63  ;;  %6505 = vmatprep.mubr.bf16.mxu1 %v11688_v1  ;;  %v11766_v63 = vld [vmem:[%s15404_s0 + $0x13cc] ss:$84 sps:$4 sm:$0xff]  }
 0x3cb   :  { %7886 = vmatprep.mubr.bf16.mxu0 %v11690_v2  ;;  %v11768_v2 = vld [vmem:[%s15404_s0 + $0xeb4] ss:$84 sps:$4 sm:$0xff]  }
 0x3d1   :  { %6506 = vmatmul.mubr.bf16.gmra.mrb[72].mxu1 %v11692_v3 }
 0x3d2   :  { %7887 = vmatmul.mubr.bf16.gmra.mrb[40].mxu0 %v11693_v4  ;;  %6513 = vmatprep.mubr.bf16.mxu1 %v11695_v5  ;;  %v11770_v5 = vld [vmem:[%s15404_s0 + $0x13c8] ss:$84 sps:$4 sm:$0xff]  }
 0x3d3   :  { %7894 = vmatprep.mubr.bf16.mxu0 %v11697_v6 }
 0x3d9   :  { %6514 = vmatmul.mubr.bf16.gmra.mrb[76].mxu1 %v11699_v8  ;;  %v11773_v8 = vld [vmem:[%s15404_s0 + $0x1474] ss:$84 sps:$4 sm:$0xff]  }
 0x3da   :  { %7895 = vmatmul.mubr.bf16.gmra.mrb[44].mxu0 %v11700_v9  ;;  %6521 = vmatprep.mubr.bf16.mxu1 %v11701_v10  ;;  %v11775_v10 = vld [vmem:[%s15404_s0 + $0xf5c] ss:$84 sps:$4 sm:$0xff]  }
 0x3db   :  { %7902 = vmatprep.mubr.bf16.mxu0 %v11703_v11 }
 0x3e1   :  { %6522 = vmatmul.mubr.bf16.gmra.mrb[80].mxu1 %v11705_v12 }
 0x3e2   :  { %7903 = vmatmul.mubr.bf16.gmra.mrb[48].mxu0 %v11706_v13  ;;  %6529 = vmatprep.mubr.bf16.mxu1 %v11708_v14  ;;  %v11777_v13 = vld [vmem:[%s15404_s0 + $0x1470] ss:$84 sps:$4 sm:$0xff]  }
 0x3e3   :  { %7910 = vmatprep.mubr.bf16.mxu0 %v11710_v15  ;;  %v11778_v15 = vld [vmem:[%s15404_s0 + $0xf58] ss:$84 sps:$4 sm:$0xff]  }
 0x3e9   :  { %6530 = vmatmul.mubr.bf16.gmra.mrb[84].mxu1 %v11712_v17 }
 0x3ea   :  { %7911 = vmatmul.mubr.bf16.gmra.mrb[52].mxu0 %v11713_v18  ;;  %6537 = vmatprep.mubr.bf16.mxu1 %v11714_v19  ;;  %v11782_v18 = vld [vmem:[%s15404_s0 + $0x1004] ss:$84 sps:$4 sm:$0xff]  }
 0x3eb   :  { %7918 = vmatprep.mubr.bf16.mxu0 %v11716_v20 }
 0x3f1   :  { %6538 = vmatmul.mubr.bf16.gmra.mrb[88].mxu1 %v11718_v0  ;;  %v11779_v0 = vld [vmem:[%s15404_s0 + $0x560] ss:$84 sps:$4 sm:$0xff]  }
 0x3f2   :  { %7919 = vmatmul.mubr.bf16.gmra.mrb[56].mxu0 %v11719_v21  ;;  %6545 = vmatprep.mubr.bf16.mxu1 %v11721_v22  ;;  %v11784_v22 = vld [vmem:[%s15404_s0 + $0x1000] ss:$84 sps:$4 sm:$0xff]  }
 0x3f3   :  { %7926 = vmatprep.mubr.bf16.mxu0 %v11723_v23 }
 0x3f9   :  { %6546 = vmatmul.mubr.bf16.gmra.mrb[92].mxu1 %v11725_v25  ;;  %v11789_v25 = vld [vmem:[%s15404_s0 + $0x10ac] ss:$84 sps:$4 sm:$0xff]  }
 0x3fa   :  { %7927 = vmatmul.mubr.bf16.gmra.mrb[60].mxu0 %v11726_v26  ;;  %6553 = vmatprep.mubr.bf16.mxu1 %v11727_v27  ;;  %v11806_v26 = vld [vmem:[%s15403_s1 + $0x508] sm:$0xff]   ;;  %v11827_v27 = vld [vmem:[%s15403_s1 + $0x510] sm:$0xff]  }
 0x3fb   :  { %7934 = vmatprep.mubr.bf16.mxu0 %v11729_v28 }
 0x401   :  { %6554 = vmatmul.mubr.bf16.gmra.mrb[96].mxu1 %v11731_v29 }
 0x402   :  { %7935 = vmatmul.mubr.bf16.gmra.mrb[64].mxu0 %v11732_v30  ;;  %6561 = vmatprep.mubr.bf16.mxu1 %v11734_v31  ;;  %v11791_v30 = vld [vmem:[%s15404_s0 + $0x608] ss:$84 sps:$4 sm:$0xff]  }
 0x403   :  { %7942 = vmatprep.mubr.bf16.mxu0 %v11736_v32  ;;  %v11793_v32 = vld [vmem:[%s15404_s0 + $0x6b4] ss:$84 sps:$4 sm:$0xff]  }
 0x409   :  { %6562 = vmatmul.mubr.bf16.gmra.mrb[100].mxu1 %v11738_v33 }
 0x40a   :  { %7943 = vmatmul.mubr.bf16.gmra.mrb[68].mxu0 %v11739_v34  ;;  %6569 = vmatprep.mubr.bf16.mxu1 %v11740_v35  ;;  %v11795_v34 = vld [vmem:[%s15404_s0 + $0x1154] ss:$84 sps:$4 sm:$0xff]   ;;  %v11846_v35 = vld [vmem:[%s15403_s1 + $0x518] sm:$0xff]  }
 0x40b   :  { %7950 = vmatprep.mubr.bf16.mxu0 %v11742_v36 }
 0x411   :  { %6570 = vmatmul.mubr.bf16.gmra.mrb[104].mxu1 %v11744_v37  ;;  %v11865_v37 = vld [vmem:[%s15403_s1 + $0x520] sm:$0xff]  }
 0x412   :  { %7951 = vmatmul.mubr.bf16.gmra.mrb[72].mxu0 %v11745_v38  ;;  %6577 = vmatprep.mubr.bf16.mxu1 %v11747_v39  ;;  %v11797_v39 = vld [vmem:[%s15404_s0 + $0x6b0] ss:$84 sps:$4 sm:$0xff]  }
 0x413   :  { %7958 = vmatprep.mubr.bf16.mxu0 %v11749_v40 }
 0x414   :  { %v14245_v41 = vpop.f32.mrb[0].mxu1 }
 0x415   :  { %v6365_v42 = vpop.f32.mrb[1].mxu1 }
 0x416   :  { %v14250_v44 = vpop.f32.mrb[2].mxu1  ;;  %v11798_v42 = vld [vmem:[%s15404_s0 + $0x1150] ss:$84 sps:$4 sm:$0xff]  }
 0x417   :  { %v6368_v47 = vpop.f32.mrb[3].mxu1 }
 0x418   :  { %v11884_v47 = vld [vmem:[%s15403_s1 + $0x528] sm:$0xff]  }
 0x419   :  { %6578 = vmatmul.mubr.bf16.gmra.mrb[108].mxu1 %v11751_v43  ;;  %v11800_v43 = vld [vmem:[%s15404_s0 + $0x75c] ss:$84 sps:$4 sm:$0xff]  }
 0x41a   :  { %7959 = vmatmul.mubr.bf16.gmra.mrb[76].mxu0 %v11752_v45  ;;  %6585 = vmatprep.mubr.bf16.mxu1 %v11753_v46  ;;  %v11802_v46 = vld [vmem:[%s15404_s0 + $0x11fc] ss:$84 sps:$4 sm:$0xff]  }
 0x41b   :  { %7966 = vmatprep.mubr.bf16.mxu0 %v11755_v48  ;;  %v11903_v48 = vld [vmem:[%s15403_s1 + $0x530] sm:$0xff]  }
 0x41c   :  { %v14261_v49 = vpop.f32.mrb[4].mxu1 }
 0x41d   :  { %v6373_v50 = vpop.f32.mrb[5].mxu1 }
 0x41e   :  { %v14266_v52 = vpop.f32.mrb[6].mxu1  ;;  %v11804_v50 = vld [vmem:[%s15404_s0 + $0x758] ss:$84 sps:$4 sm:$0xff]  }
 0x41f   :  { %v6376_v55 = vpop.f32.mrb[7].mxu1 }
 0x420   :  { %v11811_v55 = vld [vmem:[%s15404_s0 + $0x800] ss:$84 sps:$4 sm:$0xff]  }
 0x421   :  { %6586 = vmatmul.mubr.bf16.gmra.mrb[112].mxu1 %v11757_v51  ;;  %v11805_v51 = vld [vmem:[%s15404_s0 + $0x11f8] ss:$84 sps:$4 sm:$0xff]  }
 0x422   :  { %7967 = vmatmul.mubr.bf16.gmra.mrb[80].mxu0 %v11758_v53  ;;  %6593 = vmatprep.mubr.bf16.mxu1 %v11760_v54  ;;  %v11807_v53 = vld [vmem:[%s15404_s0 + $0x804] ss:$84 sps:$4 sm:$0xff]  }
 0x423   :  { %7974 = vmatprep.mubr.bf16.mxu0 %v11762_v56  ;;  %v11809_v54 = vld [vmem:[%s15404_s0 + $0x12a4] ss:$84 sps:$4 sm:$0xff]   ;;  %v11812_v56 = vld [vmem:[%s15404_s0 + $0x12a0] ss:$84 sps:$4 sm:$0xff]  }
 0x424   :  { %v14277_v57 = vpop.f32.mrb[8].mxu1 }
 0x425   :  { %v6381_v58 = vpop.f32.mrb[9].mxu1 }
 0x426   :  { %v14282_v60 = vpop.f32.mrb[10].mxu1  ;;  %v11814_v58 = vld [vmem:[%s15404_s0 + $0x8ac] ss:$84 sps:$4 sm:$0xff]  }
 0x427   :  { %v6384_v1 = vpop.f32.mrb[11].mxu1 }
 0x428   :  { %v11820_v1 = vld [vmem:[%s15404_s0 + $0x954] ss:$84 sps:$4 sm:$0xff]  }
 0x429   :  { %6594 = vmatmul.mubr.bf16.gmra.mrb[116].mxu1 %v11764_v59  ;;  %v11816_v59 = vld [vmem:[%s15404_s0 + $0x134c] ss:$84 sps:$4 sm:$0xff]  }
 0x42a   :  { %7975 = vmatmul.mubr.bf16.gmra.mrb[84].mxu0 %v11765_v62  ;;  %6601 = vmatprep.mubr.bf16.mxu1 %v11766_v63  ;;  %v11818_v62 = vld [vmem:[%s15404_s0 + $0x8a8] ss:$84 sps:$4 sm:$0xff]  }
 0x42b   :  { %7982 = vmatprep.mubr.bf16.mxu0 %v11768_v2  ;;  %v11819_v63 = vld [vmem:[%s15404_s0 + $0x1348] ss:$84 sps:$4 sm:$0xff]  }
 0x42c   :  { %v14293_v3 = vpop.f32.mrb[12].mxu1  ;;  %v11822_v2 = vld [vmem:[%s15404_s0 + $0x13f4] ss:$84 sps:$4 sm:$0xff]  }
 0x42d   :  { %v6389_v4 = vpop.f32.mrb[13].mxu1 }
 0x42e   :  { %v14298_v6 = vpop.f32.mrb[14].mxu1  ;;  %v11922_v4 = vld [vmem:[%s15403_s1 + $0x538] sm:$0xff]  }
 0x42f   :  { %v6392_v9 = vpop.f32.mrb[15].mxu1 }
 0x430   :  { %v11830_v9 = vld [vmem:[%s15404_s0 + $0x149c] ss:$84 sps:$4 sm:$0xff]  }
 0x431   :  { %6602 = vmatmul.mubr.bf16.gmra.mrb[120].mxu1 %v11770_v5  ;;  %v11824_v5 = vld [vmem:[%s15404_s0 + $0x950] ss:$84 sps:$4 sm:$0xff]  }
 0x432   :  { %7983 = vmatmul.mubr.bf16.gmra.mrb[88].mxu0 %v11771_v7  ;;  %6609 = vmatprep.mubr.bf16.mxu1 %v11773_v8  ;;  %v11825_v7 = vld [vmem:[%s15404_s0 + $0x13f0] ss:$84 sps:$4 sm:$0xff]  }
 0x433   :  { %7990 = vmatprep.mubr.bf16.mxu0 %v11775_v10  ;;  %v11828_v8 = vld [vmem:[%s15404_s0 + $0x9fc] ss:$84 sps:$4 sm:$0xff]   ;;  %v11832_v10 = vld [vmem:[%s15404_s0 + $0x9f8] ss:$84 sps:$4 sm:$0xff]  }
 0x434   :  { %v14309_v11 = vpop.f32.mrb[16].mxu1 }
 0x435   :  { %v6397_v12 = vpop.f32.mrb[17].mxu1 }
 0x436   :  { %v14314_v14 = vpop.f32.mrb[18].mxu1  ;;  %v11833_v12 = vld [vmem:[%s15404_s0 + $0x1498] ss:$84 sps:$4 sm:$0xff]  }
 0x437   :  { %v6400_v17 = vpop.f32.mrb[19].mxu1 }
 0x438   :  { %v11836_v17 = vld [vmem:[%s15404_s0 + $0x48] ss:$84 sps:$4 sm:$0xff]  }
 0x439   :  { %6610 = vmatmul.mubr.bf16.gmra.mrb[124].mxu1 %v11777_v13  ;;  %v11834_v13 = vld [vmem:[%s15404_s0 + $0xaa4] ss:$84 sps:$4 sm:$0xff]  }
 0x43a   :  { %7991 = vmatmul.mubr.bf16.gmra.mrb[92].mxu0 %v11778_v15  ;;  %6714 = vmatprep.mubr.bf16.mxu1 %v11781_v16  ;;  %v11838_v15 = vld [vmem:[%s15404_s0 + $0x4c] ss:$84 sps:$4 sm:$0xff]  }
 0x43b   :  { %7998 = vmatprep.mubr.bf16.mxu0 %v11782_v18  ;;  %v11839_v16 = vld [vmem:[%s15404_s0 + $0xaa0] ss:$84 sps:$4 sm:$0xff]  }
 0x43c   :  { %v14325_v19 = vpop.f32.mrb[20].mxu1  ;;  %v11840_v18 = vld [vmem:[%s15404_s0 + $0xb4c] ss:$84 sps:$4 sm:$0xff]  }
 0x43d   :  { %v6405_v20 = vpop.f32.mrb[21].mxu1 }
 0x43e   :  { %v14330_v21 = vpop.f32.mrb[22].mxu1  ;;  %v11842_v20 = vld [vmem:[%s15404_s0 + $0xf4] ss:$84 sps:$4 sm:$0xff]  }
 0x43f   :  { %v6408_v23 = vpop.f32.mrb[23].mxu1 }
 0x440   :  { %v11847_v23 = vld [vmem:[%s15404_s0 + $0xbf4] ss:$84 sps:$4 sm:$0xff]  }
 0x441   :  { %6715 = vmatmul.mubr.bf16.vlgmr.msra.gmra.mrb[32].mxu1 %v11779_v0  ;;  %v11844_v0 = vld [vmem:[%s15404_s0 + $0xb48] ss:$84 sps:$4 sm:$0xff]  }
 0x442   :  { %7999 = vmatmul.mubr.bf16.gmra.mrb[96].mxu0 %v11784_v22  ;;  %9591 = vmatpush3.bf16.msra.mxu1 %v14110_v61  ;;  %v11792_v61 = vld [vmem:[%s15404_s0 + $0x10a8] ss:$84 sps:$4 sm:$0xff]   ;;  %v11845_v22 = vld [vmem:[%s15404_s0 + $0xf0] ss:$84 sps:$4 sm:$0xff]  }
 0x443   :  { %6722 = vmatprep.mubr.bf16.mxu1 %v11787_v24  ;;  %8006 = vmatprep.mubr.bf16.mxu0 %v11789_v25  ;;  %v11849_v24 = vld [vmem:[%s15404_s0 + $0x19c] ss:$84 sps:$4 sm:$0xff]  }
 0x444   :  { %v14348_v28 = vpop.f32.mrb[24].mxu1  ;;  %9592 = vmatprep.subr.bf16.mxu1 %v11806_v26  ;;  %v11851_v25 = vld [vmem:[%s15404_s0 + $0xbf0] ss:$84 sps:$4 sm:$0xff]  }
 0x445   :  { %v6413_v29 = vpop.f32.mrb[25].mxu1 }
 0x446   :  { %v14353_v31 = vpop.f32.mrb[26].mxu1  ;;  %9593 = vmatpush3.bf16.msra.mxu1 %v11806_v26  ;;  %v11852_v26 = vld [vmem:[%s15404_s0 + $0x198] ss:$84 sps:$4 sm:$0xff]  }
 0x447   :  { %v6416_v33 = vpop.f32.mrb[27].mxu1  ;;  %9594 = vmatprep.subr.bf16.mxu1 %v11827_v27  ;;  %v11855_v29 = vld [vmem:[%s15404_s0 + $0x244] ss:$84 sps:$4 sm:$0xff]  }
 0x448   :  { %v11861_v33 = vld [vmem:[%s15404_s0 + $0x2ec] ss:$84 sps:$4 sm:$0xff]  }
 0x449   :  { %6723 = vmatmul.mubr.bf16.gmra.mrb[36].mxu1 %v11791_v30  ;;  %v11857_v30 = vld [vmem:[%s15404_s0 + $0xc98] ss:$84 sps:$4 sm:$0xff]  }
 0x44a   :  { %8007 = vmatmul.mubr.bf16.gmra.mrb[100].mxu0 %v11792_v61  ;;  %6730 = vmatprep.mubr.bf16.mxu1 %v11793_v32  ;;  %v11858_v61 = vld [vmem:[%s15404_s0 + $0x240] ss:$84 sps:$4 sm:$0xff]   ;;  %v11859_v32 = vld [vmem:[%s15404_s0 + $0xd44] ss:$84 sps:$4 sm:$0xff]  }
 0x44b   :  { %8014 = vmatprep.mubr.bf16.mxu0 %v11795_v34  ;;  %9595 = vmatpush3.bf16.msra.mxu1 %v11827_v27  ;;  %v11853_v27 = vld [vmem:[%s15404_s0 + $0xc9c] ss:$84 sps:$4 sm:$0xff]   ;;  %v11863_v34 = vld [vmem:[%s15404_s0 + $0xd40] ss:$84 sps:$4 sm:$0xff]  }
 0x44c   :  { %v14367_v36 = vpop.f32.mrb[28].mxu1  ;;  %9596 = vmatprep.subr.bf16.mxu1 %v11846_v35 }
 0x44d   :  { %v6421_v38 = vpop.f32.mrb[29].mxu1 }
 0x44e   :  { %v14375_v40 = vpop.f32.mrb[30].mxu1  ;;  %v11868_v38 = vld [vmem:[%s15404_s0 + $0x394] ss:$84 sps:$4 sm:$0xff]  }
 0x44f   :  { %v6424_v45 = vpop.f32.mrb[31].mxu1  ;;  %9597 = vmatpush3.bf16.msra.mxu1 %v11846_v35  ;;  %v11864_v35 = vld [vmem:[%s15404_s0 + $0x2e8] ss:$84 sps:$4 sm:$0xff]  }
 0x450   :  { %9598 = vmatprep.subr.bf16.mxu1 %v11865_v37  ;;  %v11874_v45 = vld [vmem:[%s15404_s0 + $0x43c] ss:$84 sps:$4 sm:$0xff]  }
 0x451   :  { %6731 = vmatmul.mubr.bf16.gmra.mrb[40].mxu1 %v11797_v39  ;;  %v11870_v39 = vld [vmem:[%s15404_s0 + $0xde8] ss:$84 sps:$4 sm:$0xff]  }
 0x452   :  { %8015 = vmatmul.mubr.bf16.gmra.mrb[104].mxu0 %v11798_v42  ;;  %6738 = vmatprep.mubr.bf16.mxu1 %v11800_v43  ;;  %v11871_v42 = vld [vmem:[%s15404_s0 + $0x390] ss:$84 sps:$4 sm:$0xff]   ;;  %v11872_v43 = vld [vmem:[%s15404_s0 + $0xe94] ss:$84 sps:$4 sm:$0xff]  }
 0x453   :  { %8022 = vmatprep.mubr.bf16.mxu0 %v11802_v46  ;;  %9599 = vmatpush3.bf16.msra.mxu1 %v11865_v37  ;;  %v11866_v37 = vld [vmem:[%s15404_s0 + $0xdec] ss:$84 sps:$4 sm:$0xff]   ;;  %v11876_v46 = vld [vmem:[%s15404_s0 + $0xe90] ss:$84 sps:$4 sm:$0xff]  }
 0x454   :  { %9600 = vmatprep.subr.bf16.mxu1 %v11884_v47 }
 0x457   :  { %9601 = vmatpush3.bf16.msra.mxu1 %v11884_v47  ;;  %v11877_v47 = vld [vmem:[%s15404_s0 + $0x438] ss:$84 sps:$4 sm:$0xff]  }
 0x458   :  { %9602 = vmatprep.subr.bf16.mxu1 %v11903_v48 }
 0x459   :  { %6739 = vmatmul.mubr.bf16.gmra.mrb[44].mxu1 %v11804_v50  ;;  %v11880_v50 = vld [vmem:[%s15404_s0 + $0x4e4] ss:$84 sps:$4 sm:$0xff]  }
 0x45a   :  { %8023 = vmatmul.mubr.bf16.gmra.mrb[108].mxu0 %v11805_v51  ;;  %6746 = vmatprep.mubr.bf16.mxu1 %v11807_v53  ;;  %v11882_v51 = vld [vmem:[%s15404_s0 + $0xf38] ss:$84 sps:$4 sm:$0xff]   ;;  %v11883_v53 = vld [vmem:[%s15404_s0 + $0x4e0] ss:$84 sps:$4 sm:$0xff]  }
 0x45b   :  { %8030 = vmatprep.mubr.bf16.mxu0 %v11809_v54  ;;  %9603 = vmatpush3.bf16.msra.mxu1 %v11903_v48  ;;  %v11878_v48 = vld [vmem:[%s15404_s0 + $0xf3c] ss:$84 sps:$4 sm:$0xff]   ;;  %v11885_v54 = vld [vmem:[%s15404_s0 + $0xfe4] ss:$84 sps:$4 sm:$0xff]  }
 0x45c   :  { %9604 = vmatprep.subr.bf16.mxu1 %v11922_v4 }
 0x45f   :  { %9605 = vmatpush3.bf16.msra.mxu1 %v11922_v4  ;;  %v11899_v4 = vld [vmem:[%s15404_s0 + $0x6dc] ss:$84 sps:$4 sm:$0xff]  }
 0x461   :  { %6747 = vmatmul.mubr.bf16.gmra.mrb[48].mxu1 %v11811_v55  ;;  %v11887_v55 = vld [vmem:[%s15404_s0 + $0x58c] ss:$84 sps:$4 sm:$0xff]  }
 0x462   :  { %8031 = vmatmul.mubr.bf16.gmra.mrb[112].mxu0 %v11812_v56  ;;  %6754 = vmatprep.mubr.bf16.mxu1 %v11814_v58  ;;  %v11889_v56 = vld [vmem:[%s15404_s0 + $0xfe0] ss:$84 sps:$4 sm:$0xff]   ;;  %v11890_v58 = vld [vmem:[%s15404_s0 + $0x588] ss:$84 sps:$4 sm:$0xff]  }
 0x463   :  { %8038 = vmatprep.mubr.bf16.mxu0 %v11816_v59  ;;  %v11891_v59 = vld [vmem:[%s15404_s0 + $0x108c] ss:$84 sps:$4 sm:$0xff]  }
 0x469   :  { %6755 = vmatmul.mubr.bf16.gmra.mrb[52].mxu1 %v11818_v62  ;;  %v11893_v62 = vld [vmem:[%s15404_s0 + $0x634] ss:$84 sps:$4 sm:$0xff]  }
 0x46a   :  { %8039 = vmatmul.mubr.bf16.gmra.mrb[116].mxu0 %v11819_v63  ;;  %6762 = vmatprep.mubr.bf16.mxu1 %v11820_v1  ;;  %v11895_v63 = vld [vmem:[%s15404_s0 + $0x1088] ss:$84 sps:$4 sm:$0xff]   ;;  %v11896_v1 = vld [vmem:[%s15404_s0 + $0x630] ss:$84 sps:$4 sm:$0xff]  }
 0x46b   :  { %8046 = vmatprep.mubr.bf16.mxu0 %v11822_v2  ;;  %v11897_v2 = vld [vmem:[%s15404_s0 + $0x1134] ss:$84 sps:$4 sm:$0xff]  }
 0x471   :  { %6763 = vmatmul.mubr.bf16.gmra.mrb[56].mxu1 %v11824_v5  ;;  %v11901_v5 = vld [vmem:[%s15404_s0 + $0x1130] ss:$84 sps:$4 sm:$0xff]  }
 0x472   :  { %8047 = vmatmul.mubr.bf16.gmra.mrb[120].mxu0 %v11825_v7  ;;  %6770 = vmatprep.mubr.bf16.mxu1 %v11828_v8  ;;  %v11902_v7 = vld [vmem:[%s15404_s0 + $0x6d8] ss:$84 sps:$4 sm:$0xff]   ;;  %v11904_v8 = vld [vmem:[%s15404_s0 + $0x11dc] ss:$84 sps:$4 sm:$0xff]  }
 0x473   :  { %8054 = vmatprep.mubr.bf16.mxu0 %v11830_v9  ;;  %v11906_v9 = vld [vmem:[%s15404_s0 + $0x784] ss:$84 sps:$4 sm:$0xff]  }
 0x479   :  { %6771 = vmatmul.mubr.bf16.gmra.mrb[60].mxu1 %v11832_v10  ;;  %v11908_v10 = vld [vmem:[%s15404_s0 + $0x11d8] ss:$84 sps:$4 sm:$0xff]  }
 0x47a   :  { %8055 = vmatmul.mubr.bf16.gmra.mrb[124].mxu0 %v11833_v12  ;;  %6778 = vmatprep.mubr.bf16.mxu1 %v11834_v13  ;;  %v11909_v12 = vld [vmem:[%s15404_s0 + $0x780] ss:$84 sps:$4 sm:$0xff]   ;;  %v11910_v13 = vld [vmem:[%s15404_s0 + $0x1284] ss:$84 sps:$4 sm:$0xff]  }
 0x47b   :  { %8095 = vmatprep.mubr.bf16.mxu0 %v11838_v15  ;;  %v11912_v15 = vld [vmem:[%s15404_s0 + $0x82c] ss:$84 sps:$4 sm:$0xff]  }
 0x481   :  { %6779 = vmatmul.mubr.bf16.gmra.mrb[64].mxu1 %v11839_v16  ;;  %v11914_v16 = vld [vmem:[%s15404_s0 + $0x1280] ss:$84 sps:$4 sm:$0xff]  }
 0x482   :  { %8096 = vmatmul.mubr.bf16.vlgmr.msra.gmra.mrb[0].mxu0 %v11836_v17  ;;  %6786 = vmatprep.mubr.bf16.mxu1 %v11840_v18  ;;  %v11915_v17 = vld [vmem:[%s15404_s0 + $0x828] ss:$84 sps:$4 sm:$0xff]   ;;  %v11916_v18 = vld [vmem:[%s15404_s0 + $0x132c] ss:$84 sps:$4 sm:$0xff]  }
 0x483   :  { %8103 = vmatprep.mubr.bf16.mxu0 %v11842_v20  ;;  %v11918_v20 = vld [vmem:[%s15404_s0 + $0x8d4] ss:$84 sps:$4 sm:$0xff]  }
 0x489   :  { %6787 = vmatmul.mubr.bf16.gmra.mrb[68].mxu1 %v11844_v0  ;;  %v11920_v0 = vld [vmem:[%s15404_s0 + $0x1328] ss:$84 sps:$4 sm:$0xff]  }
 0x48a   :  { %8104 = vmatmul.mubr.bf16.gmra.mrb[4].mxu0 %v11845_v22  ;;  %6794 = vmatprep.mubr.bf16.mxu1 %v11847_v23  ;;  %v11921_v22 = vld [vmem:[%s15404_s0 + $0x8d0] ss:$84 sps:$4 sm:$0xff]   ;;  %v11923_v23 = vld [vmem:[%s15404_s0 + $0x13d4] ss:$84 sps:$4 sm:$0xff]  }
 0x48b   :  { %8111 = vmatprep.mubr.bf16.mxu0 %v11849_v24  ;;  %v11925_v24 = vld [vmem:[%s15404_s0 + $0x97c] ss:$84 sps:$4 sm:$0xff]  }
 0x491   :  { %6795 = vmatmul.mubr.bf16.gmra.mrb[72].mxu1 %v11851_v25  ;;  %v11927_v25 = vld [vmem:[%s15404_s0 + $0x13d0] ss:$84 sps:$4 sm:$0xff]  }
 0x492   :  { %8112 = vmatmul.mubr.bf16.gmra.mrb[8].mxu0 %v11852_v26  ;;  %6802 = vmatprep.mubr.bf16.mxu1 %v11853_v27  ;;  %v11928_v26 = vld [vmem:[%s15404_s0 + $0x978] ss:$84 sps:$4 sm:$0xff]   ;;  %v11929_v27 = vld [vmem:[%s15404_s0 + $0x147c] ss:$84 sps:$4 sm:$0xff]  }
 0x493   :  { %8119 = vmatprep.mubr.bf16.mxu0 %v11855_v29  ;;  %v11931_v29 = vld [vmem:[%s15404_s0 + $0xa24] ss:$84 sps:$4 sm:$0xff]  }
 0x499   :  { %6803 = vmatmul.mubr.bf16.gmra.mrb[76].mxu1 %v11857_v30  ;;  %v11933_v30 = vld [vmem:[%s15404_s0 + $0x1478] ss:$84 sps:$4 sm:$0xff]  }
 0x49a   :  { %8120 = vmatmul.mubr.bf16.gmra.mrb[12].mxu0 %v11858_v61  ;;  %6810 = vmatprep.mubr.bf16.mxu1 %v11859_v32  ;;  %v11934_v61 = vld [vmem:[%s15404_s0 + $0xa20] ss:$84 sps:$4 sm:$0xff]   ;;  %v11937_v32 = vld [vmem:[%s15404_s0 + $0x50] ss:$84 sps:$4 sm:$0xff]  }
 0x49b   :  { %8127 = vmatprep.mubr.bf16.mxu0 %v11861_v33  ;;  %v11935_v33 = vld [vmem:[%s15404_s0 + $0xacc] ss:$84 sps:$4 sm:$0xff]  }
 0x4a1   :  { %6811 = vmatmul.mubr.bf16.gmra.mrb[80].mxu1 %v11863_v34  ;;  %v11939_v34 = vld [vmem:[%s15404_s0 + $0xf8] ss:$84 sps:$4 sm:$0xff]  }
 0x4a2   :  { %8128 = vmatmul.mubr.bf16.gmra.mrb[16].mxu0 %v11864_v35  ;;  %6818 = vmatprep.mubr.bf16.mxu1 %v11866_v37  ;;  %v11938_v35 = vld [vmem:[%s15404_s0 + $0xac8] ss:$84 sps:$4 sm:$0xff]   ;;  %v11942_v37 = vld [vmem:[%s15404_s0 + $0x1a0] ss:$84 sps:$4 sm:$0xff]  }
 0x4a3   :  { %8135 = vmatprep.mubr.bf16.mxu0 %v11868_v38  ;;  %v11940_v38 = vld [vmem:[%s15404_s0 + $0xb74] ss:$84 sps:$4 sm:$0xff]  }
 0x4a9   :  { %6819 = vmatmul.mubr.bf16.gmra.mrb[84].mxu1 %v11870_v39  ;;  %v11944_v39 = vld [vmem:[%s15404_s0 + $0x248] ss:$84 sps:$4 sm:$0xff]  }
 0x4aa   :  { %8136 = vmatmul.mubr.bf16.gmra.mrb[20].mxu0 %v11871_v42  ;;  %6826 = vmatprep.mubr.bf16.mxu1 %v11872_v43  ;;  %v11943_v42 = vld [vmem:[%s15404_s0 + $0xb70] ss:$84 sps:$4 sm:$0xff]  }
 0x4ab   :  { %8143 = vmatprep.mubr.bf16.mxu0 %v11874_v45  ;;  %v11947_v43 = vld [vmem:[%s15404_s0 + $0x2f0] ss:$84 sps:$4 sm:$0xff]  }
 0x4ac   :  { %v11945_v45 = vld [vmem:[%s15404_s0 + $0xc1c] ss:$84 sps:$4 sm:$0xff]  }
 0x4b1   :  { %6827 = vmatmul.mubr.bf16.gmra.mrb[88].mxu1 %v11876_v46  ;;  %v11949_v46 = vld [vmem:[%s15404_s0 + $0x398] ss:$84 sps:$4 sm:$0xff]  }
 0x4b2   :  { %8144 = vmatmul.mubr.bf16.gmra.mrb[24].mxu0 %v11877_v47  ;;  %6834 = vmatprep.mubr.bf16.mxu1 %v11878_v48  ;;  %v11948_v47 = vld [vmem:[%s15404_s0 + $0xc18] ss:$84 sps:$4 sm:$0xff]   ;;  %v11952_v48 = vld [vmem:[%s15404_s0 + $0x440] ss:$84 sps:$4 sm:$0xff]  }
 0x4b3   :  { %8151 = vmatprep.mubr.bf16.mxu0 %v11880_v50  ;;  %v11950_v50 = vld [vmem:[%s15404_s0 + $0xcc4] ss:$84 sps:$4 sm:$0xff]  }
 0x4b9   :  { %6835 = vmatmul.mubr.bf16.gmra.mrb[92].mxu1 %v11882_v51 }
 0x4ba   :  { %8152 = vmatmul.mubr.bf16.gmra.mrb[28].mxu0 %v11883_v53  ;;  %6842 = vmatprep.mubr.bf16.mxu1 %v11885_v54  ;;  %v11954_v54 = vld [vmem:[%s15404_s0 + $0x4e8] ss:$84 sps:$4 sm:$0xff]  }
 0x4bb   :  { %8159 = vmatprep.mubr.bf16.mxu0 %v11887_v55 }
 0x4c1   :  { %6843 = vmatmul.mubr.bf16.gmra.mrb[96].mxu1 %v11889_v56  ;;  %v11953_v56 = vld [vmem:[%s15404_s0 + $0xcc0] ss:$84 sps:$4 sm:$0xff]  }
 0x4c2   :  { %8160 = vmatmul.mubr.bf16.gmra.mrb[32].mxu0 %v11890_v58  ;;  %6850 = vmatprep.mubr.bf16.mxu1 %v11891_v59  ;;  %v11957_v58 = vld [vmem:[%s15404_s0 + $0x590] ss:$84 sps:$4 sm:$0xff]  }
 0x4c3   :  { %8167 = vmatprep.mubr.bf16.mxu0 %v11893_v62  ;;  %v11955_v62 = vld [vmem:[%s15404_s0 + $0xd6c] ss:$84 sps:$4 sm:$0xff]  }
 0x4c9   :  { %6851 = vmatmul.mubr.bf16.gmra.mrb[100].mxu1 %v11895_v63 }
 0x4ca   :  { %8168 = vmatmul.mubr.bf16.gmra.mrb[36].mxu0 %v11896_v1  ;;  %6858 = vmatprep.mubr.bf16.mxu1 %v11897_v2  ;;  %v11959_v2 = vld [vmem:[%s15404_s0 + $0x638] ss:$84 sps:$4 sm:$0xff]  }
 0x4cb   :  { %8175 = vmatprep.mubr.bf16.mxu0 %v11899_v4 }
 0x4d1   :  { %6859 = vmatmul.mubr.bf16.gmra.mrb[104].mxu1 %v11901_v5  ;;  %v11958_v5 = vld [vmem:[%s15404_s0 + $0xd68] ss:$84 sps:$4 sm:$0xff]  }
 0x4d2   :  { %8176 = vmatmul.mubr.bf16.gmra.mrb[40].mxu0 %v11902_v7  ;;  %6866 = vmatprep.mubr.bf16.mxu1 %v11904_v8  ;;  %v11962_v7 = vld [vmem:[%s15404_s0 + $0x6e0] ss:$84 sps:$4 sm:$0xff]  }
 0x4d3   :  { %8183 = vmatprep.mubr.bf16.mxu0 %v11906_v9  ;;  %v11960_v9 = vld [vmem:[%s15404_s0 + $0xe14] ss:$84 sps:$4 sm:$0xff]  }
 0x4d9   :  { %6867 = vmatmul.mubr.bf16.gmra.mrb[108].mxu1 %v11908_v10 }
 0x4da   :  { %8184 = vmatmul.mubr.bf16.gmra.mrb[44].mxu0 %v11909_v12  ;;  %6874 = vmatprep.mubr.bf16.mxu1 %v11910_v13  ;;  %v11964_v13 = vld [vmem:[%s15404_s0 + $0x788] ss:$84 sps:$4 sm:$0xff]  }
 0x4db   :  { %8191 = vmatprep.mubr.bf16.mxu0 %v11912_v15 }
 0x4e1   :  { %6875 = vmatmul.mubr.bf16.gmra.mrb[112].mxu1 %v11914_v16  ;;  %v11963_v16 = vld [vmem:[%s15404_s0 + $0xe10] ss:$84 sps:$4 sm:$0xff]  }
 0x4e2   :  { %8192 = vmatmul.mubr.bf16.gmra.mrb[48].mxu0 %v11915_v17  ;;  %6882 = vmatprep.mubr.bf16.mxu1 %v11916_v18  ;;  %v11967_v17 = vld [vmem:[%s15404_s0 + $0x830] ss:$84 sps:$4 sm:$0xff]  }
 0x4e3   :  { %8199 = vmatprep.mubr.bf16.mxu0 %v11918_v20  ;;  %v11965_v20 = vld [vmem:[%s15404_s0 + $0xebc] ss:$84 sps:$4 sm:$0xff]  }
 0x4e9   :  { %6883 = vmatmul.mubr.bf16.gmra.mrb[116].mxu1 %v11920_v0 }
 0x4ea   :  { %8200 = vmatmul.mubr.bf16.gmra.mrb[52].mxu0 %v11921_v22  ;;  %6890 = vmatprep.mubr.bf16.mxu1 %v11923_v23  ;;  %v11969_v23 = vld [vmem:[%s15404_s0 + $0x8d8] ss:$84 sps:$4 sm:$0xff]  }
 0x4eb   :  { %8207 = vmatprep.mubr.bf16.mxu0 %v11925_v24 }
 0x4f1   :  { %6891 = vmatmul.mubr.bf16.gmra.mrb[120].mxu1 %v11927_v25  ;;  %v11968_v25 = vld [vmem:[%s15404_s0 + $0xeb8] ss:$84 sps:$4 sm:$0xff]  }
 0x4f2   :  { %8208 = vmatmul.mubr.bf16.gmra.mrb[56].mxu0 %v11928_v26  ;;  %6898 = vmatprep.mubr.bf16.mxu1 %v11929_v27  ;;  %v11972_v26 = vld [vmem:[%s15404_s0 + $0x980] ss:$84 sps:$4 sm:$0xff]  }
 0x4f3   :  { %8215 = vmatprep.mubr.bf16.mxu0 %v11931_v29  ;;  %v11970_v29 = vld [vmem:[%s15404_s0 + $0xf64] ss:$84 sps:$4 sm:$0xff]  }
 0x4f9   :  { %6899 = vmatmul.mubr.bf16.gmra.mrb[124].mxu1 %v11933_v30 }
 0x4fa   :  { %8216 = vmatmul.mubr.bf16.gmra.mrb[60].mxu0 %v11934_v61  ;;  %9606 = vmatprep.mubr.bf16.mxu1 %v11937_v32  ;;  %v11974_v32 = vld [vmem:[%s15404_s0 + $0xa28] ss:$84 sps:$4 sm:$0xff]  }
 0x4fb   :  { %8223 = vmatprep.mubr.bf16.mxu0 %v11935_v33 }
 0x501   :  { %9607 = vmatmul.mubr.bf16.vlgmr.msra.gmra.mrb[128].mxu1 %v11939_v34  ;;  %v11973_v34 = vld [vmem:[%s15404_s0 + $0xf60] ss:$84 sps:$4 sm:$0xff]  }
 0x502   :  { %8224 = vmatmul.mubr.bf16.gmra.mrb[64].mxu0 %v11938_v35  ;;  %9610 = vmatprep.mubr.bf16.mxu1 %v11942_v37  ;;  %v11977_v35 = vld [vmem:[%s15404_s0 + $0xad0] ss:$84 sps:$4 sm:$0xff]  }
 0x503   :  { %8231 = vmatprep.mubr.bf16.mxu0 %v11940_v38  ;;  %v11975_v38 = vld [vmem:[%s15404_s0 + $0x100c] ss:$84 sps:$4 sm:$0xff]  }
 0x509   :  { %9611 = vmatmul.mubr.bf16.gmra.mrb[132].mxu1 %v11944_v39 }
 0x50a   :  { %8232 = vmatmul.mubr.bf16.gmra.mrb[68].mxu0 %v11943_v42  ;;  %9614 = vmatprep.mubr.bf16.mxu1 %v11947_v43  ;;  %v11979_v43 = vld [vmem:[%s15404_s0 + $0xb78] ss:$84 sps:$4 sm:$0xff]  }
 0x50b   :  { %8239 = vmatprep.mubr.bf16.mxu0 %v11945_v45 }
 0x511   :  { %9615 = vmatmul.mubr.bf16.gmra.mrb[136].mxu1 %v11949_v46  ;;  %v11978_v46 = vld [vmem:[%s15404_s0 + $0x1008] ss:$84 sps:$4 sm:$0xff]  }
 0x512   :  { %8240 = vmatmul.mubr.bf16.gmra.mrb[72].mxu0 %v11948_v47  ;;  %9618 = vmatprep.mubr.bf16.mxu1 %v11952_v48  ;;  %v11982_v47 = vld [vmem:[%s15404_s0 + $0xc20] ss:$84 sps:$4 sm:$0xff]  }
 0x513   :  { %8247 = vmatprep.mubr.bf16.mxu0 %v11950_v50  ;;  %v11980_v50 = vld [vmem:[%s15404_s0 + $0x10b4] ss:$84 sps:$4 sm:$0xff]  }
 0x514   :  { %v14683_v51 = vpop.f32.mrb[32].mxu1 }
 0x515   :  { %v6718_v53 = vpop.f32.mrb[33].mxu1 }
 0x516   :  { %v14688_v55 = vpop.f32.mrb[34].mxu1 }
 0x517   :  { %v6721_v59 = vpop.f32.mrb[35].mxu1 }
 0x518   :  { %v11983_v59 = vld [vmem:[%s15404_s0 + $0x10b0] ss:$84 sps:$4 sm:$0xff]  }
 0x519   :  { %9619 = vmatmul.mubr.bf16.gmra.mrb[140].mxu1 %v11954_v54 }
 0x51a   :  { %8248 = vmatmul.mubr.bf16.gmra.mrb[76].mxu0 %v11953_v56  ;;  %9622 = vmatprep.mubr.bf16.mxu1 %v11957_v58  ;;  %v11984_v56 = vld [vmem:[%s15404_s0 + $0xcc8] ss:$84 sps:$4 sm:$0xff]  }
 0x51b   :  { %8255 = vmatprep.mubr.bf16.mxu0 %v11955_v62  ;;  %v11987_v62 = vld [vmem:[%s15404_s0 + $0xd70] ss:$84 sps:$4 sm:$0xff]  }
 0x51c   :  { %v14699_v63 = vpop.f32.mrb[36].mxu1 }
 0x51d   :  { %v6726_v1 = vpop.f32.mrb[37].mxu1 }
 0x51e   :  { %v14704_v4 = vpop.f32.mrb[38].mxu1 }
 0x51f   :  { %v6729_v8 = vpop.f32.mrb[39].mxu1 }
 0x520   :  { %v11989_v8 = vld [vmem:[%s15404_s0 + $0xe18] ss:$84 sps:$4 sm:$0xff]  }
 0x521   :  { %9623 = vmatmul.mubr.bf16.gmra.mrb[144].mxu1 %v11959_v2  ;;  %v11985_v2 = vld [vmem:[%s15404_s0 + $0x115c] ss:$84 sps:$4 sm:$0xff]  }
 0x522   :  { %8256 = vmatmul.mubr.bf16.gmra.mrb[80].mxu0 %v11958_v5  ;;  %9626 = vmatprep.mubr.bf16.mxu1 %v11962_v7 }
 0x523   :  { %8263 = vmatprep.mubr.bf16.mxu0 %v11960_v9 }
 0x524   :  { %v14715_v10 = vpop.f32.mrb[40].mxu1 }
 0x525   :  { %v6734_v12 = vpop.f32.mrb[41].mxu1 }
 0x526   :  { %v14720_v15 = vpop.f32.mrb[42].mxu1  ;;  %v11988_v12 = vld [vmem:[%s15404_s0 + $0x1158] ss:$84 sps:$4 sm:$0xff]  }
 0x527   :  { %v6737_v18 = vpop.f32.mrb[43].mxu1 }
 0x528   :  { %v14814_v18 = vld [vmem:[%s15405_s2] ss:$0 sm:$0xff] }
 0x529   :  { %9627 = vmatmul.mubr.bf16.gmra.mrb[148].mxu1 %v11964_v13  ;;  %v11992_v13 = vld [vmem:[%s15404_s0 + $0xec0] ss:$84 sps:$4 sm:$0xff]  }
 0x52a   :  { %8264 = vmatmul.mubr.bf16.gmra.mrb[84].mxu0 %v11963_v16  ;;  %9630 = vmatprep.mubr.bf16.mxu1 %v11967_v17  ;;  %v11990_v17 = vld [vmem:[%s15404_s0 + $0x1204] ss:$84 sps:$4 sm:$0xff]  }
 0x52b   :  { %8271 = vmatprep.mubr.bf16.mxu0 %v11965_v20  ;;  %v9702_v20 = vadd.f32 %v14814_v18, %v14245_v41  ;;  %v11993_v41 = vld [vmem:[%s15404_s0 + $0x1200] ss:$84 sps:$4 sm:$0xff]  }
 0x52c   :  { %v14731_v0 = vpop.f32.mrb[44].mxu1 }
 0x52d   :  { %v6742_v22 = vpop.f32.mrb[45].mxu1 }
 0x52e   :  { %v14736_v24 = vpop.f32.mrb[46].mxu1 }
 0x52f   :  { %v6745_v27 = vpop.f32.mrb[47].mxu1 }
 0x530   :  { %v9704_v27 = vadd.f32 %v14814_v18, %v14250_v44 }
 0x531   :  { %9631 = vmatmul.mubr.bf16.gmra.mrb[152].mxu1 %v11969_v23 }
 0x532   :  { %8272 = vmatmul.mubr.bf16.gmra.mrb[88].mxu0 %v11968_v25  ;;  %9634 = vmatprep.mubr.bf16.mxu1 %v11972_v26  ;;  %v11994_v26 = vld [vmem:[%s15404_s0 + $0xf68] ss:$84 sps:$4 sm:$0xff]  }
 0x533   :  { %8279 = vmatprep.mubr.bf16.mxu0 %v11970_v29 }
 0x534   :  { %v14747_v30 = vpop.f32.mrb[48].mxu1 }
 0x535   :  { %v6750_v61 = vpop.f32.mrb[49].mxu1 }
 0x536   :  { %v14752_v33 = vpop.f32.mrb[50].mxu1 }
 0x537   :  { %v6753_v37 = vpop.f32.mrb[51].mxu1 }
 0x539   :  { %9635 = vmatmul.mubr.bf16.gmra.mrb[156].mxu1 %v11974_v32 }
 0x53a   :  { %8280 = vmatmul.mubr.bf16.gmra.mrb[92].mxu0 %v11973_v34  ;;  %9638 = vmatprep.mubr.bf16.mxu1 %v11977_v35  ;;  %v11997_v34 = vld [vmem:[%s15404_s0 + $0x1010] ss:$84 sps:$4 sm:$0xff]  }
 0x53b   :  { %8287 = vmatprep.mubr.bf16.mxu0 %v11975_v38  ;;  %v11995_v38 = vld [vmem:[%s15404_s0 + $0x12ac] ss:$84 sps:$4 sm:$0xff]  }
 0x53c   :  { %v14763_v39 = vpop.f32.mrb[52].mxu1 }
 0x53d   :  { %v6758_v42 = vpop.f32.mrb[53].mxu1 }
 0x53e   :  { %v14768_v45 = vpop.f32.mrb[54].mxu1 }
 0x53f   :  { %v6761_v48 = vpop.f32.mrb[55].mxu1 }
 0x541   :  { %9639 = vmatmul.mubr.bf16.gmra.mrb[160].mxu1 %v11979_v43  ;;  %v9706_v43 = vadd.f32 %v14814_v18, %v14261_v49  ;;  %v11998_v49 = vld [vmem:[%s15404_s0 + $0x12a8] ss:$84 sps:$4 sm:$0xff]  }
 0x542   :  { %8288 = vmatmul.mubr.bf16.gmra.mrb[96].mxu0 %v11978_v46  ;;  %9642 = vmatprep.mubr.bf16.mxu1 %v11982_v47 }
 0x543   :  { %8295 = vmatprep.mubr.bf16.mxu0 %v11980_v50  ;;  %v11999_v50 = vld [vmem:[%s15404_s0 + $0x10b8] ss:$84 sps:$4 sm:$0xff]  }
 0x544   :  { %v14779_v53 = vpop.f32.mrb[56].mxu1 }
 0x545   :  { %v6766_v54 = vpop.f32.mrb[57].mxu1 }
 0x546   :  { %v14784_v58 = vpop.f32.mrb[58].mxu1  ;;  %v9708_v54 = vadd.f32 %v14814_v18, %v14266_v52 }
 0x547   :  { %v6769_v1 = vpop.f32.mrb[59].mxu1 }
 0x548   :  { %v12002_v1 = vld [vmem:[%s15404_s0 + $0x1160] ss:$84 sps:$4 sm:$0xff]  }
 0x549   :  { %9643 = vmatmul.mubr.bf16.gmra.mrb[164].mxu1 %v11984_v56 }
 0x54a   :  { %8296 = vmatmul.mubr.bf16.gmra.mrb[100].mxu0 %v11983_v59  ;;  %9646 = vmatprep.mubr.bf16.mxu1 %v11987_v62 }
 0x54b   :  { %8303 = vmatprep.mubr.bf16.mxu0 %v11985_v2 }
 0x54c   :  { %v14795_v5 = vpop.f32.mrb[60].mxu1 }
 0x54d   :  { %v6774_v7 = vpop.f32.mrb[61].mxu1 }
 0x54e   :  { %v14800_v9 = vpop.f32.mrb[62].mxu1 }
 0x54f   :  { %v6777_v16 = vpop.f32.mrb[63].mxu1 }
 0x551   :  { %9647 = vmatmul.mubr.bf16.gmra.mrb[168].mxu1 %v11989_v8  ;;  %v12000_v8 = vld [vmem:[%s15404_s0 + $0x1354] ss:$84 sps:$4 sm:$0xff]  }
 0x552   :  { %8304 = vmatmul.mubr.bf16.gmra.mrb[104].mxu0 %v11988_v12  ;;  %9650 = vmatprep.mubr.bf16.mxu1 %v11992_v13  ;;  %v9710_v13 = vadd.f32 %v14814_v18, %v14277_v57  ;;  %v12003_v57 = vld [vmem:[%s15404_s0 + $0x1350] ss:$84 sps:$4 sm:$0xff]  }
 0x553   :  { %8311 = vmatprep.mubr.bf16.mxu0 %v11990_v17 }
 0x554   :  { %v14818_v22 = vpop.f32.mrb[64].mxu1 }
 0x555   :  { %v8097_v23 = vpop.f32.mrb[0].mxu0  ;;  %v6782_v25 = vpop.f32.mrb[65].mxu1 }
 0x556   :  { %v14825_v29 = vadd.f32 %v9702_v20, %v8097_v23  ;;  %v8099_v61 = vpop.f32.mrb[1].mxu0  ;;  %v14827_v32 = vpop.f32.mrb[66].mxu1  ;;  %v12004_v23 = vld [vmem:[%s15404_s0 + $0x1208] ss:$84 sps:$4 sm:$0xff]   ;;  %v9712_v25 = vadd.f32 %v14814_v18, %v14282_v60 }
 0x557   :  { %v8100_v35 = vpop.f32.mrb[2].mxu0  ;;  %v6785_v37 = vpop.f32.mrb[67].mxu1 }
 0x558   :  { %v14838_v44 = vadd.f32 %v9704_v27, %v8100_v35  ;;  %v8102_v42 = vpop.f32.mrb[3].mxu0  ;;  %v12005_v37 = vld [vmem:[%s15404_s0 + $0x13fc] ss:$84 sps:$4 sm:$0xff]  }
 0x559   :  { %9651 = vmatmul.mubr.bf16.gmra.mrb[172].mxu1 %v11994_v26  ;;  %v9714_v42 = vadd.f32 %v14814_v18, %v14293_v3  ;;  %v12008_v3 = vld [vmem:[%s15404_s0 + $0x13f8] ss:$84 sps:$4 sm:$0xff]  }
 0x55a   :  { %8312 = vmatmul.mubr.bf16.gmra.mrb[108].mxu0 %v11993_v41  ;;  %9654 = vmatprep.mubr.bf16.mxu1 %v11997_v34  ;;  %v12007_v41 = vld [vmem:[%s15404_s0 + $0x12b0] ss:$84 sps:$4 sm:$0xff]  }
 0x55b   :  { %8319 = vmatprep.mubr.bf16.mxu0 %v11995_v38 }
 0x55c   :  { %v14842_v46 = vpop.f32.mrb[68].mxu1 }
 0x55d   :  { %v8105_v47 = vpop.f32.mrb[4].mxu0  ;;  %v6790_v48 = vpop.f32.mrb[69].mxu1 }
 0x55e   :  { %v14849_v56 = vadd.f32 %v9706_v43, %v8105_v47  ;;  %v8107_v59 = vpop.f32.mrb[5].mxu0  ;;  %v14851_v62 = vpop.f32.mrb[70].mxu1 }
 0x55f   :  { %v8108_v2 = vpop.f32.mrb[6].mxu0  ;;  %v6793_v7 = vpop.f32.mrb[71].mxu1 }
 0x560   :  { %v14862_v52 = vadd.f32 %v9708_v54, %v8108_v2  ;;  %v8110_v12 = vpop.f32.mrb[7].mxu0  ;;  %v9716_v54 = vadd.f32 %v14814_v18, %v14298_v6  ;;  %v12012_v2 = vld [vmem:[%s15404_s0 + $0x1400] ss:$84 sps:$4 sm:$0xff]  }
 0x561   :  { %9655 = vmatmul.mubr.bf16.gmra.mrb[176].mxu1 %v11999_v50  ;;  %v12009_v50 = vld [vmem:[%s15404_s0 + $0x1358] ss:$84 sps:$4 sm:$0xff]  }
 0x562   :  { %8320 = vmatmul.mubr.bf16.gmra.mrb[112].mxu0 %v11998_v49  ;;  %9658 = vmatprep.mubr.bf16.mxu1 %v12002_v1  ;;  %v12010_v12 = vld [vmem:[%s15404_s0 + $0x14a4] ss:$84 sps:$4 sm:$0xff]  }
 0x563   :  { %8327 = vmatprep.mubr.bf16.mxu0 %v12000_v8 }
 0x564   :  { %v14866_v16 = vpop.f32.mrb[72].mxu1 }
 0x565   :  { %v8113_v17 = vpop.f32.mrb[8].mxu0  ;;  %v6798_v20 = vpop.f32.mrb[73].mxu1 }
 0x566   :  { %v14873_v26 = vadd.f32 %v9710_v13, %v8113_v17  ;;  %v8115_v27 = vpop.f32.mrb[9].mxu0  ;;  %v14875_v61 = vpop.f32.mrb[74].mxu1  ;;  %v9718_v17 = vadd.f32 %v14814_v18, %v14309_v11  ;;  %v12013_v11 = vld [vmem:[%s15404_s0 + $0x14a0] ss:$84 sps:$4 sm:$0xff]  }
 0x567   :  { %v8116_v34 = vpop.f32.mrb[10].mxu0  ;;  %v6801_v35 = vpop.f32.mrb[75].mxu1  ;;  %v12014_v27 = vld [vmem:[%s15404_s0 + $0x14a8] ss:$84 sps:$4 sm:$0xff]  }
 0x568   :  { %v14886_v60 = vadd.f32 %v9712_v25, %v8116_v34  ;;  %v8118_v38 = vpop.f32.mrb[11].mxu0 }
 0x569   :  { %9659 = vmatmul.mubr.bf16.gmra.mrb[180].mxu1 %v12004_v23 }
 0x56a   :  { %8328 = vmatmul.mubr.bf16.gmra.mrb[116].mxu0 %v12003_v57  ;;  %9662 = vmatprep.mubr.bf16.mxu1 %v12007_v41  ;;  %v9720_v57 = vadd.f32 %v14814_v18, %v14314_v14 }
 0x56b   :  { %8335 = vmatprep.mubr.bf16.mxu0 %v12005_v37 }
 0x56c   :  { %v14890_v43 = vpop.f32.mrb[76].mxu1 }
 0x56d   :  { %v8121_v47 = vpop.f32.mrb[12].mxu0  ;;  %v6806_v48 = vpop.f32.mrb[77].mxu1 }
 0x56e   :  { %v14897_v59 = vadd.f32 %v9714_v42, %v8121_v47  ;;  %v8123_v49 = vpop.f32.mrb[13].mxu0  ;;  %v14899_v1 = vpop.f32.mrb[78].mxu1  ;;  %v9722_v48 = vadd.f32 %v14814_v18, %v14325_v19  ;;  %v9726_v19 = vadd.f32 %v14814_v18, %v14348_v28  ;;  %v9730_v28 = vadd.f32 %v14814_v18, %v14367_v36 }
 0x56f   :  { %v8124_v7 = vpop.f32.mrb[14].mxu0  ;;  %v6809_v8 = vpop.f32.mrb[79].mxu1  ;;  %v9724_v49 = vadd.f32 %v14814_v18, %v14330_v21  ;;  %v9728_v21 = vadd.f32 %v14814_v18, %v14353_v31  ;;  %v9732_v31 = vadd.f32 %v14814_v18, %v14375_v40  ;;  %v9734_v36 = vadd.f32 %v14814_v18, %v14683_v51 }
 0x570   :  { %v14910_v6 = vadd.f32 %v9716_v54, %v8124_v7  ;;  %v8126_v13 = vpop.f32.mrb[15].mxu0  ;;  %v9736_v40 = vadd.f32 %v14814_v18, %v14688_v55  ;;  %v9738_v51 = vadd.f32 %v14814_v18, %v14699_v63  ;;  %v9740_v55 = vadd.f32 %v14814_v18, %v14704_v4 }
 0x571   :  { %9663 = vmatmul.mubr.bf16.gmra.mrb[184].mxu1 %v12009_v50  ;;  %v9742_v63 = vadd.f32 %v14814_v18, %v14715_v10  ;;  %v9744_v4 = vadd.f32 %v14814_v18, %v14720_v15  ;;  %v9746_v10 = vadd.f32 %v14814_v18, %v14731_v0  ;;  %v9748_v15 = vadd.f32 %v14814_v18, %v14736_v24 }
 0x572   :  { %8336 = vmatmul.mubr.bf16.gmra.mrb[120].mxu0 %v12008_v3  ;;  %9666 = vmatprep.mubr.bf16.mxu1 %v12012_v2  ;;  %v9750_v0 = vadd.f32 %v14814_v18, %v14747_v30  ;;  %v9752_v24 = vadd.f32 %v14814_v18, %v14752_v33  ;;  %v9754_v30 = vadd.f32 %v14814_v18, %v14763_v39 }
 0x573   :  { %8343 = vmatprep.mubr.bf16.mxu0 %v12010_v12  ;;  %v9756_v33 = vadd.f32 %v14814_v18, %v14768_v45  ;;  %v9758_v39 = vadd.f32 %v14814_v18, %v14779_v53  ;;  %v9760_v45 = vadd.f32 %v14814_v18, %v14784_v58  ;;  %v9762_v53 = vadd.f32 %v14814_v18, %v14795_v5 }
 0x574   :  { %v14914_v20 = vpop.f32.mrb[80].mxu1  ;;  %v9764_v58 = vadd.f32 %v14814_v18, %v14800_v9  ;;  %v9766_v5 = vadd.f32 %v14814_v18, %v14818_v22  ;;  %v9768_v9 = vadd.f32 %v14814_v18, %v14827_v32 }
 0x575   :  { %v8129_v23 = vpop.f32.mrb[16].mxu0  ;;  %v6814_v25 = vpop.f32.mrb[81].mxu1 }
 0x576   :  { %v14921_v41 = vadd.f32 %v9718_v17, %v8129_v23  ;;  %v8131_v34 = vpop.f32.mrb[17].mxu0  ;;  %v14923_v35 = vpop.f32.mrb[82].mxu1 }
 0x577   :  { %v8132_v37 = vpop.f32.mrb[18].mxu0  ;;  %v6817_v38 = vpop.f32.mrb[83].mxu1 }
 0x578   :  { %v14928_v42 = vadd.f32 %v9720_v57, %v8132_v37  ;;  %v8134_v47 = vpop.f32.mrb[19].mxu0 }
 0x579   :  { %9667 = vmatmul.mubr.bf16.gmra.mrb[188].mxu1 %v12014_v27 }
 0x57a   :  { %8344 = vmatmul.mubr.bf16.gmra.mrb[124].mxu0 %v12013_v11 }
 0x57c   :  { %v14932_v14 = vpop.f32.mrb[84].mxu1 }
 0x57d   :  { %v8137_v50 = vpop.f32.mrb[20].mxu0  ;;  %v6822_v54 = vpop.f32.mrb[85].mxu1 }
 0x57e   :  { %v14936_v3 = vadd.f32 %v9722_v48, %v8137_v50  ;;  %v8139_v2 = vpop.f32.mrb[21].mxu0  ;;  %v14938_v7 = vpop.f32.mrb[86].mxu1 }
 0x57f   :  { %v8140_v8 = vpop.f32.mrb[22].mxu0  ;;  %v6825_v12 = vpop.f32.mrb[87].mxu1 }
 0x580   :  { %v14940_v13 = vadd.f32 %v9724_v49, %v8140_v8  ;;  %v8142_v17 = vpop.f32.mrb[23].mxu0 }
 0x584   :  { %v14944_v23 = vpop.f32.mrb[88].mxu1 }
 0x585   :  { %v8145_v25 = vpop.f32.mrb[24].mxu0  ;;  %v6830_v27 = vpop.f32.mrb[89].mxu1 }
 0x586   :  { %v14948_v57 = vadd.f32 %v9726_v19, %v8145_v25  ;;  %v8147_v34 = vpop.f32.mrb[25].mxu0  ;;  %v14950_v11 = vpop.f32.mrb[90].mxu1 }
 0x587   :  { %v8148_v37 = vpop.f32.mrb[26].mxu0  ;;  %v6833_v38 = vpop.f32.mrb[91].mxu1 }
 0x588   :  { %v14952_v47 = vadd.f32 %v9728_v21, %v8148_v37  ;;  %v8150_v48 = vpop.f32.mrb[27].mxu0 }
 0x58c   :  { %v14956_v50 = vpop.f32.mrb[92].mxu1 }
 0x58d   :  { %v8153_v54 = vpop.f32.mrb[28].mxu0  ;;  %v6838_v49 = vpop.f32.mrb[93].mxu1 }
 0x58e   :  { %v14960_v2 = vadd.f32 %v9730_v28, %v8153_v54  ;;  %v8155_v8 = vpop.f32.mrb[29].mxu0  ;;  %v14962_v12 = vpop.f32.mrb[94].mxu1 }
 0x58f   :  { %v8156_v17 = vpop.f32.mrb[30].mxu0  ;;  %v6841_v19 = vpop.f32.mrb[95].mxu1 }
 0x590   :  { %v14964_v25 = vadd.f32 %v9732_v31, %v8156_v17  ;;  %v8158_v27 = vpop.f32.mrb[31].mxu0 }
 0x594   :  { %v14968_v21 = vpop.f32.mrb[96].mxu1 }
 0x595   :  { %v8161_v34 = vpop.f32.mrb[32].mxu0  ;;  %v6846_v37 = vpop.f32.mrb[97].mxu1 }
 0x596   :  { %v14972_v38 = vadd.f32 %v9734_v36, %v8161_v34  ;;  %v8163_v48 = vpop.f32.mrb[33].mxu0  ;;  %v14974_v28 = vpop.f32.mrb[98].mxu1 }
 0x597   :  { %15407 = vst [vmem:[#allocation2_spill] sm:$0xff] %v14974_v28  ;;  %v8164_v54 = vpop.f32.mrb[34].mxu0  ;;  %v6849_v49 = vpop.f32.mrb[99].mxu1 }
 0x598   :  { %v14976_v31 = vadd.f32 %v9736_v40, %v8164_v54  ;;  %v8166_v8 = vpop.f32.mrb[35].mxu0 }
 0x59c   :  { %v14980_v17 = vpop.f32.mrb[100].mxu1 }
 0x59d   :  { %15408 = vst [vmem:[#allocation3_spill] sm:$0xff] %v14980_v17  ;;  %v8169_v19 = vpop.f32.mrb[36].mxu0  ;;  %v6854_v27 = vpop.f32.mrb[101].mxu1 }
 0x59e   :  { %v14984_v36 = vadd.f32 %v9738_v51, %v8169_v19  ;;  %v8171_v34 = vpop.f32.mrb[37].mxu0  ;;  %v14986_v37 = vpop.f32.mrb[102].mxu1 }
 0x59f   :  { %15409 = vst [vmem:[#allocation4_spill] sm:$0xff] %v14986_v37  ;;  %v8172_v48 = vpop.f32.mrb[38].mxu0  ;;  %v6857_v49 = vpop.f32.mrb[103].mxu1 }
 0x5a0   :  { %v14988_v40 = vadd.f32 %v9740_v55, %v8172_v48  ;;  %v8174_v54 = vpop.f32.mrb[39].mxu0 }
 0x5a4   :  { %v14992_v8 = vpop.f32.mrb[104].mxu1 }
 0x5a5   :  { %15410 = vst [vmem:[#allocation5_spill] sm:$0xff] %v14992_v8  ;;  %v8177_v17 = vpop.f32.mrb[40].mxu0  ;;  %v6862_v27 = vpop.f32.mrb[105].mxu1 }
 0x5a6   :  { %v14996_v51 = vadd.f32 %v9742_v63, %v8177_v17  ;;  %v8179_v19 = vpop.f32.mrb[41].mxu0  ;;  %v14998_v34 = vpop.f32.mrb[106].mxu1 }
 0x5a7   :  { %15411 = vst [vmem:[#allocation6_spill] sm:$0xff] %v14998_v34  ;;  %v8180_v37 = vpop.f32.mrb[42].mxu0  ;;  %v6865_v49 = vpop.f32.mrb[107].mxu1 }
 0x5a8   :  { %v15000_v55 = vadd.f32 %v9744_v4, %v8180_v37  ;;  %v8182_v48 = vpop.f32.mrb[43].mxu0 }
 0x5ac   :  { %v15004_v54 = vpop.f32.mrb[108].mxu1 }
 0x5ad   :  { %15412 = vst [vmem:[#allocation7_spill] sm:$0xff] %v15004_v54  ;;  %v8185_v8 = vpop.f32.mrb[44].mxu0  ;;  %v6870_v27 = vpop.f32.mrb[109].mxu1 }
 0x5ae   :  { %v15008_v17 = vadd.f32 %v9746_v10, %v8185_v8  ;;  %v8187_v63 = vpop.f32.mrb[45].mxu0  ;;  %v15010_v19 = vpop.f32.mrb[110].mxu1 }
 0x5af   :  { %15413 = vst [vmem:[#allocation8_spill] sm:$0xff] %v15010_v19  ;;  %v8188_v34 = vpop.f32.mrb[46].mxu0  ;;  %v6873_v49 = vpop.f32.mrb[111].mxu1 }
 0x5b0   :  { %v15012_v37 = vadd.f32 %v9748_v15, %v8188_v34  ;;  %v8190_v4 = vpop.f32.mrb[47].mxu0 }
 0x5b4   :  { %v15016_v48 = vpop.f32.mrb[112].mxu1 }
 0x5b5   :  { %15414 = vst [vmem:[#allocation9_spill] sm:$0xff] %v15016_v48  ;;  %v8193_v54 = vpop.f32.mrb[48].mxu0  ;;  %v6878_v27 = vpop.f32.mrb[113].mxu1 }
 0x5b6   :  { %v15020_v8 = vadd.f32 %v9750_v0, %v8193_v54  ;;  %v8195_v10 = vpop.f32.mrb[49].mxu0  ;;  %v15022_v63 = vpop.f32.mrb[114].mxu1 }
 0x5b7   :  { %15415 = vst [vmem:[#allocation10_spill] sm:$0xff] %v15022_v63  ;;  %v8196_v19 = vpop.f32.mrb[50].mxu0  ;;  %v6881_v49 = vpop.f32.mrb[115].mxu1 }
 0x5b8   :  { %v15024_v34 = vadd.f32 %v9752_v24, %v8196_v19  ;;  %v8198_v15 = vpop.f32.mrb[51].mxu0 }
 0x5bc   :  { %v15028_v4 = vpop.f32.mrb[116].mxu1 }
 0x5bd   :  { %15416 = vst [vmem:[#allocation11_spill] sm:$0xff] %v15028_v4  ;;  %v8201_v48 = vpop.f32.mrb[52].mxu0  ;;  %v6886_v27 = vpop.f32.mrb[117].mxu1 }
 0x5be   :  { %v15032_v54 = vadd.f32 %v9754_v30, %v8201_v48  ;;  %v8203_v0 = vpop.f32.mrb[53].mxu0  ;;  %v15034_v10 = vpop.f32.mrb[118].mxu1 }
 0x5bf   :  { %15417 = vst [vmem:[#allocation12_spill] sm:$0xff] %v15034_v10  ;;  %v8204_v63 = vpop.f32.mrb[54].mxu0  ;;  %v6889_v49 = vpop.f32.mrb[119].mxu1 }
 0x5c0   :  { %v15036_v19 = vadd.f32 %v9756_v33, %v8204_v63  ;;  %v8206_v24 = vpop.f32.mrb[55].mxu0 }
 0x5c4   :  { %v15040_v15 = vpop.f32.mrb[120].mxu1 }
 0x5c5   :  { %15418 = vst [vmem:[#allocation13_spill] sm:$0xff] %v15040_v15  ;;  %v8209_v4 = vpop.f32.mrb[56].mxu0  ;;  %v6894_v27 = vpop.f32.mrb[121].mxu1 }
 0x5c6   :  { %v15044_v48 = vadd.f32 %v9758_v39, %v8209_v4  ;;  %v8211_v30 = vpop.f32.mrb[57].mxu0  ;;  %v15046_v0 = vpop.f32.mrb[122].mxu1 }
 0x5c7   :  { %15419 = vst [vmem:[#allocation14_spill] sm:$0xff] %v15046_v0  ;;  %v8212_v10 = vpop.f32.mrb[58].mxu0  ;;  %v6897_v49 = vpop.f32.mrb[123].mxu1 }
 0x5c8   :  { %v15048_v63 = vadd.f32 %v9760_v45, %v8212_v10  ;;  %v8214_v33 = vpop.f32.mrb[59].mxu0 }
 0x5cc   :  { %v15052_v24 = vpop.f32.mrb[124].mxu1 }
 0x5cd   :  { %15420 = vst [vmem:[#allocation15_spill] sm:$0xff] %v15052_v24  ;;  %v8217_v15 = vpop.f32.mrb[60].mxu0  ;;  %v6902_v27 = vpop.f32.mrb[125].mxu1 }
 0x5ce   :  { %v15056_v4 = vadd.f32 %v9762_v53, %v8217_v15  ;;  %v8219_v39 = vpop.f32.mrb[61].mxu0  ;;  %v15058_v30 = vpop.f32.mrb[126].mxu1 }
 0x5cf   :  { %v8220_v0 = vpop.f32.mrb[62].mxu0  ;;  %v6905_v49 = vpop.f32.mrb[127].mxu1 }
 0x5d0   :  { %v15060_v10 = vadd.f32 %v9764_v58, %v8220_v0  ;;  %v8222_v45 = vpop.f32.mrb[63].mxu0 }
 0x5d4   :  { %v9608_v33 = vpop.f32.mrb[128].mxu1 }
 0x5d5   :  { %v8225_v24 = vpop.f32.mrb[64].mxu0  ;;  %v8395_v27 = vadd.f32 %v14849_v56, %v9608_v33  ;;  %v8386_v28 = vpop.f32.mrb[129].mxu1  ;;  %v9772_v33 = vadd.f32 %v14814_v18, %v14851_v62 }
 0x5d6   :  { %v15067_v15 = vadd.f32 %v9766_v5, %v8225_v24  ;;  %v8227_v53 = vpop.f32.mrb[65].mxu0  ;;  %v8387_v39 = vadd.f32 %v14825_v29, %v8386_v28  ;;  %v9609_v49 = vpop.f32.mrb[130].mxu1  ;;  %v9770_v29 = vadd.f32 %v14814_v18, %v14842_v46 }
 0x5d7   :  { %8643 = vst [vmem:[%s15406_s3 + $0x10] sm:$0xff] %v8395_v27  ;;  %v8228_v0 = vpop.f32.mrb[66].mxu0  ;;  %v8398_v22 = vadd.f32 %v14862_v52, %v9609_v49  ;;  %v8389_v58 = vpop.f32.mrb[131].mxu1 }
 0x5d8   :  { %8641 = vst [vmem:[%s15406_s3] sm:$0xff] %v8387_v39  ;;  %v15077_v56 = vadd.f32 %v9768_v9, %v8228_v0  ;;  %v8230_v32 = vpop.f32.mrb[67].mxu0  ;;  %v8390_v24 = vadd.f32 %v14838_v44, %v8389_v58 }
 0x5d9   :  { %8644 = vst [vmem:[%s15406_s3 + $0x18] sm:$0xff] %v8398_v22 }
 0x5da   :  { %8642 = vst [vmem:[%s15406_s3 + $0x8] sm:$0xff] %v8390_v24  ;;  %v9776_v24 = vadd.f32 %v14814_v18, %v14875_v61 }
 0x5dc   :  { %v9612_v52 = vpop.f32.mrb[132].mxu1 }
 0x5dd   :  { %v8233_v28 = vpop.f32.mrb[68].mxu0  ;;  %v8411_v45 = vadd.f32 %v14897_v59, %v9612_v52  ;;  %v8402_v5 = vpop.f32.mrb[133].mxu1 }
 0x5de   :  { %v15091_v44 = vadd.f32 %v9770_v29, %v8233_v28  ;;  %v8235_v27 = vpop.f32.mrb[69].mxu0  ;;  %v8403_v9 = vadd.f32 %v14873_v26, %v8402_v5  ;;  %v9613_v53 = vpop.f32.mrb[134].mxu1  ;;  %v9774_v26 = vadd.f32 %v14814_v18, %v14866_v16 }
 0x5df   :  { %8647 = vst [vmem:[%s15406_s3 + $0x30] sm:$0xff] %v8411_v45  ;;  %v8236_v39 = vpop.f32.mrb[70].mxu0  ;;  %v8414_v46 = vadd.f32 %v14910_v6, %v9613_v53  ;;  %v8405_v49 = vpop.f32.mrb[135].mxu1 }
 0x5e0   :  { %8645 = vst [vmem:[%s15406_s3 + $0x20] sm:$0xff] %v8403_v9  ;;  %v15101_v59 = vadd.f32 %v9772_v33, %v8236_v39  ;;  %v8238_v62 = vpop.f32.mrb[71].mxu0  ;;  %v8406_v0 = vadd.f32 %v14886_v60, %v8405_v49  ;;  %v9780_v39 = vadd.f32 %v14814_v18, %v14899_v1 }
 0x5e1   :  { %8648 = vst [vmem:[%s15406_s3 + $0x38] sm:$0xff] %v8414_v46 }
 0x5e2   :  { %8646 = vst [vmem:[%s15406_s3 + $0x28] sm:$0xff] %v8406_v0 }
 0x5e4   :  { %v9616_v6 = vpop.f32.mrb[136].mxu1 }
 0x5e5   :  { %v8241_v22 = vpop.f32.mrb[72].mxu0  ;;  %v8427_v58 = vadd.f32 %v14936_v3, %v9616_v6  ;;  %v8418_v32 = vpop.f32.mrb[137].mxu1 }
 0x5e6   :  { %v15115_v60 = vadd.f32 %v9774_v26, %v8241_v22  ;;  %v8243_v29 = vpop.f32.mrb[73].mxu0  ;;  %v8419_v52 = vadd.f32 %v14921_v41, %v8418_v32  ;;  %v9617_v28 = vpop.f32.mrb[138].mxu1  ;;  %v9778_v41 = vadd.f32 %v14814_v18, %v14890_v43 }
 0x5e7   :  { %8651 = vst [vmem:[%s15406_s3 + $0x50] sm:$0xff] %v8427_v58  ;;  %v8244_v45 = vpop.f32.mrb[74].mxu0  ;;  %v8430_v16 = vadd.f32 %v14940_v13, %v9617_v28  ;;  %v8421_v5 = vpop.f32.mrb[139].mxu1 }
 0x5e8   :  { %8649 = vst [vmem:[%s15406_s3 + $0x40] sm:$0xff] %v8419_v52  ;;  %v15125_v3 = vadd.f32 %v9776_v24, %v8244_v45  ;;  %v8246_v61 = vpop.f32.mrb[75].mxu0  ;;  %v8422_v33 = vadd.f32 %v14928_v42, %v8421_v5  ;;  %v9784_v24 = vadd.f32 %v14814_v18, %v14923_v35 }
 0x5e9   :  { %8652 = vst [vmem:[%s15406_s3 + $0x58] sm:$0xff] %v8430_v16 }
 0x5ea   :  { %8650 = vst [vmem:[%s15406_s3 + $0x48] sm:$0xff] %v8422_v33 }
 0x5ec   :  { %v9620_v13 = vpop.f32.mrb[140].mxu1 }
 0x5ed   :  { %v8249_v27 = vpop.f32.mrb[76].mxu0  ;;  %v8443_v9 = vadd.f32 %v14960_v2, %v9620_v13  ;;  %v8434_v53 = vpop.f32.mrb[141].mxu1  ;;  %v9788_v13 = vadd.f32 %v14814_v18, %v14938_v7 }
 0x5ee   :  { %v15139_v42 = vadd.f32 %v9778_v41, %v8249_v27  ;;  %v8251_v46 = vpop.f32.mrb[77].mxu0  ;;  %v8435_v49 = vadd.f32 %v14948_v57, %v8434_v53  ;;  %v9621_v62 = vpop.f32.mrb[142].mxu1  ;;  %v9782_v57 = vadd.f32 %v14814_v18, %v14914_v20 }
 0x5ef   :  { %8655 = vst [vmem:[%s15406_s3 + $0x70] sm:$0xff] %v8443_v9  ;;  %v8252_v0 = vpop.f32.mrb[78].mxu0  ;;  %v8446_v43 = vadd.f32 %v14964_v25, %v9621_v62  ;;  %v8437_v26 = vpop.f32.mrb[143].mxu1 }
 0x5f0   :  { %8653 = vst [vmem:[%s15406_s3 + $0x60] sm:$0xff] %v8435_v49  ;;  %v15149_v2 = vadd.f32 %v9780_v39, %v8252_v0  ;;  %v8254_v1 = vpop.f32.mrb[79].mxu0  ;;  %v8438_v6 = vadd.f32 %v14952_v47, %v8437_v26  ;;  %v9792_v26 = vadd.f32 %v14814_v18, %v14950_v11 }
 0x5f1   :  { %8656 = vst [vmem:[%s15406_s3 + $0x78] sm:$0xff] %v8446_v43 }
 0x5f2   :  { %8654 = vst [vmem:[%s15406_s3 + $0x68] sm:$0xff] %v8438_v6 }
 0x5f4   :  { %v9624_v25 = vpop.f32.mrb[144].mxu1 }
 0x5f5   :  { %v8257_v22 = vpop.f32.mrb[80].mxu0  ;;  %v8459_v58 = vadd.f32 %v14984_v36, %v9624_v25  ;;  %v8450_v32 = vpop.f32.mrb[145].mxu1 }
 0x5f6   :  { %v15163_v47 = vadd.f32 %v9782_v57, %v8257_v22  ;;  %v8259_v29 = vpop.f32.mrb[81].mxu0  ;;  %v8451_v52 = vadd.f32 %v14972_v38, %v8450_v32  ;;  %v9625_v28 = vpop.f32.mrb[146].mxu1  ;;  %v9786_v38 = vadd.f32 %v14814_v18, %v14932_v14 }
 0x5f7   :  { %8659 = vst [vmem:[%s15406_s3 + $0x90] sm:$0xff] %v8459_v58  ;;  %v8260_v45 = vpop.f32.mrb[82].mxu0  ;;  %v8462_v20 = vadd.f32 %v14988_v40, %v9625_v28  ;;  %v8453_v16 = vpop.f32.mrb[147].mxu1 }
 0x5f8   :  { %8657 = vst [vmem:[%s15406_s3 + $0x80] sm:$0xff] %v8451_v52  ;;  %v15173_v36 = vadd.f32 %v9784_v24, %v8260_v45  ;;  %v8262_v35 = vpop.f32.mrb[83].mxu0  ;;  %v8454_v5 = vadd.f32 %v14976_v31, %v8453_v16  ;;  %v9796_v52 = vadd.f32 %v14814_v18, %v14962_v12 }
 0x5f9   :  { %8660 = vst [vmem:[%s15406_s3 + $0x98] sm:$0xff] %v8462_v20 }
 0x5fa   :  { %8658 = vst [vmem:[%s15406_s3 + $0x88] sm:$0xff] %v8454_v5 }
 0x5fc   :  { %v9628_v40 = vpop.f32.mrb[148].mxu1 }
 0x5fd   :  { %v8265_v61 = vpop.f32.mrb[84].mxu0  ;;  %v8475_v33 = vadd.f32 %v15008_v17, %v9628_v40  ;;  %v8466_v41 = vpop.f32.mrb[149].mxu1 }
 0x5fe   :  { %v15187_v31 = vadd.f32 %v9786_v38, %v8265_v61  ;;  %v8267_v27 = vpop.f32.mrb[85].mxu0  ;;  %v8467_v9 = vadd.f32 %v14996_v51, %v8466_v41  ;;  %v9629_v53 = vpop.f32.mrb[150].mxu1  ;;  %v9790_v51 = vadd.f32 %v14814_v18, %v14944_v23 }
 0x5ff   :  { %8663 = vst [vmem:[%s15406_s3 + $0xb0] sm:$0xff] %v8475_v33  ;;  %v8268_v39 = vpop.f32.mrb[86].mxu0  ;;  %v8478_v14 = vadd.f32 %v15012_v37, %v9629_v53  ;;  %v8469_v46 = vpop.f32.mrb[151].mxu1  ;;  %v15421_v33 = vld [vmem:[#allocation2_spill] sm:$0xff] }
 0x600   :  { %8661 = vst [vmem:[%s15406_s3 + $0xa0] sm:$0xff] %v8467_v9  ;;  %v15197_v17 = vadd.f32 %v9788_v13, %v8268_v39  ;;  %v8270_v7 = vpop.f32.mrb[87].mxu0  ;;  %v8470_v49 = vadd.f32 %v15000_v55, %v8469_v46  ;;  %v9800_v41 = vadd.f32 %v14814_v18, %v15421_v33 }
 0x601   :  { %8664 = vst [vmem:[%s15406_s3 + $0xb8] sm:$0xff] %v8478_v14 }
 0x602   :  { %8662 = vst [vmem:[%s15406_s3 + $0xa8] sm:$0xff] %v8470_v49 }
 0x604   :  { %v9632_v37 = vpop.f32.mrb[152].mxu1 }
 0x605   :  { %v8273_v62 = vpop.f32.mrb[88].mxu0  ;;  %v8491_v0 = vadd.f32 %v15032_v54, %v9632_v37  ;;  %v8482_v43 = vpop.f32.mrb[153].mxu1 }
 0x606   :  { %v15211_v55 = vadd.f32 %v9790_v51, %v8273_v62  ;;  %v8275_v1 = vpop.f32.mrb[89].mxu0  ;;  %v8483_v6 = vadd.f32 %v15020_v8, %v8482_v43  ;;  %v9633_v57 = vpop.f32.mrb[154].mxu1  ;;  %v9794_v8 = vadd.f32 %v14814_v18, %v14956_v50  ;;  %v15423_v62 = vld [vmem:[#allocation4_spill] sm:$0xff] }
 0x607   :  { %8667 = vst [vmem:[%s15406_s3 + $0xd0] sm:$0xff] %v8491_v0  ;;  %v8276_v25 = vpop.f32.mrb[90].mxu0  ;;  %v8494_v23 = vadd.f32 %v15036_v19, %v9633_v57  ;;  %v8485_v22 = vpop.f32.mrb[155].mxu1  ;;  %v9804_v0 = vadd.f32 %v14814_v18, %v15423_v62 }
 0x608   :  { %8665 = vst [vmem:[%s15406_s3 + $0xc0] sm:$0xff] %v8483_v6  ;;  %v15221_v54 = vadd.f32 %v9792_v26, %v8276_v25  ;;  %v8278_v11 = vpop.f32.mrb[91].mxu0  ;;  %v8486_v58 = vadd.f32 %v15024_v34, %v8485_v22 }
 0x609   :  { %8668 = vst [vmem:[%s15406_s3 + $0xd8] sm:$0xff] %v8494_v23 }
 0x60a   :  { %8666 = vst [vmem:[%s15406_s3 + $0xc8] sm:$0xff] %v8486_v58 }
 0x60c   :  { %v9636_v19 = vpop.f32.mrb[156].mxu1 }
 0x60d   :  { %v8281_v32 = vpop.f32.mrb[92].mxu0  ;;  %v8507_v24 = vadd.f32 %v15056_v4, %v9636_v19  ;;  %v8498_v29 = vpop.f32.mrb[157].mxu1 }
 0x60e   :  { %v15235_v34 = vadd.f32 %v9794_v8, %v8281_v32  ;;  %v8283_v28 = vpop.f32.mrb[93].mxu0  ;;  %v8499_v45 = vadd.f32 %v15044_v48, %v8498_v29  ;;  %v9637_v20 = vpop.f32.mrb[158].mxu1  ;;  %v9798_v48 = vadd.f32 %v14814_v18, %v14968_v21  ;;  %v15425_v32 = vld [vmem:[#allocation6_spill] sm:$0xff] }
 0x60f   :  { %8671 = vst [vmem:[%s15406_s3 + $0xf0] sm:$0xff] %v8507_v24  ;;  %v8284_v16 = vpop.f32.mrb[94].mxu0  ;;  %v8510_v50 = vadd.f32 %v15060_v10, %v9637_v20  ;;  %v8501_v35 = vpop.f32.mrb[159].mxu1  ;;  %v9808_v24 = vadd.f32 %v14814_v18, %v15425_v32 }
 0x610   :  { %8669 = vst [vmem:[%s15406_s3 + $0xe0] sm:$0xff] %v8499_v45  ;;  %v15245_v4 = vadd.f32 %v9796_v52, %v8284_v16  ;;  %v8286_v12 = vpop.f32.mrb[95].mxu0  ;;  %v8502_v5 = vadd.f32 %v15048_v63, %v8501_v35 }
 0x611   :  { %8672 = vst [vmem:[%s15406_s3 + $0xf8] sm:$0xff] %v8510_v50 }
 0x612   :  { %8670 = vst [vmem:[%s15406_s3 + $0xe8] sm:$0xff] %v8502_v5 }
 0x614   :  { %v9640_v10 = vpop.f32.mrb[160].mxu1 }
 0x615   :  { %v8289_v38 = vpop.f32.mrb[96].mxu0  ;;  %v8523_v40 = vadd.f32 %v15091_v44, %v9640_v10  ;;  %v8514_v61 = vpop.f32.mrb[161].mxu1 }
 0x616   :  { %v15259_v63 = vadd.f32 %v9798_v48, %v8289_v38  ;;  %v8291_v13 = vpop.f32.mrb[97].mxu0  ;;  %v8515_v27 = vadd.f32 %v15067_v15, %v8514_v61  ;;  %v9641_v9 = vpop.f32.mrb[162].mxu1  ;;  %v15422_v15 = vld [vmem:[#allocation3_spill] sm:$0xff]  ;;  %v15427_v38 = vld [vmem:[#allocation8_spill] sm:$0xff] }
 0x617   :  { %8675 = vst [vmem:[%s15406_s3 + $0x110] sm:$0xff] %v8523_v40  ;;  %v8292_v53 = vpop.f32.mrb[98].mxu0  ;;  %v8526_v21 = vadd.f32 %v15101_v59, %v9641_v9  ;;  %v8517_v39 = vpop.f32.mrb[163].mxu1  ;;  %v9802_v59 = vadd.f32 %v14814_v18, %v15422_v15  ;;  %v9812_v40 = vadd.f32 %v14814_v18, %v15427_v38 }
 0x618   :  { %8673 = vst [vmem:[%s15406_s3 + $0x100] sm:$0xff] %v8515_v27  ;;  %v15269_v44 = vadd.f32 %v9800_v41, %v8292_v53  ;;  %v8294_v14 = vpop.f32.mrb[99].mxu0  ;;  %v8518_v46 = vadd.f32 %v15077_v56, %v8517_v39 }
 0x619   :  { %8676 = vst [vmem:[%s15406_s3 + $0x118] sm:$0xff] %v8526_v21 }
 0x61a   :  { %8674 = vst [vmem:[%s15406_s3 + $0x108] sm:$0xff] %v8518_v46 }
 0x61c   :  { %v9644_v7 = vpop.f32.mrb[164].mxu1 }
 0x61d   :  { %v8297_v49 = vpop.f32.mrb[100].mxu0  ;;  %v8539_v51 = vadd.f32 %v15139_v42, %v9644_v7  ;;  %v8530_v37 = vpop.f32.mrb[165].mxu1 }
 0x61e   :  { %v9803_v56 = vadd.f32 %v9802_v59, %v8297_v49  ;;  %v8299_v43 = vpop.f32.mrb[101].mxu0  ;;  %v8531_v26 = vadd.f32 %v15115_v60, %v8530_v37  ;;  %v9645_v1 = vpop.f32.mrb[166].mxu1  ;;  %v15424_v60 = vld [vmem:[#allocation5_spill] sm:$0xff]  ;;  %v15429_v59 = vld [vmem:[#allocation10_spill] sm:$0xff] }
 0x61f   :  { %8679 = vst [vmem:[%s15406_s3 + $0x130] sm:$0xff] %v8539_v51  ;;  %v8300_v6 = vpop.f32.mrb[102].mxu0  ;;  %v8542_v57 = vadd.f32 %v15149_v2, %v9645_v1  ;;  %v8533_v25 = vpop.f32.mrb[167].mxu1  ;;  %v9806_v2 = vadd.f32 %v14814_v18, %v15424_v60  ;;  %v9816_v7 = vadd.f32 %v14814_v18, %v15429_v59 }
 0x620   :  { %8677 = vst [vmem:[%s15406_s3 + $0x120] sm:$0xff] %v8531_v26  ;;  %v9805_v42 = vadd.f32 %v9804_v0, %v8300_v6  ;;  %v8302_v23 = vpop.f32.mrb[103].mxu0  ;;  %v8534_v22 = vadd.f32 %v15125_v3, %v8533_v25 }
 0x621   :  { %8680 = vst [vmem:[%s15406_s3 + $0x138] sm:$0xff] %v8542_v57 }
 0x622   :  { %8678 = vst [vmem:[%s15406_s3 + $0x128] sm:$0xff] %v8534_v22  ;;  %v15431_v22 = vld [vmem:[#allocation12_spill] sm:$0xff] }
 0x623   :  { %v9820_v60 = vadd.f32 %v14814_v18, %v15431_v22 }
 0x624   :  { %v9648_v11 = vpop.f32.mrb[168].mxu1 }
 0x625   :  { %v8305_v58 = vpop.f32.mrb[104].mxu0  ;;  %v8555_v8 = vadd.f32 %v15187_v31, %v9648_v11  ;;  %v8546_v19 = vpop.f32.mrb[169].mxu1 }
 0x626   :  { %v9807_v3 = vadd.f32 %v9806_v2, %v8305_v58  ;;  %v8307_v29 = vpop.f32.mrb[105].mxu0  ;;  %v8547_v52 = vadd.f32 %v15163_v47, %v8546_v19  ;;  %v9649_v28 = vpop.f32.mrb[170].mxu1  ;;  %v15426_v47 = vld [vmem:[#allocation7_spill] sm:$0xff] }
 0x627   :  { %8683 = vst [vmem:[%s15406_s3 + $0x150] sm:$0xff] %v8555_v8  ;;  %v8308_v45 = vpop.f32.mrb[106].mxu0  ;;  %v8558_v20 = vadd.f32 %v15197_v17, %v9649_v28  ;;  %v8549_v16 = vpop.f32.mrb[171].mxu1  ;;  %v9810_v17 = vadd.f32 %v14814_v18, %v15426_v47 }
 0x628   :  { %8681 = vst [vmem:[%s15406_s3 + $0x140] sm:$0xff] %v8547_v52  ;;  %v9809_v31 = vadd.f32 %v9808_v24, %v8308_v45  ;;  %v8310_v50 = vpop.f32.mrb[107].mxu0  ;;  %v8550_v35 = vadd.f32 %v15173_v36, %v8549_v16 }
 0x629   :  { %8684 = vst [vmem:[%s15406_s3 + $0x158] sm:$0xff] %v8558_v20 }
 0x62a   :  { %8682 = vst [vmem:[%s15406_s3 + $0x148] sm:$0xff] %v8550_v35  ;;  %v15433_v35 = vld [vmem:[#allocation14_spill] sm:$0xff] }
 0x62c   :  { %v9652_v12 = vpop.f32.mrb[172].mxu1 }
 0x62d   :  { %v8313_v5 = vpop.f32.mrb[108].mxu0  ;;  %v8571_v48 = vadd.f32 %v15235_v34, %v9652_v12  ;;  %v8562_v10 = vpop.f32.mrb[173].mxu1 }
 0x62e   :  { %v9811_v36 = vadd.f32 %v9810_v17, %v8313_v5  ;;  %v8315_v61 = vpop.f32.mrb[109].mxu0  ;;  %v8563_v33 = vadd.f32 %v15211_v55, %v8562_v10  ;;  %v9653_v41 = vpop.f32.mrb[174].mxu1  ;;  %v15428_v55 = vld [vmem:[#allocation9_spill] sm:$0xff] }
 0x62f   :  { %8687 = vst [vmem:[%s15406_s3 + $0x170] sm:$0xff] %v8571_v48  ;;  %v8316_v13 = vpop.f32.mrb[110].mxu0  ;;  %v8574_v27 = vadd.f32 %v15245_v4, %v9653_v41  ;;  %v8565_v9 = vpop.f32.mrb[175].mxu1  ;;  %v9814_v4 = vadd.f32 %v14814_v18, %v15428_v55 }
 0x630   :  { %8685 = vst [vmem:[%s15406_s3 + $0x160] sm:$0xff] %v8563_v33  ;;  %v9813_v34 = vadd.f32 %v9812_v40, %v8316_v13  ;;  %v8318_v53 = vpop.f32.mrb[111].mxu0  ;;  %v8566_v21 = vadd.f32 %v15221_v54, %v8565_v9  ;;  %v15434_v33 = vld [vmem:[#allocation15_spill] sm:$0xff] }
 0x631   :  { %8688 = vst [vmem:[%s15406_s3 + $0x178] sm:$0xff] %v8574_v27 }
 0x632   :  { %8686 = vst [vmem:[%s15406_s3 + $0x168] sm:$0xff] %v8566_v21 }
 0x634   :  { %v9656_v39 = vpop.f32.mrb[176].mxu1 }
 0x635   :  { %v8321_v14 = vpop.f32.mrb[112].mxu0  ;;  %v8587_v46 = vadd.f32 %v9803_v56, %v9656_v39  ;;  %v8578_v15 = vpop.f32.mrb[177].mxu1 }
 0x636   :  { %v9815_v49 = vadd.f32 %v9814_v4, %v8321_v14  ;;  %v8323_v54 = vpop.f32.mrb[113].mxu0  ;;  %v8579_v51 = vadd.f32 %v15259_v63, %v8578_v15  ;;  %v9657_v37 = vpop.f32.mrb[178].mxu1  ;;  %v15430_v63 = vld [vmem:[#allocation11_spill] sm:$0xff] }
 0x637   :  { %8691 = vst [vmem:[%s15406_s3 + $0x190] sm:$0xff] %v8587_v46  ;;  %v8324_v62 = vpop.f32.mrb[114].mxu0  ;;  %v8590_v0 = vadd.f32 %v9805_v42, %v9657_v37  ;;  %v8581_v43 = vpop.f32.mrb[179].mxu1  ;;  %v9818_v6 = vadd.f32 %v14814_v18, %v15430_v63  ;;  %v12031_v18 = vld [vmem:[%s15405_s2] ss:$0 sm:$0xff] }
 0x638   :  { %8689 = vst [vmem:[%s15406_s3 + $0x180] sm:$0xff] %v8579_v51  ;;  %v9817_v56 = vadd.f32 %v9816_v7, %v8324_v62  ;;  %v8326_v26 = vpop.f32.mrb[115].mxu0  ;;  %v8582_v1 = vadd.f32 %v15269_v44, %v8581_v43  ;;  %v9826_v41 = vadd.f32 %v12031_v18, %v15434_v33 }
 0x639   :  { %8692 = vst [vmem:[%s15406_s3 + $0x198] sm:$0xff] %v8590_v0 }
 0x63a   :  { %8690 = vst [vmem:[%s15406_s3 + $0x188] sm:$0xff] %v8582_v1 }
 0x63c   :  { %v9660_v57 = vpop.f32.mrb[180].mxu1 }
 0x63d   :  { %v8329_v25 = vpop.f32.mrb[116].mxu0  ;;  %v8603_v42 = vadd.f32 %v9811_v36, %v9660_v57  ;;  %v8594_v23 = vpop.f32.mrb[181].mxu1 }
 0x63e   :  { %v9819_v2 = vadd.f32 %v9818_v6, %v8329_v25  ;;  %v8331_v44 = vpop.f32.mrb[117].mxu0  ;;  %v8595_v11 = vadd.f32 %v9807_v3, %v8594_v23  ;;  %v9661_v58 = vpop.f32.mrb[182].mxu1  ;;  %v15432_v3 = vld [vmem:[#allocation13_spill] sm:$0xff] }
 0x63f   :  { %8695 = vst [vmem:[%s15406_s3 + $0x1b0] sm:$0xff] %v8603_v42  ;;  %v8332_v8 = vpop.f32.mrb[118].mxu0  ;;  %v8606_v19 = vadd.f32 %v9813_v34, %v9661_v58  ;;  %v8597_v32 = vpop.f32.mrb[183].mxu1  ;;  %v9822_v28 = vadd.f32 %v12031_v18, %v15432_v3  ;;  %v9828_v34 = vadd.f32 %v12031_v18, %v15058_v30 }
 0x640   :  { %8693 = vst [vmem:[%s15406_s3 + $0x1a0] sm:$0xff] %v8595_v11  ;;  %v9821_v24 = vadd.f32 %v9820_v60, %v8332_v8  ;;  %v8334_v29 = vpop.f32.mrb[119].mxu0  ;;  %v8598_v52 = vadd.f32 %v9809_v31, %v8597_v32  ;;  %v9824_v31 = vadd.f32 %v12031_v18, %v15433_v35 }
 0x641   :  { %8696 = vst [vmem:[%s15406_s3 + $0x1b8] sm:$0xff] %v8606_v19 }
 0x642   :  { %8694 = vst [vmem:[%s15406_s3 + $0x1a8] sm:$0xff] %v8598_v52 }
 0x644   :  { %v9664_v45 = vpop.f32.mrb[184].mxu1 }
 0x645   :  { %v8337_v20 = vpop.f32.mrb[120].mxu0  ;;  %v8619_v16 = vadd.f32 %v9819_v2, %v9664_v45  ;;  %v8610_v50 = vpop.f32.mrb[185].mxu1 }
 0x646   :  { %v9823_v47 = vadd.f32 %v9822_v28, %v8337_v20  ;;  %v8339_v17 = vpop.f32.mrb[121].mxu0  ;;  %v8611_v12 = vadd.f32 %v9815_v49, %v8610_v50  ;;  %v9665_v5 = vpop.f32.mrb[186].mxu1 }
 0x647   :  { %8699 = vst [vmem:[%s15406_s3 + $0x1d0] sm:$0xff] %v8619_v16  ;;  %v8340_v48 = vpop.f32.mrb[122].mxu0  ;;  %v8622_v10 = vadd.f32 %v9821_v24, %v9665_v5  ;;  %v8613_v38 = vpop.f32.mrb[187].mxu1 }
 0x648   :  { %8697 = vst [vmem:[%s15406_s3 + $0x1c0] sm:$0xff] %v8611_v12  ;;  %v9825_v40 = vadd.f32 %v9824_v31, %v8340_v48  ;;  %v8342_v36 = vpop.f32.mrb[123].mxu0  ;;  %v8614_v61 = vadd.f32 %v9817_v56, %v8613_v38 }
 0x649   :  { %8700 = vst [vmem:[%s15406_s3 + $0x1d8] sm:$0xff] %v8622_v10 }
 0x64a   :  { %8698 = vst [vmem:[%s15406_s3 + $0x1c8] sm:$0xff] %v8614_v61 }
 0x64c   :  { %v9668_v13 = vpop.f32.mrb[188].mxu1 }
 0x64d   :  { %v8345_v27 = vpop.f32.mrb[124].mxu0  ;;  %v8626_v9 = vpop.f32.mrb[189].mxu1 }
 0x64e   :  { %v9827_v53 = vadd.f32 %v9826_v41, %v8345_v27  ;;  %v8347_v21 = vpop.f32.mrb[125].mxu0  ;;  %v8627_v55 = vadd.f32 %v9823_v47, %v8626_v9  ;;  %v9669_v4 = vpop.f32.mrb[190].mxu1 }
 0x64f   :  { %v8348_v39 = vpop.f32.mrb[126].mxu0  ;;  %v8629_v14 = vpop.f32.mrb[191].mxu1 }
 0x650   :  { %v8635_v46 = vadd.f32 %v9827_v53, %v9668_v13  ;;  %8701 = vst [vmem:[%s15406_s3 + $0x1e0] sm:$0xff] %v8627_v55  ;;  %v9829_v15 = vadd.f32 %v9828_v34, %v8348_v39  ;;  %v8350_v59 = vpop.f32.mrb[127].mxu0  ;;  %v8630_v7 = vadd.f32 %v9825_v40, %v8629_v14 }
 0x652   :  { %8703 = vst [vmem:[%s15406_s3 + $0x1f0] sm:$0xff] %v8635_v46  ;;  %v8638_v49 = vadd.f32 %v9829_v15, %v9669_v4  ;;  %8702 = vst [vmem:[%s15406_s3 + $0x1e8] sm:$0xff] %v8630_v7 }
 0x654   :  { %8704 = vst [vmem:[%s15406_s3 + $0x1f8] sm:$0xff] %v8638_v49 }

</bundles_post_ra>
